<compile_context>
chip_gen: v6e
topology: v6e:2x2x1
jax: 0.10.0
libtpu: 0.0.40
codegen_flags: <defaults>
</compile_context>

<pallas_src>
import functools

import jax
import jax.numpy as jnp
from jax.experimental import pallas as pl
from jax.experimental.pallas import tpu as pltpu

_BN_EPS = 1e-5
_NEG_INF = -1e30  # logit for padding lanes of the lane-dense head outputs


def _vmem_spec(shape):
    """Whole-array BlockSpec (no grid): block == full array dims."""
    nd = len(shape)
    return pl.BlockSpec(shape, lambda *_, _nd=nd: (0,) * _nd)


# ------------------------------- fused kernel ------------------------------ #

def _fused_kernel(S,
                  clin_ref, gen_ref, img_ref,
                  wc1, bc1, wc2, bc2,
                  m1m, m10, m1p, bcv1, sh1e, sh1o, sw1e, sw1o,
                  m2m, m20, m2p, bcv2, sh2e, sh2o, sw2e, sw2o,
                  wfc, bfc,
                  wg1, bg1, wg2, bg2,
                  wf1c, wf1i, wf1g, bf1, wf2, bf2,
                  wh1, bh1, wh2, bh2,
                  out_diag, out_stage, out_grade):
    f32 = jnp.float32
    B = clin_ref.shape[0]
    S4 = S // 4

    def dot(a, b):
        return jnp.dot(a, b, preferred_element_type=f32)

    def relu(x):
        return jnp.maximum(x, 0.0)

    # ---- clinical encoder: Linear -> ReLU -> [BN+Dropout folded] -> Linear ----
    h = relu(dot(clin_ref[...], wc1[...]) + bc1[...])
    clin_f = dot(h, wc2[...]) + bc2[...]

    # ---- genomic encoder ----
    h = relu(dot(gen_ref[...], wg1[...]) + bg1[...])
    gen_f = dot(h, wg2[...]) + bg2[...]

    # ---- imaging encoder: (conv3x3 -> ReLU -> maxpool2)x2 -> flatten -> FC ----
    m1 = (m1m[...], m10[...], m1p[...])
    m2 = (m2m[...], m20[...], m2p[...])
    b1t, b2t = bcv1[...], bcv2[...]
    p1sel = (sh1e[...], sh1o[...], sw1e[...], sw1o[...])
    p2sel = (sh2e[...], sh2o[...], sw2e[...], sw2o[...])

    def conv3x3_relu(x, mats, bias_t):
        # x: (H, W*Cin), one image, rows = h, lanes = w*Cin + c.
        # 'same' 3x3 conv = three band-matrix matmuls over h-shifted copies;
        # w-padding is encoded inside the band matrices, h-padding = zero rows.
        zrow = jnp.zeros((1, x.shape[1]), f32)
        up = jnp.concatenate([zrow, x[:-1, :]], axis=0)   # row h-1
        dn = jnp.concatenate([x[1:, :], zrow], axis=0)    # row h+1
        y = dot(up, mats[0]) + dot(x, mats[1]) + dot(dn, mats[2]) + bias_t
        return relu(y)

    def maxpool2x2(y, sel):
        # 2x2/stride-2 max pool via 0/1 selection matmuls (MXU) + elementwise max.
        sh_e, sh_o, sw_e, sw_o = sel
        yh = jnp.maximum(dot(sh_e, y), dot(sh_o, y))        # pool over h
        return jnp.maximum(dot(yh, sw_e), dot(yh, sw_o))    # pool over w

    ximg = img_ref[...]                                     # (B*S, S*Cin)
    flat_rows = []
    for b in range(B):                                      # B small & static
        xb = ximg[b * S:(b + 1) * S, :]
        p1 = maxpool2x2(conv3x3_relu(xb, m1, b1t), p1sel)   # (S/2, (S/2)*32)
        p2 = maxpool2x2(conv3x3_relu(p1, m2, b2t), p2sel)   # (S/4, (S/4)*64)
        # flatten to one lane-dense row; the NCHW->(h,w,c) reorder is folded
        # into the img_fc weight rows at init, so no transpose is needed here.
        flat_rows.append(jnp.concatenate([p2[i:i + 1, :] for i in range(S4)], axis=1))
    xflat = jnp.concatenate(flat_rows, axis=0)              # (B, S4*S4*64)
    img_f = dot(xflat, wfc[...]) + bfc[...]                 # (B, 128)

    # ---- fusion: torch.cat([clin, img, gen]) folded into split weights ----
    h = relu(dot(clin_f, wf1c[...]) + dot(img_f, wf1i[...]) +
             dot(gen_f, wf1g[...]) + bf1[...])
    features = dot(h, wf2[...]) + bf2[...]                  # (B, 128)

    # ---- three heads merged: one (128,192) matmul + one block-diag (192,384) ----
    hh = relu(dot(features, wh1[...]) + bh1[...])           # (B, 192)
    logits = dot(hh, wh2[...]) + bh2[...]                   # (B, 384); pad lanes = -1e30

    def softmax_lane_block(l):
        m = jnp.max(l, axis=-1, keepdims=True)
        e = jnp.exp(l - m)                                  # padding lanes -> 0
        s = jnp.sum(e, axis=-1, keepdims=True)
        # exact divide kept for parity with the reference;
        # pl.reciprocal(s, approx=True) would move it to the EUP slot.
        return e / s

    out_diag[...] = softmax_lane_block(logits[:, 0:128])
    out_stage[...] = softmax_lane_block(logits[:, 128:256])
    out_grade[...] = softmax_lane_block(logits[:, 256:384])


# -------------------------- parameters (raw, torch-style) ------------------ #

def init_raw_params(key, cfg):
    ks = iter(jax.random.split(key, 64))

    def lin(fan_in, fan_out):
        w = jax.random.normal(next(ks), (fan_in, fan_out), jnp.float32) / jnp.sqrt(jnp.float32(fan_in))
        b = 0.05 * jax.random.normal(next(ks), (fan_out,), jnp.float32)
        return {'w': w, 'b': b}

    def bn(n):  # eval-mode BatchNorm1d running stats + affine
        return {'gamma': 1.0 + 0.1 * jax.random.normal(next(ks), (n,), jnp.float32),
                'beta': 0.1 * jax.random.normal(next(ks), (n,), jnp.float32),
                'mean': 0.1 * jax.random.normal(next(ks), (n,), jnp.float32),
                'var': jax.random.uniform(next(ks), (n,), jnp.float32, 0.5, 1.5)}

    def conv(cin, cout):
        w = jax.random.normal(next(ks), (cout, cin, 3, 3), jnp.float32) / jnp.sqrt(jnp.float32(cin * 9))
        b = 0.05 * jax.random.normal(next(ks), (cout,), jnp.float32)
        return {'w': w, 'b': b}

    s4 = cfg['image_size'] // 4
    return {
        'clin1': lin(cfg['clinical_dim'], 256), 'clin_bn': bn(256), 'clin2': lin(256, 128),
        'conv1': conv(cfg['image_channels'], 32), 'conv2': conv(32, 64),
        'img_fc': lin(64 * s4 * s4, 128),
        'gen1': lin(cfg['genomic_dim'], 512), 'gen_bn': bn(512), 'gen2': lin(512, 128),
        'fus1': lin(384, 256), 'fus_bn': bn(256), 'fus2': lin(256, 128),
        'diag1': lin(128, 64), 'diag_bn': bn(64), 'diag2': lin(64, cfg['num_cancer_types']),
        'stage1': lin(128, 64), 'stage_bn': bn(64), 'stage2': lin(64, 4),
        'grade1': lin(128, 64), 'grade_bn': bn(64), 'grade2': lin(64, 3),
    }


# ------------------- init-time folding into kernel-ready params ------------ #

def prepare_kernel_params(raw, cfg):
    S = cfg['image_size']
    nct = cfg['num_cancer_types']
    C2 = 64
    S2, S4 = S // 2, S // 4

    def row(v):
        return v.reshape(1, -1).astype(jnp.float32)

    def fold_bn(bnp, lin):
        # ...ReLU -> BN(eval) -> Dropout(identity) -> Linear  ==>  fold BN into Linear
        scale = bnp['gamma'] / jnp.sqrt(bnp['var'] + _BN_EPS)
        shift = bnp['beta'] - bnp['mean'] * scale
        return scale[:, None] * lin['w'], lin['b'] + shift @ lin['w']

    def band(conv_p, W):
        # 3x3 'same' conv as 3 band matrices M_dh of shape (W*Cin, W*Cout):
        # M_dh[w'*Cin+ci, w*Cout+co] = K[co, ci, dh+1, w'-w+1]  (zero outside band)
        wt = conv_p['w']
        mats = []
        for kh in range(3):
            m = jnp.zeros((W * wt.shape[1], W * wt.shape[0]), jnp.float32)
            for kw in range(3):
                K = wt[:, :, kh, kw].T                         # (Cin, Cout)
                m = m + jnp.kron(jnp.eye(W, k=1 - kw, dtype=jnp.float32), K)
            mats.append(m)
        return mats, row(jnp.tile(conv_p['b'], W))

    def pool_selectors(H, W, C):
        # 0/1 selection matrices: rows-even/odd (left mult), w-block-even/odd (right mult)
        eye_h = jnp.eye(H, dtype=jnp.float32)
        eye_w = jnp.eye(W, dtype=jnp.float32)
        eye_c = jnp.eye(C, dtype=jnp.float32)
        sh_e, sh_o = eye_h[0::2, :], eye_h[1::2, :]            # (H/2, H)
        sw_e = jnp.kron(eye_w[:, 0::2], eye_c)                 # (W*C, (W/2)*C)
        sw_o = jnp.kron(eye_w[:, 1::2], eye_c)
        return sh_e, sh_o, sw_e, sw_o

    # clinical / genomic encoders (BN folded into the second Linear)
    wc1, bc1 = raw['clin1']['w'], row(raw['clin1']['b'])
    wc2, bc2 = fold_bn(raw['clin_bn'], raw['clin2']); bc2 = row(bc2)
    wg1, bg1 = raw['gen1']['w'], row(raw['gen1']['b'])
    wg2, bg2 = fold_bn(raw['gen_bn'], raw['gen2']); bg2 = row(bg2)

    # imaging encoder
    (m1m, m10, m1p), bcv1 = band(raw['conv1'], S)
    (m2m, m20, m2p), bcv2 = band(raw['conv2'], S2)
    sh1e, sh1o, sw1e, sw1o = pool_selectors(S, S, 32)
    sh2e, sh2o, sw2e, sw2o = pool_selectors(S2, S2, 64)
    # fold torch's NCHW flatten order (c, h, w) into the FC weight rows -> (h, w, c)
    wfc = raw['img_fc']['w'].reshape(C2, S4, S4, -1).transpose(1, 2, 0, 3).reshape(S4 * S4 * C2, -1)
    bfc = row(raw['img_fc']['b'])

    # fusion (torch.cat order: clinical, imaging, genomic), BN folded into fus2
    wf1 = raw['fus1']['w']
    wf1c, wf1i, wf1g = wf1[0:128], wf1[128:256], wf1[256:384]
    bf1 = row(raw['fus1']['b'])
    wf2, bf2 = fold_bn(raw['fus_bn'], raw['fus2']); bf2 = row(bf2)

    # heads: merge the three l1's; BN-folded l2's as a block-diagonal matrix whose
    # outputs land in three lane-dense 128-wide blocks (padding lanes biased to -1e30).
    wh1 = jnp.concatenate([raw['diag1']['w'], raw['stage1']['w'], raw['grade1']['w']], axis=1)
    bh1 = row(jnp.concatenate([raw['diag1']['b'], raw['stage1']['b'], raw['grade1']['b']]))
    wd2, bd2 = fold_bn(raw['diag_bn'], raw['diag2'])
    ws2, bs2 = fold_bn(raw['stage_bn'], raw['stage2'])
    wgr2, bgr2 = fold_bn(raw['grade_bn'], raw['grade2'])
    wh2 = jnp.zeros((192, 3 * 128), jnp.float32)
    wh2 = wh2.at[0:64, 0:nct].set(wd2)
    wh2 = wh2.at[64:128, 128:128 + 4].set(ws2)
    wh2 = wh2.at[128:192, 256:256 + 3].set(wgr2)
    bh2 = jnp.full((3 * 128,), _NEG_INF, jnp.float32)
    bh2 = bh2.at[0:nct].set(bd2).at[128:128 + 4].set(bs2).at[256:256 + 3].set(bgr2)
    bh2 = row(bh2)

    return (wc1, bc1, wc2, bc2,
            m1m, m10, m1p, bcv1, sh1e, sh1o, sw1e, sw1o,
            m2m, m20, m2p, bcv2, sh2e, sh2o, sw2e, sw2o,
            wfc, bfc,
            wg1, bg1, wg2, bg2,
            wf1c, wf1i, wf1g, bf1, wf2, bf2,
            wh1, bh1, wh2, bh2)


# ------------------------------- forward wrapper --------------------------- #

def cancer_diagnosis_forward(kernel_params, clinical, imaging_nchw, genomic, *, cfg):
    B = clinical.shape[0]
    S, C0 = cfg['image_size'], cfg['image_channels']
    assert S % 4 == 0, "image_size must be divisible by 4 (two 2x2 max-pools)"
    assert imaging_nchw.shape == (B, C0, S, S)

    # Input-side prep only (2 KB): NCHW -> rows=(b,h), lanes=(w,c) for the
    # in-kernel band-matrix conv. All intermediates stay inside the one kernel.
    img2d = jnp.transpose(imaging_nchw, (0, 2, 3, 1)).reshape(B * S, S * C0)

    args = (clinical, genomic, img2d) + tuple(kernel_params)
    out_shape = tuple(jax.ShapeDtypeStruct((B, 128), jnp.float32) for _ in range(3))
    p_diag, p_stage, p_grade = pl.pallas_call(
        functools.partial(_fused_kernel, S),
        out_shape=out_shape,
        in_specs=[_vmem_spec(a.shape) for a in args],
        out_specs=tuple(_vmem_spec((B, 128)) for _ in range(3)),
        compiler_params=pltpu.CompilerParams(vmem_limit_bytes=32 * 1024 * 1024),
    )(*args)

    return (p_diag[:, :cfg['num_cancer_types']], p_stage[:, :4], p_grade[:, :3])


# ------------------------ pure-JAX (XLA) reference ------------------------- #

def reference_forward(raw, clinical, imaging, genomic):
    def linear(x, p):
        return x @ p['w'] + p['b']

    def bn_eval(x, p):
        scale = p['gamma'] / jnp.sqrt(p['var'] + _BN_EPS)
        return (x - p['mean']) * scale + p['beta']

    def mlp(x, l1, bnp, l2):  # Linear -> ReLU -> BN -> Dropout(id) -> Linear
        return linear(bn_eval(jax.nn.relu(linear(x, l1)), bnp), l2)

    def conv2d(x, p):
        y = jax.lax.conv_general_dilated(x, p['w'], (1, 1), ((1, 1), (1, 1)),
                                         dimension_numbers=('NCHW', 'OIHW', 'NCHW'))
        return y + p['b'][None, :, None, None]

    def maxpool2(x):
        return jax.lax.reduce_window(x, -jnp.inf, jax.lax.max,
                                     (1, 1, 2, 2), (1, 1, 2, 2), 'VALID')

    clin_f = mlp(clinical, raw['clin1'], raw['clin_bn'], raw['clin2'])
    gen_f = mlp(genomic, raw['gen1'], raw['gen_bn'], raw['gen2'])
    x = maxpool2(jax.nn.relu(conv2d(imaging, raw['conv1'])))
    x = maxpool2(jax.nn.relu(conv2d(x, raw['conv2'])))
    img_f = linear(x.reshape(x.shape[0], -1), raw['img_fc'])
    fused_in = jnp.concatenate([clin_f, img_f, gen_f], axis=1)
    features = mlp(fused_in, raw['fus1'], raw['fus_bn'], raw['fus2'])

    def head(l1, bnp, l2):
        return jax.nn.softmax(mlp(features, l1, bnp, l2), axis=-1)

    return (head(raw['diag1'], raw['diag_bn'], raw['diag2']),
            head(raw['stage1'], raw['stage_bn'], raw['stage2']),
            head(raw['grade1'], raw['grade_bn'], raw['grade2']))


# ------------------------------------ main ---------------------------------- #

if __name__ == "__main__":
    cfg = dict(clinical_dim=16, image_channels=4, image_size=16,
               genomic_dim=32, num_cancer_types=5)
    B = 2

    key = jax.random.PRNGKey(0)
    k_clin, k_img, k_gen, k_par = jax.random.split(key, 4)
    clinical = jax.random.normal(k_clin, (B, cfg['clinical_dim']), jnp.float32)
    imaging = jax.random.normal(
        k_img, (B, cfg['image_channels'], cfg['image_size'], cfg['image_size']),
        jnp.float32)
    genomic = jax.random.normal(k_gen, (B, cfg['genomic_dim']), jnp.float32)

    raw = init_raw_params(k_par, cfg)
    kparams = prepare_kernel_params(raw, cfg)

    fwd = jax.jit(functools.partial(cancer_diagnosis_forward, cfg=cfg))
    p_diag, p_stage, p_grade = fwd(kparams, clinical, imaging, genomic)
    jax.block_until_ready((p_diag, p_stage, p_grade))

    assert p_diag.shape == (B, cfg['num_cancer_types'])
    assert p_stage.shape == (B, 4)
    assert p_grade.shape == (B, 3)
    assert jnp.allclose(jnp.sum(p_diag, axis=1), 1.0, atol=1e-4)
    assert jnp.allclose(jnp.sum(p_stage, axis=1), 1.0, atol=1e-4)
    assert jnp.allclose(jnp.sum(p_grade, axis=1), 1.0, atol=1e-4)

    # structural sanity check against the XLA reference; tolerance allows for
    # MXU bf16-pass rounding differences between the two matmul formulations.
    r_diag, r_stage, r_grade = reference_forward(raw, clinical, imaging, genomic)
    assert jnp.allclose(p_diag, r_diag, atol=5e-2)
    assert jnp.allclose(p_stage, r_stage, atol=5e-2)
    assert jnp.allclose(p_grade, r_grade, atol=5e-2)

    print("KERNEL_OK")
</pallas_src>

<mosaic_0001>
module attributes {stable_mosaic.version = 11 : i64} {
  func.func @_fused_kernel(%arg0: memref<2x16xf32, #tpu.memory_space<vmem>>, %arg1: memref<2x32xf32, #tpu.memory_space<vmem>>, %arg2: memref<32x64xf32, #tpu.memory_space<vmem>>, %arg3: memref<16x256xf32, #tpu.memory_space<vmem>>, %arg4: memref<1x256xf32, #tpu.memory_space<vmem>>, %arg5: memref<256x128xf32, #tpu.memory_space<vmem>>, %arg6: memref<1x128xf32, #tpu.memory_space<vmem>>, %arg7: memref<64x512xf32, #tpu.memory_space<vmem>>, %arg8: memref<64x512xf32, #tpu.memory_space<vmem>>, %arg9: memref<64x512xf32, #tpu.memory_space<vmem>>, %arg10: memref<1x512xf32, #tpu.memory_space<vmem>>, %arg11: memref<8x16xf32, #tpu.memory_space<vmem>>, %arg12: memref<8x16xf32, #tpu.memory_space<vmem>>, %arg13: memref<512x256xf32, #tpu.memory_space<vmem>>, %arg14: memref<512x256xf32, #tpu.memory_space<vmem>>, %arg15: memref<256x512xf32, #tpu.memory_space<vmem>>, %arg16: memref<256x512xf32, #tpu.memory_space<vmem>>, %arg17: memref<256x512xf32, #tpu.memory_space<vmem>>, %arg18: memref<1x512xf32, #tpu.memory_space<vmem>>, %arg19: memref<4x8xf32, #tpu.memory_space<vmem>>, %arg20: memref<4x8xf32, #tpu.memory_space<vmem>>, %arg21: memref<512x256xf32, #tpu.memory_space<vmem>>, %arg22: memref<512x256xf32, #tpu.memory_space<vmem>>, %arg23: memref<1024x128xf32, #tpu.memory_space<vmem>>, %arg24: memref<1x128xf32, #tpu.memory_space<vmem>>, %arg25: memref<32x512xf32, #tpu.memory_space<vmem>>, %arg26: memref<1x512xf32, #tpu.memory_space<vmem>>, %arg27: memref<512x128xf32, #tpu.memory_space<vmem>>, %arg28: memref<1x128xf32, #tpu.memory_space<vmem>>, %arg29: memref<128x256xf32, #tpu.memory_space<vmem>>, %arg30: memref<128x256xf32, #tpu.memory_space<vmem>>, %arg31: memref<128x256xf32, #tpu.memory_space<vmem>>, %arg32: memref<1x256xf32, #tpu.memory_space<vmem>>, %arg33: memref<256x128xf32, #tpu.memory_space<vmem>>, %arg34: memref<1x128xf32, #tpu.memory_space<vmem>>, %arg35: memref<128x192xf32, #tpu.memory_space<vmem>>, %arg36: memref<1x192xf32, #tpu.memory_space<vmem>>, %arg37: memref<192x384xf32, #tpu.memory_space<vmem>>, %arg38: memref<1x384xf32, #tpu.memory_space<vmem>>, %arg39: memref<2x128xf32, #tpu.memory_space<vmem>>, %arg40: memref<2x128xf32, #tpu.memory_space<vmem>>, %arg41: memref<2x128xf32, #tpu.memory_space<vmem>>) attributes {dimension_semantics = [], scalar_prefetch = 0 : i64, scratch_operands = 0 : i64, tpu.core_type = #tpu.core_type<tc>} {
    %c0 = arith.constant 0 : index
    %c0_0 = arith.constant 0 : index
    %0 = vector.load %arg0[%c0, %c0_0] : memref<2x16xf32, #tpu.memory_space<vmem>>, vector<2x16xf32>
    %c0_1 = arith.constant 0 : index
    %c0_2 = arith.constant 0 : index
    %1 = vector.load %arg3[%c0_1, %c0_2] : memref<16x256xf32, #tpu.memory_space<vmem>>, vector<16x256xf32>
    %cst = arith.constant dense<0.000000e+00> : vector<2x256xf32>
    %2 = tpu.matmul %0, %1, %cst {dimension_numbers = #tpu.dot_dimension_numbers<[1], [0], [0], [1], [0, 0, 1, 1], [], []>} : vector<2x16xf32>, vector<16x256xf32>, vector<2x256xf32> -> vector<2x256xf32>
    %c0_3 = arith.constant 0 : index
    %c0_4 = arith.constant 0 : index
    %3 = vector.load %arg4[%c0_3, %c0_4] : memref<1x256xf32, #tpu.memory_space<vmem>>, vector<1x256xf32>
    %4 = vector.broadcast %3 : vector<1x256xf32> to vector<2x256xf32>
    %5 = arith.addf %2, %4 : vector<2x256xf32>
    %cst_5 = arith.constant 0.000000e+00 : f32
    %6 = vector.broadcast %cst_5 : f32 to vector<2x256xf32>
    %7 = arith.maximumf %5, %6 : vector<2x256xf32>
    %c0_6 = arith.constant 0 : index
    %c0_7 = arith.constant 0 : index
    %8 = vector.load %arg5[%c0_6, %c0_7] : memref<256x128xf32, #tpu.memory_space<vmem>>, vector<256x128xf32>
    %cst_8 = arith.constant dense<0.000000e+00> : vector<2x128xf32>
    %9 = tpu.matmul %7, %8, %cst_8 {dimension_numbers = #tpu.dot_dimension_numbers<[1], [0], [0], [1], [0, 0, 1, 1], [], []>} : vector<2x256xf32>, vector<256x128xf32>, vector<2x128xf32> -> vector<2x128xf32>
    %c0_9 = arith.constant 0 : index
    %c0_10 = arith.constant 0 : index
    %10 = vector.load %arg6[%c0_9, %c0_10] : memref<1x128xf32, #tpu.memory_space<vmem>>, vector<1x128xf32>
    %11 = vector.broadcast %10 : vector<1x128xf32> to vector<2x128xf32>
    %12 = arith.addf %9, %11 : vector<2x128xf32>
    %c0_11 = arith.constant 0 : index
    %c0_12 = arith.constant 0 : index
    %13 = vector.load %arg1[%c0_11, %c0_12] : memref<2x32xf32, #tpu.memory_space<vmem>>, vector<2x32xf32>
    %c0_13 = arith.constant 0 : index
    %c0_14 = arith.constant 0 : index
    %14 = vector.load %arg25[%c0_13, %c0_14] : memref<32x512xf32, #tpu.memory_space<vmem>>, vector<32x512xf32>
    %cst_15 = arith.constant dense<0.000000e+00> : vector<2x512xf32>
    %15 = tpu.matmul %13, %14, %cst_15 {dimension_numbers = #tpu.dot_dimension_numbers<[1], [0], [0], [1], [0, 0, 1, 1], [], []>} : vector<2x32xf32>, vector<32x512xf32>, vector<2x512xf32> -> vector<2x512xf32>
    %c0_16 = arith.constant 0 : index
    %c0_17 = arith.constant 0 : index
    %16 = vector.load %arg26[%c0_16, %c0_17] : memref<1x512xf32, #tpu.memory_space<vmem>>, vector<1x512xf32>
    %17 = vector.broadcast %16 : vector<1x512xf32> to vector<2x512xf32>
    %18 = arith.addf %15, %17 : vector<2x512xf32>
    %cst_18 = arith.constant 0.000000e+00 : f32
    %19 = vector.broadcast %cst_18 : f32 to vector<2x512xf32>
    %20 = arith.maximumf %18, %19 : vector<2x512xf32>
    %c0_19 = arith.constant 0 : index
    %c0_20 = arith.constant 0 : index
    %21 = vector.load %arg27[%c0_19, %c0_20] : memref<512x128xf32, #tpu.memory_space<vmem>>, vector<512x128xf32>
    %cst_21 = arith.constant dense<0.000000e+00> : vector<2x128xf32>
    %22 = tpu.matmul %20, %21, %cst_21 {dimension_numbers = #tpu.dot_dimension_numbers<[1], [0], [0], [1], [0, 0, 1, 1], [], []>} : vector<2x512xf32>, vector<512x128xf32>, vector<2x128xf32> -> vector<2x128xf32>
    %c0_22 = arith.constant 0 : index
    %c0_23 = arith.constant 0 : index
    %23 = vector.load %arg28[%c0_22, %c0_23] : memref<1x128xf32, #tpu.memory_space<vmem>>, vector<1x128xf32>
    %24 = vector.broadcast %23 : vector<1x128xf32> to vector<2x128xf32>
    %25 = arith.addf %22, %24 : vector<2x128xf32>
    %c0_24 = arith.constant 0 : index
    %c0_25 = arith.constant 0 : index
    %26 = vector.load %arg7[%c0_24, %c0_25] : memref<64x512xf32, #tpu.memory_space<vmem>>, vector<64x512xf32>
    %c0_26 = arith.constant 0 : index
    %c0_27 = arith.constant 0 : index
    %27 = vector.load %arg8[%c0_26, %c0_27] : memref<64x512xf32, #tpu.memory_space<vmem>>, vector<64x512xf32>
    %c0_28 = arith.constant 0 : index
    %c0_29 = arith.constant 0 : index
    %28 = vector.load %arg9[%c0_28, %c0_29] : memref<64x512xf32, #tpu.memory_space<vmem>>, vector<64x512xf32>
    %c0_30 = arith.constant 0 : index
    %c0_31 = arith.constant 0 : index
    %29 = vector.load %arg15[%c0_30, %c0_31] : memref<256x512xf32, #tpu.memory_space<vmem>>, vector<256x512xf32>
    %c0_32 = arith.constant 0 : index
    %c0_33 = arith.constant 0 : index
    %30 = vector.load %arg16[%c0_32, %c0_33] : memref<256x512xf32, #tpu.memory_space<vmem>>, vector<256x512xf32>
    %c0_34 = arith.constant 0 : index
    %c0_35 = arith.constant 0 : index
    %31 = vector.load %arg17[%c0_34, %c0_35] : memref<256x512xf32, #tpu.memory_space<vmem>>, vector<256x512xf32>
    %c0_36 = arith.constant 0 : index
    %c0_37 = arith.constant 0 : index
    %32 = vector.load %arg10[%c0_36, %c0_37] : memref<1x512xf32, #tpu.memory_space<vmem>>, vector<1x512xf32>
    %c0_38 = arith.constant 0 : index
    %c0_39 = arith.constant 0 : index
    %33 = vector.load %arg18[%c0_38, %c0_39] : memref<1x512xf32, #tpu.memory_space<vmem>>, vector<1x512xf32>
    %c0_40 = arith.constant 0 : index
    %c0_41 = arith.constant 0 : index
    %34 = vector.load %arg11[%c0_40, %c0_41] : memref<8x16xf32, #tpu.memory_space<vmem>>, vector<8x16xf32>
    %c0_42 = arith.constant 0 : index
    %c0_43 = arith.constant 0 : index
    %35 = vector.load %arg12[%c0_42, %c0_43] : memref<8x16xf32, #tpu.memory_space<vmem>>, vector<8x16xf32>
    %c0_44 = arith.constant 0 : index
    %c0_45 = arith.constant 0 : index
    %36 = vector.load %arg13[%c0_44, %c0_45] : memref<512x256xf32, #tpu.memory_space<vmem>>, vector<512x256xf32>
    %c0_46 = arith.constant 0 : index
    %c0_47 = arith.constant 0 : index
    %37 = vector.load %arg14[%c0_46, %c0_47] : memref<512x256xf32, #tpu.memory_space<vmem>>, vector<512x256xf32>
    %c0_48 = arith.constant 0 : index
    %c0_49 = arith.constant 0 : index
    %38 = vector.load %arg19[%c0_48, %c0_49] : memref<4x8xf32, #tpu.memory_space<vmem>>, vector<4x8xf32>
    %c0_50 = arith.constant 0 : index
    %c0_51 = arith.constant 0 : index
    %39 = vector.load %arg20[%c0_50, %c0_51] : memref<4x8xf32, #tpu.memory_space<vmem>>, vector<4x8xf32>
    %c0_52 = arith.constant 0 : index
    %c0_53 = arith.constant 0 : index
    %40 = vector.load %arg21[%c0_52, %c0_53] : memref<512x256xf32, #tpu.memory_space<vmem>>, vector<512x256xf32>
    %c0_54 = arith.constant 0 : index
    %c0_55 = arith.constant 0 : index
    %41 = vector.load %arg22[%c0_54, %c0_55] : memref<512x256xf32, #tpu.memory_space<vmem>>, vector<512x256xf32>
    %c0_56 = arith.constant 0 : index
    %c0_57 = arith.constant 0 : index
    %42 = vector.load %arg2[%c0_56, %c0_57] : memref<32x64xf32, #tpu.memory_space<vmem>>, vector<32x64xf32>
    %43 = vector.extract_strided_slice %42 {offsets = [0, 0], sizes = [16, 64], strides = [1, 1]} : vector<32x64xf32> to vector<16x64xf32>
    %cst_58 = arith.constant 0.000000e+00 : f32
    %44 = vector.broadcast %cst_58 : f32 to vector<1x64xf32>
    %45 = vector.extract_strided_slice %43 {offsets = [0, 0], sizes = [15, 64], strides = [1, 1]} : vector<16x64xf32> to vector<15x64xf32>
    %46 = tpu.concatenate %44, %45 in 0 : vector<1x64xf32>, vector<15x64xf32> -> vector<16x64xf32>
    %47 = vector.extract_strided_slice %43 {offsets = [1, 0], sizes = [15, 64], strides = [1, 1]} : vector<16x64xf32> to vector<15x64xf32>
    %48 = tpu.concatenate %47, %44 in 0 : vector<15x64xf32>, vector<1x64xf32> -> vector<16x64xf32>
    %cst_59 = arith.constant dense<0.000000e+00> : vector<16x512xf32>
    %49 = tpu.matmul %46, %26, %cst_59 {dimension_numbers = #tpu.dot_dimension_numbers<[1], [0], [0], [1], [0, 0, 1, 1], [], []>} : vector<16x64xf32>, vector<64x512xf32>, vector<16x512xf32> -> vector<16x512xf32>
    %cst_60 = arith.constant dense<0.000000e+00> : vector<16x512xf32>
    %50 = tpu.matmul %43, %27, %cst_60 {dimension_numbers = #tpu.dot_dimension_numbers<[1], [0], [0], [1], [0, 0, 1, 1], [], []>} : vector<16x64xf32>, vector<64x512xf32>, vector<16x512xf32> -> vector<16x512xf32>
    %51 = arith.addf %49, %50 : vector<16x512xf32>
    %cst_61 = arith.constant dense<0.000000e+00> : vector<16x512xf32>
    %52 = tpu.matmul %48, %28, %cst_61 {dimension_numbers = #tpu.dot_dimension_numbers<[1], [0], [0], [1], [0, 0, 1, 1], [], []>} : vector<16x64xf32>, vector<64x512xf32>, vector<16x512xf32> -> vector<16x512xf32>
    %53 = arith.addf %51, %52 : vector<16x512xf32>
    %54 = vector.broadcast %32 : vector<1x512xf32> to vector<16x512xf32>
    %55 = arith.addf %53, %54 : vector<16x512xf32>
    %cst_62 = arith.constant 0.000000e+00 : f32
    %56 = vector.broadcast %cst_62 : f32 to vector<16x512xf32>
    %57 = arith.maximumf %55, %56 : vector<16x512xf32>
    %cst_63 = arith.constant dense<0.000000e+00> : vector<8x512xf32>
    %58 = tpu.matmul %34, %57, %cst_63 {dimension_numbers = #tpu.dot_dimension_numbers<[1], [0], [0], [1], [0, 0, 1, 1], [], []>} : vector<8x16xf32>, vector<16x512xf32>, vector<8x512xf32> -> vector<8x512xf32>
    %cst_64 = arith.constant dense<0.000000e+00> : vector<8x512xf32>
    %59 = tpu.matmul %35, %57, %cst_64 {dimension_numbers = #tpu.dot_dimension_numbers<[1], [0], [0], [1], [0, 0, 1, 1], [], []>} : vector<8x16xf32>, vector<16x512xf32>, vector<8x512xf32> -> vector<8x512xf32>
    %60 = arith.maximumf %58, %59 : vector<8x512xf32>
    %cst_65 = arith.constant dense<0.000000e+00> : vector<8x256xf32>
    %61 = tpu.matmul %60, %36, %cst_65 {dimension_numbers = #tpu.dot_dimension_numbers<[1], [0], [0], [1], [0, 0, 1, 1], [], []>} : vector<8x512xf32>, vector<512x256xf32>, vector<8x256xf32> -> vector<8x256xf32>
    %cst_66 = arith.constant dense<0.000000e+00> : vector<8x256xf32>
    %62 = tpu.matmul %60, %37, %cst_66 {dimension_numbers = #tpu.dot_dimension_numbers<[1], [0], [0], [1], [0, 0, 1, 1], [], []>} : vector<8x512xf32>, vector<512x256xf32>, vector<8x256xf32> -> vector<8x256xf32>
    %63 = arith.maximumf %61, %62 : vector<8x256xf32>
    %cst_67 = arith.constant 0.000000e+00 : f32
    %64 = vector.broadcast %cst_67 : f32 to vector<1x256xf32>
    %65 = vector.extract_strided_slice %63 {offsets = [0, 0], sizes = [7, 256], strides = [1, 1]} : vector<8x256xf32> to vector<7x256xf32>
    %66 = tpu.concatenate %64, %65 in 0 : vector<1x256xf32>, vector<7x256xf32> -> vector<8x256xf32>
    %67 = vector.extract_strided_slice %63 {offsets = [1, 0], sizes = [7, 256], strides = [1, 1]} : vector<8x256xf32> to vector<7x256xf32>
    %68 = tpu.concatenate %67, %64 in 0 : vector<7x256xf32>, vector<1x256xf32> -> vector<8x256xf32>
    %cst_68 = arith.constant dense<0.000000e+00> : vector<8x512xf32>
    %69 = tpu.matmul %66, %29, %cst_68 {dimension_numbers = #tpu.dot_dimension_numbers<[1], [0], [0], [1], [0, 0, 1, 1], [], []>} : vector<8x256xf32>, vector<256x512xf32>, vector<8x512xf32> -> vector<8x512xf32>
    %cst_69 = arith.constant dense<0.000000e+00> : vector<8x512xf32>
    %70 = tpu.matmul %63, %30, %cst_69 {dimension_numbers = #tpu.dot_dimension_numbers<[1], [0], [0], [1], [0, 0, 1, 1], [], []>} : vector<8x256xf32>, vector<256x512xf32>, vector<8x512xf32> -> vector<8x512xf32>
    %71 = arith.addf %69, %70 : vector<8x512xf32>
    %cst_70 = arith.constant dense<0.000000e+00> : vector<8x512xf32>
    %72 = tpu.matmul %68, %31, %cst_70 {dimension_numbers = #tpu.dot_dimension_numbers<[1], [0], [0], [1], [0, 0, 1, 1], [], []>} : vector<8x256xf32>, vector<256x512xf32>, vector<8x512xf32> -> vector<8x512xf32>
    %73 = arith.addf %71, %72 : vector<8x512xf32>
    %74 = vector.broadcast %33 : vector<1x512xf32> to vector<8x512xf32>
    %75 = arith.addf %73, %74 : vector<8x512xf32>
    %cst_71 = arith.constant 0.000000e+00 : f32
    %76 = vector.broadcast %cst_71 : f32 to vector<8x512xf32>
    %77 = arith.maximumf %75, %76 : vector<8x512xf32>
    %cst_72 = arith.constant dense<0.000000e+00> : vector<4x512xf32>
    %78 = tpu.matmul %38, %77, %cst_72 {dimension_numbers = #tpu.dot_dimension_numbers<[1], [0], [0], [1], [0, 0, 1, 1], [], []>} : vector<4x8xf32>, vector<8x512xf32>, vector<4x512xf32> -> vector<4x512xf32>
    %cst_73 = arith.constant dense<0.000000e+00> : vector<4x512xf32>
    %79 = tpu.matmul %39, %77, %cst_73 {dimension_numbers = #tpu.dot_dimension_numbers<[1], [0], [0], [1], [0, 0, 1, 1], [], []>} : vector<4x8xf32>, vector<8x512xf32>, vector<4x512xf32> -> vector<4x512xf32>
    %80 = arith.maximumf %78, %79 : vector<4x512xf32>
    %cst_74 = arith.constant dense<0.000000e+00> : vector<4x256xf32>
    %81 = tpu.matmul %80, %40, %cst_74 {dimension_numbers = #tpu.dot_dimension_numbers<[1], [0], [0], [1], [0, 0, 1, 1], [], []>} : vector<4x512xf32>, vector<512x256xf32>, vector<4x256xf32> -> vector<4x256xf32>
    %cst_75 = arith.constant dense<0.000000e+00> : vector<4x256xf32>
    %82 = tpu.matmul %80, %41, %cst_75 {dimension_numbers = #tpu.dot_dimension_numbers<[1], [0], [0], [1], [0, 0, 1, 1], [], []>} : vector<4x512xf32>, vector<512x256xf32>, vector<4x256xf32> -> vector<4x256xf32>
    %83 = arith.maximumf %81, %82 : vector<4x256xf32>
    %84 = vector.extract_strided_slice %83 {offsets = [0, 0], sizes = [1, 256], strides = [1, 1]} : vector<4x256xf32> to vector<1x256xf32>
    %85 = vector.extract_strided_slice %83 {offsets = [1, 0], sizes = [1, 256], strides = [1, 1]} : vector<4x256xf32> to vector<1x256xf32>
    %86 = vector.extract_strided_slice %83 {offsets = [2, 0], sizes = [1, 256], strides = [1, 1]} : vector<4x256xf32> to vector<1x256xf32>
    %87 = vector.extract_strided_slice %83 {offsets = [3, 0], sizes = [1, 256], strides = [1, 1]} : vector<4x256xf32> to vector<1x256xf32>
    %88 = tpu.concatenate %84, %85, %86, %87 in 1 : vector<1x256xf32>, vector<1x256xf32>, vector<1x256xf32>, vector<1x256xf32> -> vector<1x1024xf32>
    %89 = vector.extract_strided_slice %42 {offsets = [16, 0], sizes = [16, 64], strides = [1, 1]} : vector<32x64xf32> to vector<16x64xf32>
    %cst_76 = arith.constant 0.000000e+00 : f32
    %90 = vector.broadcast %cst_76 : f32 to vector<1x64xf32>
    %91 = vector.extract_strided_slice %89 {offsets = [0, 0], sizes = [15, 64], strides = [1, 1]} : vector<16x64xf32> to vector<15x64xf32>
    %92 = tpu.concatenate %90, %91 in 0 : vector<1x64xf32>, vector<15x64xf32> -> vector<16x64xf32>
    %93 = vector.extract_strided_slice %89 {offsets = [1, 0], sizes = [15, 64], strides = [1, 1]} : vector<16x64xf32> to vector<15x64xf32>
    %94 = tpu.concatenate %93, %90 in 0 : vector<15x64xf32>, vector<1x64xf32> -> vector<16x64xf32>
    %cst_77 = arith.constant dense<0.000000e+00> : vector<16x512xf32>
    %95 = tpu.matmul %92, %26, %cst_77 {dimension_numbers = #tpu.dot_dimension_numbers<[1], [0], [0], [1], [0, 0, 1, 1], [], []>} : vector<16x64xf32>, vector<64x512xf32>, vector<16x512xf32> -> vector<16x512xf32>
    %cst_78 = arith.constant dense<0.000000e+00> : vector<16x512xf32>
    %96 = tpu.matmul %89, %27, %cst_78 {dimension_numbers = #tpu.dot_dimension_numbers<[1], [0], [0], [1], [0, 0, 1, 1], [], []>} : vector<16x64xf32>, vector<64x512xf32>, vector<16x512xf32> -> vector<16x512xf32>
    %97 = arith.addf %95, %96 : vector<16x512xf32>
    %cst_79 = arith.constant dense<0.000000e+00> : vector<16x512xf32>
    %98 = tpu.matmul %94, %28, %cst_79 {dimension_numbers = #tpu.dot_dimension_numbers<[1], [0], [0], [1], [0, 0, 1, 1], [], []>} : vector<16x64xf32>, vector<64x512xf32>, vector<16x512xf32> -> vector<16x512xf32>
    %99 = arith.addf %97, %98 : vector<16x512xf32>
    %100 = vector.broadcast %32 : vector<1x512xf32> to vector<16x512xf32>
    %101 = arith.addf %99, %100 : vector<16x512xf32>
    %cst_80 = arith.constant 0.000000e+00 : f32
    %102 = vector.broadcast %cst_80 : f32 to vector<16x512xf32>
    %103 = arith.maximumf %101, %102 : vector<16x512xf32>
    %cst_81 = arith.constant dense<0.000000e+00> : vector<8x512xf32>
    %104 = tpu.matmul %34, %103, %cst_81 {dimension_numbers = #tpu.dot_dimension_numbers<[1], [0], [0], [1], [0, 0, 1, 1], [], []>} : vector<8x16xf32>, vector<16x512xf32>, vector<8x512xf32> -> vector<8x512xf32>
    %cst_82 = arith.constant dense<0.000000e+00> : vector<8x512xf32>
    %105 = tpu.matmul %35, %103, %cst_82 {dimension_numbers = #tpu.dot_dimension_numbers<[1], [0], [0], [1], [0, 0, 1, 1], [], []>} : vector<8x16xf32>, vector<16x512xf32>, vector<8x512xf32> -> vector<8x512xf32>
    %106 = arith.maximumf %104, %105 : vector<8x512xf32>
    %cst_83 = arith.constant dense<0.000000e+00> : vector<8x256xf32>
    %107 = tpu.matmul %106, %36, %cst_83 {dimension_numbers = #tpu.dot_dimension_numbers<[1], [0], [0], [1], [0, 0, 1, 1], [], []>} : vector<8x512xf32>, vector<512x256xf32>, vector<8x256xf32> -> vector<8x256xf32>
    %cst_84 = arith.constant dense<0.000000e+00> : vector<8x256xf32>
    %108 = tpu.matmul %106, %37, %cst_84 {dimension_numbers = #tpu.dot_dimension_numbers<[1], [0], [0], [1], [0, 0, 1, 1], [], []>} : vector<8x512xf32>, vector<512x256xf32>, vector<8x256xf32> -> vector<8x256xf32>
    %109 = arith.maximumf %107, %108 : vector<8x256xf32>
    %cst_85 = arith.constant 0.000000e+00 : f32
    %110 = vector.broadcast %cst_85 : f32 to vector<1x256xf32>
    %111 = vector.extract_strided_slice %109 {offsets = [0, 0], sizes = [7, 256], strides = [1, 1]} : vector<8x256xf32> to vector<7x256xf32>
    %112 = tpu.concatenate %110, %111 in 0 : vector<1x256xf32>, vector<7x256xf32> -> vector<8x256xf32>
    %113 = vector.extract_strided_slice %109 {offsets = [1, 0], sizes = [7, 256], strides = [1, 1]} : vector<8x256xf32> to vector<7x256xf32>
    %114 = tpu.concatenate %113, %110 in 0 : vector<7x256xf32>, vector<1x256xf32> -> vector<8x256xf32>
    %cst_86 = arith.constant dense<0.000000e+00> : vector<8x512xf32>
    %115 = tpu.matmul %112, %29, %cst_86 {dimension_numbers = #tpu.dot_dimension_numbers<[1], [0], [0], [1], [0, 0, 1, 1], [], []>} : vector<8x256xf32>, vector<256x512xf32>, vector<8x512xf32> -> vector<8x512xf32>
    %cst_87 = arith.constant dense<0.000000e+00> : vector<8x512xf32>
    %116 = tpu.matmul %109, %30, %cst_87 {dimension_numbers = #tpu.dot_dimension_numbers<[1], [0], [0], [1], [0, 0, 1, 1], [], []>} : vector<8x256xf32>, vector<256x512xf32>, vector<8x512xf32> -> vector<8x512xf32>
    %117 = arith.addf %115, %116 : vector<8x512xf32>
    %cst_88 = arith.constant dense<0.000000e+00> : vector<8x512xf32>
    %118 = tpu.matmul %114, %31, %cst_88 {dimension_numbers = #tpu.dot_dimension_numbers<[1], [0], [0], [1], [0, 0, 1, 1], [], []>} : vector<8x256xf32>, vector<256x512xf32>, vector<8x512xf32> -> vector<8x512xf32>
    %119 = arith.addf %117, %118 : vector<8x512xf32>
    %120 = vector.broadcast %33 : vector<1x512xf32> to vector<8x512xf32>
    %121 = arith.addf %119, %120 : vector<8x512xf32>
    %cst_89 = arith.constant 0.000000e+00 : f32
    %122 = vector.broadcast %cst_89 : f32 to vector<8x512xf32>
    %123 = arith.maximumf %121, %122 : vector<8x512xf32>
    %cst_90 = arith.constant dense<0.000000e+00> : vector<4x512xf32>
    %124 = tpu.matmul %38, %123, %cst_90 {dimension_numbers = #tpu.dot_dimension_numbers<[1], [0], [0], [1], [0, 0, 1, 1], [], []>} : vector<4x8xf32>, vector<8x512xf32>, vector<4x512xf32> -> vector<4x512xf32>
    %cst_91 = arith.constant dense<0.000000e+00> : vector<4x512xf32>
    %125 = tpu.matmul %39, %123, %cst_91 {dimension_numbers = #tpu.dot_dimension_numbers<[1], [0], [0], [1], [0, 0, 1, 1], [], []>} : vector<4x8xf32>, vector<8x512xf32>, vector<4x512xf32> -> vector<4x512xf32>
    %126 = arith.maximumf %124, %125 : vector<4x512xf32>
    %cst_92 = arith.constant dense<0.000000e+00> : vector<4x256xf32>
    %127 = tpu.matmul %126, %40, %cst_92 {dimension_numbers = #tpu.dot_dimension_numbers<[1], [0], [0], [1], [0, 0, 1, 1], [], []>} : vector<4x512xf32>, vector<512x256xf32>, vector<4x256xf32> -> vector<4x256xf32>
    %cst_93 = arith.constant dense<0.000000e+00> : vector<4x256xf32>
    %128 = tpu.matmul %126, %41, %cst_93 {dimension_numbers = #tpu.dot_dimension_numbers<[1], [0], [0], [1], [0, 0, 1, 1], [], []>} : vector<4x512xf32>, vector<512x256xf32>, vector<4x256xf32> -> vector<4x256xf32>
    %129 = arith.maximumf %127, %128 : vector<4x256xf32>
    %130 = vector.extract_strided_slice %129 {offsets = [0, 0], sizes = [1, 256], strides = [1, 1]} : vector<4x256xf32> to vector<1x256xf32>
    %131 = vector.extract_strided_slice %129 {offsets = [1, 0], sizes = [1, 256], strides = [1, 1]} : vector<4x256xf32> to vector<1x256xf32>
    %132 = vector.extract_strided_slice %129 {offsets = [2, 0], sizes = [1, 256], strides = [1, 1]} : vector<4x256xf32> to vector<1x256xf32>
    %133 = vector.extract_strided_slice %129 {offsets = [3, 0], sizes = [1, 256], strides = [1, 1]} : vector<4x256xf32> to vector<1x256xf32>
    %134 = tpu.concatenate %130, %131, %132, %133 in 1 : vector<1x256xf32>, vector<1x256xf32>, vector<1x256xf32>, vector<1x256xf32> -> vector<1x1024xf32>
    %135 = tpu.concatenate %88, %134 in 0 : vector<1x1024xf32>, vector<1x1024xf32> -> vector<2x1024xf32>
    %c0_94 = arith.constant 0 : index
    %c0_95 = arith.constant 0 : index
    %136 = vector.load %arg23[%c0_94, %c0_95] : memref<1024x128xf32, #tpu.memory_space<vmem>>, vector<1024x128xf32>
    %cst_96 = arith.constant dense<0.000000e+00> : vector<2x128xf32>
    %137 = tpu.matmul %135, %136, %cst_96 {dimension_numbers = #tpu.dot_dimension_numbers<[1], [0], [0], [1], [0, 0, 1, 1], [], []>} : vector<2x1024xf32>, vector<1024x128xf32>, vector<2x128xf32> -> vector<2x128xf32>
    %c0_97 = arith.constant 0 : index
    %c0_98 = arith.constant 0 : index
    %138 = vector.load %arg24[%c0_97, %c0_98] : memref<1x128xf32, #tpu.memory_space<vmem>>, vector<1x128xf32>
    %139 = vector.broadcast %138 : vector<1x128xf32> to vector<2x128xf32>
    %140 = arith.addf %137, %139 : vector<2x128xf32>
    %c0_99 = arith.constant 0 : index
    %c0_100 = arith.constant 0 : index
    %141 = vector.load %arg29[%c0_99, %c0_100] : memref<128x256xf32, #tpu.memory_space<vmem>>, vector<128x256xf32>
    %cst_101 = arith.constant dense<0.000000e+00> : vector<2x256xf32>
    %142 = tpu.matmul %12, %141, %cst_101 {dimension_numbers = #tpu.dot_dimension_numbers<[1], [0], [0], [1], [0, 0, 1, 1], [], []>} : vector<2x128xf32>, vector<128x256xf32>, vector<2x256xf32> -> vector<2x256xf32>
    %c0_102 = arith.constant 0 : index
    %c0_103 = arith.constant 0 : index
    %143 = vector.load %arg30[%c0_102, %c0_103] : memref<128x256xf32, #tpu.memory_space<vmem>>, vector<128x256xf32>
    %cst_104 = arith.constant dense<0.000000e+00> : vector<2x256xf32>
    %144 = tpu.matmul %140, %143, %cst_104 {dimension_numbers = #tpu.dot_dimension_numbers<[1], [0], [0], [1], [0, 0, 1, 1], [], []>} : vector<2x128xf32>, vector<128x256xf32>, vector<2x256xf32> -> vector<2x256xf32>
    %145 = arith.addf %142, %144 : vector<2x256xf32>
    %c0_105 = arith.constant 0 : index
    %c0_106 = arith.constant 0 : index
    %146 = vector.load %arg31[%c0_105, %c0_106] : memref<128x256xf32, #tpu.memory_space<vmem>>, vector<128x256xf32>
    %cst_107 = arith.constant dense<0.000000e+00> : vector<2x256xf32>
    %147 = tpu.matmul %25, %146, %cst_107 {dimension_numbers = #tpu.dot_dimension_numbers<[1], [0], [0], [1], [0, 0, 1, 1], [], []>} : vector<2x128xf32>, vector<128x256xf32>, vector<2x256xf32> -> vector<2x256xf32>
    %148 = arith.addf %145, %147 : vector<2x256xf32>
    %c0_108 = arith.constant 0 : index
    %c0_109 = arith.constant 0 : index
    %149 = vector.load %arg32[%c0_108, %c0_109] : memref<1x256xf32, #tpu.memory_space<vmem>>, vector<1x256xf32>
    %150 = vector.broadcast %149 : vector<1x256xf32> to vector<2x256xf32>
    %151 = arith.addf %148, %150 : vector<2x256xf32>
    %cst_110 = arith.constant 0.000000e+00 : f32
    %152 = vector.broadcast %cst_110 : f32 to vector<2x256xf32>
    %153 = arith.maximumf %151, %152 : vector<2x256xf32>
    %c0_111 = arith.constant 0 : index
    %c0_112 = arith.constant 0 : index
    %154 = vector.load %arg33[%c0_111, %c0_112] : memref<256x128xf32, #tpu.memory_space<vmem>>, vector<256x128xf32>
    %cst_113 = arith.constant dense<0.000000e+00> : vector<2x128xf32>
    %155 = tpu.matmul %153, %154, %cst_113 {dimension_numbers = #tpu.dot_dimension_numbers<[1], [0], [0], [1], [0, 0, 1, 1], [], []>} : vector<2x256xf32>, vector<256x128xf32>, vector<2x128xf32> -> vector<2x128xf32>
    %c0_114 = arith.constant 0 : index
    %c0_115 = arith.constant 0 : index
    %156 = vector.load %arg34[%c0_114, %c0_115] : memref<1x128xf32, #tpu.memory_space<vmem>>, vector<1x128xf32>
    %157 = vector.broadcast %156 : vector<1x128xf32> to vector<2x128xf32>
    %158 = arith.addf %155, %157 : vector<2x128xf32>
    %c0_116 = arith.constant 0 : index
    %c0_117 = arith.constant 0 : index
    %159 = vector.load %arg35[%c0_116, %c0_117] : memref<128x192xf32, #tpu.memory_space<vmem>>, vector<128x192xf32>
    %cst_118 = arith.constant dense<0.000000e+00> : vector<2x192xf32>
    %160 = tpu.matmul %158, %159, %cst_118 {dimension_numbers = #tpu.dot_dimension_numbers<[1], [0], [0], [1], [0, 0, 1, 1], [], []>} : vector<2x128xf32>, vector<128x192xf32>, vector<2x192xf32> -> vector<2x192xf32>
    %c0_119 = arith.constant 0 : index
    %c0_120 = arith.constant 0 : index
    %161 = vector.load %arg36[%c0_119, %c0_120] : memref<1x192xf32, #tpu.memory_space<vmem>>, vector<1x192xf32>
    %162 = vector.broadcast %161 : vector<1x192xf32> to vector<2x192xf32>
    %163 = arith.addf %160, %162 : vector<2x192xf32>
    %cst_121 = arith.constant 0.000000e+00 : f32
    %164 = vector.broadcast %cst_121 : f32 to vector<2x192xf32>
    %165 = arith.maximumf %163, %164 : vector<2x192xf32>
    %c0_122 = arith.constant 0 : index
    %c0_123 = arith.constant 0 : index
    %166 = vector.load %arg37[%c0_122, %c0_123] : memref<192x384xf32, #tpu.memory_space<vmem>>, vector<192x384xf32>
    %cst_124 = arith.constant dense<0.000000e+00> : vector<2x384xf32>
    %167 = tpu.matmul %165, %166, %cst_124 {dimension_numbers = #tpu.dot_dimension_numbers<[1], [0], [0], [1], [0, 0, 1, 1], [], []>} : vector<2x192xf32>, vector<192x384xf32>, vector<2x384xf32> -> vector<2x384xf32>
    %c0_125 = arith.constant 0 : index
    %c0_126 = arith.constant 0 : index
    %168 = vector.load %arg38[%c0_125, %c0_126] : memref<1x384xf32, #tpu.memory_space<vmem>>, vector<1x384xf32>
    %169 = vector.broadcast %168 : vector<1x384xf32> to vector<2x384xf32>
    %170 = arith.addf %167, %169 : vector<2x384xf32>
    %171 = vector.extract_strided_slice %170 {offsets = [0, 0], sizes = [2, 128], strides = [1, 1]} : vector<2x384xf32> to vector<2x128xf32>
    %cst_127 = arith.constant dense<0xFF800000> : vector<2xf32>
    %172 = vector.multi_reduction <maximumf>, %171, %cst_127 [1] : vector<2x128xf32> to vector<2xf32>
    %173 = vector.shape_cast %172 : vector<2xf32> to vector<2x1xf32>
    %174 = vector.broadcast %173 : vector<2x1xf32> to vector<2x128xf32>
    %175 = arith.subf %171, %174 : vector<2x128xf32>
    %176 = math.exp %175 : vector<2x128xf32>
    %cst_128 = arith.constant dense<0.000000e+00> : vector<2xf32>
    %177 = vector.multi_reduction <add>, %176, %cst_128 [1] : vector<2x128xf32> to vector<2xf32>
    %178 = vector.shape_cast %177 : vector<2xf32> to vector<2x1xf32>
    %179 = vector.broadcast %178 : vector<2x1xf32> to vector<2x128xf32>
    %180 = arith.divf %176, %179 : vector<2x128xf32>
    %c0_129 = arith.constant 0 : index
    %c0_130 = arith.constant 0 : index
    %181 = vector.load %arg39[%c0_129, %c0_130] : memref<2x128xf32, #tpu.memory_space<vmem>>, vector<2x128xf32>
    tpu.vector_store %arg39[%c0_129, %c0_130], %180 {strides = array<i32>} : memref<2x128xf32, #tpu.memory_space<vmem>>, vector<2x128xf32>,
    %182 = vector.extract_strided_slice %170 {offsets = [0, 128], sizes = [2, 128], strides = [1, 1]} : vector<2x384xf32> to vector<2x128xf32>
    %cst_131 = arith.constant dense<0xFF800000> : vector<2xf32>
    %183 = vector.multi_reduction <maximumf>, %182, %cst_131 [1] : vector<2x128xf32> to vector<2xf32>
    %184 = vector.shape_cast %183 : vector<2xf32> to vector<2x1xf32>
    %185 = vector.broadcast %184 : vector<2x1xf32> to vector<2x128xf32>
    %186 = arith.subf %182, %185 : vector<2x128xf32>
    %187 = math.exp %186 : vector<2x128xf32>
    %cst_132 = arith.constant dense<0.000000e+00> : vector<2xf32>
    %188 = vector.multi_reduction <add>, %187, %cst_132 [1] : vector<2x128xf32> to vector<2xf32>
    %189 = vector.shape_cast %188 : vector<2xf32> to vector<2x1xf32>
    %190 = vector.broadcast %189 : vector<2x1xf32> to vector<2x128xf32>
    %191 = arith.divf %187, %190 : vector<2x128xf32>
    %c0_133 = arith.constant 0 : index
    %c0_134 = arith.constant 0 : index
    %192 = vector.load %arg40[%c0_133, %c0_134] : memref<2x128xf32, #tpu.memory_space<vmem>>, vector<2x128xf32>
    tpu.vector_store %arg40[%c0_133, %c0_134], %191 {strides = array<i32>} : memref<2x128xf32, #tpu.memory_space<vmem>>, vector<2x128xf32>,
    %193 = vector.extract_strided_slice %170 {offsets = [0, 256], sizes = [2, 128], strides = [1, 1]} : vector<2x384xf32> to vector<2x128xf32>
    %cst_135 = arith.constant dense<0xFF800000> : vector<2xf32>
    %194 = vector.multi_reduction <maximumf>, %193, %cst_135 [1] : vector<2x128xf32> to vector<2xf32>
    %195 = vector.shape_cast %194 : vector<2xf32> to vector<2x1xf32>
    %196 = vector.broadcast %195 : vector<2x1xf32> to vector<2x128xf32>
    %197 = arith.subf %193, %196 : vector<2x128xf32>
    %198 = math.exp %197 : vector<2x128xf32>
    %cst_136 = arith.constant dense<0.000000e+00> : vector<2xf32>
    %199 = vector.multi_reduction <add>, %198, %cst_136 [1] : vector<2x128xf32> to vector<2xf32>
    %200 = vector.shape_cast %199 : vector<2xf32> to vector<2x1xf32>
    %201 = vector.broadcast %200 : vector<2x1xf32> to vector<2x128xf32>
    %202 = arith.divf %198, %201 : vector<2x128xf32>
    %c0_137 = arith.constant 0 : index
    %c0_138 = arith.constant 0 : index
    %203 = vector.load %arg41[%c0_137, %c0_138] : memref<2x128xf32, #tpu.memory_space<vmem>>, vector<2x128xf32>
    tpu.vector_store %arg41[%c0_137, %c0_138], %202 {strides = array<i32>} : memref<2x128xf32, #tpu.memory_space<vmem>>, vector<2x128xf32>,
    return
  }
}

</mosaic_0001>

<bundles_post_ra>
// kernel: cancer_diagnosis_forward.1
= control target key start
LH: loop header
LB: loop body
LE: loop exit
PB: predicated region body
PF: predicated region fallthrough
CT: control target
= control target key end

     0   :  { %s9932_s6 = smov 1   ;;  %s9933_s10 = smov 2   ;;  %s10989_s0 = inlined_call_operand.smem [shape: u32[42], index: -1, kind: input, shape index: {}] }
   0x1   :  { %s10022_s5 = sld [smem:[%s10989_s0]]   ;;  %s9934_s14 = smov 3  }
   0x2   :  { %s10027_s9 = sld [smem:[%s10989_s0 + %s9932_s6]]   ;;  %s9935_s18 = smov 4  }
   0x3   :  { %s10032_s13 = sld [smem:[%s10989_s0 + %s9933_s10]]   ;;  %s9936_s22 = smov 5  }
   0x4   :  { %s10037_s17 = sld [smem:[%s10989_s0 + %s9934_s14]]   ;;  %s9937_s26 = smov 6  }
   0x5   :  { %s10042_s21 = sld [smem:[%s10989_s0 + %s9935_s18]]   ;;  %s9938_s30 = smov 7  }
   0x6   :  { %s10047_s25 = sld [smem:[%s10989_s0 + %s9936_s22]]   ;;  %s9939_s4 = smov 8  }
   0x7   :  { %10993 = sst [smem:[#allocation68_spill]] %s10022_s5  ;;  %s9940_s10 = smov 9  }
   0x8   :  { %10994 = sst [smem:[#allocation69_spill]] %s10027_s9  ;;  %s9941_s15 = smov 10  }
   0x9   :  { %10995 = sst [smem:[#allocation70_spill]] %s10032_s13  ;;  %s9942_s20 = smov 11  }
   0xa   :  { %10996 = sst [smem:[#allocation71_spill]] %s10037_s17  ;;  %s9944_s1 = smov 13  }
   0xb   :  { %s10052_s29 = sld [smem:[%s10989_s0 + %s9937_s26]]   ;;  %s9943_s26 = smov 12  }
   0xc   :  { %10997 = sst [smem:[#allocation72_spill]] %s10047_s25  ;;  %s9945_s7 = smov 14  }
   0xd   :  { %s10057_s3 = sld [smem:[%s10989_s0 + %s9938_s30]]   ;;  %s9947_s22 = smov 16  }
   0xe   :  { %s10062_s8 = sld [smem:[%s10989_s0 + %s9939_s4]]   ;;  %s9948_s28 = smov 17  }
   0xf   :  { %s10067_s14 = sld [smem:[%s10989_s0 + %s9940_s10]]  }
  0x10   :  { %s10072_s19 = sld [smem:[%s10989_s0 + %s9941_s15]]   ;;  %s9946_s15 = smov 15  }
  0x11   :  { %s10077_s24 = sld [smem:[%s10989_s0 + %s9942_s20]]  }
  0x12   :  { %s10082_s30 = sld [smem:[%s10989_s0 + %s9943_s26]]  }
  0x13   :  { %10998 = sst [smem:[#allocation73_spill]] %s10057_s3 }
  0x14   :  { %s10087_s6 = sld [smem:[%s10989_s0 + %s9944_s1]]  }
  0x15   :  { %10999 = sst [smem:[#allocation74_spill]] %s10067_s14 }
  0x16   :  { %s10092_s12 = sld [smem:[%s10989_s0 + %s9945_s7]]   ;;  %s9949_s7 = smov 18  }
  0x17   :  { %11000 = sst [smem:[#allocation75_spill]] %s10077_s24 }
  0x18   :  { %s10097_s20 = sld [smem:[%s10989_s0 + %s9946_s15]]   ;;  %s9950_s15 = smov 19  }
  0x19   :  { %s10102_s27 = sld [smem:[%s10989_s0 + %s9947_s22]]   ;;  %s9951_s22 = smov 20  }
  0x1a   :  { %11001 = sst [smem:[#allocation76_spill]] %s10087_s6 }
  0x1b   :  { %s10107_s4 = sld [smem:[%s10989_s0 + %s9948_s28]]   ;;  %s9952_s28 = smov 21  }
  0x1c   :  { %s10112_s13 = sld [smem:[%s10989_s0 + %s9949_s7]]   ;;  %s9953_s7 = smov 22  }
  0x1d   :  { %s10117_s9 = sld [smem:[%s10989_s0 + %s9950_s15]]   ;;  %s9954_s15 = smov 23  }
  0x1e   :  { %11002 = sst [smem:[#allocation77_spill]] %s10097_s20 }
  0x1f   :  { %s10122_s5 = sld [smem:[%s10989_s0 + %s9951_s22]]   ;;  %s9955_s22 = smov 24  }
  0x20   :  { %s10132_s20 = sld [smem:[%s10989_s0 + %s9953_s7]]   ;;  %s9957_s7 = smov 26  }
  0x21   :  { %11003 = sst [smem:[#allocation78_spill]] %s10107_s4 }
  0x22   :  { %s10127_s4 = sld [smem:[%s10989_s0 + %s9952_s28]]   ;;  %s9956_s28 = smov 25  }
  0x23   :  { %11004 = sst [smem:[#allocation79_spill]] %s10117_s9 }
  0x24   :  { %s10137_s9 = sld [smem:[%s10989_s0 + %s9954_s15]]   ;;  %s9958_s15 = smov 27  }
  0x25   :  { %s10142_s6 = sld [smem:[%s10989_s0 + %s9955_s22]]   ;;  %s9959_s22 = smov 28  }
  0x26   :  { %11006 = sst [smem:[#allocation81_spill]] %s10132_s20 }
  0x27   :  { %s10152_s20 = sld [smem:[%s10989_s0 + %s9957_s7]]   ;;  %s9961_s7 = smov 30  }
  0x28   :  { %11005 = sst [smem:[#allocation80_spill]] %s10127_s4 }
  0x29   :  { %s10147_s4 = sld [smem:[%s10989_s0 + %s9956_s28]]   ;;  %s9960_s28 = smov 29  }
  0x2a   :  { %s10157_s24 = sld [smem:[%s10989_s0 + %s9958_s15]]   ;;  %s9962_s15 = smov 31  }
  0x2b   :  { %11007 = sst [smem:[#allocation82_spill]] %s10142_s6 }
  0x2c   :  { %s10162_s6 = sld [smem:[%s10989_s0 + %s9959_s22]]   ;;  %s9963_s22 = smov 32  }
  0x2d   :  { %11008 = sst [smem:[#allocation83_spill]] %s10152_s20 }
  0x2e   :  { %s10167_s14 = sld [smem:[%s10989_s0 + %s9960_s28]]   ;;  %s9964_s28 = smov 33  }
  0x2f   :  { %s10172_s20 = sld [smem:[%s10989_s0 + %s9961_s7]]   ;;  %s9965_s7 = smov 34  }
  0x30   :  { %11009 = sst [smem:[#allocation84_spill]] %s10157_s24 }
  0x31   :  { %s10177_s24 = sld [smem:[%s10989_s0 + %s9962_s15]]   ;;  %s9966_s15 = smov 35  }
  0x32   :  { %s10182_s3 = sld [smem:[%s10989_s0 + %s9963_s22]]   ;;  %s9967_s22 = smov 36  }
  0x33   :  { %s10192_s25 = sld [smem:[%s10989_s0 + %s9965_s7]]   ;;  %s9969_s7 = smov 38  }
  0x34   :  { %11010 = sst [smem:[#allocation85_spill]] %s10167_s14 }
  0x35   :  { %s10187_s14 = sld [smem:[%s10989_s0 + %s9964_s28]]   ;;  %s9968_s28 = smov 37  }
  0x36   :  { %s10207_s17 = sld [smem:[%s10989_s0 + %s9968_s28]]   ;;  %s9972_s28 = smov 41  }
  0x37   :  { %11011 = sst [smem:[#allocation86_spill]] %s10177_s24 }
  0x38   :  { %11012 = sst [smem:[#allocation87_spill]] %s10182_s3 }
  0x39   :  { %11013 = sst [smem:[#allocation88_spill]] %s10192_s25 }
  0x3a   :  { %s10197_s24 = sld [smem:[%s10989_s0 + %s9966_s15]]   ;;  %s9970_s15 = smov 39  }
  0x3b   :  { %s10202_s3 = sld [smem:[%s10989_s0 + %s9967_s22]]   ;;  %s9971_s22 = smov 40  }
  0x3c   :  { %11016 = sst [smem:[#allocation91_spill]] %s10207_s17 }
  0x3d   :  { %s10212_s25 = sld [smem:[%s10989_s0 + %s9969_s7]]  }
  0x3e   :  { %s10227_s17 = sld [smem:[%s10989_s0 + %s9972_s28]]  }
  0x40   :  { %11014 = sst [smem:[#allocation89_spill]] %s10197_s24 }
  0x41   :  { %11015 = sst [smem:[#allocation90_spill]] %s10202_s3 }
  0x42   :  { %s10217_s24 = sld [smem:[%s10989_s0 + %s9970_s15]]  }
  0x43   :  { %s10222_s3 = sld [smem:[%s10989_s0 + %s9971_s22]]  }
  0x44   :  { %89 = vsyncpa [#allocation3], 0 }
  0x45   :  { %90 = vsyncpa [#allocation6], 0 }
  0x46   :  { %91 = vsyncpa [#allocation9], 0 }
  0x47   :  { %92 = vsyncpa [#allocation12], 0 }
  0x48   :  { %93 = vsyncpa [#allocation15], 0 }
  0x49   :  { %94 = vsyncpa [#allocation18], 0 }
  0x4a   :  { %95 = vsyncpa [#allocation21], 0 }
  0x4b   :  { %96 = vsyncpa [#allocation24], 0 }
  0x4c   :  { %97 = vsyncpa [#allocation27], 0 }
  0x4d   :  { %98 = vsyncpa [#allocation30], 0 }
  0x4e   :  { %99 = vsyncpa [#allocation33], 0 }
  0x4f   :  { %100 = vsyncpa [#allocation36], 0 }
  0x50   :  { %101 = vsyncpa [#allocation39], 0 }
  0x51   :  { %102 = vsyncpa [#allocation42], 0 }
  0x52   :  { %103 = vsyncpa [#allocation45], 0 }
  0x53   :  { %104 = vsyncpa [#allocation4], 0 }
  0x54   :  { %105 = vsyncpa [#allocation49], 0  ;;  %s9973_s7 = smov [#allocation5]   ;;  %s9974_s10 = smov [#allocation8]  }
  0x55   :  { %s130_s0 = sshll.u32 %s9973_s7, 4  ;;  %s152_s11 = sshll.u32 %s9974_s10, 4  ;;  %s131_s0 = int_to_ptr.vmem [resolvable:$true] %s130_s0  ;;  %s153_s11 = int_to_ptr.vmem [resolvable:$true] %s152_s11 }
  0x56   :  { %s9266_s15 = scalar_lea.vmem %s131_s0, 32  ;;  %p9271_p1 = scmp.lt.s32.totalorder %s131_s0, %s131_s0 }
  0x57   :  { %p9267_p0 = scmp.ne.s32.totalorder %s131_s0, %s9266_s15  ;;  %p9272_p2 = scmp.lt.s32.totalorder %s9266_s15, %s9266_s15 }
  0x59   :  { %p9273_p3 = por %p9272_p2, %p9271_p1 }
  0x5b   :  { %p9274_p4 = pnand %p9273_p3, %p9267_p0 }
  0x5d   :  { %9277 = shalt.err (!%p9274_p4)
}
  0x5e   :  { %133 = dma.hbm_to_vmem [thread:$0]  %s10042_s21, 32, %s131_s0, [#allocation6]  }
  0x5f   :  { %s9286_s16 = scalar_lea.vmem %s153_s11, 16  ;;  %s9290_s18 = scalar_lea.vmem %s153_s11, 32 }
  0x60   :  { %p9287_p5 = scmp.ne.s32.totalorder %s153_s11, %s9286_s16  ;;  %p9291_p6 = scmp.lt.s32.totalorder %s153_s11, %s153_s11 }
  0x61   :  { %p9292_p7 = scmp.lt.s32.totalorder %s9290_s18, %s9286_s16 }
  0x63   :  { %p9293_p8 = por %p9292_p7, %p9291_p6 }
  0x65   :  { %p9294_p9 = pnand %p9293_p8, %p9287_p5 }
  0x67   :  { %9297 = shalt.err (!%p9294_p9)
}
  0x68   :  { %155 = dma.hbm_to_vmem [thread:$0]  %s10052_s29, 16, %s153_s11, [#allocation9]  }
  0x69   :  { %s9975_s22 = smov [#allocation11]   ;;  %s9976_s26 = smov [#allocation14]  }
  0x6a   :  { %s173_s23 = sshll.u32 %s9975_s22, 4  ;;  %s198_s28 = sshll.u32 %s9976_s26, 4  ;;  %s174_s23 = int_to_ptr.vmem [resolvable:$true] %s173_s23  ;;  %s199_s28 = int_to_ptr.vmem [resolvable:$true] %s198_s28 }
  0x6b   :  { %s9306_s1 = scalar_lea.vmem %s174_s23, 4096  ;;  %p9311_p11 = scmp.lt.s32.totalorder %s174_s23, %s174_s23 }
  0x6c   :  { %p9307_p10 = scmp.ne.s32.totalorder %s174_s23, %s9306_s1  ;;  %p9312_p12 = scmp.lt.s32.totalorder %s9306_s1, %s9306_s1 }
  0x6e   :  { %p9313_p13 = por %p9312_p12, %p9311_p11 }
  0x70   :  { %p9314_p0 = pnand %p9313_p13, %p9307_p10 }
  0x72   :  { %9317 = shalt.err (!%p9314_p0)
}
  0x73   :  { %s9977_s21 = smov 512   ;;  %s9978_s2 = smov 32  }
  0x74   :  { %179 = dma.hbm_to_vmem [thread:$0]  %s10062_s8, 4096, %s174_s23, [#allocation12], %s9977_s21, %s9977_s21, %s9978_s2  }
  0x75   :  { %s9326_s29 = scalar_lea.vmem %s199_s28, 64  ;;  %p9331_p2 = scmp.lt.s32.totalorder %s199_s28, %s199_s28 }
  0x76   :  { %p9327_p1 = scmp.ne.s32.totalorder %s199_s28, %s9326_s29  ;;  %p9332_p3 = scmp.lt.s32.totalorder %s9326_s29, %s9326_s29 }
  0x78   :  { %p9333_p4 = por %p9332_p3, %p9331_p2 }
  0x7a   :  { %p9334_p5 = pnand %p9333_p4, %p9327_p1 }
  0x7c   :  { %9337 = shalt.err (!%p9334_p5)
}
  0x7d   :  { %201 = dma.hbm_to_vmem [thread:$0]  %s10072_s19, 64, %s199_s28, [#allocation15]  }
  0x7e   :  { %s9979_s7 = smov [#allocation17]  }
  0x7f   :  { %s218_s0 = sshll.u32 %s9979_s7, 4  ;;  %s219_s0 = int_to_ptr.vmem [resolvable:$true] %s218_s0 }
  0x80   :  { %s9346_s10 = scalar_lea.vmem %s219_s0, 128  ;;  %p9351_p7 = scmp.lt.s32.totalorder %s219_s0, %s219_s0 }
  0x81   :  { %p9347_p6 = scmp.ne.s32.totalorder %s219_s0, %s9346_s10  ;;  %p9352_p8 = scmp.lt.s32.totalorder %s9346_s10, %s9346_s10 }
  0x83   :  { %p9353_p9 = por %p9352_p8, %p9351_p7 }
  0x85   :  { %p9354_p10 = pnand %p9353_p9, %p9347_p6 }
  0x87   :  { %9357 = shalt.err (!%p9354_p10)
}
  0x88   :  { %221 = dma.hbm_to_vmem [thread:$0]  %s10082_s30, 128, %s219_s0, [#allocation18]  }
  0x89   :  { %s9980_s8 = smov [#allocation20]   ;;  %s9981_s15 = smov [#allocation23]  }
  0x8a   :  { %s239_s11 = sshll.u32 %s9980_s8, 4  ;;  %s263_s16 = sshll.u32 %s9981_s15, 4  ;;  %s240_s11 = int_to_ptr.vmem [resolvable:$true] %s239_s11  ;;  %s264_s16 = int_to_ptr.vmem [resolvable:$true] %s263_s16 }
  0x8b   :  { %s9366_s18 = scalar_lea.vmem %s240_s11, 16384  ;;  %p9371_p12 = scmp.lt.s32.totalorder %s240_s11, %s240_s11 }
  0x8c   :  { %p9367_p11 = scmp.ne.s32.totalorder %s240_s11, %s9366_s18  ;;  %p9372_p13 = scmp.lt.s32.totalorder %s9366_s18, %s9366_s18 }
  0x8e   :  { %p9373_p0 = por %p9372_p13, %p9371_p12 }
  0x90   :  { %p9374_p1 = pnand %p9373_p0, %p9367_p11 }
  0x92   :  { %9377 = shalt.err (!%p9374_p1)
}
  0x93   :  { %s9982_s19 = smov 256   ;;  %s9983_s22 = smov 16  }
  0x94   :  { %245 = dma.hbm_to_vmem [thread:$0]  %s10092_s12, 16384, %s240_s11, [#allocation21], %s9982_s19, %s9982_s19, %s9983_s22  }
  0x95   :  { %s9386_s30 = scalar_lea.vmem %s264_s16, 16384  ;;  %p9391_p3 = scmp.lt.s32.totalorder %s264_s16, %s264_s16 }
  0x96   :  { %p9387_p2 = scmp.ne.s32.totalorder %s264_s16, %s9386_s30  ;;  %p9392_p4 = scmp.lt.s32.totalorder %s9386_s30, %s9386_s30 }
  0x98   :  { %p9393_p5 = por %p9392_p4, %p9391_p3 }
  0x9a   :  { %p9394_p6 = pnand %p9393_p5, %p9387_p2 }
  0x9c   :  { %9397 = shalt.err (!%p9394_p6)
}
  0x9d   :  { %269 = dma.hbm_to_vmem [thread:$0]  %s10102_s27, 16384, %s264_s16, [#allocation24], %s9977_s21, %s9977_s21, %s9978_s2  }
  0x9e   :  { %s9984_s23 = smov [#allocation26]   ;;  %s9985_s28 = smov [#allocation29]  }
  0x9f   :  { %s288_s26 = sshll.u32 %s9984_s23, 4  ;;  %s308_s1 = sshll.u32 %s9985_s28, 4  ;;  %s289_s26 = int_to_ptr.vmem [resolvable:$true] %s288_s26  ;;  %s309_s1 = int_to_ptr.vmem [resolvable:$true] %s308_s1 }
  0xa0   :  { %s9406_s29 = scalar_lea.vmem %s289_s26, 64  ;;  %p9411_p8 = scmp.lt.s32.totalorder %s289_s26, %s289_s26 }
  0xa1   :  { %p9407_p7 = scmp.ne.s32.totalorder %s289_s26, %s9406_s29  ;;  %p9412_p9 = scmp.lt.s32.totalorder %s9406_s29, %s9406_s29 }
  0xa3   :  { %p9413_p10 = por %p9412_p9, %p9411_p8 }
  0xa5   :  { %p9414_p11 = pnand %p9413_p10, %p9407_p7 }
  0xa7   :  { %9417 = shalt.err (!%p9414_p11)
}
  0xa8   :  { %291 = dma.hbm_to_vmem [thread:$0]  %s10112_s13, 64, %s289_s26, [#allocation27]  }
  0xa9   :  { %s9426_s12 = scalar_lea.vmem %s309_s1, 64  ;;  %p9431_p13 = scmp.lt.s32.totalorder %s309_s1, %s309_s1 }
  0xaa   :  { %p9427_p12 = scmp.ne.s32.totalorder %s309_s1, %s9426_s12  ;;  %p9432_p0 = scmp.lt.s32.totalorder %s9426_s12, %s9426_s12 }
  0xac   :  { %p9433_p1 = por %p9432_p0, %p9431_p13 }
  0xae   :  { %p9434_p2 = pnand %p9433_p1, %p9427_p12 }
  0xb0   :  { %9437 = shalt.err (!%p9434_p2)
}
  0xb1   :  { %311 = dma.hbm_to_vmem [thread:$0]  %s10122_s5, 64, %s309_s1, [#allocation30]  }
  0xb2   :  { %s9986_s27 = smov [#allocation32]   ;;  %s9987_s0 = smov [#allocation35]  }
  0xb3   :  { %s331_s7 = sshll.u32 %s9986_s27, 4  ;;  %s353_s10 = sshll.u32 %s9987_s0, 4  ;;  %s332_s7 = int_to_ptr.vmem [resolvable:$true] %s331_s7  ;;  %s354_s10 = int_to_ptr.vmem [resolvable:$true] %s353_s10 }
  0xb4   :  { %s9446_s8 = scalar_lea.vmem %s332_s7, 16384  ;;  %p9451_p4 = scmp.lt.s32.totalorder %s332_s7, %s332_s7 }
  0xb5   :  { %p9447_p3 = scmp.ne.s32.totalorder %s332_s7, %s9446_s8  ;;  %p9452_p5 = scmp.lt.s32.totalorder %s9446_s8, %s9446_s8 }
  0xb7   :  { %p9453_p6 = por %p9452_p5, %p9451_p4 }
  0xb9   :  { %p9454_p7 = pnand %p9453_p6, %p9447_p3 }
  0xbb   :  { %9457 = shalt.err (!%p9454_p7)
}
  0xbc   :  { %s9988_s13 = smov 128   ;;  %s9989_s11 = smov 8  }
  0xbd   :  { %337 = dma.hbm_to_vmem [thread:$0]  %s10137_s9, 16384, %s332_s7, [#allocation33], %s9988_s13, %s9988_s13, %s9989_s11  }
  0xbe   :  { %s9466_s5 = scalar_lea.vmem %s354_s10, 2048  ;;  %p9471_p9 = scmp.lt.s32.totalorder %s354_s10, %s354_s10 }
  0xbf   :  { %p9467_p8 = scmp.ne.s32.totalorder %s354_s10, %s9466_s5  ;;  %p9472_p10 = scmp.lt.s32.totalorder %s9466_s5, %s9466_s5 }
  0xc1   :  { %p9473_p11 = por %p9472_p10, %p9471_p9 }
  0xc3   :  { %p9474_p12 = pnand %p9473_p11, %p9467_p8 }
  0xc5   :  { %9477 = shalt.err (!%p9474_p12)
}
  0xc6   :  { %359 = dma.hbm_to_vmem [thread:$0]  %s10147_s4, 2048, %s354_s10, [#allocation36], %s9977_s21, %s9977_s21, %s9978_s2  }
  0xc7   :  { %s9990_s15 = smov [#allocation38]   ;;  %s9991_s18 = smov [#allocation41]  }
  0xc8   :  { %s380_s16 = sshll.u32 %s9990_s15, 4  ;;  %s401_s30 = sshll.u32 %s9991_s18, 4  ;;  %s381_s16 = int_to_ptr.vmem [resolvable:$true] %s380_s16  ;;  %s402_s30 = int_to_ptr.vmem [resolvable:$true] %s401_s30 }
  0xc9   :  { %s9486_s23 = scalar_lea.vmem %s381_s16, 16  ;;  %s9490_s9 = scalar_lea.vmem %s381_s16, 32 }
  0xca   :  { %p9487_p13 = scmp.ne.s32.totalorder %s381_s16, %s9486_s23  ;;  %p9491_p0 = scmp.lt.s32.totalorder %s381_s16, %s381_s16 }
  0xcb   :  { %p9492_p1 = scmp.lt.s32.totalorder %s9490_s9, %s9486_s23 }
  0xcd   :  { %p9493_p2 = por %p9492_p1, %p9491_p0 }
  0xcf   :  { %p9494_p3 = pnand %p9493_p2, %p9487_p13 }
  0xd1   :  { %9497 = shalt.err (!%p9494_p3)
}
  0xd2   :  { %383 = dma.hbm_to_vmem [thread:$0]  %s10162_s6, 16, %s381_s16, [#allocation39]  }
  0xd3   :  { %s9506_s26 = scalar_lea.vmem %s402_s30, 4096  ;;  %p9511_p5 = scmp.lt.s32.totalorder %s402_s30, %s402_s30 }
  0xd4   :  { %p9507_p4 = scmp.ne.s32.totalorder %s402_s30, %s9506_s26  ;;  %p9512_p6 = scmp.lt.s32.totalorder %s9506_s26, %s9506_s26 }
  0xd6   :  { %p9513_p7 = por %p9512_p6, %p9511_p5 }
  0xd8   :  { %p9514_p8 = pnand %p9513_p7, %p9507_p4 }
  0xda   :  { %9517 = shalt.err (!%p9514_p8)
}
  0xdb   :  { %407 = dma.hbm_to_vmem [thread:$0]  %s10172_s20, 4096, %s402_s30, [#allocation42], %s9982_s19, %s9982_s19, %s9983_s22  }
  0xdc   :  { %s9992_s4 = smov [#allocation44]   ;;  %s9993_s1 = smov [#allocation2]  }
  0xdd   :  { %s427_s28 = sshll.u32 %s9992_s4, 4  ;;  %s117_s29 = sshll.u32 %s9993_s1, 4  ;;  %s428_s28 = int_to_ptr.vmem [resolvable:$true] %s427_s28  ;;  %s118_s29 = int_to_ptr.vmem [resolvable:$true] %s117_s29 }
  0xde   :  { %s9526_s12 = scalar_lea.vmem %s428_s28, 4096  ;;  %p9531_p10 = scmp.lt.s32.totalorder %s428_s28, %s428_s28 }
  0xdf   :  { %p9527_p9 = scmp.ne.s32.totalorder %s428_s28, %s9526_s12  ;;  %p9532_p11 = scmp.lt.s32.totalorder %s9526_s12, %s9526_s12 }
  0xe1   :  { %p9533_p12 = por %p9532_p11, %p9531_p10 }
  0xe3   :  { %p9534_p13 = pnand %p9533_p12, %p9527_p9 }
  0xe5   :  { %9537 = shalt.err (!%p9534_p13)
}
  0xe6   :  { %433 = dma.hbm_to_vmem [thread:$0]  %s10187_s14, 4096, %s428_s28, [#allocation45], %s9988_s13, %s9988_s13, %s9989_s11  }
  0xe7   :  { %s9546_s6 = scalar_lea.vmem %s118_s29, 512  ;;  %p9551_p1 = scmp.lt.s32.totalorder %s118_s29, %s118_s29 }
  0xe8   :  { %p9547_p0 = scmp.ne.s32.totalorder %s118_s29, %s9546_s6  ;;  %p9552_p2 = scmp.lt.s32.totalorder %s9546_s6, %s9546_s6 }
  0xea   :  { %p9553_p3 = por %p9552_p2, %p9551_p1 }
  0xec   :  { %p9554_p4 = pnand %p9553_p3, %p9547_p0 }
  0xee   :  { %9557 = shalt.err (!%p9554_p4)
}
  0xef   :  { %s11017_s20 = sld [smem:[#allocation71_spill]]  ;;  %s9994_s27 = smov [#allocation7]  }
  0xf0   :  { %s139_s7 = sshll.u32 %s9994_s27, 4  ;;  %s9995_s0 = smov [#allocation10]   ;;  %s140_s7 = int_to_ptr.vmem [resolvable:$true] %s139_s7 }
  0xf1   :  { %s161_s10 = sshll.u32 %s9995_s0, 4  ;;  %s9566_s8 = scalar_lea.vmem %s140_s7, 4096  ;;  %s162_s10 = int_to_ptr.vmem [resolvable:$true] %s161_s10 }
  0xf2   :  { %p9567_p5 = scmp.ne.s32.totalorder %s140_s7, %s9566_s8  ;;  %p9571_p6 = scmp.lt.s32.totalorder %s140_s7, %s140_s7 }
  0xf3   :  { %p9572_p7 = scmp.lt.s32.totalorder %s9566_s8, %s9566_s8 }
  0xf5   :  { %123 = dma.hbm_to_vmem [thread:$0]  %s11017_s20, 512, %s118_s29, [#allocation3], %s9982_s19, %s9982_s19, %s9983_s22  }
  0xf6   :  { %p9573_p8 = por %p9572_p7, %p9571_p6 }
  0xf8   :  { %p9574_p9 = pnand %p9573_p8, %p9567_p5 }
  0xfa   :  { %9577 = shalt.err (!%p9574_p9)
}
  0xfb   :  { %s11018_s14 = sld [smem:[#allocation72_spill]]  ;;  %s9586_s5 = scalar_lea.vmem %s162_s10, 4096 }
  0xfc   :  { %p9587_p10 = scmp.ne.s32.totalorder %s162_s10, %s9586_s5  ;;  %p9591_p11 = scmp.lt.s32.totalorder %s162_s10, %s162_s10 }
  0xfd   :  { %p9592_p12 = scmp.lt.s32.totalorder %s9586_s5, %s9586_s5 }
  0xff   :  { %p9593_p13 = por %p9592_p12, %p9591_p11 }
 0x101   :  { %145 = dma.hbm_to_vmem [thread:$0]  %s11018_s14, 4096, %s140_s7, [#allocation6], %s9988_s13, %s9988_s13, %s9989_s11  }
 0x102   :  { %p9594_p0 = pnand %p9593_p13, %p9587_p10 }
 0x104   :  { %9597 = shalt.err (!%p9594_p0)
}
 0x105   :  { %s11019_s15 = sld [smem:[#allocation73_spill]]  ;;  %s9996_s16 = smov [#allocation13]  }
 0x106   :  { %s185_s18 = sshll.u32 %s9996_s16, 4  ;;  %s9997_s30 = smov [#allocation16]   ;;  %s186_s18 = int_to_ptr.vmem [resolvable:$true] %s185_s18 }
 0x107   :  { %s208_s23 = sshll.u32 %s9997_s30, 4  ;;  %s9606_s9 = scalar_lea.vmem %s186_s18, 4096  ;;  %s209_s23 = int_to_ptr.vmem [resolvable:$true] %s208_s23 }
 0x108   :  { %p9607_p1 = scmp.ne.s32.totalorder %s186_s18, %s9606_s9  ;;  %p9611_p2 = scmp.lt.s32.totalorder %s186_s18, %s186_s18 }
 0x109   :  { %p9612_p3 = scmp.lt.s32.totalorder %s9606_s9, %s9606_s9 }
 0x10b   :  { %167 = dma.hbm_to_vmem [thread:$0]  %s11019_s15, 4096, %s162_s10, [#allocation9], %s9977_s21, %s9977_s21, %s9978_s2  }
 0x10c   :  { %p9613_p4 = por %p9612_p3, %p9611_p2 }
 0x10e   :  { %p9614_p5 = pnand %p9613_p4, %p9607_p1 }
 0x110   :  { %9617 = shalt.err (!%p9614_p5)
}
 0x111   :  { %s11020_s26 = sld [smem:[#allocation74_spill]]  ;;  %s9626_s4 = scalar_lea.vmem %s209_s23, 128 }
 0x112   :  { %p9627_p6 = scmp.ne.s32.totalorder %s209_s23, %s9626_s4  ;;  %p9631_p7 = scmp.lt.s32.totalorder %s209_s23, %s209_s23 }
 0x113   :  { %p9632_p8 = scmp.lt.s32.totalorder %s9626_s4, %s9626_s4 }
 0x115   :  { %p9633_p9 = por %p9632_p8, %p9631_p7 }
 0x117   :  { %191 = dma.hbm_to_vmem [thread:$0]  %s11020_s26, 4096, %s186_s18, [#allocation12], %s9977_s21, %s9977_s21, %s9978_s2  }
 0x118   :  { %p9634_p10 = pnand %p9633_p9, %p9627_p6 }
 0x11a   :  { %9637 = shalt.err (!%p9634_p10)
}
 0x11b   :  { %s11021_s28 = sld [smem:[#allocation75_spill]]  ;;  %s9998_s1 = smov [#allocation19]  }
 0x11c   :  { %s227_s29 = sshll.u32 %s9998_s1, 4  ;;  %s9999_s12 = smov [#allocation22]   ;;  %s228_s29 = int_to_ptr.vmem [resolvable:$true] %s227_s29 }
 0x11d   :  { %s251_s6 = sshll.u32 %s9999_s12, 4  ;;  %s9646_s20 = scalar_lea.vmem %s228_s29, 16384  ;;  %s252_s6 = int_to_ptr.vmem [resolvable:$true] %s251_s6 }
 0x11e   :  { %p9647_p11 = scmp.ne.s32.totalorder %s228_s29, %s9646_s20  ;;  %p9651_p12 = scmp.lt.s32.totalorder %s228_s29, %s228_s29 }
 0x11f   :  { %p9652_p13 = scmp.lt.s32.totalorder %s9646_s20, %s9646_s20 }
 0x121   :  { %211 = dma.hbm_to_vmem [thread:$0]  %s11021_s28, 128, %s209_s23, [#allocation15]  }
 0x122   :  { %p9653_p0 = por %p9652_p13, %p9651_p12 }
 0x124   :  { %p9654_p1 = pnand %p9653_p0, %p9647_p11 }
 0x126   :  { %9657 = shalt.err (!%p9654_p1)
}
 0x127   :  { %s11022_s27 = sld [smem:[#allocation76_spill]]  ;;  %s9666_s7 = scalar_lea.vmem %s252_s6, 16384 }
 0x128   :  { %p9667_p2 = scmp.ne.s32.totalorder %s252_s6, %s9666_s7  ;;  %p9671_p3 = scmp.lt.s32.totalorder %s252_s6, %s252_s6 }
 0x129   :  { %p9672_p4 = scmp.lt.s32.totalorder %s9666_s7, %s9666_s7 }
 0x12b   :  { %p9673_p5 = por %p9672_p4, %p9671_p3 }
 0x12d   :  { %233 = dma.hbm_to_vmem [thread:$0]  %s11022_s27, 16384, %s228_s29, [#allocation18], %s9982_s19, %s9982_s19, %s9983_s22  }
 0x12e   :  { %p9674_p6 = pnand %p9673_p5, %p9667_p2 }
 0x130   :  { %9677 = shalt.err (!%p9674_p6)
}
 0x131   :  { %s11023_s0 = sld [smem:[#allocation77_spill]]  ;;  %s10000_s10 = smov [#allocation25]  }
 0x132   :  { %s275_s8 = sshll.u32 %s10000_s10, 4  ;;  %s10001_s14 = smov [#allocation28]   ;;  %s276_s8 = int_to_ptr.vmem [resolvable:$true] %s275_s8 }
 0x133   :  { %s298_s5 = sshll.u32 %s10001_s14, 4  ;;  %s9686_s15 = scalar_lea.vmem %s276_s8, 16384  ;;  %s299_s5 = int_to_ptr.vmem [resolvable:$true] %s298_s5 }
 0x134   :  { %p9687_p7 = scmp.ne.s32.totalorder %s276_s8, %s9686_s15  ;;  %p9691_p8 = scmp.lt.s32.totalorder %s276_s8, %s276_s8 }
 0x135   :  { %p9692_p9 = scmp.lt.s32.totalorder %s9686_s15, %s9686_s15 }
 0x137   :  { %257 = dma.hbm_to_vmem [thread:$0]  %s11023_s0, 16384, %s252_s6, [#allocation21], %s9977_s21, %s9977_s21, %s9978_s2  }
 0x138   :  { %p9693_p10 = por %p9692_p9, %p9691_p8 }
 0x13a   :  { %p9694_p11 = pnand %p9693_p10, %p9687_p7 }
 0x13c   :  { %9697 = shalt.err (!%p9694_p11)
}
 0x13d   :  { %s11024_s16 = sld [smem:[#allocation78_spill]]  ;;  %s9706_s18 = scalar_lea.vmem %s299_s5, 64 }
 0x13e   :  { %p9707_p12 = scmp.ne.s32.totalorder %s299_s5, %s9706_s18  ;;  %p9711_p13 = scmp.lt.s32.totalorder %s299_s5, %s299_s5 }
 0x13f   :  { %p9712_p0 = scmp.lt.s32.totalorder %s9706_s18, %s9706_s18 }
 0x141   :  { %p9713_p1 = por %p9712_p0, %p9711_p13 }
 0x143   :  { %281 = dma.hbm_to_vmem [thread:$0]  %s11024_s16, 16384, %s276_s8, [#allocation24], %s9977_s21, %s9977_s21, %s9978_s2  }
 0x144   :  { %p9714_p2 = pnand %p9713_p1, %p9707_p12 }
 0x146   :  { %9717 = shalt.err (!%p9714_p2)
}
 0x147   :  { %s11025_s30 = sld [smem:[#allocation79_spill]]  ;;  %s10002_s23 = smov [#allocation31]  }
 0x148   :  { %s319_s9 = sshll.u32 %s10002_s23, 4  ;;  %s10003_s26 = smov [#allocation34]   ;;  %s320_s9 = int_to_ptr.vmem [resolvable:$true] %s319_s9 }
 0x149   :  { %s344_s4 = sshll.u32 %s10003_s26, 4  ;;  %s9726_s28 = scalar_lea.vmem %s320_s9, 16384  ;;  %s345_s4 = int_to_ptr.vmem [resolvable:$true] %s344_s4 }
 0x14a   :  { %p9727_p3 = scmp.ne.s32.totalorder %s320_s9, %s9726_s28  ;;  %p9731_p4 = scmp.lt.s32.totalorder %s320_s9, %s320_s9 }
 0x14b   :  { %p9732_p5 = scmp.lt.s32.totalorder %s9726_s28, %s9726_s28 }
 0x14d   :  { %301 = dma.hbm_to_vmem [thread:$0]  %s11025_s30, 64, %s299_s5, [#allocation27]  }
 0x14e   :  { %p9733_p6 = por %p9732_p5, %p9731_p4 }
 0x150   :  { %p9734_p7 = pnand %p9733_p6, %p9727_p3 }
 0x152   :  { %9737 = shalt.err (!%p9734_p7)
}
 0x153   :  { %s11026_s21 = sld [smem:[#allocation81_spill]]  ;;  %s9746_s2 = scalar_lea.vmem %s345_s4, 16 }
 0x154   :  { %p9747_p8 = scmp.ne.s32.totalorder %s345_s4, %s9746_s2  ;;  %s9750_s1 = scalar_lea.vmem %s345_s4, 32 }
 0x155   :  { %p9751_p9 = scmp.lt.s32.totalorder %s345_s4, %s345_s4  ;;  %p9752_p10 = scmp.lt.s32.totalorder %s9750_s1, %s9746_s2 }
 0x157   :  { %p9753_p11 = por %p9752_p10, %p9751_p9 }
 0x159   :  { %325 = dma.hbm_to_vmem [thread:$0]  %s11026_s21, 16384, %s320_s9, [#allocation30], %s9982_s19, %s9982_s19, %s9983_s22  }
 0x15a   :  { %p9754_p12 = pnand %p9753_p11, %p9747_p8 }
 0x15c   :  { %9757 = shalt.err (!%p9754_p12)
}
 0x15d   :  { %s11027_s29 = sld [smem:[#allocation82_spill]]  ;;  %s10004_s12 = smov [#allocation37]  }
 0x15e   :  { %s367_s6 = sshll.u32 %s10004_s12, 4  ;;  %s10005_s20 = smov [#allocation40]   ;;  %s368_s6 = int_to_ptr.vmem [resolvable:$true] %s367_s6 }
 0x15f   :  { %s389_s27 = sshll.u32 %s10005_s20, 4  ;;  %s9766_s7 = scalar_lea.vmem %s368_s6, 8192  ;;  %s390_s27 = int_to_ptr.vmem [resolvable:$true] %s389_s27 }
 0x160   :  { %p9767_p13 = scmp.ne.s32.totalorder %s368_s6, %s9766_s7  ;;  %p9771_p0 = scmp.lt.s32.totalorder %s368_s6, %s368_s6 }
 0x161   :  { %p9772_p1 = scmp.lt.s32.totalorder %s9766_s7, %s9766_s7 }
 0x163   :  { %347 = dma.hbm_to_vmem [thread:$0]  %s11027_s29, 16, %s345_s4, [#allocation33]  }
 0x164   :  { %p9773_p2 = por %p9772_p1, %p9771_p0 }
 0x166   :  { %p9774_p3 = pnand %p9773_p2, %p9767_p13 }
 0x168   :  { %9777 = shalt.err (!%p9774_p3)
}
 0x169   :  { %s11028_s0 = sld [smem:[#allocation84_spill]]  ;;  %s9786_s10 = scalar_lea.vmem %s390_s27, 4096 }
 0x16a   :  { %p9787_p4 = scmp.ne.s32.totalorder %s390_s27, %s9786_s10  ;;  %p9791_p5 = scmp.lt.s32.totalorder %s390_s27, %s390_s27 }
 0x16b   :  { %p9792_p6 = scmp.lt.s32.totalorder %s9786_s10, %s9786_s10 }
 0x16d   :  { %p9793_p7 = por %p9792_p6, %p9791_p5 }
 0x16f   :  { %373 = dma.hbm_to_vmem [thread:$0]  %s11028_s0, 8192, %s368_s6, [#allocation36], %s9988_s13, %s9988_s13, %s9989_s11  }
 0x170   :  { %p9794_p8 = pnand %p9793_p7, %p9787_p4 }
 0x172   :  { %9797 = shalt.err (!%p9794_p8)
}
 0x173   :  { %s11029_s8 = sld [smem:[#allocation85_spill]]  ;;  %s10006_s14 = smov [#allocation43]  }
 0x174   :  { %s413_s5 = sshll.u32 %s10006_s14, 4  ;;  %s10007_s15 = smov [#allocation46]   ;;  %s414_s5 = int_to_ptr.vmem [resolvable:$true] %s413_s5 }
 0x175   :  { %s445_s16 = sshll.u32 %s10007_s15, 4  ;;  %s9806_s18 = scalar_lea.vmem %s414_s5, 4096  ;;  %s446_s16 = int_to_ptr.vmem [resolvable:$true] %s445_s16 }
 0x176   :  { %p9807_p9 = scmp.ne.s32.totalorder %s414_s5, %s9806_s18  ;;  %p9811_p10 = scmp.lt.s32.totalorder %s414_s5, %s414_s5 }
 0x177   :  { %p9812_p11 = scmp.lt.s32.totalorder %s9806_s18, %s9806_s18 }
 0x179   :  { %395 = dma.hbm_to_vmem [thread:$0]  %s11029_s8, 4096, %s390_s27, [#allocation39], %s9982_s19, %s9982_s19, %s9983_s22  }
 0x17a   :  { %p9813_p12 = por %p9812_p11, %p9811_p10 }
 0x17c   :  { %p9814_p13 = pnand %p9813_p12, %p9807_p9 }
 0x17e   :  { %9817 = shalt.err (!%p9814_p13)
}
 0x17f   :  { %s11030_s13 = sld [smem:[#allocation86_spill]]  ;;  %s9826_s11 = scalar_lea.vmem %s446_s16, 9216 }
 0x180   :  { %p9827_p0 = scmp.ne.s32.totalorder %s446_s16, %s9826_s11  ;;  %p9831_p1 = scmp.lt.s32.totalorder %s446_s16, %s446_s16 }
 0x181   :  { %p9832_p2 = scmp.lt.s32.totalorder %s9826_s11, %s9826_s11 }
 0x183   :  { %p9833_p3 = por %p9832_p2, %p9831_p1 }
 0x185   :  { %419 = dma.hbm_to_vmem [thread:$0]  %s11030_s13, 4096, %s414_s5, [#allocation42], %s9982_s19, %s9982_s19, %s9983_s22  }
 0x186   :  { %p9834_p4 = pnand %p9833_p3, %p9827_p0 }
 0x188   :  { %9837 = shalt.err (!%p9834_p4)
}
 0x189   :  { %s10008_s30 = smov 384   ;;  %s11031_s23 = sld [smem:[#allocation91_spill]] }
 0x18a   :  { %s10009_s9 = smov 24  }
 0x18f   :  { %451 = dma.hbm_to_vmem [thread:$0]  %s11031_s23, 9216, %s446_s16, [#allocation45], %s10008_s30, %s10008_s30, %s10009_s9  }
 0x190   :  { %9898 = dma.done.wait [#allocation3], 512  }
 0x191   :  { %9899 = vsyncadd [#allocation3], 4294966784 }
 0x192   :  { %9900 = dma.done.wait [#allocation6], 4128  }
 0x193   :  { %9901 = vsyncadd [#allocation6], 4294963168 }
 0x194   :  { %9902 = dma.done.wait [#allocation9], 4112  }
 0x195   :  { %9903 = vsyncadd [#allocation9], 4294963184 }
 0x196   :  { %9904 = dma.done.wait [#allocation12], 8192  }
 0x197   :  { %9905 = vsyncadd [#allocation12], 4294959104 }
 0x198   :  { %9906 = dma.done.wait [#allocation15], 192  }
 0x199   :  { %9907 = vsyncadd [#allocation15], 4294967104 }
 0x19a   :  { %9908 = dma.done.wait [#allocation18], 16512  }
 0x19b   :  { %9909 = vsyncadd [#allocation18], 4294950784 }
 0x19c   :  { %9910 = dma.done.wait [#allocation21], 32768  }
 0x19d   :  { %9911 = vsyncadd [#allocation21], 4294934528 }
 0x19e   :  { %9912 = dma.done.wait [#allocation24], 32768  }
 0x19f   :  { %9913 = vsyncadd [#allocation24], 4294934528 }
 0x1a0   :  { %9914 = dma.done.wait [#allocation27], 128  }
 0x1a1   :  { %9915 = vsyncadd [#allocation27], 4294967168 }
 0x1a2   :  { %9916 = dma.done.wait [#allocation30], 16448  }
 0x1a3   :  { %9917 = vsyncadd [#allocation30], 4294950848 }
 0x1a4   :  { %9918 = dma.done.wait [#allocation33], 16400  }
 0x1a5   :  { %9919 = vsyncadd [#allocation33], 4294950896 }
 0x1a6   :  { %9920 = dma.done.wait [#allocation36], 10240  }
 0x1a7   :  { %9921 = vsyncadd [#allocation36], 4294957056 }
 0x1a8   :  { %9922 = dma.done.wait [#allocation39], 4112  }
 0x1a9   :  { %9923 = vsyncadd [#allocation39], 4294963184 }
 0x1aa   :  { %9924 = dma.done.wait [#allocation42], 8192  }
 0x1ab   :  { %9925 = vsyncadd [#allocation42], 4294959104 }
 0x1ac   :  { %9926 = dma.done.wait [#allocation45], 13312  }
 0x1ad   :  { %9927 = vsyncadd [#allocation45], 4294953984  ;;  %s11032_s19 = sld [smem:[#allocation68_spill]]  ;;  %v10010_v0 = vmov 0.0   ;;  %v545_v1 = vld [vmem:[#allocation2 + $0x18] sm:$0xff]  ;;  %v544_v2 = vld [vmem:[#allocation2 + $0x10] sm:$0xff] }
 0x1ae   :  { %626 = vmatprep.mubr.f32.mxu0 %v10010_v0  ;;  %v543_v3 = vld [vmem:[#allocation2 + $0x8] sm:$0xff]  ;;  %590 = vmatprep.subr.mxu0 %v545_v1  ;;  %v542_v4 = vld [vmem:[#allocation2] sm:$0xff]  ;;  %vm558_vm0 = vcmask 130048   ;;  %s11033_s22 = sld [smem:[#allocation69_spill]]  ;;  %v665_v15 = vld [vmem:[#allocation7 + $0xf0] sm:$0xff]  ;;  %vm783_vm1 = vcmask 261120  }
 0x1af   :  { %591 = vmatpush1.msra.mxu0 %v544_v2  ;;  %v758_v6 = vld [vmem:[#allocation35 + $0x68] sm:$0xff]  ;;  %v757_v7 = vld [vmem:[#allocation35 + $0x60] sm:$0xff]  ;;  %v666_v12 = vld [vmem:[#allocation7 + $0xf8] sm:$0xff]  ;;  %s11034_s26 = sld [smem:[#allocation83_spill]]  ;;  %vm2148_vm2 = vcmask 1040384   ;;  %vm2160_vm3 = vcmask 523264  }
 0x1b0   :  { %592 = vmatprep.subr.mxu0 %v543_v3  ;;  %v754_v8 = vld [vmem:[#allocation35 + $0x48] sm:$0xff]  ;;  %v753_v9 = vld [vmem:[#allocation35 + $0x40] sm:$0xff]  ;;  %v650_v13 = vld [vmem:[#allocation7 + $0x78] sm:$0xff]  ;;  %7888 = vmatprep.subr.mxu1 %v666_v12  ;;  %s11035_s4 = sld [smem:[#allocation70_spill]]  ;;  %vm2154_vm4 = vcmask 1046528   ;;  %vm3735_vm6 = vcmask 64512  }
 0x1b1   :  { %593 = vmatpush1.msra.mxu0 %v542_v4  ;;  %v750_v10 = vld [vmem:[#allocation35 + $0x28] sm:$0xff]  ;;  %v749_v11 = vld [vmem:[#allocation35 + $0x20] sm:$0xff]  ;;  %7889 = vmatpush3.msra.mxu1 %v650_v13  ;;  %v760_v20 = vld [vmem:[#allocation35 + $0x78] sm:$0xff]  ;;  %s11038_s28 = sld [smem:[#allocation80_spill]]  ;;  %vm7675_vm7 = vcmask 1041408   ;;  %s10012_s6 = smov [#allocation50]  }
 0x1b2   :  { %811 = vmatprep.subr.mxu0 %v758_v6  ;;  %v746_v14 = vld [vmem:[#allocation35 + $0x8] sm:$0xff]  ;;  %v745_v17 = vld [vmem:[#allocation35] sm:$0xff]  ;;  %7890 = vmatprep.subr.mxu1 %v665_v15  ;;  %v759_v21 = vld [vmem:[#allocation35 + $0x70] sm:$0xff]  ;;  %s11039_s21 = sld [smem:[#allocation89_spill]]  ;;  %s7738_s20 = sshll.u32 %s10012_s6, 4  ;;  %s7739_s20 = int_to_ptr.vmem [resolvable:$true] %s7738_s20 }
 0x1b3   :  { %v541_v5 = vld [vmem:[%s11032_s19] sm:$0x3]  ;;  %v649_v16 = vld [vmem:[#allocation7 + $0x70] sm:$0xff]  ;;  %v664_v18 = vld [vmem:[#allocation7 + $0xe8] sm:$0xff]  ;;  %s11040_s2 = sld [smem:[#allocation87_spill]]  ;;  %s10013_s27 = smov [#allocation47]  }
 0x1b4   :  { %7809 = vmatmul.mubr.msk.f32.vlgmr.msra.gmra.mxu0 %vm558_vm0, %v541_v5  ;;  %v744_v19 = vld [vmem:[%s11033_s22] sm:$0x3]  ;;  %7891 = vmatpush3.msra.mxu1 %v649_v16  ;;  %v648_v23 = vld [vmem:[#allocation7 + $0x68] sm:$0xff]  ;;  %v755_v24 = vld [vmem:[#allocation35 + $0x50] sm:$0xff]  ;;  %s11041_s1 = sld [smem:[#allocation88_spill]]  ;;  %s7718_s7 = sshll.u32 %s10013_s27, 4  ;;  %s7719_s7 = int_to_ptr.vmem [resolvable:$true] %s7718_s7 }
 0x1b5   :  { %812 = vmatpush1.msra.mxu0 %v757_v7  ;;  %851 = vmatprep.mubr.f32.mxu0 %v10010_v0  ;;  %v756_v22 = vld [vmem:[#allocation35 + $0x58] sm:$0xff]  ;;  %v751_v28 = vld [vmem:[#allocation35 + $0x30] sm:$0xff]  ;;  %v660_v35 = vld [vmem:[#allocation7 + $0xc8] sm:$0xff]  ;;  %s11042_s29 = sld [smem:[#allocation90_spill]] }
 0x1b6   :  { %813 = vmatprep.subr.mxu0 %v754_v8  ;;  %7892 = vmatprep.subr.mxu1 %v664_v18  ;;  %v663_v25 = vld [vmem:[#allocation7 + $0xe0] sm:$0xff]  ;;  %v662_v29 = vld [vmem:[#allocation7 + $0xd8] sm:$0xff]  ;;  %v661_v33 = vld [vmem:[#allocation7 + $0xd0] sm:$0xff] }
 0x1b7   :  { %814 = vmatpush1.msra.mxu0 %v753_v9  ;;  %v752_v26 = vld [vmem:[#allocation35 + $0x38] sm:$0xff]  ;;  %7893 = vmatpush3.msra.mxu1 %v648_v23  ;;  %v747_v32 = vld [vmem:[#allocation35 + $0x10] sm:$0xff]  ;;  %v644_v37 = vld [vmem:[#allocation7 + $0x48] sm:$0xff] }
 0x1b8   :  { %815 = vmatprep.subr.mxu0 %v750_v10  ;;  %v647_v27 = vld [vmem:[#allocation7 + $0x60] sm:$0xff]  ;;  %7894 = vmatprep.subr.mxu1 %v663_v25  ;;  %v646_v31 = vld [vmem:[#allocation7 + $0x58] sm:$0xff]  ;;  %v645_v34 = vld [vmem:[#allocation7 + $0x50] sm:$0xff] }
 0x1b9   :  { %816 = vmatpush1.msra.mxu0 %v749_v11  ;;  %v748_v30 = vld [vmem:[#allocation35 + $0x18] sm:$0xff]  ;;  %7895 = vmatpush3.msra.mxu1 %v647_v27  ;;  %v963_v40 = vld [vmem:[#allocation37 + $0xf0] sm:$0xff]  ;;  %v962_v44 = vld [vmem:[#allocation37 + $0xe8] sm:$0xff] }
 0x1ba   :  { %817 = vmatprep.subr.mxu0 %v746_v14  ;;  %7896 = vmatprep.subr.mxu1 %v662_v29  ;;  %v964_v36 = vld [vmem:[#allocation37 + $0xf8] sm:$0xff]  ;;  %v947_v42 = vld [vmem:[#allocation37 + $0x70] sm:$0xff]  ;;  %v946_v46 = vld [vmem:[#allocation37 + $0x68] sm:$0xff] }
 0x1bb   :  { %818 = vmatpush1.msra.mxu0 %v745_v17  ;;  %7897 = vmatpush3.msra.mxu1 %v646_v31  ;;  %v948_v38 = vld [vmem:[#allocation37 + $0x78] sm:$0xff]  ;;  %v657_v47 = vld [vmem:[#allocation7 + $0xb0] sm:$0xff]  ;;  %v961_v48 = vld [vmem:[#allocation37 + $0xe0] sm:$0xff] }
 0x1bc   :  { %7811 = vmatmul.mubr.msk.f32.vlgmr.msra.gmra.mxu0 %vm783_vm1, %v744_v19  ;;  %882 = vmatprep.subr.mxu0 %v760_v20  ;;  %v659_v39 = vld [vmem:[#allocation7 + $0xc0] sm:$0xff]  ;;  %v658_v43 = vld [vmem:[#allocation7 + $0xb8] sm:$0xff]  ;;  %v641_v49 = vld [vmem:[#allocation7 + $0x30] sm:$0xff] }
 0x1bd   :  { %883 = vmatpush1.msra.mxu0 %v759_v21  ;;  %922 = vmatprep.mubr.f32.mxu0 %v10010_v0  ;;  %v643_v41 = vld [vmem:[#allocation7 + $0x40] sm:$0xff]  ;;  %v642_v45 = vld [vmem:[#allocation7 + $0x38] sm:$0xff]  ;;  %v656_v50 = vld [vmem:[#allocation7 + $0xa8] sm:$0xff] }
 0x1be   :  { %884 = vmatprep.subr.mxu0 %v756_v22  ;;  %7898 = vmatprep.subr.mxu1 %v661_v33  ;;  %v640_v51 = vld [vmem:[#allocation7 + $0x28] sm:$0xff]  ;;  %v655_v52 = vld [vmem:[#allocation7 + $0xa0] sm:$0xff]  ;;  %v654_v54 = vld [vmem:[#allocation7 + $0x98] sm:$0xff] }
 0x1bf   :  { %885 = vmatpush1.msra.mxu0 %v755_v24  ;;  %7899 = vmatpush3.msra.mxu1 %v645_v34  ;;  %v639_v53 = vld [vmem:[#allocation7 + $0x20] sm:$0xff]  ;;  %v638_v55 = vld [vmem:[#allocation7 + $0x18] sm:$0xff]  ;;  %v653_v57 = vld [vmem:[#allocation7 + $0x90] sm:$0xff] }
 0x1c0   :  { %886 = vmatprep.subr.mxu0 %v752_v26  ;;  %7900 = vmatprep.subr.mxu1 %v660_v35  ;;  %v945_v56 = vld [vmem:[#allocation37 + $0x60] sm:$0xff]  ;;  %v960_v58 = vld [vmem:[#allocation37 + $0xd8] sm:$0xff]  ;;  %v637_v59 = vld [vmem:[#allocation7 + $0x10] sm:$0xff]  ;;  %v548_v26 = vlaneseq }
 0x1c1   :  { %887 = vmatpush1.msra.mxu0 %v751_v28  ;;  %7901 = vmatpush3.msra.mxu1 %v644_v37  ;;  %v944_v60 = vld [vmem:[#allocation37 + $0x58] sm:$0xff]  ;;  %v652_v61 = vld [vmem:[#allocation7 + $0x88] sm:$0xff]  ;;  %v959_v62 = vld [vmem:[#allocation37 + $0xd0] sm:$0xff] }
 0x1c2   :  { %888 = vmatprep.subr.mxu0 %v748_v30  ;;  %7902 = vmatprep.subr.mxu1 %v659_v39  ;;  %v636_v63 = vld [vmem:[#allocation7 + $0x8] sm:$0xff]  ;;  %v943_v1 = vld [vmem:[#allocation37 + $0x50] sm:$0xff]  ;;  %v651_v2 = vld [vmem:[#allocation7 + $0x80] sm:$0xff]  ;;  %v10320_v27 = vshrl.u32 %v548_v26, 7 }
 0x1c3   :  { %889 = vmatpush1.msra.mxu0 %v747_v32  ;;  %7903 = vmatpush3.msra.mxu1 %v643_v41  ;;  %v958_v3 = vld [vmem:[#allocation37 + $0xc8] sm:$0xff]  ;;  %v635_v4 = vld [vmem:[#allocation7] sm:$0xff]  ;;  %v955_v11 = vld [vmem:[#allocation37 + $0xb0] sm:$0xff] }
 0x1c4   :  { %7812 = vmatmul.mubr.msk.f32.vlgmr.msra.gmra.mxu0 %vm783_vm1, %v744_v19  ;;  %7923 = vmatprep.subr.mxu0 %v964_v36  ;;  %v942_v5 = vld [vmem:[#allocation37 + $0x48] sm:$0xff]  ;;  %v957_v6 = vld [vmem:[#allocation37 + $0xc0] sm:$0xff]  ;;  %v996_v7 = vld [vmem:[#allocation37 + $0x1f8] sm:$0xff]  ;;  %v10323_v28 = vsub.s32 0, %v10320_v27  ;;  %v10326_v30 = vsub.s32 1, %v10320_v27 }
 0x1c5   :  { %7924 = vmatpush3.msra.mxu0 %v948_v38  ;;  %7904 = vmatprep.subr.mxu1 %v658_v43  ;;  %v941_v8 = vld [vmem:[#allocation37 + $0x40] sm:$0xff]  ;;  %v956_v9 = vld [vmem:[#allocation37 + $0xb8] sm:$0xff]  ;;  %v939_v12 = vld [vmem:[#allocation37 + $0x30] sm:$0xff] }
 0x1c6   :  { %7925 = vmatprep.subr.mxu0 %v963_v40  ;;  %7905 = vmatpush3.msra.mxu1 %v642_v45  ;;  %v940_v10 = vld [vmem:[#allocation37 + $0x38] sm:$0xff]  ;;  %v954_v13 = vld [vmem:[#allocation37 + $0xa8] sm:$0xff]  ;;  %v953_v15 = vld [vmem:[#allocation37 + $0xa0] sm:$0xff] }
 0x1c7   :  { %7926 = vmatpush3.msra.mxu0 %v947_v42  ;;  %7906 = vmatprep.subr.mxu1 %v657_v47  ;;  %v938_v14 = vld [vmem:[#allocation37 + $0x28] sm:$0xff]  ;;  %v937_v16 = vld [vmem:[#allocation37 + $0x20] sm:$0xff]  ;;  %v952_v17 = vld [vmem:[#allocation37 + $0x98] sm:$0xff] }
 0x1c8   :  { %7927 = vmatprep.subr.mxu0 %v962_v44  ;;  %7907 = vmatpush3.msra.mxu1 %v641_v49  ;;  %v936_v18 = vld [vmem:[#allocation37 + $0x18] sm:$0xff]  ;;  %v951_v19 = vld [vmem:[#allocation37 + $0x90] sm:$0xff]  ;;  %v950_v21 = vld [vmem:[#allocation37 + $0x88] sm:$0xff] }
 0x1c9   :  { %7928 = vmatpush3.msra.mxu0 %v946_v46  ;;  %7908 = vmatprep.subr.mxu1 %v656_v50  ;;  %v935_v20 = vld [vmem:[#allocation37 + $0x10] sm:$0xff]  ;;  %v934_v22 = vld [vmem:[#allocation37 + $0x8] sm:$0xff]  ;;  %v949_v23 = vld [vmem:[#allocation37 + $0x80] sm:$0xff] }
 0x1ca   :  { %7929 = vmatprep.subr.mxu0 %v961_v48  ;;  %7909 = vmatpush3.msra.mxu1 %v640_v51  ;;  %v933_v24 = vld [vmem:[#allocation37] sm:$0xff]  ;;  %v546_v29 = vld [vmem:[#allocation5] sm:$0x3]  ;;  %v995_v42 = vld [vmem:[#allocation37 + $0x1f0] sm:$0xff] }
 0x1cb   :  { %7910 = vmatprep.subr.mxu1 %v655_v52  ;;  %7930 = vmatpush3.msra.mxu0 %v945_v56  ;;  %v1173_v25 = vld [vmem:[#allocation10 + $0xe8] sm:$0xff]  ;;  %v551_v31 = vrot.slane %v546_v29, %v10323_v28  ;;  %v555_v32 = vrot.slane %v546_v29, %v10326_v30  ;;  %v10331_v36 = vld [vmem:[%s11034_s26] sm:$0xf]  ;;  %v979_v44 = vld [vmem:[#allocation37 + $0x170] sm:$0xff] }
 0x1cc   :  { %7911 = vmatpush3.msra.mxu1 %v639_v53  ;;  %7931 = vmatprep.subr.mxu0 %v960_v58  ;;  %v766_v39 = vrot.slane %v10331_v36, %v10323_v28  ;;  %v980_v41 = vld [vmem:[#allocation37 + $0x178] sm:$0xff]  ;;  %v770_v43 = vrot.slane %v10331_v36, %v10326_v30  ;;  %v994_v46 = vld [vmem:[#allocation37 + $0x1e8] sm:$0xff]  ;;  %v993_v50 = vld [vmem:[#allocation37 + $0x1e0] sm:$0xff] }
 0x1cd   :  { %7912 = vmatprep.subr.mxu1 %v654_v54  ;;  %7932 = vmatpush3.msra.mxu0 %v944_v60  ;;  %v978_v48 = vld [vmem:[#allocation37 + $0x168] sm:$0xff]  ;;  %v977_v52 = vld [vmem:[#allocation37 + $0x160] sm:$0xff]  ;;  %v10338_v54 = vsub.s32 3, %v10320_v27  ;;  %vm10460_vm5 = vmneg %vm2148_vm2 }
 0x1ce   :  { %7913 = vmatpush3.msra.mxu1 %v638_v55  ;;  %7933 = vmatprep.subr.mxu0 %v959_v62  ;;  %v992_v55 = vld [vmem:[#allocation37 + $0x1d8] sm:$0xff]  ;;  %v1169_v60 = vld [vmem:[#allocation10 + $0xc8] sm:$0xff] }
 0x1cf   :  { %7914 = vmatprep.subr.mxu1 %v653_v57  ;;  %7934 = vmatpush3.msra.mxu0 %v943_v1  ;;  %v976_v57 = vld [vmem:[#allocation37 + $0x158] sm:$0xff]  ;;  %v778_v1 = vrot.slane %v10331_v36, %v10338_v54  ;;  %v985_v26 = vld [vmem:[#allocation37 + $0x1a0] sm:$0xff] }
 0x1d0   :  { %7915 = vmatpush3.msra.mxu1 %v637_v59  ;;  %7935 = vmatprep.subr.mxu0 %v958_v3  ;;  %v1172_v58 = vld [vmem:[#allocation10 + $0xe0] sm:$0xff]  ;;  %v991_v59 = vld [vmem:[#allocation37 + $0x1d0] sm:$0xff]  ;;  %v1165_v3 = vld [vmem:[#allocation10 + $0xa8] sm:$0xff] }
 0x1d1   :  { %7916 = vmatprep.subr.mxu1 %v652_v61  ;;  %7936 = vmatpush3.msra.mxu0 %v942_v5  ;;  %v975_v61 = vld [vmem:[#allocation37 + $0x150] sm:$0xff]  ;;  %v1168_v62 = vld [vmem:[#allocation10 + $0xc0] sm:$0xff] }
 0x1d2   :  { %7917 = vmatpush3.msra.mxu1 %v636_v63  ;;  %7937 = vmatprep.subr.mxu0 %v957_v6  ;;  %v1164_v5 = vld [vmem:[#allocation10 + $0xa0] sm:$0xff] }
 0x1d3   :  { %7918 = vmatprep.subr.mxu1 %v651_v2  ;;  %7938 = vmatpush3.msra.mxu0 %v941_v8  ;;  %v990_v2 = vld [vmem:[#allocation37 + $0x1c8] sm:$0xff]  ;;  %v1148_v29 = vld [vmem:[#allocation10 + $0x20] sm:$0xff] }
 0x1d4   :  { %7919 = vmatpush3.msra.mxu1 %v635_v4  ;;  %7939 = vmatprep.subr.mxu0 %v956_v9  ;;  %v974_v4 = vld [vmem:[#allocation37 + $0x148] sm:$0xff]  ;;  %v973_v9 = vld [vmem:[#allocation37 + $0x140] sm:$0xff] }
 0x1d5   :  { %7958 = vmatprep.subr.mxu1 %v996_v7  ;;  %7940 = vmatpush3.msra.mxu0 %v940_v10  ;;  %v989_v7 = vld [vmem:[#allocation37 + $0x1c0] sm:$0xff] }
 0x1d6   :  { %7941 = vmatprep.subr.mxu0 %v955_v11  ;;  %v1161_v8 = vld [vmem:[#allocation10 + $0x88] sm:$0xff]  ;;  %v1160_v11 = vld [vmem:[#allocation10 + $0x80] sm:$0xff] }
 0x1d7   :  { %7942 = vmatpush3.msra.mxu0 %v939_v12  ;;  %v988_v12 = vld [vmem:[#allocation37 + $0x1b8] sm:$0xff] }
 0x1d8   :  { %7943 = vmatprep.subr.mxu0 %v954_v13  ;;  %v1157_v13 = vld [vmem:[#allocation10 + $0x68] sm:$0xff] }
 0x1d9   :  { %7944 = vmatpush3.msra.mxu0 %v938_v14  ;;  %v972_v14 = vld [vmem:[#allocation37 + $0x138] sm:$0xff] }
 0x1da   :  { %7945 = vmatprep.subr.mxu0 %v953_v15  ;;  %v1156_v15 = vld [vmem:[#allocation10 + $0x60] sm:$0xff] }
 0x1db   :  { %7946 = vmatpush3.msra.mxu0 %v937_v16  ;;  %v987_v16 = vld [vmem:[#allocation37 + $0x1b0] sm:$0xff] }
 0x1dc   :  { %7947 = vmatprep.subr.mxu0 %v952_v17  ;;  %v1153_v17 = vld [vmem:[#allocation10 + $0x48] sm:$0xff] }
 0x1dd   :  { %7948 = vmatpush3.msra.mxu0 %v936_v18  ;;  %v971_v18 = vld [vmem:[#allocation37 + $0x130] sm:$0xff] }
 0x1de   :  { %7949 = vmatprep.subr.mxu0 %v951_v19 }
 0x1df   :  { %7950 = vmatpush3.msra.mxu0 %v935_v20  ;;  %v1152_v20 = vld [vmem:[#allocation10 + $0x40] sm:$0xff] }
 0x1e0   :  { %7951 = vmatprep.subr.mxu0 %v950_v21  ;;  %v986_v21 = vld [vmem:[#allocation37 + $0x1a8] sm:$0xff] }
 0x1e1   :  { %7952 = vmatpush3.msra.mxu0 %v934_v22  ;;  %v10345_v22 = vld [vmem:[%s11035_s4] sm:$0xff] }
 0x1e2   :  { %7953 = vmatprep.subr.mxu0 %v949_v23  ;;  %v970_v23 = vld [vmem:[#allocation37 + $0x128] sm:$0xff] }
 0x1e3   :  { %7954 = vmatpush3.msra.mxu0 %v933_v24  ;;  %v10348_v24 = vsub.s32 2, %v10320_v27 }
 0x1e4   :  { %2340 = vmatprep.subr.mxu0 %v1173_v25  ;;  %v1149_v25 = vld [vmem:[#allocation10 + $0x28] sm:$0xff] }
 0x1e5   :  { %v774_v27 = vrot.slane %v10331_v36, %v10348_v24  ;;  %v1236_v36 = vld [vmem:[#allocation13 + $0xe0] sm:$0xff] }
 0x274   :  { %v628_v33 = vpop.f32.mrf.mxu0 }
 0x275   :  { %v629_v34 = vadd.f32 %v628_v33, %v551_v31  ;;  %v969_v31 = vld [vmem:[#allocation37 + $0x120] sm:$0xff]  ;;  %v2149_v33 = vrot.slane %v10345_v22, 7 }
 0x276   :  { %v630_v35 = vpop.f32.mrf.mxu0 }
 0x277   :  { %v631_v37 = vadd.f32 %v630_v35, %v555_v32  ;;  %v633_v40 = vmax.f32 %v629_v34, 0.0  ;;  %v1145_v32 = vld [vmem:[#allocation10 + $0x8] sm:$0xff]  ;;  %v984_v34 = vld [vmem:[#allocation37 + $0x198] sm:$0xff] }
 0x278   :  { %v1144_v35 = vld [vmem:[#allocation10] sm:$0xff] }
 0x279   :  { %v634_v38 = vmax.f32 %v631_v37, 0.0  ;;  %v968_v37 = vld [vmem:[#allocation37 + $0x118] sm:$0xff] }
 0x27b   :  { %738 = vmatprep.mubr.f32.mxu1 %v634_v38  ;;  %v983_v38 = vld [vmem:[#allocation37 + $0x190] sm:$0xff] }
 0x27c   :  { %739 = vmatmul.mubr.f32.vlgmr.msra.gmra.mxu1 %v633_v40  ;;  %v853_v45 = vpop.f32.mrf.mxu0  ;;  %v967_v40 = vld [vmem:[#allocation37 + $0x110] sm:$0xff] }
 0x27d   :  { %7959 = vmatpush3.msra.mxu1 %v980_v41  ;;  %v854_v47 = vadd.f32 %v853_v45, %v766_v39  ;;  %v1237_v39 = vld [vmem:[#allocation13 + $0xe8] sm:$0xff]  ;;  %v10356_v41 = vsel %vm2148_vm2, 0.0, %v2149_v33 }
 0x27e   :  { %7960 = vmatprep.subr.mxu1 %v995_v42  ;;  %v855_v49 = vpop.f32.mrf.mxu0  ;;  %v982_v42 = vld [vmem:[#allocation37 + $0x188] sm:$0xff] }
 0x27f   :  { %7961 = vmatpush3.msra.mxu1 %v979_v44  ;;  %v856_v51 = vadd.f32 %v855_v49, %v770_v43  ;;  %v929_v53 = vmax.f32 %v854_v47, 0.0  ;;  %v966_v44 = vld [vmem:[#allocation37 + $0x108] sm:$0xff]  ;;  %v1232_v47 = vld [vmem:[#allocation13 + $0xc0] sm:$0xff] }
 0x280   :  { %7962 = vmatprep.subr.mxu1 %v994_v46  ;;  %v1233_v45 = vld [vmem:[#allocation13 + $0xc8] sm:$0xff] }
 0x281   :  { %7963 = vmatpush3.msra.mxu1 %v978_v48  ;;  %v930_v56 = vmax.f32 %v856_v51, 0.0  ;;  %v981_v46 = vld [vmem:[#allocation37 + $0x180] sm:$0xff] }
 0x282   :  { %7964 = vmatprep.subr.mxu1 %v993_v50  ;;  %v965_v48 = vld [vmem:[#allocation37 + $0x100] sm:$0xff] }
 0x283   :  { %7965 = vmatpush3.msra.mxu1 %v977_v52  ;;  %1068 = vmatprep.mubr.f32.mxu0 %v930_v56  ;;  %v1229_v49 = vld [vmem:[#allocation13 + $0xa8] sm:$0xff]  ;;  %v1204_v52 = vld [vmem:[#allocation11 + $0xe0] sm:$0xff] }
 0x284   :  { %7966 = vmatprep.subr.mxu1 %v992_v55  ;;  %1069 = vmatmul.mubr.f32.vlgmr.msra.gmra.mxu0 %v929_v53  ;;  %v10340_v63 = vpop.f32.mrf.mxu0  ;;  %v1205_v50 = vld [vmem:[#allocation11 + $0xe8] sm:$0xff]  ;;  %v1228_v53 = vld [vmem:[#allocation13 + $0xa0] sm:$0xff] }
 0x285   :  { %7967 = vmatpush3.msra.mxu1 %v976_v57  ;;  %2341 = vmatpush1.msra.mxu0 %v1172_v58  ;;  %v925_v43 = vadd.f32 %v10340_v63, %v774_v27  ;;  %v1201_v55 = vld [vmem:[#allocation11 + $0xc8] sm:$0xff]  ;;  %v1200_v58 = vld [vmem:[#allocation11 + $0xc0] sm:$0xff]  ;;  %v1191_v27 = vld [vmem:[#allocation11 + $0x78] sm:$0xff] }
 0x286   :  { %7968 = vmatprep.subr.mxu1 %v991_v59  ;;  %2342 = vmatprep.subr.mxu0 %v1169_v60  ;;  %v926_v6 = vpop.f32.mrf.mxu0  ;;  %v1225_v56 = vld [vmem:[#allocation13 + $0x88] sm:$0xff]  ;;  %v1224_v59 = vld [vmem:[#allocation13 + $0x80] sm:$0xff] }
 0x287   :  { %7969 = vmatpush3.msra.mxu1 %v975_v61  ;;  %2343 = vmatpush1.msra.mxu0 %v1168_v62  ;;  %v927_v10 = vadd.f32 %v926_v6, %v778_v1  ;;  %v931_v51 = vmax.f32 %v925_v43, 0.0  ;;  %v10363_v57 = vld [vmem:[%s11035_s4 + $0x8] sm:$0xff]  ;;  %v1178_v43 = vld [vmem:[#allocation11 + $0x10] sm:$0xff] }
 0x288   :  { %7970 = vmatprep.subr.mxu1 %v990_v2  ;;  %2344 = vmatprep.subr.mxu0 %v1165_v3  ;;  %v1197_v60 = vld [vmem:[#allocation11 + $0xa8] sm:$0xff]  ;;  %v1196_v62 = vld [vmem:[#allocation11 + $0xa0] sm:$0xff]  ;;  %v2150_v1 = vrot.slane %v10363_v57, 7 }
 0x289   :  { %7971 = vmatpush3.msra.mxu1 %v974_v4  ;;  %2345 = vmatpush1.msra.mxu0 %v1164_v5  ;;  %v932_v19 = vmax.f32 %v927_v10, 0.0  ;;  %v1221_v61 = vld [vmem:[#allocation13 + $0x68] sm:$0xff]  ;;  %v1220_v63 = vld [vmem:[#allocation13 + $0x60] sm:$0xff] }
 0x28a   :  { %7972 = vmatprep.subr.mxu1 %v989_v7  ;;  %2346 = vmatprep.subr.mxu0 %v1161_v8  ;;  %v1193_v2 = vld [vmem:[#allocation11 + $0x88] sm:$0xff]  ;;  %v1192_v4 = vld [vmem:[#allocation11 + $0x80] sm:$0xff]  ;;  %v10369_v8 = vsel %vm2148_vm2, %v2149_v33, %v2150_v1  ;;  %v1231_v1 = vld [vmem:[#allocation13 + $0xb8] sm:$0xff] }
 0x28b   :  { %7973 = vmatpush3.msra.mxu1 %v973_v9  ;;  %2347 = vmatpush1.msra.mxu0 %v1160_v11  ;;  %v1217_v3 = vld [vmem:[#allocation13 + $0x48] sm:$0xff]  ;;  %v1216_v6 = vld [vmem:[#allocation13 + $0x40] sm:$0xff] }
 0x28c   :  { %7974 = vmatprep.subr.mxu1 %v988_v12  ;;  %2348 = vmatprep.subr.mxu0 %v1157_v13  ;;  %v1189_v5 = vld [vmem:[#allocation11 + $0x68] sm:$0xff]  ;;  %v1188_v7 = vld [vmem:[#allocation11 + $0x60] sm:$0xff] }
 0x28d   :  { %7975 = vmatpush3.msra.mxu1 %v972_v14  ;;  %2349 = vmatpush1.msra.mxu0 %v1156_v15  ;;  %v1185_v9 = vld [vmem:[#allocation11 + $0x48] sm:$0xff]  ;;  %v1184_v11 = vld [vmem:[#allocation11 + $0x40] sm:$0xff] }
 0x28e   :  { %7976 = vmatprep.subr.mxu1 %v987_v16  ;;  %2350 = vmatprep.subr.mxu0 %v1153_v17  ;;  %v1213_v10 = vld [vmem:[#allocation13 + $0x28] sm:$0xff]  ;;  %v1212_v13 = vld [vmem:[#allocation13 + $0x20] sm:$0xff]  ;;  %v2155_v16 = vrot.slane %v10345_v22, 1  ;;  %v2156_v17 = vrot.slane %v10363_v57, 1 }
 0x28f   :  { %7977 = vmatpush3.msra.mxu1 %v971_v18  ;;  %2351 = vmatpush1.msra.mxu0 %v1152_v20  ;;  %v1181_v12 = vld [vmem:[#allocation11 + $0x28] sm:$0xff]  ;;  %v1180_v14 = vld [vmem:[#allocation11 + $0x20] sm:$0xff] }
 0x290   :  { %7978 = vmatprep.subr.mxu1 %v986_v21  ;;  %1138 = vmatprep.mubr.f32.mxu1 %v932_v19  ;;  %v1209_v15 = vld [vmem:[#allocation13 + $0x8] sm:$0xff]  ;;  %v1208_v19 = vld [vmem:[#allocation13] sm:$0xff]  ;;  %v1207_v21 = vld [vmem:[#allocation11 + $0xf8] sm:$0xff]  ;;  %v10387_v33 = vsel %vm2154_vm4, %v2156_v17, 0.0 }
 0x291   :  { %7979 = vmatpush3.msra.mxu1 %v970_v23  ;;  %2352 = vmatprep.subr.mxu0 %v1149_v25  ;;  %v1177_v18 = vld [vmem:[#allocation11 + $0x8] sm:$0xff]  ;;  %v1176_v20 = vld [vmem:[#allocation11] sm:$0xff]  ;;  %v1206_v23 = vld [vmem:[#allocation11 + $0xf0] sm:$0xff]  ;;  %v10378_v25 = vsel %vm2154_vm4, %v2155_v16, %v2156_v17 }
 0x292   :  { %7980 = vmatprep.subr.mxu1 %v985_v26  ;;  %2353 = vmatpush1.msra.mxu0 %v1148_v29  ;;  %v1203_v26 = vld [vmem:[#allocation11 + $0xd8] sm:$0xff]  ;;  %v1202_v29 = vld [vmem:[#allocation11 + $0xd0] sm:$0xff]  ;;  %v1654_v17 = vld [vmem:[#allocation19 + $0xd0] sm:$0xff] }
 0x293   :  { %7981 = vmatpush3.msra.mxu1 %v969_v31  ;;  %2354 = vmatprep.subr.mxu0 %v1145_v32  ;;  %v1199_v31 = vld [vmem:[#allocation11 + $0xb8] sm:$0xff]  ;;  %v1198_v32 = vld [vmem:[#allocation11 + $0xb0] sm:$0xff] }
 0x294   :  { %7982 = vmatprep.subr.mxu1 %v984_v34  ;;  %2355 = vmatpush1.msra.mxu0 %v1144_v35  ;;  %v1195_v34 = vld [vmem:[#allocation11 + $0x98] sm:$0xff]  ;;  %v1194_v35 = vld [vmem:[#allocation11 + $0x90] sm:$0xff] }
 0x295   :  { %7983 = vmatpush3.msra.mxu1 %v968_v37  ;;  %2388 = vmatprep.mubr.f32.mxu0 %v10010_v0  ;;  %v1190_v37 = vld [vmem:[#allocation11 + $0x70] sm:$0xff] }
 0x296   :  { %7984 = vmatprep.subr.mxu1 %v983_v38  ;;  %2499 = vmatprep.subr.mxu0 %v1237_v39  ;;  %v1187_v38 = vld [vmem:[#allocation11 + $0x58] sm:$0xff]  ;;  %v1186_v39 = vld [vmem:[#allocation11 + $0x50] sm:$0xff] }
 0x297   :  { %7985 = vmatpush3.msra.mxu1 %v967_v40  ;;  %7818 = vmatmul.mubr.msk.f32.vlgmr.msra.gmra.mxu0 %vm2160_vm3, %v10356_v41  ;;  %v1183_v40 = vld [vmem:[#allocation11 + $0x38] sm:$0xff]  ;;  %v1655_v16 = vld [vmem:[#allocation19 + $0xd8] sm:$0xff] }
 0x298   :  { %7986 = vmatprep.subr.mxu1 %v982_v42  ;;  %2500 = vmatpush1.msra.mxu0 %v1236_v36  ;;  %v1182_v42 = vld [vmem:[#allocation11 + $0x30] sm:$0xff]  ;;  %v1179_v36 = vld [vmem:[#allocation11 + $0x18] sm:$0xff] }
 0x299   :  { %7987 = vmatpush3.msra.mxu1 %v966_v44  ;;  %2501 = vmatprep.subr.mxu0 %v1233_v45  ;;  %v1175_v44 = vld [vmem:[#allocation10 + $0xf8] sm:$0xff]  ;;  %v1174_v45 = vld [vmem:[#allocation10 + $0xf0] sm:$0xff] }
 0x29a   :  { %7988 = vmatprep.subr.mxu1 %v981_v46  ;;  %2502 = vmatpush1.msra.mxu0 %v1232_v47  ;;  %v1171_v46 = vld [vmem:[#allocation10 + $0xd8] sm:$0xff]  ;;  %v1170_v47 = vld [vmem:[#allocation10 + $0xd0] sm:$0xff] }
 0x29b   :  { %7989 = vmatpush3.msra.mxu1 %v965_v48  ;;  %2503 = vmatprep.subr.mxu0 %v1229_v49  ;;  %v1167_v48 = vld [vmem:[#allocation10 + $0xb8] sm:$0xff]  ;;  %v1166_v49 = vld [vmem:[#allocation10 + $0xb0] sm:$0xff] }
 0x29c   :  { %1139 = vmatmul.mubr.f32.vlgmr.msra.gmra.mxu1 %v931_v51  ;;  %2181 = vmatprep.subr.mxu1 %v1205_v50  ;;  %v1163_v50 = vld [vmem:[#allocation10 + $0x98] sm:$0xff]  ;;  %v1162_v51 = vld [vmem:[#allocation10 + $0x90] sm:$0xff] }
 0x29d   :  { %2182 = vmatpush1.msra.mxu1 %v1204_v52  ;;  %2504 = vmatpush1.msra.mxu0 %v1228_v53  ;;  %v1159_v52 = vld [vmem:[#allocation10 + $0x78] sm:$0xff] }
 0x29e   :  { %2183 = vmatprep.subr.mxu1 %v1201_v55  ;;  %2505 = vmatprep.subr.mxu0 %v1225_v56  ;;  %v1155_v53 = vld [vmem:[#allocation10 + $0x58] sm:$0xff]  ;;  %v1154_v55 = vld [vmem:[#allocation10 + $0x50] sm:$0xff] }
 0x29f   :  { %2184 = vmatpush1.msra.mxu1 %v1200_v58  ;;  %2506 = vmatpush1.msra.mxu0 %v1224_v59  ;;  %v1151_v56 = vld [vmem:[#allocation10 + $0x38] sm:$0xff]  ;;  %v1150_v58 = vld [vmem:[#allocation10 + $0x30] sm:$0xff] }
 0x2a0   :  { %2185 = vmatprep.subr.mxu1 %v1197_v60  ;;  %2507 = vmatprep.subr.mxu0 %v1221_v61  ;;  %v1147_v59 = vld [vmem:[#allocation10 + $0x18] sm:$0xff]  ;;  %v1146_v60 = vld [vmem:[#allocation10 + $0x10] sm:$0xff] }
 0x2a1   :  { %2186 = vmatpush1.msra.mxu1 %v1196_v62  ;;  %2508 = vmatpush1.msra.mxu0 %v1220_v63  ;;  %v1238_v61 = vld [vmem:[#allocation13 + $0xf0] sm:$0xff]  ;;  %v1235_v62 = vld [vmem:[#allocation13 + $0xd8] sm:$0xff] }
 0x2a2   :  { %2187 = vmatprep.subr.mxu1 %v1193_v2  ;;  %2509 = vmatprep.subr.mxu0 %v1217_v3  ;;  %v1234_v63 = vld [vmem:[#allocation13 + $0xd0] sm:$0xff]  ;;  %v1227_v3 = vld [vmem:[#allocation13 + $0x98] sm:$0xff] }
 0x2a3   :  { %2188 = vmatpush1.msra.mxu1 %v1192_v4  ;;  %2394 = vmatprep.mubr.f32.mxu0 %v10010_v0  ;;  %v1230_v2 = vld [vmem:[#allocation13 + $0xb0] sm:$0xff] }
 0x2a4   :  { %2189 = vmatprep.subr.mxu1 %v1189_v5  ;;  %2510 = vmatpush1.msra.mxu0 %v1216_v6  ;;  %v1226_v4 = vld [vmem:[#allocation13 + $0x90] sm:$0xff]  ;;  %v1223_v5 = vld [vmem:[#allocation13 + $0x78] sm:$0xff] }
 0x2a5   :  { %2190 = vmatpush1.msra.mxu1 %v1188_v7  ;;  %7819 = vmatmul.mubr.msk.f32.gmra.mxu0 %vm2160_vm3, %v10369_v8  ;;  %v1219_v6 = vld [vmem:[#allocation13 + $0x58] sm:$0xff]  ;;  %v1218_v7 = vld [vmem:[#allocation13 + $0x50] sm:$0xff] }
 0x2a6   :  { %2191 = vmatprep.subr.mxu1 %v1185_v9  ;;  %2511 = vmatprep.subr.mxu0 %v1213_v10  ;;  %v1215_v9 = vld [vmem:[#allocation13 + $0x38] sm:$0xff]  ;;  %v1214_v10 = vld [vmem:[#allocation13 + $0x30] sm:$0xff] }
 0x2a7   :  { %2192 = vmatpush1.msra.mxu1 %v1184_v11  ;;  %2229 = vmatprep.mubr.f32.mxu1 %v10010_v0  ;;  %v1211_v11 = vld [vmem:[#allocation13 + $0x18] sm:$0xff] }
 0x2a8   :  { %2193 = vmatprep.subr.mxu1 %v1181_v12  ;;  %2512 = vmatpush1.msra.mxu0 %v1212_v13  ;;  %v1659_v12 = vld [vmem:[#allocation19 + $0xf8] sm:$0xff]  ;;  %v1658_v13 = vld [vmem:[#allocation19 + $0xf0] sm:$0xff] }
 0x2a9   :  { %2194 = vmatpush1.msra.mxu1 %v1180_v14  ;;  %2513 = vmatprep.subr.mxu0 %v1209_v15  ;;  %v1657_v14 = vld [vmem:[#allocation19 + $0xe8] sm:$0xff]  ;;  %v1656_v15 = vld [vmem:[#allocation19 + $0xe0] sm:$0xff] }
 0x2aa   :  { %2195 = vmatprep.subr.mxu1 %v1177_v18  ;;  %2514 = vmatpush1.msra.mxu0 %v1208_v19  ;;  %v1653_v18 = vld [vmem:[#allocation19 + $0xc8] sm:$0xff]  ;;  %v1652_v19 = vld [vmem:[#allocation19 + $0xc0] sm:$0xff] }
 0x2ab   :  { %2196 = vmatpush1.msra.mxu1 %v1176_v20  ;;  %2547 = vmatprep.mubr.f32.mxu0 %v10010_v0  ;;  %v1651_v20 = vld [vmem:[#allocation19 + $0xb8] sm:$0xff] }
 0x2ac   :  { %7814 = vmatmul.mubr.msk.f32.vlgmr.msra.gmra.mxu1 %vm2160_vm3, %v10345_v22  ;;  %2258 = vmatprep.subr.mxu1 %v1207_v21 }
 0x2ad   :  { %2259 = vmatpush1.msra.mxu1 %v1206_v23  ;;  %7822 = vmatmul.mubr.msk.f32.vlgmr.msra.gmra.mxu0 %vm2160_vm3, %v10378_v25  ;;  %v1650_v23 = vld [vmem:[#allocation19 + $0xb0] sm:$0xff] }
 0x2ae   :  { %2260 = vmatprep.subr.mxu1 %v1203_v26  ;;  %2235 = vmatprep.mubr.f32.mxu1 %v10010_v0 }
 0x2af   :  { %2261 = vmatpush1.msra.mxu1 %v1202_v29  ;;  %2553 = vmatprep.mubr.f32.mxu0 %v10010_v0  ;;  %v1648_v29 = vld [vmem:[#allocation19 + $0xa0] sm:$0xff] }
 0x2b0   :  { %7815 = vmatmul.mubr.msk.f32.gmra.mxu1 %vm2160_vm3, %v10363_v57  ;;  %2262 = vmatprep.subr.mxu1 %v1199_v31 }
 0x2b1   :  { %2263 = vmatpush1.msra.mxu1 %v1198_v32  ;;  %7823 = vmatmul.mubr.msk.f32.gmra.mxu0 %vm2160_vm3, %v10387_v33  ;;  %v1647_v32 = vld [vmem:[#allocation19 + $0x98] sm:$0xff] }
 0x2b2   :  { %2264 = vmatprep.subr.mxu1 %v1195_v34  ;;  %2306 = vmatprep.mubr.f32.mxu1 %v10010_v0  ;;  %v1645_v34 = vld [vmem:[#allocation19 + $0x88] sm:$0xff] }
 0x2b3   :  { %2265 = vmatpush1.msra.mxu1 %v1194_v35  ;;  %2749 = vmatprep.mubr.f32.mxu0 %v10010_v0  ;;  %v1644_v35 = vld [vmem:[#allocation19 + $0x80] sm:$0xff] }
 0x2b4   :  { %2266 = vmatprep.subr.mxu1 %v1191_v27  ;;  %v1643_v27 = vld [vmem:[#allocation19 + $0x78] sm:$0xff] }
 0x2b5   :  { %2267 = vmatpush1.msra.mxu1 %v1190_v37 }
 0x2b6   :  { %2268 = vmatprep.subr.mxu1 %v1187_v38  ;;  %v1642_v38 = vld [vmem:[#allocation19 + $0x70] sm:$0xff] }
 0x2b7   :  { %2269 = vmatpush1.msra.mxu1 %v1186_v39  ;;  %v1641_v39 = vld [vmem:[#allocation19 + $0x68] sm:$0xff] }
 0x2b8   :  { %2270 = vmatprep.subr.mxu1 %v1183_v40 }
 0x2b9   :  { %2271 = vmatpush1.msra.mxu1 %v1182_v42  ;;  %v1640_v42 = vld [vmem:[#allocation19 + $0x60] sm:$0xff] }
 0x2ba   :  { %2272 = vmatprep.subr.mxu1 %v1179_v36 }
 0x2bb   :  { %2273 = vmatpush1.msra.mxu1 %v1178_v43  ;;  %v1639_v43 = vld [vmem:[#allocation19 + $0x58] sm:$0xff] }
 0x2bc   :  { %7816 = vmatmul.mubr.msk.f32.vlgmr.msra.gmra.mxu1 %vm2160_vm3, %v10345_v22  ;;  %2417 = vmatprep.subr.mxu1 %v1175_v44  ;;  %v1158_v22 = vld [vmem:[#allocation10 + $0x70] sm:$0xff]  ;;  %v1638_v44 = vld [vmem:[#allocation19 + $0x50] sm:$0xff] }
 0x2bd   :  { %2418 = vmatpush1.msra.mxu1 %v1174_v45  ;;  %2312 = vmatprep.mubr.f32.mxu1 %v10010_v0  ;;  %v1637_v45 = vld [vmem:[#allocation19 + $0x48] sm:$0xff] }
 0x2be   :  { %2419 = vmatprep.subr.mxu1 %v1171_v46  ;;  %v1636_v46 = vld [vmem:[#allocation19 + $0x40] sm:$0xff] }
 0x2bf   :  { %2420 = vmatpush1.msra.mxu1 %v1170_v47  ;;  %v1635_v47 = vld [vmem:[#allocation19 + $0x38] sm:$0xff] }
 0x2c0   :  { %2421 = vmatprep.subr.mxu1 %v1167_v48  ;;  %7817 = vmatmul.mubr.msk.f32.gmra.mxu1 %vm2160_vm3, %v10363_v57  ;;  %v1239_v57 = vld [vmem:[#allocation13 + $0xf8] sm:$0xff]  ;;  %v1634_v48 = vld [vmem:[#allocation19 + $0x30] sm:$0xff] }
 0x2c1   :  { %2422 = vmatpush1.msra.mxu1 %v1166_v49  ;;  %2465 = vmatprep.mubr.f32.mxu1 %v10010_v0  ;;  %v1633_v49 = vld [vmem:[#allocation19 + $0x28] sm:$0xff] }
 0x2c2   :  { %2423 = vmatprep.subr.mxu1 %v1163_v50  ;;  %v1632_v50 = vld [vmem:[#allocation19 + $0x20] sm:$0xff] }
 0x2c3   :  { %2424 = vmatpush1.msra.mxu1 %v1162_v51  ;;  %v1631_v51 = vld [vmem:[#allocation19 + $0x18] sm:$0xff] }
 0x2c4   :  { %2425 = vmatprep.subr.mxu1 %v1159_v52  ;;  %v1630_v52 = vld [vmem:[#allocation19 + $0x10] sm:$0xff] }
 0x2c5   :  { %2426 = vmatpush1.msra.mxu1 %v1158_v22  ;;  %v1629_v22 = vld [vmem:[#allocation19 + $0x8] sm:$0xff] }
 0x2c6   :  { %2427 = vmatprep.subr.mxu1 %v1155_v53  ;;  %v1628_v53 = vld [vmem:[#allocation19] sm:$0xff] }
 0x2c7   :  { %2428 = vmatpush1.msra.mxu1 %v1154_v55  ;;  %v1691_v55 = vld [vmem:[#allocation19 + $0x1f8] sm:$0xff] }
 0x2c8   :  { %2429 = vmatprep.subr.mxu1 %v1151_v56  ;;  %v1690_v56 = vld [vmem:[#allocation19 + $0x1f0] sm:$0xff] }
 0x2c9   :  { %2430 = vmatpush1.msra.mxu1 %v1150_v58  ;;  %v1689_v58 = vld [vmem:[#allocation19 + $0x1e8] sm:$0xff] }
 0x2ca   :  { %2431 = vmatprep.subr.mxu1 %v1147_v59  ;;  %v1688_v59 = vld [vmem:[#allocation19 + $0x1e0] sm:$0xff] }
 0x2cb   :  { %2432 = vmatpush1.msra.mxu1 %v1146_v60  ;;  %v1687_v60 = vld [vmem:[#allocation19 + $0x1d8] sm:$0xff] }
 0x2cc   :  { %7820 = vmatmul.mubr.msk.f32.vlgmr.msra.gmra.mxu1 %vm2160_vm3, %v10356_v41  ;;  %2576 = vmatprep.subr.mxu1 %v1239_v57  ;;  %v1222_v41 = vld [vmem:[#allocation13 + $0x70] sm:$0xff]  ;;  %v1686_v57 = vld [vmem:[#allocation19 + $0x1d0] sm:$0xff] }
 0x2cd   :  { %2577 = vmatpush1.msra.mxu1 %v1238_v61  ;;  %2471 = vmatprep.mubr.f32.mxu1 %v10010_v0  ;;  %v1685_v61 = vld [vmem:[#allocation19 + $0x1c8] sm:$0xff] }
 0x2ce   :  { %2578 = vmatprep.subr.mxu1 %v1235_v62  ;;  %v1684_v62 = vld [vmem:[#allocation19 + $0x1c0] sm:$0xff] }
 0x2cf   :  { %2579 = vmatpush1.msra.mxu1 %v1234_v63  ;;  %v1683_v63 = vld [vmem:[#allocation19 + $0x1b8] sm:$0xff] }
 0x2d0   :  { %7821 = vmatmul.mubr.msk.f32.gmra.mxu1 %vm2160_vm3, %v10369_v8  ;;  %2580 = vmatprep.subr.mxu1 %v1231_v1  ;;  %v1210_v8 = vld [vmem:[#allocation13 + $0x10] sm:$0xff]  ;;  %v7813_v1 = vld [vmem:[#allocation38] ss:$0 sm:$0xff] }
 0x2d1   :  { %2581 = vmatpush1.msra.mxu1 %v1230_v2  ;;  %2624 = vmatprep.mubr.f32.mxu1 %v10010_v0 }
 0x2d2   :  { %2582 = vmatprep.subr.mxu1 %v1227_v3  ;;  %v1682_v3 = vld [vmem:[#allocation19 + $0x1b0] sm:$0xff] }
 0x2d3   :  { %2583 = vmatpush1.msra.mxu1 %v1226_v4 }
 0x2d4   :  { %2584 = vmatprep.subr.mxu1 %v1223_v5  ;;  %v1681_v5 = vld [vmem:[#allocation19 + $0x1a8] sm:$0xff] }
 0x2d5   :  { %2585 = vmatpush1.msra.mxu1 %v1222_v41 }
 0x2d6   :  { %2586 = vmatprep.subr.mxu1 %v1219_v6  ;;  %v1680_v6 = vld [vmem:[#allocation19 + $0x1a0] sm:$0xff] }
 0x2d7   :  { %2587 = vmatpush1.msra.mxu1 %v1218_v7 }
 0x2d8   :  { %2588 = vmatprep.subr.mxu1 %v1215_v9 }
 0x2d9   :  { %2589 = vmatpush1.msra.mxu1 %v1214_v10  ;;  %v1679_v10 = vld [vmem:[#allocation19 + $0x198] sm:$0xff] }
 0x2da   :  { %2590 = vmatprep.subr.mxu1 %v1211_v11  ;;  %v1678_v11 = vld [vmem:[#allocation19 + $0x190] sm:$0xff] }
 0x2db   :  { %2591 = vmatpush1.msra.mxu1 %v1210_v8 }
 0x2dc   :  { %7824 = vmatmul.mubr.msk.f32.vlgmr.msra.gmra.mxu1 %vm2160_vm3, %v10378_v25  ;;  %2976 = vmatprep.subr.mxu1 %v1659_v12  ;;  %v1649_v25 = vld [vmem:[#allocation19 + $0xa8] sm:$0xff] }
 0x2dd   :  { %2630 = vmatprep.mubr.f32.mxu1 %v10010_v0  ;;  %2977 = vmatpush1.msra.mxu1 %v1658_v13  ;;  %v1677_v13 = vld [vmem:[#allocation19 + $0x188] sm:$0xff] }
 0x2de   :  { %2978 = vmatprep.subr.mxu1 %v1657_v14  ;;  %v1676_v14 = vld [vmem:[#allocation19 + $0x180] sm:$0xff] }
 0x2df   :  { %2979 = vmatpush1.msra.mxu1 %v1656_v15  ;;  %v1675_v15 = vld [vmem:[#allocation19 + $0x178] sm:$0xff] }
 0x2e0   :  { %7825 = vmatmul.mubr.msk.f32.gmra.mxu1 %vm2160_vm3, %v10387_v33  ;;  %2980 = vmatprep.subr.mxu1 %v1655_v16  ;;  %v1646_v33 = vld [vmem:[#allocation19 + $0x90] sm:$0xff] }
 0x2e1   :  { %2981 = vmatpush1.msra.mxu1 %v1654_v17 }
 0x2e2   :  { %2982 = vmatprep.subr.mxu1 %v1653_v18 }
 0x2e3   :  { %2983 = vmatpush1.msra.mxu1 %v1652_v19 }
 0x2e4   :  { %2984 = vmatprep.subr.mxu1 %v1651_v20 }
 0x2e5   :  { %2985 = vmatpush1.msra.mxu1 %v1650_v23  ;;  %v1624_v23 = vld [vmem:[#allocation14] sm:$0xf] }
 0x2e6   :  { %2986 = vmatprep.subr.mxu1 %v1649_v25 }
 0x2e7   :  { %2987 = vmatpush1.msra.mxu1 %v1648_v29 }
 0x2e8   :  { %2988 = vmatprep.subr.mxu1 %v1647_v32 }
 0x2e9   :  { %2989 = vmatpush1.msra.mxu1 %v1646_v33 }
 0x2ea   :  { %2990 = vmatprep.subr.mxu1 %v1645_v34  ;;  %v10418_v34 = vrot.slane %v1624_v23, %v10323_v28 }
 0x2eb   :  { %2991 = vmatpush1.msra.mxu1 %v1644_v35 }
 0x2ec   :  { %2992 = vmatprep.subr.mxu1 %v1643_v27 }
 0x2ed   :  { %2993 = vmatpush1.msra.mxu1 %v1642_v38 }
 0x2ee   :  { %2994 = vmatprep.subr.mxu1 %v1641_v39 }
 0x2ef   :  { %2995 = vmatpush1.msra.mxu1 %v1640_v42 }
 0x2f0   :  { %2996 = vmatprep.subr.mxu1 %v1639_v43 }
 0x2f1   :  { %2997 = vmatpush1.msra.mxu1 %v1638_v44 }
 0x2f2   :  { %2998 = vmatprep.subr.mxu1 %v1637_v45 }
 0x2f3   :  { %2999 = vmatpush1.msra.mxu1 %v1636_v46 }
 0x2f4   :  { %3000 = vmatprep.subr.mxu1 %v1635_v47 }
 0x2f5   :  { %3001 = vmatpush1.msra.mxu1 %v1634_v48 }
 0x2f6   :  { %3002 = vmatprep.subr.mxu1 %v1633_v49 }
 0x2f7   :  { %3003 = vmatpush1.msra.mxu1 %v1632_v50 }
 0x2f8   :  { %3004 = vmatprep.subr.mxu1 %v1631_v51  ;;  %v1626_v51 = vld [vmem:[#allocation16] sm:$0xff] }
 0x2f9   :  { %3005 = vmatpush1.msra.mxu1 %v1630_v52 }
 0x2fa   :  { %3006 = vmatprep.subr.mxu1 %v1629_v22 }
 0x2fb   :  { %3007 = vmatpush1.msra.mxu1 %v1628_v53 }
 0x2fc   :  { %3008 = vmatprep.subr.mxu1 %v1691_v55 }
 0x2fd   :  { %3009 = vmatpush2.msra.mxu1 %v1690_v56 }
 0x2fe   :  { %3010 = vmatprep.subr.mxu1 %v1689_v58 }
 0x2ff   :  { %3011 = vmatpush2.msra.mxu1 %v1688_v59 }
 0x300   :  { %3012 = vmatprep.subr.mxu1 %v1687_v60 }
 0x301   :  { %3013 = vmatpush2.msra.mxu1 %v1686_v57 }
 0x302   :  { %3014 = vmatprep.subr.mxu1 %v1685_v61 }
 0x303   :  { %3015 = vmatpush2.msra.mxu1 %v1684_v62 }
 0x304   :  { %3016 = vmatprep.subr.mxu1 %v1683_v63 }
 0x305   :  { %3017 = vmatpush2.msra.mxu1 %v1682_v3 }
 0x306   :  { %3018 = vmatprep.subr.mxu1 %v1681_v5  ;;  %v10430_v5 = vrot.slane %v1624_v23, %v10338_v54 }
 0x307   :  { %3019 = vmatpush2.msra.mxu1 %v1680_v6 }
 0x308   :  { %3020 = vmatprep.subr.mxu1 %v1679_v10 }
 0x309   :  { %3021 = vmatpush2.msra.mxu1 %v1678_v11 }
 0x30a   :  { %3022 = vmatprep.subr.mxu1 %v1677_v13 }
 0x30b   :  { %3023 = vmatpush2.msra.mxu1 %v1676_v14 }
 0x30c   :  { %3024 = vmatprep.subr.mxu1 %v1675_v15 }
 0x33c   :  { %v7920_v21 = vpop.f32.mrf.mxu1 }
 0x33e   :  { %v7921_v26 = vpop.f32.mrf.mxu1 }
 0x33f   :  { %v10413_v31 = vadd.f32 %v7921_v26, %v7920_v21 }
 0x344   :  { %v7955_v37 = vpop.f32.mrf.mxu0 }
 0x346   :  { %v7956_v40 = vpop.f32.mrf.mxu0 }
 0x347   :  { %v7957_v36 = vadd.f32 %v7956_v40, %v7955_v37  ;;  %v10421_v37 = vrot.slane %v1624_v23, %v10326_v30 }
 0x349   :  { %v1071_v7 = vadd.f32 %v7957_v36, %v7813_v1 }
 0x357   :  { %v2390_v4 = vpop.f32.mrf.mxu0 }
 0x359   :  { %v2392_v12 = vpop.f32.mrf.mxu0 }
 0x35c   :  { %v7990_v2 = vpop.f32.mrf.mxu1 }
 0x35e   :  { %v7991_v41 = vpop.f32.mrf.mxu1 }
 0x35f   :  { %v7992_v9 = vadd.f32 %v7991_v41, %v7990_v2 }
 0x361   :  { %v10415_v8 = vadd.f32 %v7992_v9, %v1071_v7  ;;  %v10433_v7 = vrot.slane %v1624_v23, %v10348_v24  ;;  %v1721_v23 = vld [vmem:[#allocation19 + $0x2e8] sm:$0xff] }
 0x365   :  { %v2396_v16 = vpop.f32.mrf.mxu0 }
 0x367   :  { %v2398_v17 = vpop.f32.mrf.mxu0 }
 0x36c   :  { %v2231_v18 = vpop.f32.mrf.mxu1 }
 0x36d   :  { %v2549_v19 = vpop.f32.mrf.mxu0  ;;  %v2391_v26 = vadd.f32 %v2390_v4, %v2231_v18 }
 0x36e   :  { %v2233_v20 = vpop.f32.mrf.mxu1 }
 0x36f   :  { %v2393_v21 = vadd.f32 %v2392_v12, %v2233_v20  ;;  %v2551_v25 = vpop.f32.mrf.mxu0  ;;  %v2637_v42 = vadd.f32 %v2549_v19, %v2391_v26  ;;  %v1627_v19 = vld [vmem:[#allocation17] sm:$0xff] }
 0x370   :  { %v2237_v29 = vpop.f32.mrf.mxu1  ;;  %v1723_v20 = vld [vmem:[#allocation19 + $0x2f8] sm:$0xff] }
 0x371   :  { %v2397_v32 = vadd.f32 %v2396_v16, %v2237_v29  ;;  %v2555_v33 = vpop.f32.mrf.mxu0  ;;  %v2638_v27 = vadd.f32 %v2551_v25, %v2393_v21  ;;  %v2666_v46 = vadd.f32 %v10418_v34, %v2637_v42  ;;  %v1722_v21 = vld [vmem:[#allocation19 + $0x2f0] sm:$0xff]  ;;  %v1720_v25 = vld [vmem:[#allocation19 + $0x2e0] sm:$0xff]  ;;  %v1719_v26 = vld [vmem:[#allocation19 + $0x2d8] sm:$0xff] }
 0x372   :  { %v2239_v35 = vpop.f32.mrf.mxu1  ;;  %v1718_v29 = vld [vmem:[#allocation19 + $0x2d0] sm:$0xff] }
 0x373   :  { %v2399_v38 = vadd.f32 %v2398_v17, %v2239_v35  ;;  %v2641_v39 = vadd.f32 %v2555_v33, %v2397_v32  ;;  %v2557_v40 = vpop.f32.mrf.mxu0  ;;  %v2667_v44 = vadd.f32 %v10421_v37, %v2638_v27  ;;  %v2674_v50 = vmax.f32 %v2666_v46, 0.0  ;;  %v1717_v32 = vld [vmem:[#allocation19 + $0x2c8] sm:$0xff]  ;;  %v1716_v33 = vld [vmem:[#allocation19 + $0x2c0] sm:$0xff]  ;;  %v1715_v35 = vld [vmem:[#allocation19 + $0x2b8] sm:$0xff] }
 0x374   :  { %v1714_v27 = vld [vmem:[#allocation19 + $0x2b0] sm:$0xff]  ;;  %v1672_v46 = vld [vmem:[#allocation19 + $0x160] sm:$0xff] }
 0x375   :  { %v2670_v36 = vadd.f32 %v10418_v34, %v2641_v39  ;;  %v2642_v43 = vadd.f32 %v2557_v40, %v2399_v38  ;;  %v2675_v49 = vmax.f32 %v2667_v44, 0.0  ;;  %v1713_v38 = vld [vmem:[#allocation19 + $0x2a8] sm:$0xff]  ;;  %v1712_v39 = vld [vmem:[#allocation19 + $0x2a0] sm:$0xff]  ;;  %v1711_v40 = vld [vmem:[#allocation19 + $0x298] sm:$0xff] }
 0x376   :  { %v1710_v42 = vld [vmem:[#allocation19 + $0x290] sm:$0xff]  ;;  %v1709_v44 = vld [vmem:[#allocation19 + $0x288] sm:$0xff] }
 0x377   :  { %v2671_v45 = vadd.f32 %v10421_v37, %v2642_v43  ;;  %v2678_v47 = vmax.f32 %v2670_v36, 0.0  ;;  %v1674_v36 = vld [vmem:[#allocation19 + $0x170] sm:$0xff]  ;;  %v1673_v43 = vld [vmem:[#allocation19 + $0x168] sm:$0xff] }
 0x378   :  { %3025 = vmatpush2.msra.mxu1 %v1674_v36  ;;  %v1663_v36 = vld [vmem:[#allocation19 + $0x118] sm:$0xff] }
 0x379   :  { %v2679_v48 = vmax.f32 %v2671_v45, 0.0  ;;  %v1708_v45 = vld [vmem:[#allocation19 + $0x280] sm:$0xff]  ;;  %3026 = vmatprep.subr.mxu1 %v1673_v43  ;;  %v1731_v43 = vld [vmem:[#allocation19 + $0x338] sm:$0xff] }
 0x37a   :  { %3027 = vmatpush2.msra.mxu1 %v1672_v46  ;;  %v1661_v46 = vld [vmem:[#allocation19 + $0x108] sm:$0xff] }
 0x37b   :  { %2713 = vmatprep.subr.mxu0 %v2679_v48 }
 0x37c   :  { %2714 = vmatpush1.msra.mxu0 %v2678_v47  ;;  %v2308_v52 = vpop.f32.mrf.mxu1 }
 0x37d   :  { %2715 = vmatprep.subr.mxu0 %v2675_v49 }
 0x37e   :  { %2716 = vmatpush1.msra.mxu0 %v2674_v50  ;;  %v2310_v22 = vpop.f32.mrf.mxu1 }
 0x37f   :  { %7826 = vmatmul.mubr.msk.f32.vlgmr.msra.gmra.mxu0 %vm558_vm0, %v1626_v51 }
 0x380   :  { %2820 = vmatprep.mubr.f32.mxu0 %v10010_v0  ;;  %v2314_v53 = vpop.f32.mrf.mxu1 }
 0x382   :  { %v2316_v55 = vpop.f32.mrf.mxu1 }
 0x38c   :  { %v2467_v56 = vpop.f32.mrf.mxu1 }
 0x38d   :  { %v2468_v1 = vadd.f32 %v2467_v56, %v2308_v52  ;;  %v1705_v52 = vld [vmem:[#allocation19 + $0x268] sm:$0xff] }
 0x38e   :  { %v2469_v58 = vpop.f32.mrf.mxu1  ;;  %v1701_v56 = vld [vmem:[#allocation19 + $0x248] sm:$0xff] }
 0x38f   :  { %v2470_v62 = vadd.f32 %v2469_v58, %v2310_v22  ;;  %v1704_v22 = vld [vmem:[#allocation19 + $0x260] sm:$0xff] }
 0x390   :  { %v2473_v59 = vpop.f32.mrf.mxu1  ;;  %v1700_v58 = vld [vmem:[#allocation19 + $0x240] sm:$0xff] }
 0x391   :  { %v2474_v63 = vadd.f32 %v2473_v59, %v2314_v53  ;;  %v1703_v53 = vld [vmem:[#allocation19 + $0x258] sm:$0xff] }
 0x392   :  { %v2475_v60 = vpop.f32.mrf.mxu1  ;;  %v1699_v59 = vld [vmem:[#allocation19 + $0x238] sm:$0xff] }
 0x393   :  { %v2476_v3 = vadd.f32 %v2475_v60, %v2316_v55  ;;  %v1702_v55 = vld [vmem:[#allocation19 + $0x250] sm:$0xff] }
 0x394   :  { %v1698_v60 = vld [vmem:[#allocation19 + $0x230] sm:$0xff] }
 0x39c   :  { %v2626_v57 = vpop.f32.mrf.mxu1 }
 0x39d   :  { %v2639_v6 = vadd.f32 %v2626_v57, %v2468_v1  ;;  %v1697_v57 = vld [vmem:[#allocation19 + $0x228] sm:$0xff] }
 0x39e   :  { %v2628_v61 = vpop.f32.mrf.mxu1  ;;  %v1693_v1 = vld [vmem:[#allocation19 + $0x208] sm:$0xff] }
 0x39f   :  { %v2640_v4 = vadd.f32 %v2628_v61, %v2470_v62  ;;  %v2668_v14 = vadd.f32 %v10433_v7, %v2639_v6  ;;  %v1696_v61 = vld [vmem:[#allocation19 + $0x220] sm:$0xff]  ;;  %v1695_v62 = vld [vmem:[#allocation19 + $0x218] sm:$0xff] }
 0x3a0   :  { %v2632_v2 = vpop.f32.mrf.mxu1  ;;  %v1752_v6 = vld [vmem:[#allocation19 + $0x3e0] sm:$0xff] }
 0x3a1   :  { %v2643_v41 = vadd.f32 %v2632_v2, %v2474_v63  ;;  %v2669_v12 = vadd.f32 %v10430_v5, %v2640_v4  ;;  %v2676_v18 = vmax.f32 %v2668_v14, 0.0  ;;  %v1694_v63 = vld [vmem:[#allocation19 + $0x210] sm:$0xff]  ;;  %v1692_v2 = vld [vmem:[#allocation19 + $0x200] sm:$0xff] }
 0x3a2   :  { %v2634_v9 = vpop.f32.mrf.mxu1  ;;  %v1754_v4 = vld [vmem:[#allocation19 + $0x3f0] sm:$0xff] }
 0x3a3   :  { %v2644_v10 = vadd.f32 %v2634_v9, %v2476_v3  ;;  %v2672_v11 = vadd.f32 %v10433_v7, %v2643_v41  ;;  %v2677_v17 = vmax.f32 %v2669_v12, 0.0  ;;  %v1755_v3 = vld [vmem:[#allocation19 + $0x3f8] sm:$0xff]  ;;  %v1753_v41 = vld [vmem:[#allocation19 + $0x3e8] sm:$0xff]  ;;  %v1748_v12 = vld [vmem:[#allocation19 + $0x3c0] sm:$0xff] }
 0x3a4   :  { %v1751_v9 = vld [vmem:[#allocation19 + $0x3d8] sm:$0xff]  ;;  %v1746_v14 = vld [vmem:[#allocation19 + $0x3b0] sm:$0xff] }
 0x3a5   :  { %v2673_v13 = vadd.f32 %v10430_v5, %v2644_v10  ;;  %v2680_v16 = vmax.f32 %v2672_v11, 0.0  ;;  %v1750_v10 = vld [vmem:[#allocation19 + $0x3d0] sm:$0xff]  ;;  %v1749_v11 = vld [vmem:[#allocation19 + $0x3c8] sm:$0xff] }
 0x3a7   :  { %v2681_v15 = vmax.f32 %v2673_v13, 0.0  ;;  %v1747_v13 = vld [vmem:[#allocation19 + $0x3b8] sm:$0xff] }
 0x3a9   :  { %2784 = vmatprep.subr.mxu0 %v2681_v15 }
 0x3aa   :  { %2785 = vmatpush1.msra.mxu0 %v2680_v16 }
 0x3ab   :  { %2786 = vmatprep.subr.mxu0 %v2677_v17 }
 0x3ac   :  { %2787 = vmatpush1.msra.mxu0 %v2676_v18 }
 0x3ad   :  { %7827 = vmatmul.mubr.msk.f32.vlgmr.msra.gmra.mxu0 %vm558_vm0, %v1626_v51  ;;  %2858 = vmatprep.subr.mxu0 %v2679_v48  ;;  %v1707_v48 = vld [vmem:[#allocation19 + $0x278] sm:$0xff]  ;;  %v1669_v51 = vld [vmem:[#allocation19 + $0x148] sm:$0xff] }
 0x3ae   :  { %2859 = vmatpush1.msra.mxu0 %v2678_v47  ;;  %2894 = vmatprep.mubr.f32.mxu0 %v10010_v0  ;;  %v1671_v47 = vld [vmem:[#allocation19 + $0x158] sm:$0xff] }
 0x3af   :  { %2860 = vmatprep.subr.mxu0 %v2675_v49  ;;  %v1670_v49 = vld [vmem:[#allocation19 + $0x150] sm:$0xff]  ;;  %3028 = vmatprep.subr.mxu1 %v1671_v47  ;;  %v1729_v47 = vld [vmem:[#allocation19 + $0x328] sm:$0xff] }
 0x3b0   :  { %2861 = vmatpush1.msra.mxu0 %v2674_v50  ;;  %v1706_v50 = vld [vmem:[#allocation19 + $0x270] sm:$0xff]  ;;  %3029 = vmatpush2.msra.mxu1 %v1670_v49  ;;  %v1728_v49 = vld [vmem:[#allocation19 + $0x320] sm:$0xff] }
 0x3b1   :  { %7828 = vmatmul.mubr.msk.f32.vlgmr.msra.gmra.mxu0 %vm558_vm0, %v1627_v19  ;;  %2929 = vmatprep.subr.mxu0 %v2681_v15  ;;  %v1745_v15 = vld [vmem:[#allocation19 + $0x3a8] sm:$0xff] }
 0x3b2   :  { %2930 = vmatpush1.msra.mxu0 %v2680_v16  ;;  %2965 = vmatprep.mubr.f32.mxu0 %v10010_v0  ;;  %v1744_v16 = vld [vmem:[#allocation19 + $0x3a0] sm:$0xff] }
 0x3b3   :  { %2931 = vmatprep.subr.mxu0 %v2677_v17  ;;  %3030 = vmatprep.subr.mxu1 %v1669_v51  ;;  %v1743_v17 = vld [vmem:[#allocation19 + $0x398] sm:$0xff] }
 0x3b4   :  { %2932 = vmatpush1.msra.mxu0 %v2676_v18  ;;  %v1742_v18 = vld [vmem:[#allocation19 + $0x390] sm:$0xff]  ;;  %v1787_v51 = vld [vmem:[#allocation20 + $0xf8] sm:$0xff] }
 0x3b5   :  { %7829 = vmatmul.mubr.msk.f32.vlgmr.msra.gmra.mxu0 %vm558_vm0, %v1627_v19  ;;  %3047 = vmatprep.subr.mxu0 %v1723_v20  ;;  %v1741_v19 = vld [vmem:[#allocation19 + $0x388] sm:$0xff]  ;;  %v1740_v20 = vld [vmem:[#allocation19 + $0x380] sm:$0xff] }
 0x3b6   :  { %3048 = vmatpush1.msra.mxu0 %v1722_v21  ;;  %v1739_v21 = vld [vmem:[#allocation19 + $0x378] sm:$0xff] }
 0x3b7   :  { %3049 = vmatprep.subr.mxu0 %v1721_v23  ;;  %v1738_v23 = vld [vmem:[#allocation19 + $0x370] sm:$0xff] }
 0x3b8   :  { %3050 = vmatpush1.msra.mxu0 %v1720_v25  ;;  %v1737_v25 = vld [vmem:[#allocation19 + $0x368] sm:$0xff] }
 0x3b9   :  { %3051 = vmatprep.subr.mxu0 %v1719_v26  ;;  %v1668_v26 = vld [vmem:[#allocation19 + $0x140] sm:$0xff] }
 0x3ba   :  { %3052 = vmatpush1.msra.mxu0 %v1718_v29  ;;  %v1736_v29 = vld [vmem:[#allocation19 + $0x360] sm:$0xff]  ;;  %3031 = vmatpush2.msra.mxu1 %v1668_v26 }
 0x3bb   :  { %3053 = vmatprep.subr.mxu0 %v1717_v32  ;;  %v1667_v32 = vld [vmem:[#allocation19 + $0x138] sm:$0xff]  ;;  %v1844_v26 = vld [vmem:[#allocation20 + $0x2c0] sm:$0xff] }
 0x3bc   :  { %3054 = vmatpush1.msra.mxu0 %v1716_v33  ;;  %v1735_v33 = vld [vmem:[#allocation19 + $0x358] sm:$0xff]  ;;  %3032 = vmatprep.subr.mxu1 %v1667_v32 }
 0x3bd   :  { %3055 = vmatprep.subr.mxu0 %v1715_v35  ;;  %v1666_v35 = vld [vmem:[#allocation19 + $0x130] sm:$0xff]  ;;  %v1843_v32 = vld [vmem:[#allocation20 + $0x2b8] sm:$0xff] }
 0x3be   :  { %3056 = vmatpush1.msra.mxu0 %v1714_v27  ;;  %v1734_v27 = vld [vmem:[#allocation19 + $0x350] sm:$0xff]  ;;  %3033 = vmatpush2.msra.mxu1 %v1666_v35 }
 0x3bf   :  { %3057 = vmatprep.subr.mxu0 %v1713_v38  ;;  %v1665_v38 = vld [vmem:[#allocation19 + $0x128] sm:$0xff]  ;;  %v1842_v35 = vld [vmem:[#allocation20 + $0x2b0] sm:$0xff] }
 0x3c0   :  { %3058 = vmatpush1.msra.mxu0 %v1712_v39  ;;  %v1733_v39 = vld [vmem:[#allocation19 + $0x348] sm:$0xff]  ;;  %3034 = vmatprep.subr.mxu1 %v1665_v38 }
 0x3c1   :  { %3059 = vmatprep.subr.mxu0 %v1711_v40  ;;  %v1664_v40 = vld [vmem:[#allocation19 + $0x120] sm:$0xff]  ;;  %v1841_v38 = vld [vmem:[#allocation20 + $0x2a8] sm:$0xff] }
 0x3c2   :  { %3060 = vmatpush1.msra.mxu0 %v1710_v42  ;;  %v1732_v42 = vld [vmem:[#allocation19 + $0x340] sm:$0xff]  ;;  %3035 = vmatpush2.msra.mxu1 %v1664_v40 }
 0x3c3   :  { %3061 = vmatprep.subr.mxu0 %v1709_v44  ;;  %3036 = vmatprep.subr.mxu1 %v1663_v36  ;;  %v1662_v44 = vld [vmem:[#allocation19 + $0x110] sm:$0xff]  ;;  %v1840_v40 = vld [vmem:[#allocation20 + $0x2a0] sm:$0xff]  ;;  %v1839_v36 = vld [vmem:[#allocation20 + $0x298] sm:$0xff] }
 0x3c4   :  { %3062 = vmatpush1.msra.mxu0 %v1708_v45  ;;  %v1730_v45 = vld [vmem:[#allocation19 + $0x330] sm:$0xff]  ;;  %3037 = vmatpush2.msra.mxu1 %v1662_v44 }
 0x3c5   :  { %3063 = vmatprep.subr.mxu0 %v1707_v48  ;;  %3038 = vmatprep.subr.mxu1 %v1661_v46  ;;  %v1660_v48 = vld [vmem:[#allocation19 + $0x100] sm:$0xff]  ;;  %v1838_v44 = vld [vmem:[#allocation20 + $0x290] sm:$0xff]  ;;  %v1837_v46 = vld [vmem:[#allocation20 + $0x288] sm:$0xff] }
 0x3c6   :  { %3064 = vmatpush1.msra.mxu0 %v1706_v50  ;;  %3039 = vmatpush2.msra.mxu1 %v1660_v48  ;;  %v1727_v50 = vld [vmem:[#allocation19 + $0x318] sm:$0xff]  ;;  %v1836_v48 = vld [vmem:[#allocation20 + $0x280] sm:$0xff] }
 0x3c7   :  { %3065 = vmatprep.subr.mxu0 %v1705_v52  ;;  %3118 = vmatprep.subr.mxu1 %v1787_v51  ;;  %v1726_v52 = vld [vmem:[#allocation19 + $0x310] sm:$0xff] }
 0x3c8   :  { %3066 = vmatpush1.msra.mxu0 %v1704_v22  ;;  %v1725_v22 = vld [vmem:[#allocation19 + $0x308] sm:$0xff]  ;;  %v1766_v51 = vld [vmem:[#allocation20 + $0x50] sm:$0xff] }
 0x3c9   :  { %3067 = vmatprep.subr.mxu0 %v1703_v53  ;;  %v1724_v53 = vld [vmem:[#allocation19 + $0x300] sm:$0xff] }
 0x3ca   :  { %3068 = vmatpush1.msra.mxu0 %v1702_v55  ;;  %v1851_v55 = vld [vmem:[#allocation20 + $0x2f8] sm:$0xff] }
 0x3cb   :  { %3069 = vmatprep.subr.mxu0 %v1701_v56 }
 0x3cc   :  { %3070 = vmatpush1.msra.mxu0 %v1700_v58 }
 0x3cd   :  { %3071 = vmatprep.subr.mxu0 %v1699_v59 }
 0x3ce   :  { %3072 = vmatpush1.msra.mxu0 %v1698_v60 }
 0x3cf   :  { %3073 = vmatprep.subr.mxu0 %v1697_v57 }
 0x3d0   :  { %3074 = vmatpush1.msra.mxu0 %v1696_v61 }
 0x3d1   :  { %3075 = vmatprep.subr.mxu0 %v1695_v62 }
 0x3d2   :  { %3076 = vmatpush1.msra.mxu0 %v1694_v63 }
 0x3d3   :  { %3077 = vmatprep.subr.mxu0 %v1693_v1 }
 0x3d4   :  { %3078 = vmatpush1.msra.mxu0 %v1692_v2  ;;  %v1786_v2 = vld [vmem:[#allocation20 + $0xf0] sm:$0xff] }
 0x3d5   :  { %3079 = vmatprep.subr.mxu0 %v1755_v3  ;;  %v1785_v3 = vld [vmem:[#allocation20 + $0xe8] sm:$0xff] }
 0x3d6   :  { %3080 = vmatpush2.msra.mxu0 %v1754_v4 }
 0x3d7   :  { %3081 = vmatprep.subr.mxu0 %v1753_v41  ;;  %v1784_v41 = vld [vmem:[#allocation20 + $0xe0] sm:$0xff] }
 0x3d8   :  { %3082 = vmatpush2.msra.mxu0 %v1752_v6 }
 0x3d9   :  { %3083 = vmatprep.subr.mxu0 %v1751_v9  ;;  %v1783_v9 = vld [vmem:[#allocation20 + $0xd8] sm:$0xff] }
 0x3da   :  { %3084 = vmatpush2.msra.mxu0 %v1750_v10 }
 0x3db   :  { %3085 = vmatprep.subr.mxu0 %v1749_v11  ;;  %v1782_v11 = vld [vmem:[#allocation20 + $0xd0] sm:$0xff] }
 0x3dc   :  { %3086 = vmatpush2.msra.mxu0 %v1748_v12  ;;  %v1850_v12 = vld [vmem:[#allocation20 + $0x2f0] sm:$0xff] }
 0x3dd   :  { %3087 = vmatprep.subr.mxu0 %v1747_v13  ;;  %v1781_v13 = vld [vmem:[#allocation20 + $0xc8] sm:$0xff] }
 0x3de   :  { %3088 = vmatpush2.msra.mxu0 %v1746_v14  ;;  %v1849_v14 = vld [vmem:[#allocation20 + $0x2e8] sm:$0xff] }
 0x3df   :  { %3089 = vmatprep.subr.mxu0 %v1745_v15  ;;  %v1780_v15 = vld [vmem:[#allocation20 + $0xc0] sm:$0xff] }
 0x3e0   :  { %3090 = vmatpush2.msra.mxu0 %v1744_v16  ;;  %v1848_v16 = vld [vmem:[#allocation20 + $0x2e0] sm:$0xff] }
 0x3e1   :  { %3091 = vmatprep.subr.mxu0 %v1743_v17  ;;  %v1779_v17 = vld [vmem:[#allocation20 + $0xb8] sm:$0xff] }
 0x3e2   :  { %3092 = vmatpush2.msra.mxu0 %v1742_v18  ;;  %v1847_v18 = vld [vmem:[#allocation20 + $0x2d8] sm:$0xff] }
 0x3e3   :  { %3093 = vmatprep.subr.mxu0 %v1741_v19  ;;  %v1778_v19 = vld [vmem:[#allocation20 + $0xb0] sm:$0xff] }
 0x3e4   :  { %3094 = vmatpush2.msra.mxu0 %v1740_v20  ;;  %v1846_v20 = vld [vmem:[#allocation20 + $0x2d0] sm:$0xff] }
 0x3e5   :  { %3095 = vmatprep.subr.mxu0 %v1739_v21  ;;  %v1777_v21 = vld [vmem:[#allocation20 + $0xa8] sm:$0xff] }
 0x3e6   :  { %3096 = vmatpush2.msra.mxu0 %v1738_v23  ;;  %v1845_v23 = vld [vmem:[#allocation20 + $0x2c8] sm:$0xff] }
 0x3e7   :  { %3097 = vmatprep.subr.mxu0 %v1737_v25  ;;  %v1776_v25 = vld [vmem:[#allocation20 + $0xa0] sm:$0xff] }
 0x3e8   :  { %3098 = vmatpush2.msra.mxu0 %v1736_v29  ;;  %v1775_v29 = vld [vmem:[#allocation20 + $0x98] sm:$0xff] }
 0x3e9   :  { %3099 = vmatprep.subr.mxu0 %v1735_v33  ;;  %v1774_v33 = vld [vmem:[#allocation20 + $0x90] sm:$0xff] }
 0x3ea   :  { %3100 = vmatpush2.msra.mxu0 %v1734_v27  ;;  %v1773_v27 = vld [vmem:[#allocation20 + $0x88] sm:$0xff] }
 0x3eb   :  { %3101 = vmatprep.subr.mxu0 %v1733_v39  ;;  %v1772_v39 = vld [vmem:[#allocation20 + $0x80] sm:$0xff] }
 0x3ec   :  { %3102 = vmatpush2.msra.mxu0 %v1732_v42  ;;  %v1771_v42 = vld [vmem:[#allocation20 + $0x78] sm:$0xff] }
 0x3ed   :  { %3103 = vmatprep.subr.mxu0 %v1731_v43  ;;  %v1770_v43 = vld [vmem:[#allocation20 + $0x70] sm:$0xff] }
 0x3ee   :  { %3104 = vmatpush2.msra.mxu0 %v1730_v45  ;;  %v1769_v45 = vld [vmem:[#allocation20 + $0x68] sm:$0xff] }
 0x3ef   :  { %3105 = vmatprep.subr.mxu0 %v1729_v47  ;;  %v1768_v47 = vld [vmem:[#allocation20 + $0x60] sm:$0xff] }
 0x3f0   :  { %3106 = vmatpush2.msra.mxu0 %v1728_v49  ;;  %v1767_v49 = vld [vmem:[#allocation20 + $0x58] sm:$0xff] }
 0x3f1   :  { %3107 = vmatprep.subr.mxu0 %v1727_v50  ;;  %v1835_v50 = vld [vmem:[#allocation20 + $0x278] sm:$0xff] }
 0x3f2   :  { %3108 = vmatpush2.msra.mxu0 %v1726_v52  ;;  %v1834_v52 = vld [vmem:[#allocation20 + $0x270] sm:$0xff] }
 0x3f3   :  { %3109 = vmatprep.subr.mxu0 %v1725_v22  ;;  %v1765_v22 = vld [vmem:[#allocation20 + $0x48] sm:$0xff] }
 0x3f4   :  { %3110 = vmatpush2.msra.mxu0 %v1724_v53  ;;  %v1833_v53 = vld [vmem:[#allocation20 + $0x268] sm:$0xff] }
 0x3f5   :  { %3189 = vmatprep.subr.mxu0 %v1851_v55  ;;  %v1764_v55 = vld [vmem:[#allocation20 + $0x40] sm:$0xff] }
 0x43f   :  { %v2751_v56 = vpop.f32.mrf.mxu0 }
 0x441   :  { %v2753_v58 = vpop.f32.mrf.mxu0 }
 0x46d   :  { %v2822_v59 = vpop.f32.mrf.mxu0 }
 0x46f   :  { %v2824_v60 = vpop.f32.mrf.mxu0 }
 0x471   :  { %v2896_v57 = vpop.f32.mrf.mxu0 }
 0x472   :  { %v10444_v63 = vmax.f32 %v2751_v56, %v2896_v57  ;;  %v1832_v56 = vld [vmem:[#allocation20 + $0x260] sm:$0xff]  ;;  %v1830_v57 = vld [vmem:[#allocation20 + $0x250] sm:$0xff] }
 0x473   :  { %v2898_v61 = vpop.f32.mrf.mxu0 }
 0x474   :  { %v2973_v62 = vmax.f32 %v2753_v58, %v2898_v61  ;;  %v1763_v58 = vld [vmem:[#allocation20 + $0x38] sm:$0xff]  ;;  %v1761_v61 = vld [vmem:[#allocation20 + $0x28] sm:$0xff] }
 0x475   :  { %v2967_v1 = vpop.f32.mrf.mxu0 }
 0x476   :  { %3040 = vmatprep.mubr.f32.mxu1 %v2973_v62  ;;  %v10447_v10 = vmax.f32 %v2822_v59, %v2967_v1  ;;  %v1831_v59 = vld [vmem:[#allocation20 + $0x258] sm:$0xff]  ;;  %v1760_v1 = vld [vmem:[#allocation20 + $0x20] sm:$0xff] }
 0x477   :  { %v2969_v4 = vpop.f32.mrf.mxu0  ;;  %3041 = vmatmul.mubr.f32.vlgmr.msra.gmra.mxu1 %v10444_v63 }
 0x478   :  { %v2975_v6 = vmax.f32 %v2824_v60, %v2969_v4  ;;  %3119 = vmatpush1.msra.mxu1 %v1786_v2  ;;  %3182 = vmatprep.mubr.f32.mxu1 %v2973_v62  ;;  %v1762_v60 = vld [vmem:[#allocation20 + $0x30] sm:$0xff]  ;;  %v1829_v62 = vld [vmem:[#allocation20 + $0x248] sm:$0xff]  ;;  %v1828_v2 = vld [vmem:[#allocation20 + $0x240] sm:$0xff] }
 0x479   :  { %3120 = vmatprep.subr.mxu1 %v1785_v3  ;;  %v1759_v3 = vld [vmem:[#allocation20 + $0x18] sm:$0xff] }
 0x47a   :  { %3121 = vmatpush1.msra.mxu1 %v1784_v41  ;;  %3111 = vmatprep.mubr.f32.mxu0 %v2975_v6  ;;  %v1827_v4 = vld [vmem:[#allocation20 + $0x238] sm:$0xff]  ;;  %v1758_v41 = vld [vmem:[#allocation20 + $0x10] sm:$0xff] }
 0x47b   :  { %3122 = vmatprep.subr.mxu1 %v1783_v9  ;;  %3112 = vmatmul.mubr.f32.vlgmr.msra.gmra.mxu0 %v10447_v10  ;;  %v1757_v9 = vld [vmem:[#allocation20 + $0x8] sm:$0xff] }
 0x47c   :  { %3123 = vmatpush1.msra.mxu1 %v1782_v11  ;;  %3190 = vmatpush1.msra.mxu0 %v1850_v12  ;;  %v1825_v11 = vld [vmem:[#allocation20 + $0x228] sm:$0xff]  ;;  %v1756_v12 = vld [vmem:[#allocation20] sm:$0xff] }
 0x47d   :  { %3124 = vmatprep.subr.mxu1 %v1781_v13  ;;  %3191 = vmatprep.subr.mxu0 %v1849_v14  ;;  %v1824_v13 = vld [vmem:[#allocation20 + $0x220] sm:$0xff]  ;;  %v1819_v14 = vld [vmem:[#allocation20 + $0x1f8] sm:$0xff] }
 0x47e   :  { %3253 = vmatprep.mubr.f32.mxu0 %v2975_v6  ;;  %3125 = vmatpush1.msra.mxu1 %v1780_v15  ;;  %v1826_v6 = vld [vmem:[#allocation20 + $0x230] sm:$0xff]  ;;  %v1823_v15 = vld [vmem:[#allocation20 + $0x218] sm:$0xff] }
 0x47f   :  { %3192 = vmatpush1.msra.mxu0 %v1848_v16  ;;  %3126 = vmatprep.subr.mxu1 %v1779_v17  ;;  %v1818_v16 = vld [vmem:[#allocation20 + $0x1f0] sm:$0xff] }
 0x480   :  { %3193 = vmatprep.subr.mxu0 %v1847_v18  ;;  %3127 = vmatpush1.msra.mxu1 %v1778_v19  ;;  %v1822_v17 = vld [vmem:[#allocation20 + $0x210] sm:$0xff]  ;;  %v1817_v18 = vld [vmem:[#allocation20 + $0x1e8] sm:$0xff] }
 0x481   :  { %3194 = vmatpush1.msra.mxu0 %v1846_v20  ;;  %3128 = vmatprep.subr.mxu1 %v1777_v21  ;;  %v1821_v19 = vld [vmem:[#allocation20 + $0x208] sm:$0xff]  ;;  %v1816_v20 = vld [vmem:[#allocation20 + $0x1e0] sm:$0xff] }
 0x482   :  { %3195 = vmatprep.subr.mxu0 %v1845_v23  ;;  %3129 = vmatpush1.msra.mxu1 %v1776_v25  ;;  %v1820_v21 = vld [vmem:[#allocation20 + $0x200] sm:$0xff]  ;;  %v1815_v23 = vld [vmem:[#allocation20 + $0x1d8] sm:$0xff] }
 0x483   :  { %3196 = vmatpush1.msra.mxu0 %v1844_v26  ;;  %3130 = vmatprep.subr.mxu1 %v1775_v29  ;;  %v1883_v25 = vld [vmem:[#allocation20 + $0x3f8] sm:$0xff]  ;;  %v1814_v26 = vld [vmem:[#allocation20 + $0x1d0] sm:$0xff] }
 0x484   :  { %3197 = vmatprep.subr.mxu0 %v1843_v32  ;;  %3131 = vmatpush1.msra.mxu1 %v1774_v33  ;;  %v1882_v29 = vld [vmem:[#allocation20 + $0x3f0] sm:$0xff]  ;;  %v1813_v32 = vld [vmem:[#allocation20 + $0x1c8] sm:$0xff] }
 0x485   :  { %3198 = vmatpush1.msra.mxu0 %v1842_v35  ;;  %3132 = vmatprep.subr.mxu1 %v1773_v27  ;;  %v1881_v33 = vld [vmem:[#allocation20 + $0x3e8] sm:$0xff]  ;;  %v1812_v35 = vld [vmem:[#allocation20 + $0x1c0] sm:$0xff] }
 0x486   :  { %3199 = vmatprep.subr.mxu0 %v1841_v38  ;;  %3133 = vmatpush1.msra.mxu1 %v1772_v39  ;;  %v1880_v27 = vld [vmem:[#allocation20 + $0x3e0] sm:$0xff]  ;;  %v1811_v38 = vld [vmem:[#allocation20 + $0x1b8] sm:$0xff] }
 0x487   :  { %3200 = vmatpush1.msra.mxu0 %v1840_v40  ;;  %3134 = vmatprep.subr.mxu1 %v1771_v42  ;;  %v1879_v39 = vld [vmem:[#allocation20 + $0x3d8] sm:$0xff]  ;;  %v1810_v40 = vld [vmem:[#allocation20 + $0x1b0] sm:$0xff] }
 0x488   :  { %3201 = vmatprep.subr.mxu0 %v1839_v36  ;;  %3135 = vmatpush1.msra.mxu1 %v1770_v43  ;;  %v1878_v42 = vld [vmem:[#allocation20 + $0x3d0] sm:$0xff]  ;;  %v1809_v36 = vld [vmem:[#allocation20 + $0x1a8] sm:$0xff] }
 0x489   :  { %3202 = vmatpush1.msra.mxu0 %v1838_v44  ;;  %3136 = vmatprep.subr.mxu1 %v1769_v45  ;;  %v1877_v43 = vld [vmem:[#allocation20 + $0x3c8] sm:$0xff]  ;;  %v1808_v44 = vld [vmem:[#allocation20 + $0x1a0] sm:$0xff] }
 0x48a   :  { %3203 = vmatprep.subr.mxu0 %v1837_v46  ;;  %3137 = vmatpush1.msra.mxu1 %v1768_v47  ;;  %v1876_v45 = vld [vmem:[#allocation20 + $0x3c0] sm:$0xff]  ;;  %v1807_v46 = vld [vmem:[#allocation20 + $0x198] sm:$0xff] }
 0x48b   :  { %3204 = vmatpush1.msra.mxu0 %v1836_v48  ;;  %3138 = vmatprep.subr.mxu1 %v1767_v49  ;;  %v1875_v47 = vld [vmem:[#allocation20 + $0x3b8] sm:$0xff]  ;;  %v1806_v48 = vld [vmem:[#allocation20 + $0x190] sm:$0xff] }
 0x48c   :  { %3205 = vmatprep.subr.mxu0 %v1835_v50  ;;  %3139 = vmatpush1.msra.mxu1 %v1766_v51  ;;  %v1874_v49 = vld [vmem:[#allocation20 + $0x3b0] sm:$0xff]  ;;  %v1805_v50 = vld [vmem:[#allocation20 + $0x188] sm:$0xff] }
 0x48d   :  { %3206 = vmatpush1.msra.mxu0 %v1834_v52  ;;  %3140 = vmatprep.subr.mxu1 %v1765_v22  ;;  %v1873_v51 = vld [vmem:[#allocation20 + $0x3a8] sm:$0xff]  ;;  %v1804_v52 = vld [vmem:[#allocation20 + $0x180] sm:$0xff] }
 0x48e   :  { %3207 = vmatprep.subr.mxu0 %v1833_v53  ;;  %3141 = vmatpush1.msra.mxu1 %v1764_v55  ;;  %v1872_v22 = vld [vmem:[#allocation20 + $0x3a0] sm:$0xff]  ;;  %v1803_v53 = vld [vmem:[#allocation20 + $0x178] sm:$0xff] }
 0x48f   :  { %3208 = vmatpush1.msra.mxu0 %v1832_v56  ;;  %3142 = vmatprep.subr.mxu1 %v1763_v58  ;;  %v1871_v55 = vld [vmem:[#allocation20 + $0x398] sm:$0xff]  ;;  %v1802_v56 = vld [vmem:[#allocation20 + $0x170] sm:$0xff] }
 0x490   :  { %3209 = vmatprep.subr.mxu0 %v1831_v59  ;;  %3143 = vmatpush1.msra.mxu1 %v1762_v60  ;;  %v1870_v58 = vld [vmem:[#allocation20 + $0x390] sm:$0xff]  ;;  %v1801_v59 = vld [vmem:[#allocation20 + $0x168] sm:$0xff] }
 0x491   :  { %3210 = vmatpush1.msra.mxu0 %v1830_v57  ;;  %3144 = vmatprep.subr.mxu1 %v1761_v61  ;;  %v1869_v60 = vld [vmem:[#allocation20 + $0x388] sm:$0xff]  ;;  %v1800_v57 = vld [vmem:[#allocation20 + $0x160] sm:$0xff] }
 0x492   :  { %3211 = vmatprep.subr.mxu0 %v1829_v62  ;;  %3145 = vmatpush1.msra.mxu1 %v1760_v1  ;;  %v1868_v61 = vld [vmem:[#allocation20 + $0x380] sm:$0xff]  ;;  %v1799_v62 = vld [vmem:[#allocation20 + $0x158] sm:$0xff] }
 0x493   :  { %3212 = vmatpush1.msra.mxu0 %v1828_v2  ;;  %3146 = vmatprep.subr.mxu1 %v1759_v3  ;;  %v1867_v1 = vld [vmem:[#allocation20 + $0x378] sm:$0xff]  ;;  %v1798_v2 = vld [vmem:[#allocation20 + $0x150] sm:$0xff] }
 0x494   :  { %3213 = vmatprep.subr.mxu0 %v1827_v4  ;;  %3147 = vmatpush1.msra.mxu1 %v1758_v41  ;;  %v1866_v3 = vld [vmem:[#allocation20 + $0x370] sm:$0xff]  ;;  %v1797_v4 = vld [vmem:[#allocation20 + $0x148] sm:$0xff] }
 0x495   :  { %3214 = vmatpush1.msra.mxu0 %v1826_v6  ;;  %3148 = vmatprep.subr.mxu1 %v1757_v9  ;;  %v1865_v41 = vld [vmem:[#allocation20 + $0x368] sm:$0xff]  ;;  %v1796_v6 = vld [vmem:[#allocation20 + $0x140] sm:$0xff] }
 0x496   :  { %3215 = vmatprep.subr.mxu0 %v1825_v11  ;;  %3149 = vmatpush1.msra.mxu1 %v1756_v12  ;;  %v1864_v9 = vld [vmem:[#allocation20 + $0x360] sm:$0xff]  ;;  %v1795_v11 = vld [vmem:[#allocation20 + $0x138] sm:$0xff] }
 0x497   :  { %3216 = vmatpush1.msra.mxu0 %v1824_v13  ;;  %3150 = vmatprep.subr.mxu1 %v1819_v14  ;;  %v1863_v12 = vld [vmem:[#allocation20 + $0x358] sm:$0xff]  ;;  %v1794_v13 = vld [vmem:[#allocation20 + $0x130] sm:$0xff] }
 0x498   :  { %3217 = vmatprep.subr.mxu0 %v1823_v15  ;;  %3151 = vmatpush2.msra.mxu1 %v1818_v16  ;;  %v1862_v14 = vld [vmem:[#allocation20 + $0x350] sm:$0xff]  ;;  %v1793_v15 = vld [vmem:[#allocation20 + $0x128] sm:$0xff] }
 0x499   :  { %3218 = vmatpush1.msra.mxu0 %v1822_v17  ;;  %3152 = vmatprep.subr.mxu1 %v1817_v18  ;;  %v1861_v16 = vld [vmem:[#allocation20 + $0x348] sm:$0xff]  ;;  %v1792_v17 = vld [vmem:[#allocation20 + $0x120] sm:$0xff] }
 0x49a   :  { %3219 = vmatprep.subr.mxu0 %v1821_v19  ;;  %3153 = vmatpush2.msra.mxu1 %v1816_v20  ;;  %v1860_v18 = vld [vmem:[#allocation20 + $0x340] sm:$0xff]  ;;  %v1791_v19 = vld [vmem:[#allocation20 + $0x118] sm:$0xff] }
 0x49b   :  { %3220 = vmatpush1.msra.mxu0 %v1820_v21  ;;  %3154 = vmatprep.subr.mxu1 %v1815_v23  ;;  %v1859_v20 = vld [vmem:[#allocation20 + $0x338] sm:$0xff]  ;;  %v1790_v21 = vld [vmem:[#allocation20 + $0x110] sm:$0xff] }
 0x49c   :  { %3221 = vmatprep.subr.mxu0 %v1883_v25  ;;  %3155 = vmatpush2.msra.mxu1 %v1814_v26  ;;  %v1858_v23 = vld [vmem:[#allocation20 + $0x330] sm:$0xff]  ;;  %v1789_v25 = vld [vmem:[#allocation20 + $0x108] sm:$0xff] }
 0x49d   :  { %3222 = vmatpush2.msra.mxu0 %v1882_v29  ;;  %3156 = vmatprep.subr.mxu1 %v1813_v32  ;;  %v1857_v26 = vld [vmem:[#allocation20 + $0x328] sm:$0xff]  ;;  %v1788_v29 = vld [vmem:[#allocation20 + $0x100] sm:$0xff] }
 0x49e   :  { %3223 = vmatprep.subr.mxu0 %v1881_v33  ;;  %3157 = vmatpush2.msra.mxu1 %v1812_v35  ;;  %v1856_v32 = vld [vmem:[#allocation20 + $0x320] sm:$0xff]  ;;  %v1855_v33 = vld [vmem:[#allocation20 + $0x318] sm:$0xff]  ;;  %v1854_v35 = vld [vmem:[#allocation20 + $0x310] sm:$0xff] }
 0x49f   :  { %3224 = vmatpush2.msra.mxu0 %v1880_v27  ;;  %3158 = vmatprep.subr.mxu1 %v1811_v38  ;;  %v1853_v27 = vld [vmem:[#allocation20 + $0x308] sm:$0xff]  ;;  %v1852_v38 = vld [vmem:[#allocation20 + $0x300] sm:$0xff] }
 0x4a0   :  { %3225 = vmatprep.subr.mxu0 %v1879_v39  ;;  %3159 = vmatpush2.msra.mxu1 %v1810_v40  ;;  %v1429_v39 = vld [vmem:[#allocation23 + $0x1e8] sm:$0xff]  ;;  %v1431_v40 = vld [vmem:[#allocation23 + $0x1f8] sm:$0xff] }
 0x4a1   :  { %3226 = vmatpush2.msra.mxu0 %v1878_v42  ;;  %3160 = vmatprep.subr.mxu1 %v1809_v36  ;;  %v1428_v42 = vld [vmem:[#allocation23 + $0x1e0] sm:$0xff]  ;;  %v1430_v36 = vld [vmem:[#allocation23 + $0x1f0] sm:$0xff] }
 0x4a2   :  { %3227 = vmatprep.subr.mxu0 %v1877_v43  ;;  %3161 = vmatpush2.msra.mxu1 %v1808_v44  ;;  %v1425_v43 = vld [vmem:[#allocation23 + $0x1c8] sm:$0xff]  ;;  %v1427_v44 = vld [vmem:[#allocation23 + $0x1d8] sm:$0xff] }
 0x4a3   :  { %3228 = vmatpush2.msra.mxu0 %v1876_v45  ;;  %3162 = vmatprep.subr.mxu1 %v1807_v46  ;;  %v1424_v45 = vld [vmem:[#allocation23 + $0x1c0] sm:$0xff]  ;;  %v1421_v46 = vld [vmem:[#allocation23 + $0x1a8] sm:$0xff] }
 0x4a4   :  { %3229 = vmatprep.subr.mxu0 %v1875_v47  ;;  %3163 = vmatpush2.msra.mxu1 %v1806_v48  ;;  %v1423_v47 = vld [vmem:[#allocation23 + $0x1b8] sm:$0xff]  ;;  %v1420_v48 = vld [vmem:[#allocation23 + $0x1a0] sm:$0xff] }
 0x4a5   :  { %3230 = vmatpush2.msra.mxu0 %v1874_v49  ;;  %3164 = vmatprep.subr.mxu1 %v1805_v50  ;;  %v1422_v49 = vld [vmem:[#allocation23 + $0x1b0] sm:$0xff]  ;;  %v1419_v50 = vld [vmem:[#allocation23 + $0x198] sm:$0xff] }
 0x4a6   :  { %3231 = vmatprep.subr.mxu0 %v1873_v51  ;;  %3165 = vmatpush2.msra.mxu1 %v1804_v52  ;;  %v1416_v51 = vld [vmem:[#allocation23 + $0x180] sm:$0xff]  ;;  %v1418_v52 = vld [vmem:[#allocation23 + $0x190] sm:$0xff] }
 0x4a7   :  { %3232 = vmatpush2.msra.mxu0 %v1872_v22  ;;  %3166 = vmatprep.subr.mxu1 %v1803_v53  ;;  %v1413_v22 = vld [vmem:[#allocation23 + $0x168] sm:$0xff]  ;;  %v1415_v53 = vld [vmem:[#allocation23 + $0x178] sm:$0xff] }
 0x4a8   :  { %3233 = vmatprep.subr.mxu0 %v1871_v55  ;;  %3167 = vmatpush2.msra.mxu1 %v1802_v56  ;;  %v1412_v55 = vld [vmem:[#allocation23 + $0x160] sm:$0xff]  ;;  %v1414_v56 = vld [vmem:[#allocation23 + $0x170] sm:$0xff] }
 0x4a9   :  { %3234 = vmatpush2.msra.mxu0 %v1870_v58  ;;  %3168 = vmatprep.subr.mxu1 %v1801_v59  ;;  %v1409_v58 = vld [vmem:[#allocation23 + $0x148] sm:$0xff]  ;;  %v1411_v59 = vld [vmem:[#allocation23 + $0x158] sm:$0xff] }
 0x4aa   :  { %3235 = vmatprep.subr.mxu0 %v1869_v60  ;;  %3169 = vmatpush2.msra.mxu1 %v1800_v57  ;;  %v1408_v60 = vld [vmem:[#allocation23 + $0x140] sm:$0xff]  ;;  %v1410_v57 = vld [vmem:[#allocation23 + $0x150] sm:$0xff] }
 0x4ab   :  { %3236 = vmatpush2.msra.mxu0 %v1868_v61  ;;  %3170 = vmatprep.subr.mxu1 %v1799_v62  ;;  %v1405_v61 = vld [vmem:[#allocation23 + $0x128] sm:$0xff]  ;;  %v1407_v62 = vld [vmem:[#allocation23 + $0x138] sm:$0xff] }
 0x4ac   :  { %3237 = vmatprep.subr.mxu0 %v1867_v1  ;;  %3171 = vmatpush2.msra.mxu1 %v1798_v2  ;;  %v1404_v1 = vld [vmem:[#allocation23 + $0x120] sm:$0xff]  ;;  %v1406_v2 = vld [vmem:[#allocation23 + $0x130] sm:$0xff] }
 0x4ad   :  { %3238 = vmatpush2.msra.mxu0 %v1866_v3  ;;  %3172 = vmatprep.subr.mxu1 %v1797_v4  ;;  %v1401_v3 = vld [vmem:[#allocation23 + $0x108] sm:$0xff]  ;;  %v1403_v4 = vld [vmem:[#allocation23 + $0x118] sm:$0xff] }
 0x4ae   :  { %3239 = vmatprep.subr.mxu0 %v1865_v41  ;;  %3173 = vmatpush2.msra.mxu1 %v1796_v6  ;;  %v1400_v41 = vld [vmem:[#allocation23 + $0x100] sm:$0xff]  ;;  %v1402_v6 = vld [vmem:[#allocation23 + $0x110] sm:$0xff] }
 0x4af   :  { %3240 = vmatpush2.msra.mxu0 %v1864_v9  ;;  %3174 = vmatprep.subr.mxu1 %v1795_v11  ;;  %v1397_v9 = vld [vmem:[#allocation23 + $0xe8] sm:$0xff]  ;;  %v1399_v11 = vld [vmem:[#allocation23 + $0xf8] sm:$0xff] }
 0x4b0   :  { %3241 = vmatprep.subr.mxu0 %v1863_v12  ;;  %3175 = vmatpush2.msra.mxu1 %v1794_v13  ;;  %v1396_v12 = vld [vmem:[#allocation23 + $0xe0] sm:$0xff]  ;;  %v1398_v13 = vld [vmem:[#allocation23 + $0xf0] sm:$0xff] }
 0x4b1   :  { %3242 = vmatpush2.msra.mxu0 %v1862_v14  ;;  %3176 = vmatprep.subr.mxu1 %v1793_v15  ;;  %v1393_v14 = vld [vmem:[#allocation23 + $0xc8] sm:$0xff]  ;;  %v1395_v15 = vld [vmem:[#allocation23 + $0xd8] sm:$0xff] }
 0x4b2   :  { %3243 = vmatprep.subr.mxu0 %v1861_v16  ;;  %3177 = vmatpush2.msra.mxu1 %v1792_v17  ;;  %v1392_v16 = vld [vmem:[#allocation23 + $0xc0] sm:$0xff]  ;;  %v1394_v17 = vld [vmem:[#allocation23 + $0xd0] sm:$0xff] }
 0x4b3   :  { %3244 = vmatpush2.msra.mxu0 %v1860_v18  ;;  %3178 = vmatprep.subr.mxu1 %v1791_v19  ;;  %v1389_v18 = vld [vmem:[#allocation23 + $0xa8] sm:$0xff]  ;;  %v1391_v19 = vld [vmem:[#allocation23 + $0xb8] sm:$0xff] }
 0x4b4   :  { %3245 = vmatprep.subr.mxu0 %v1859_v20  ;;  %3179 = vmatpush2.msra.mxu1 %v1790_v21  ;;  %v1388_v20 = vld [vmem:[#allocation23 + $0xa0] sm:$0xff]  ;;  %v1390_v21 = vld [vmem:[#allocation23 + $0xb0] sm:$0xff] }
 0x4b5   :  { %3246 = vmatpush2.msra.mxu0 %v1858_v23  ;;  %3180 = vmatprep.subr.mxu1 %v1789_v25  ;;  %v1385_v23 = vld [vmem:[#allocation23 + $0x88] sm:$0xff]  ;;  %v1387_v25 = vld [vmem:[#allocation23 + $0x98] sm:$0xff] }
 0x4b6   :  { %3247 = vmatprep.subr.mxu0 %v1857_v26  ;;  %3181 = vmatpush2.msra.mxu1 %v1788_v29  ;;  %v1384_v26 = vld [vmem:[#allocation23 + $0x80] sm:$0xff]  ;;  %v1386_v29 = vld [vmem:[#allocation23 + $0x90] sm:$0xff] }
 0x4b7   :  { %3248 = vmatpush2.msra.mxu0 %v1856_v32  ;;  %3183 = vmatmul.mubr.f32.vlgmr.msra.gmra.mxu1 %v10444_v63  ;;  %v1426_v63 = vld [vmem:[#allocation23 + $0x1d0] sm:$0xff]  ;;  %v1381_v32 = vld [vmem:[#allocation23 + $0x68] sm:$0xff] }
 0x4b8   :  { %3249 = vmatprep.subr.mxu0 %v1855_v33  ;;  %3276 = vmatprep.subr.mxu1 %v1429_v39  ;;  %v1383_v33 = vld [vmem:[#allocation23 + $0x78] sm:$0xff] }
 0x4b9   :  { %3250 = vmatpush2.msra.mxu0 %v1854_v35  ;;  %3277 = vmatpush1.msra.mxu1 %v1428_v42  ;;  %v1380_v35 = vld [vmem:[#allocation23 + $0x60] sm:$0xff]  ;;  %v1379_v39 = vld [vmem:[#allocation23 + $0x58] sm:$0xff]  ;;  %v1378_v42 = vld [vmem:[#allocation23 + $0x50] sm:$0xff] }
 0x4ba   :  { %3251 = vmatprep.subr.mxu0 %v1853_v27  ;;  %3278 = vmatprep.subr.mxu1 %v1425_v43  ;;  %v1382_v27 = vld [vmem:[#allocation23 + $0x70] sm:$0xff]  ;;  %v1375_v43 = vld [vmem:[#allocation23 + $0x38] sm:$0xff] }
 0x4bb   :  { %3252 = vmatpush2.msra.mxu0 %v1852_v38  ;;  %3279 = vmatpush1.msra.mxu1 %v1424_v45  ;;  %v1377_v38 = vld [vmem:[#allocation23 + $0x48] sm:$0xff]  ;;  %v1374_v45 = vld [vmem:[#allocation23 + $0x30] sm:$0xff] }
 0x4bc   :  { %3254 = vmatmul.mubr.f32.vlgmr.msra.gmra.mxu0 %v10447_v10  ;;  %3347 = vmatprep.subr.mxu0 %v1431_v40  ;;  %v1417_v10 = vld [vmem:[#allocation23 + $0x188] sm:$0xff]  ;;  %v1376_v40 = vld [vmem:[#allocation23 + $0x40] sm:$0xff] }
 0x4bd   :  { %3348 = vmatpush1.msra.mxu0 %v1430_v36  ;;  %3280 = vmatprep.subr.mxu1 %v1421_v46  ;;  %v1373_v36 = vld [vmem:[#allocation23 + $0x28] sm:$0xff]  ;;  %v1371_v46 = vld [vmem:[#allocation23 + $0x18] sm:$0xff] }
 0x4be   :  { %3349 = vmatprep.subr.mxu0 %v1427_v44  ;;  %3281 = vmatpush1.msra.mxu1 %v1420_v48  ;;  %v1372_v44 = vld [vmem:[#allocation23 + $0x20] sm:$0xff]  ;;  %v1370_v48 = vld [vmem:[#allocation23 + $0x10] sm:$0xff] }
 0x4bf   :  { %3350 = vmatpush1.msra.mxu0 %v1426_v63  ;;  %3282 = vmatprep.subr.mxu1 %v1417_v10  ;;  %v1369_v63 = vld [vmem:[#allocation23 + $0x8] sm:$0xff]  ;;  %v1495_v10 = vld [vmem:[#allocation23 + $0x3f8] sm:$0xff] }
 0x4c0   :  { %3351 = vmatprep.subr.mxu0 %v1423_v47  ;;  %3283 = vmatpush1.msra.mxu1 %v1416_v51  ;;  %v1368_v47 = vld [vmem:[#allocation23] sm:$0xff]  ;;  %v1494_v51 = vld [vmem:[#allocation23 + $0x3f0] sm:$0xff] }
 0x4c1   :  { %3352 = vmatpush1.msra.mxu0 %v1422_v49  ;;  %3284 = vmatprep.subr.mxu1 %v1413_v22  ;;  %v1493_v49 = vld [vmem:[#allocation23 + $0x3e8] sm:$0xff]  ;;  %v1491_v22 = vld [vmem:[#allocation23 + $0x3d8] sm:$0xff] }
 0x4c2   :  { %3353 = vmatprep.subr.mxu0 %v1419_v50  ;;  %3285 = vmatpush1.msra.mxu1 %v1412_v55  ;;  %v1492_v50 = vld [vmem:[#allocation23 + $0x3e0] sm:$0xff]  ;;  %v1490_v55 = vld [vmem:[#allocation23 + $0x3d0] sm:$0xff] }
 0x4c3   :  { %3354 = vmatpush1.msra.mxu0 %v1418_v52  ;;  %3286 = vmatprep.subr.mxu1 %v1409_v58  ;;  %v1489_v52 = vld [vmem:[#allocation23 + $0x3c8] sm:$0xff]  ;;  %v1487_v58 = vld [vmem:[#allocation23 + $0x3b8] sm:$0xff] }
 0x4c4   :  { %3355 = vmatprep.subr.mxu0 %v1415_v53  ;;  %3287 = vmatpush1.msra.mxu1 %v1408_v60  ;;  %v1488_v53 = vld [vmem:[#allocation23 + $0x3c0] sm:$0xff]  ;;  %v1486_v60 = vld [vmem:[#allocation23 + $0x3b0] sm:$0xff] }
 0x4c5   :  { %3356 = vmatpush1.msra.mxu0 %v1414_v56  ;;  %3288 = vmatprep.subr.mxu1 %v1405_v61  ;;  %v1485_v56 = vld [vmem:[#allocation23 + $0x3a8] sm:$0xff]  ;;  %v1483_v61 = vld [vmem:[#allocation23 + $0x398] sm:$0xff] }
 0x4c6   :  { %3357 = vmatprep.subr.mxu0 %v1411_v59  ;;  %3289 = vmatpush1.msra.mxu1 %v1404_v1  ;;  %v1484_v59 = vld [vmem:[#allocation23 + $0x3a0] sm:$0xff]  ;;  %v1482_v1 = vld [vmem:[#allocation23 + $0x390] sm:$0xff] }
 0x4c7   :  { %3358 = vmatpush1.msra.mxu0 %v1410_v57  ;;  %3290 = vmatprep.subr.mxu1 %v1401_v3  ;;  %v1481_v57 = vld [vmem:[#allocation23 + $0x388] sm:$0xff]  ;;  %v1479_v3 = vld [vmem:[#allocation23 + $0x378] sm:$0xff] }
 0x4c8   :  { %3359 = vmatprep.subr.mxu0 %v1407_v62  ;;  %3291 = vmatpush1.msra.mxu1 %v1400_v41  ;;  %v1480_v62 = vld [vmem:[#allocation23 + $0x380] sm:$0xff]  ;;  %v1478_v41 = vld [vmem:[#allocation23 + $0x370] sm:$0xff] }
 0x4c9   :  { %3360 = vmatpush1.msra.mxu0 %v1406_v2  ;;  %3292 = vmatprep.subr.mxu1 %v1397_v9  ;;  %v1477_v2 = vld [vmem:[#allocation23 + $0x368] sm:$0xff]  ;;  %v1475_v9 = vld [vmem:[#allocation23 + $0x358] sm:$0xff] }
 0x4ca   :  { %3361 = vmatprep.subr.mxu0 %v1403_v4  ;;  %3293 = vmatpush1.msra.mxu1 %v1396_v12  ;;  %v1476_v4 = vld [vmem:[#allocation23 + $0x360] sm:$0xff]  ;;  %v1474_v12 = vld [vmem:[#allocation23 + $0x350] sm:$0xff] }
 0x4cb   :  { %3362 = vmatpush1.msra.mxu0 %v1402_v6  ;;  %3294 = vmatprep.subr.mxu1 %v1393_v14  ;;  %v1473_v6 = vld [vmem:[#allocation23 + $0x348] sm:$0xff]  ;;  %v1471_v14 = vld [vmem:[#allocation23 + $0x338] sm:$0xff] }
 0x4cc   :  { %3363 = vmatprep.subr.mxu0 %v1399_v11  ;;  %3295 = vmatpush1.msra.mxu1 %v1392_v16  ;;  %v1472_v11 = vld [vmem:[#allocation23 + $0x340] sm:$0xff]  ;;  %v1470_v16 = vld [vmem:[#allocation23 + $0x330] sm:$0xff] }
 0x4cd   :  { %3364 = vmatpush1.msra.mxu0 %v1398_v13  ;;  %3296 = vmatprep.subr.mxu1 %v1389_v18  ;;  %v1469_v13 = vld [vmem:[#allocation23 + $0x328] sm:$0xff]  ;;  %v1467_v18 = vld [vmem:[#allocation23 + $0x318] sm:$0xff] }
 0x4ce   :  { %3365 = vmatprep.subr.mxu0 %v1395_v15  ;;  %3297 = vmatpush1.msra.mxu1 %v1388_v20  ;;  %v1468_v15 = vld [vmem:[#allocation23 + $0x320] sm:$0xff]  ;;  %v1466_v20 = vld [vmem:[#allocation23 + $0x310] sm:$0xff] }
 0x4cf   :  { %3366 = vmatpush1.msra.mxu0 %v1394_v17  ;;  %3298 = vmatprep.subr.mxu1 %v1385_v23  ;;  %v1465_v17 = vld [vmem:[#allocation23 + $0x308] sm:$0xff]  ;;  %v1463_v23 = vld [vmem:[#allocation23 + $0x2f8] sm:$0xff] }
 0x4d0   :  { %3367 = vmatprep.subr.mxu0 %v1391_v19  ;;  %3299 = vmatpush1.msra.mxu1 %v1384_v26  ;;  %v1464_v19 = vld [vmem:[#allocation23 + $0x300] sm:$0xff]  ;;  %v1462_v26 = vld [vmem:[#allocation23 + $0x2f0] sm:$0xff] }
 0x4d1   :  { %3368 = vmatpush1.msra.mxu0 %v1390_v21  ;;  %3300 = vmatprep.subr.mxu1 %v1381_v32  ;;  %v1461_v21 = vld [vmem:[#allocation23 + $0x2e8] sm:$0xff]  ;;  %v1459_v32 = vld [vmem:[#allocation23 + $0x2d8] sm:$0xff] }
 0x4d2   :  { %3369 = vmatprep.subr.mxu0 %v1387_v25  ;;  %3301 = vmatpush1.msra.mxu1 %v1380_v35  ;;  %v1460_v25 = vld [vmem:[#allocation23 + $0x2e0] sm:$0xff]  ;;  %v1458_v35 = vld [vmem:[#allocation23 + $0x2d0] sm:$0xff] }
 0x4d3   :  { %3370 = vmatpush1.msra.mxu0 %v1386_v29  ;;  %3302 = vmatprep.subr.mxu1 %v1377_v38  ;;  %v1457_v29 = vld [vmem:[#allocation23 + $0x2c8] sm:$0xff]  ;;  %v1455_v38 = vld [vmem:[#allocation23 + $0x2b8] sm:$0xff] }
 0x4d4   :  { %3371 = vmatprep.subr.mxu0 %v1383_v33  ;;  %3303 = vmatpush1.msra.mxu1 %v1376_v40  ;;  %v1456_v33 = vld [vmem:[#allocation23 + $0x2c0] sm:$0xff]  ;;  %v1454_v40 = vld [vmem:[#allocation23 + $0x2b0] sm:$0xff] }
 0x4d5   :  { %3372 = vmatpush1.msra.mxu0 %v1382_v27  ;;  %3304 = vmatprep.subr.mxu1 %v1373_v36  ;;  %v1453_v27 = vld [vmem:[#allocation23 + $0x2a8] sm:$0xff]  ;;  %v1451_v36 = vld [vmem:[#allocation23 + $0x298] sm:$0xff] }
 0x4d6   :  { %3373 = vmatprep.subr.mxu0 %v1379_v39  ;;  %3305 = vmatpush1.msra.mxu1 %v1372_v44  ;;  %v1452_v39 = vld [vmem:[#allocation23 + $0x2a0] sm:$0xff]  ;;  %v1450_v44 = vld [vmem:[#allocation23 + $0x290] sm:$0xff] }
 0x4d7   :  { %3374 = vmatpush1.msra.mxu0 %v1378_v42  ;;  %3306 = vmatprep.subr.mxu1 %v1369_v63  ;;  %v1449_v42 = vld [vmem:[#allocation23 + $0x288] sm:$0xff]  ;;  %v1447_v63 = vld [vmem:[#allocation23 + $0x278] sm:$0xff] }
 0x4d8   :  { %3375 = vmatprep.subr.mxu0 %v1375_v43  ;;  %3307 = vmatpush1.msra.mxu1 %v1368_v47  ;;  %v1448_v43 = vld [vmem:[#allocation23 + $0x280] sm:$0xff]  ;;  %v1446_v47 = vld [vmem:[#allocation23 + $0x270] sm:$0xff] }
 0x4d9   :  { %3376 = vmatpush1.msra.mxu0 %v1374_v45  ;;  %3308 = vmatprep.subr.mxu1 %v1493_v49  ;;  %v1445_v45 = vld [vmem:[#allocation23 + $0x268] sm:$0xff]  ;;  %v1443_v49 = vld [vmem:[#allocation23 + $0x258] sm:$0xff] }
 0x4da   :  { %3377 = vmatprep.subr.mxu0 %v1371_v46  ;;  %3309 = vmatpush2.msra.mxu1 %v1492_v50  ;;  %v1444_v46 = vld [vmem:[#allocation23 + $0x260] sm:$0xff]  ;;  %v1442_v50 = vld [vmem:[#allocation23 + $0x250] sm:$0xff] }
 0x4db   :  { %3378 = vmatpush1.msra.mxu0 %v1370_v48  ;;  %3310 = vmatprep.subr.mxu1 %v1489_v52  ;;  %v1441_v48 = vld [vmem:[#allocation23 + $0x248] sm:$0xff]  ;;  %v1439_v52 = vld [vmem:[#allocation23 + $0x238] sm:$0xff] }
 0x4dc   :  { %3379 = vmatprep.subr.mxu0 %v1495_v10  ;;  %3311 = vmatpush2.msra.mxu1 %v1488_v53  ;;  %v1440_v10 = vld [vmem:[#allocation23 + $0x240] sm:$0xff]  ;;  %v1438_v53 = vld [vmem:[#allocation23 + $0x230] sm:$0xff] }
 0x4dd   :  { %3380 = vmatpush2.msra.mxu0 %v1494_v51  ;;  %3312 = vmatprep.subr.mxu1 %v1485_v56  ;;  %v1437_v51 = vld [vmem:[#allocation23 + $0x228] sm:$0xff]  ;;  %v1435_v56 = vld [vmem:[#allocation23 + $0x218] sm:$0xff] }
 0x4de   :  { %3381 = vmatprep.subr.mxu0 %v1491_v22  ;;  %3313 = vmatpush2.msra.mxu1 %v1484_v59  ;;  %v1436_v22 = vld [vmem:[#allocation23 + $0x220] sm:$0xff]  ;;  %v1434_v59 = vld [vmem:[#allocation23 + $0x210] sm:$0xff] }
 0x4df   :  { %3382 = vmatpush2.msra.mxu0 %v1490_v55  ;;  %3314 = vmatprep.subr.mxu1 %v1481_v57  ;;  %v1433_v55 = vld [vmem:[#allocation23 + $0x208] sm:$0xff]  ;;  %v1303_v57 = vld [vmem:[#allocation22 + $0x1f8] sm:$0xff] }
 0x4e0   :  { %3383 = vmatprep.subr.mxu0 %v1487_v58  ;;  %3315 = vmatpush2.msra.mxu1 %v1480_v62  ;;  %v1432_v58 = vld [vmem:[#allocation23 + $0x200] sm:$0xff] }
 0x4e1   :  { %3384 = vmatpush2.msra.mxu0 %v1486_v60  ;;  %3316 = vmatprep.subr.mxu1 %v1477_v2  ;;  %v1301_v60 = vld [vmem:[#allocation22 + $0x1e8] sm:$0xff] }
 0x4e2   :  { %3385 = vmatprep.subr.mxu0 %v1483_v61  ;;  %3317 = vmatpush2.msra.mxu1 %v1476_v4 }
 0x4e3   :  { %3386 = vmatpush2.msra.mxu0 %v1482_v1  ;;  %3318 = vmatprep.subr.mxu1 %v1473_v6 }
 0x4e4   :  { %3387 = vmatprep.subr.mxu0 %v1479_v3  ;;  %3319 = vmatpush2.msra.mxu1 %v1472_v11 }
 0x4e5   :  { %3388 = vmatpush2.msra.mxu0 %v1478_v41  ;;  %3320 = vmatprep.subr.mxu1 %v1469_v13 }
 0x4e6   :  { %3389 = vmatprep.subr.mxu0 %v1475_v9  ;;  %3321 = vmatpush2.msra.mxu1 %v1468_v15 }
 0x4e7   :  { %3390 = vmatpush2.msra.mxu0 %v1474_v12  ;;  %3322 = vmatprep.subr.mxu1 %v1465_v17  ;;  %v1302_v17 = vld [vmem:[#allocation22 + $0x1f0] sm:$0xff] }
 0x4e8   :  { %3391 = vmatprep.subr.mxu0 %v1471_v14  ;;  %3323 = vmatpush2.msra.mxu1 %v1464_v19 }
 0x4e9   :  { %3392 = vmatpush2.msra.mxu0 %v1470_v16  ;;  %3324 = vmatprep.subr.mxu1 %v1461_v21  ;;  %v1300_v16 = vld [vmem:[#allocation22 + $0x1e0] sm:$0xff]  ;;  %v1299_v21 = vld [vmem:[#allocation22 + $0x1d8] sm:$0xff] }
 0x4ea   :  { %3393 = vmatprep.subr.mxu0 %v1467_v18  ;;  %3325 = vmatpush2.msra.mxu1 %v1460_v25  ;;  %v1297_v18 = vld [vmem:[#allocation22 + $0x1c8] sm:$0xff]  ;;  %v1298_v25 = vld [vmem:[#allocation22 + $0x1d0] sm:$0xff] }
 0x4eb   :  { %3394 = vmatpush2.msra.mxu0 %v1466_v20  ;;  %3326 = vmatprep.subr.mxu1 %v1457_v29  ;;  %v1295_v29 = vld [vmem:[#allocation22 + $0x1b8] sm:$0xff]  ;;  %v8878_v20 = vld [vmem:[#allocation25 + $0x1c0] sm:$0xff] }
 0x4ec   :  { %3395 = vmatprep.subr.mxu0 %v1463_v23  ;;  %3327 = vmatpush2.msra.mxu1 %v1456_v33  ;;  %v1296_v23 = vld [vmem:[#allocation22 + $0x1c0] sm:$0xff]  ;;  %v1294_v33 = vld [vmem:[#allocation22 + $0x1b0] sm:$0xff] }
 0x4ed   :  { %3396 = vmatpush2.msra.mxu0 %v1462_v26  ;;  %3328 = vmatprep.subr.mxu1 %v1453_v27  ;;  %v1293_v26 = vld [vmem:[#allocation22 + $0x1a8] sm:$0xff]  ;;  %v1291_v27 = vld [vmem:[#allocation22 + $0x198] sm:$0xff] }
 0x4ee   :  { %3397 = vmatprep.subr.mxu0 %v1459_v32  ;;  %3329 = vmatpush2.msra.mxu1 %v1452_v39  ;;  %v1292_v32 = vld [vmem:[#allocation22 + $0x1a0] sm:$0xff]  ;;  %v1290_v39 = vld [vmem:[#allocation22 + $0x190] sm:$0xff] }
 0x4ef   :  { %3398 = vmatpush2.msra.mxu0 %v1458_v35  ;;  %3330 = vmatprep.subr.mxu1 %v1449_v42  ;;  %v1289_v35 = vld [vmem:[#allocation22 + $0x188] sm:$0xff]  ;;  %v1287_v42 = vld [vmem:[#allocation22 + $0x178] sm:$0xff] }
 0x4f0   :  { %3399 = vmatprep.subr.mxu0 %v1455_v38  ;;  %3331 = vmatpush2.msra.mxu1 %v1448_v43  ;;  %v1288_v38 = vld [vmem:[#allocation22 + $0x180] sm:$0xff]  ;;  %v1286_v43 = vld [vmem:[#allocation22 + $0x170] sm:$0xff] }
 0x4f1   :  { %3400 = vmatpush2.msra.mxu0 %v1454_v40  ;;  %3332 = vmatprep.subr.mxu1 %v1445_v45  ;;  %v1285_v40 = vld [vmem:[#allocation22 + $0x168] sm:$0xff]  ;;  %v1283_v45 = vld [vmem:[#allocation22 + $0x158] sm:$0xff] }
 0x4f2   :  { %3401 = vmatprep.subr.mxu0 %v1451_v36  ;;  %3333 = vmatpush2.msra.mxu1 %v1444_v46  ;;  %v1284_v36 = vld [vmem:[#allocation22 + $0x160] sm:$0xff]  ;;  %v1282_v46 = vld [vmem:[#allocation22 + $0x150] sm:$0xff] }
 0x4f3   :  { %3402 = vmatpush2.msra.mxu0 %v1450_v44  ;;  %3334 = vmatprep.subr.mxu1 %v1441_v48  ;;  %v1281_v44 = vld [vmem:[#allocation22 + $0x148] sm:$0xff]  ;;  %v1279_v48 = vld [vmem:[#allocation22 + $0x138] sm:$0xff] }
 0x4f4   :  { %3403 = vmatprep.subr.mxu0 %v1447_v63  ;;  %3335 = vmatpush2.msra.mxu1 %v1440_v10  ;;  %v1280_v63 = vld [vmem:[#allocation22 + $0x140] sm:$0xff]  ;;  %v1278_v10 = vld [vmem:[#allocation22 + $0x130] sm:$0xff] }
 0x4f5   :  { %3404 = vmatpush2.msra.mxu0 %v1446_v47  ;;  %3336 = vmatprep.subr.mxu1 %v1437_v51  ;;  %v1277_v47 = vld [vmem:[#allocation22 + $0x128] sm:$0xff]  ;;  %v1275_v51 = vld [vmem:[#allocation22 + $0x118] sm:$0xff] }
 0x4f6   :  { %3405 = vmatprep.subr.mxu0 %v1443_v49  ;;  %3337 = vmatpush2.msra.mxu1 %v1436_v22  ;;  %v1276_v49 = vld [vmem:[#allocation22 + $0x120] sm:$0xff]  ;;  %v1274_v22 = vld [vmem:[#allocation22 + $0x110] sm:$0xff] }
 0x4f7   :  { %3406 = vmatpush2.msra.mxu0 %v1442_v50  ;;  %3338 = vmatprep.subr.mxu1 %v1433_v55  ;;  %v1273_v50 = vld [vmem:[#allocation22 + $0x108] sm:$0xff]  ;;  %v1271_v55 = vld [vmem:[#allocation22 + $0xf8] sm:$0xff] }
 0x4f8   :  { %3407 = vmatprep.subr.mxu0 %v1439_v52  ;;  %3339 = vmatpush2.msra.mxu1 %v1432_v58  ;;  %v1272_v52 = vld [vmem:[#allocation22 + $0x100] sm:$0xff]  ;;  %v1270_v58 = vld [vmem:[#allocation22 + $0xf0] sm:$0xff] }
 0x4f9   :  { %3408 = vmatpush2.msra.mxu0 %v1438_v53  ;;  %3418 = vmatprep.subr.mxu1 %v1301_v60  ;;  %v1269_v53 = vld [vmem:[#allocation22 + $0xe8] sm:$0xff]  ;;  %v1267_v60 = vld [vmem:[#allocation22 + $0xd8] sm:$0xff] }
 0x4fa   :  { %3409 = vmatprep.subr.mxu0 %v1435_v56  ;;  %v1268_v56 = vld [vmem:[#allocation22 + $0xe0] sm:$0xff] }
 0x4fb   :  { %3410 = vmatpush2.msra.mxu0 %v1434_v59  ;;  %v1265_v59 = vld [vmem:[#allocation22 + $0xc8] sm:$0xff] }
 0x4fc   :  { %3489 = vmatprep.subr.mxu0 %v1303_v57  ;;  %v1264_v57 = vld [vmem:[#allocation22 + $0xc0] sm:$0xff] }
 0x537   :  { %v3042_v61 = vpop.f32.mrf.mxu1 }
 0x539   :  { %v3044_v1 = vpop.f32.mrf.mxu1 }
 0x53b   :  { %v3113_v62 = vpop.f32.mrf.mxu0 }
 0x53c   :  { %v3114_v13 = vadd.f32 %v3113_v62, %v3042_v61  ;;  %v1266_v61 = vld [vmem:[#allocation22 + $0xd0] sm:$0xff]  ;;  %v1261_v62 = vld [vmem:[#allocation22 + $0xa8] sm:$0xff] }
 0x53d   :  { %v3115_v2 = vpop.f32.mrf.mxu0 }
 0x53e   :  { %v3116_v11 = vadd.f32 %v3115_v2, %v3044_v1  ;;  %v1263_v1 = vld [vmem:[#allocation22 + $0xb8] sm:$0xff]  ;;  %v1260_v2 = vld [vmem:[#allocation22 + $0xa0] sm:$0xff] }
 0x577   :  { %v3184_v3 = vpop.f32.mrf.mxu1 }
 0x579   :  { %v3186_v41 = vpop.f32.mrf.mxu1 }
 0x57c   :  { %v3255_v4 = vpop.f32.mrf.mxu0 }
 0x57d   :  { %v3256_v6 = vadd.f32 %v3255_v4, %v3184_v3  ;;  %v1262_v3 = vld [vmem:[#allocation22 + $0xb0] sm:$0xff]  ;;  %v1257_v4 = vld [vmem:[#allocation22 + $0x88] sm:$0xff] }
 0x57e   :  { %v3257_v9 = vpop.f32.mrf.mxu0 }
 0x57f   :  { %v3258_v12 = vadd.f32 %v3257_v9, %v3186_v41  ;;  %v10454_v15 = vmax.f32 %v3114_v13, %v3256_v6  ;;  %v1259_v41 = vld [vmem:[#allocation22 + $0x98] sm:$0xff]  ;;  %v1256_v6 = vld [vmem:[#allocation22 + $0x80] sm:$0xff]  ;;  %v1258_v9 = vld [vmem:[#allocation22 + $0x90] sm:$0xff] }
 0x580   :  { %v1252_v13 = vld [vmem:[#allocation22 + $0x60] sm:$0xff] }
 0x581   :  { %v10452_v14 = vmax.f32 %v3116_v11, %v3258_v12  ;;  %v1253_v11 = vld [vmem:[#allocation22 + $0x68] sm:$0xff]  ;;  %v1255_v12 = vld [vmem:[#allocation22 + $0x78] sm:$0xff] }
 0x583   :  { %3340 = vmatprep.mubr.f32.mxu1 %v10452_v14  ;;  %3411 = vmatprep.mubr.f32.mxu0 %v10452_v14  ;;  %v3265_v19 = vrot.slane %v10452_v14, 7 }
 0x584   :  { %3341 = vmatmul.mubr.f32.vlgmr.msra.gmra.mxu1 %v10454_v15  ;;  %3412 = vmatmul.mubr.f32.vlgmr.msra.gmra.mxu0 %v10454_v15 }
 0x585   :  { %3419 = vmatpush1.msra.mxu1 %v1300_v16  ;;  %3490 = vmatpush1.msra.mxu0 %v1302_v17  ;;  %v1254_v16 = vld [vmem:[#allocation22 + $0x70] sm:$0xff]  ;;  %v1249_v17 = vld [vmem:[#allocation22 + $0x48] sm:$0xff] }
 0x586   :  { %3420 = vmatprep.subr.mxu1 %v1297_v18  ;;  %7831 = vmatprep.mubr.msk.f32.mxu1 %vm10460_vm5, %v3265_v19  ;;  %v1251_v18 = vld [vmem:[#allocation22 + $0x58] sm:$0xff] }
 0x587   :  { %3491 = vmatprep.subr.mxu0 %v1299_v21  ;;  %7835 = vmatprep.mubr.msk.f32.mxu0 %vm10460_vm5, %v3265_v19  ;;  %v1248_v19 = vld [vmem:[#allocation22 + $0x40] sm:$0xff]  ;;  %v1250_v21 = vld [vmem:[#allocation22 + $0x50] sm:$0xff] }
 0x588   :  { %3421 = vmatpush1.msra.mxu1 %v1296_v23  ;;  %3492 = vmatpush1.msra.mxu0 %v1298_v25  ;;  %v1245_v23 = vld [vmem:[#allocation22 + $0x28] sm:$0xff]  ;;  %v1247_v25 = vld [vmem:[#allocation22 + $0x38] sm:$0xff] }
 0x589   :  { %3422 = vmatprep.subr.mxu1 %v1293_v26  ;;  %3493 = vmatprep.subr.mxu0 %v1295_v29  ;;  %v1244_v26 = vld [vmem:[#allocation22 + $0x20] sm:$0xff]  ;;  %v1246_v29 = vld [vmem:[#allocation22 + $0x30] sm:$0xff] }
 0x58a   :  { %3423 = vmatpush1.msra.mxu1 %v1292_v32  ;;  %3494 = vmatpush1.msra.mxu0 %v1294_v33  ;;  %v1241_v32 = vld [vmem:[#allocation22 + $0x8] sm:$0xff]  ;;  %v1243_v33 = vld [vmem:[#allocation22 + $0x18] sm:$0xff] }
 0x58b   :  { %3424 = vmatprep.subr.mxu1 %v1289_v35  ;;  %3495 = vmatprep.subr.mxu0 %v1291_v27  ;;  %v1240_v35 = vld [vmem:[#allocation22] sm:$0xff]  ;;  %v1242_v27 = vld [vmem:[#allocation22 + $0x10] sm:$0xff] }
 0x58c   :  { %3425 = vmatpush1.msra.mxu1 %v1288_v38  ;;  %3496 = vmatpush1.msra.mxu0 %v1290_v39  ;;  %v1365_v38 = vld [vmem:[#allocation22 + $0x3e8] sm:$0xff]  ;;  %v1367_v39 = vld [vmem:[#allocation22 + $0x3f8] sm:$0xff] }
 0x58d   :  { %3426 = vmatprep.subr.mxu1 %v1285_v40  ;;  %3497 = vmatprep.subr.mxu0 %v1287_v42  ;;  %v1364_v40 = vld [vmem:[#allocation22 + $0x3e0] sm:$0xff]  ;;  %v1366_v42 = vld [vmem:[#allocation22 + $0x3f0] sm:$0xff] }
 0x58e   :  { %3427 = vmatpush1.msra.mxu1 %v1284_v36  ;;  %3498 = vmatpush1.msra.mxu0 %v1286_v43  ;;  %v1361_v36 = vld [vmem:[#allocation22 + $0x3c8] sm:$0xff]  ;;  %v1363_v43 = vld [vmem:[#allocation22 + $0x3d8] sm:$0xff] }
 0x58f   :  { %3428 = vmatprep.subr.mxu1 %v1281_v44  ;;  %3499 = vmatprep.subr.mxu0 %v1283_v45  ;;  %v1360_v44 = vld [vmem:[#allocation22 + $0x3c0] sm:$0xff]  ;;  %v1362_v45 = vld [vmem:[#allocation22 + $0x3d0] sm:$0xff] }
 0x590   :  { %3429 = vmatpush1.msra.mxu1 %v1280_v63  ;;  %3500 = vmatpush1.msra.mxu0 %v1282_v46  ;;  %v1357_v63 = vld [vmem:[#allocation22 + $0x3a8] sm:$0xff]  ;;  %v1359_v46 = vld [vmem:[#allocation22 + $0x3b8] sm:$0xff] }
 0x591   :  { %3430 = vmatprep.subr.mxu1 %v1277_v47  ;;  %3501 = vmatprep.subr.mxu0 %v1279_v48  ;;  %v1356_v47 = vld [vmem:[#allocation22 + $0x3a0] sm:$0xff]  ;;  %v1358_v48 = vld [vmem:[#allocation22 + $0x3b0] sm:$0xff] }
 0x592   :  { %3431 = vmatpush1.msra.mxu1 %v1276_v49  ;;  %3502 = vmatpush1.msra.mxu0 %v1278_v10  ;;  %v1353_v49 = vld [vmem:[#allocation22 + $0x388] sm:$0xff]  ;;  %v1355_v10 = vld [vmem:[#allocation22 + $0x398] sm:$0xff] }
 0x593   :  { %3432 = vmatprep.subr.mxu1 %v1273_v50  ;;  %3503 = vmatprep.subr.mxu0 %v1275_v51  ;;  %v1352_v50 = vld [vmem:[#allocation22 + $0x380] sm:$0xff]  ;;  %v1354_v51 = vld [vmem:[#allocation22 + $0x390] sm:$0xff] }
 0x594   :  { %3433 = vmatpush1.msra.mxu1 %v1272_v52  ;;  %3504 = vmatpush1.msra.mxu0 %v1274_v22  ;;  %v1349_v52 = vld [vmem:[#allocation22 + $0x368] sm:$0xff]  ;;  %v1351_v22 = vld [vmem:[#allocation22 + $0x378] sm:$0xff] }
 0x595   :  { %3434 = vmatprep.subr.mxu1 %v1269_v53  ;;  %3505 = vmatprep.subr.mxu0 %v1271_v55  ;;  %v1348_v53 = vld [vmem:[#allocation22 + $0x360] sm:$0xff]  ;;  %v1350_v55 = vld [vmem:[#allocation22 + $0x370] sm:$0xff] }
 0x596   :  { %3435 = vmatpush1.msra.mxu1 %v1268_v56  ;;  %3506 = vmatpush1.msra.mxu0 %v1270_v58  ;;  %v1345_v56 = vld [vmem:[#allocation22 + $0x348] sm:$0xff]  ;;  %v1347_v58 = vld [vmem:[#allocation22 + $0x358] sm:$0xff] }
 0x597   :  { %3436 = vmatprep.subr.mxu1 %v1265_v59  ;;  %3507 = vmatprep.subr.mxu0 %v1267_v60  ;;  %v1344_v59 = vld [vmem:[#allocation22 + $0x340] sm:$0xff]  ;;  %v1346_v60 = vld [vmem:[#allocation22 + $0x350] sm:$0xff] }
 0x598   :  { %3437 = vmatpush1.msra.mxu1 %v1264_v57  ;;  %3508 = vmatpush1.msra.mxu0 %v1266_v61  ;;  %v1341_v57 = vld [vmem:[#allocation22 + $0x328] sm:$0xff]  ;;  %v1343_v61 = vld [vmem:[#allocation22 + $0x338] sm:$0xff] }
 0x599   :  { %3438 = vmatprep.subr.mxu1 %v1261_v62  ;;  %3509 = vmatprep.subr.mxu0 %v1263_v1  ;;  %v1340_v62 = vld [vmem:[#allocation22 + $0x320] sm:$0xff]  ;;  %v1342_v1 = vld [vmem:[#allocation22 + $0x330] sm:$0xff] }
 0x59a   :  { %3439 = vmatpush1.msra.mxu1 %v1260_v2  ;;  %3510 = vmatpush1.msra.mxu0 %v1262_v3  ;;  %v1337_v2 = vld [vmem:[#allocation22 + $0x308] sm:$0xff]  ;;  %v1339_v3 = vld [vmem:[#allocation22 + $0x318] sm:$0xff] }
 0x59b   :  { %3440 = vmatprep.subr.mxu1 %v1257_v4  ;;  %3511 = vmatprep.subr.mxu0 %v1259_v41  ;;  %v1336_v4 = vld [vmem:[#allocation22 + $0x300] sm:$0xff]  ;;  %v1338_v41 = vld [vmem:[#allocation22 + $0x310] sm:$0xff] }
 0x59c   :  { %3441 = vmatpush1.msra.mxu1 %v1256_v6  ;;  %3512 = vmatpush1.msra.mxu0 %v1258_v9  ;;  %v1333_v6 = vld [vmem:[#allocation22 + $0x2e8] sm:$0xff]  ;;  %v1335_v9 = vld [vmem:[#allocation22 + $0x2f8] sm:$0xff] }
 0x59d   :  { %3442 = vmatprep.subr.mxu1 %v1253_v11  ;;  %3513 = vmatprep.subr.mxu0 %v1255_v12  ;;  %v1332_v11 = vld [vmem:[#allocation22 + $0x2e0] sm:$0xff]  ;;  %v1334_v12 = vld [vmem:[#allocation22 + $0x2f0] sm:$0xff] }
 0x59e   :  { %3443 = vmatpush1.msra.mxu1 %v1252_v13  ;;  %3514 = vmatpush1.msra.mxu0 %v1254_v16  ;;  %v1329_v13 = vld [vmem:[#allocation22 + $0x2c8] sm:$0xff]  ;;  %v1331_v16 = vld [vmem:[#allocation22 + $0x2d8] sm:$0xff] }
 0x59f   :  { %3444 = vmatprep.subr.mxu1 %v1249_v17  ;;  %3515 = vmatprep.subr.mxu0 %v1251_v18  ;;  %v1328_v17 = vld [vmem:[#allocation22 + $0x2c0] sm:$0xff]  ;;  %v1330_v18 = vld [vmem:[#allocation22 + $0x2d0] sm:$0xff] }
 0x5a0   :  { %3445 = vmatpush1.msra.mxu1 %v1248_v19  ;;  %3516 = vmatpush1.msra.mxu0 %v1250_v21  ;;  %v1325_v19 = vld [vmem:[#allocation22 + $0x2a8] sm:$0xff]  ;;  %v1327_v21 = vld [vmem:[#allocation22 + $0x2b8] sm:$0xff] }
 0x5a1   :  { %3446 = vmatprep.subr.mxu1 %v1245_v23  ;;  %3517 = vmatprep.subr.mxu0 %v1247_v25  ;;  %v1324_v23 = vld [vmem:[#allocation22 + $0x2a0] sm:$0xff]  ;;  %v1326_v25 = vld [vmem:[#allocation22 + $0x2b0] sm:$0xff] }
 0x5a2   :  { %3447 = vmatpush1.msra.mxu1 %v1244_v26  ;;  %3518 = vmatpush1.msra.mxu0 %v1246_v29  ;;  %v1321_v26 = vld [vmem:[#allocation22 + $0x288] sm:$0xff]  ;;  %v1323_v29 = vld [vmem:[#allocation22 + $0x298] sm:$0xff] }
 0x5a3   :  { %3448 = vmatprep.subr.mxu1 %v1241_v32  ;;  %3519 = vmatprep.subr.mxu0 %v1243_v33  ;;  %v1320_v32 = vld [vmem:[#allocation22 + $0x280] sm:$0xff]  ;;  %v1322_v33 = vld [vmem:[#allocation22 + $0x290] sm:$0xff] }
 0x5a4   :  { %3449 = vmatpush1.msra.mxu1 %v1240_v35  ;;  %3520 = vmatpush1.msra.mxu0 %v1242_v27  ;;  %v1317_v35 = vld [vmem:[#allocation22 + $0x268] sm:$0xff]  ;;  %v1319_v27 = vld [vmem:[#allocation22 + $0x278] sm:$0xff] }
 0x5a5   :  { %3450 = vmatprep.subr.mxu1 %v1365_v38  ;;  %3521 = vmatprep.subr.mxu0 %v1367_v39  ;;  %v1316_v38 = vld [vmem:[#allocation22 + $0x260] sm:$0xff]  ;;  %v1318_v39 = vld [vmem:[#allocation22 + $0x270] sm:$0xff] }
 0x5a6   :  { %3451 = vmatpush2.msra.mxu1 %v1364_v40  ;;  %3522 = vmatpush2.msra.mxu0 %v1366_v42  ;;  %v1313_v40 = vld [vmem:[#allocation22 + $0x248] sm:$0xff]  ;;  %v1315_v42 = vld [vmem:[#allocation22 + $0x258] sm:$0xff] }
 0x5a7   :  { %3452 = vmatprep.subr.mxu1 %v1361_v36  ;;  %3523 = vmatprep.subr.mxu0 %v1363_v43  ;;  %v1312_v36 = vld [vmem:[#allocation22 + $0x240] sm:$0xff]  ;;  %v1314_v43 = vld [vmem:[#allocation22 + $0x250] sm:$0xff] }
 0x5a8   :  { %3453 = vmatpush2.msra.mxu1 %v1360_v44  ;;  %3524 = vmatpush2.msra.mxu0 %v1362_v45  ;;  %v1309_v44 = vld [vmem:[#allocation22 + $0x228] sm:$0xff]  ;;  %v1311_v45 = vld [vmem:[#allocation22 + $0x238] sm:$0xff] }
 0x5a9   :  { %3454 = vmatprep.subr.mxu1 %v1357_v63  ;;  %3525 = vmatprep.subr.mxu0 %v1359_v46  ;;  %v1308_v63 = vld [vmem:[#allocation22 + $0x220] sm:$0xff]  ;;  %v1310_v46 = vld [vmem:[#allocation22 + $0x230] sm:$0xff] }
 0x5aa   :  { %3455 = vmatpush2.msra.mxu1 %v1356_v47  ;;  %3526 = vmatpush2.msra.mxu0 %v1358_v48  ;;  %v1305_v47 = vld [vmem:[#allocation22 + $0x208] sm:$0xff]  ;;  %v1307_v48 = vld [vmem:[#allocation22 + $0x218] sm:$0xff] }
 0x5ab   :  { %3456 = vmatprep.subr.mxu1 %v1353_v49  ;;  %3527 = vmatprep.subr.mxu0 %v1355_v10  ;;  %v1304_v49 = vld [vmem:[#allocation22 + $0x200] sm:$0xff]  ;;  %v1306_v10 = vld [vmem:[#allocation22 + $0x210] sm:$0xff] }
 0x5ac   :  { %3457 = vmatpush2.msra.mxu1 %v1352_v50  ;;  %3528 = vmatpush2.msra.mxu0 %v1354_v51  ;;  %v3264_v50 = vrot.slane %v10454_v15, 7  ;;  %v1557_v51 = vld [vmem:[#allocation25 + $0x1e8] sm:$0xff] }
 0x5ad   :  { %3458 = vmatprep.subr.mxu1 %v1349_v52  ;;  %3529 = vmatprep.subr.mxu0 %v1351_v22  ;;  %v1559_v52 = vld [vmem:[#allocation25 + $0x1f8] sm:$0xff]  ;;  %v1556_v22 = vld [vmem:[#allocation25 + $0x1e0] sm:$0xff] }
 0x5ae   :  { %3459 = vmatpush2.msra.mxu1 %v1348_v53  ;;  %3530 = vmatpush2.msra.mxu0 %v1350_v55  ;;  %v3271_v53 = vrot.slane %v10452_v14, 1  ;;  %v1558_v55 = vld [vmem:[#allocation25 + $0x1f0] sm:$0xff]  ;;  %v1545_v14 = vld [vmem:[#allocation25 + $0x188] sm:$0xff] }
 0x5af   :  { %3460 = vmatprep.subr.mxu1 %v1345_v56  ;;  %3531 = vmatprep.subr.mxu0 %v1347_v58  ;;  %v1553_v56 = vld [vmem:[#allocation25 + $0x1c8] sm:$0xff]  ;;  %v1555_v58 = vld [vmem:[#allocation25 + $0x1d8] sm:$0xff] }
 0x5b0   :  { %3461 = vmatpush2.msra.mxu1 %v1344_v59  ;;  %3532 = vmatpush2.msra.mxu0 %v1346_v60  ;;  %v1552_v59 = vld [vmem:[#allocation25 + $0x1c0] sm:$0xff]  ;;  %v1554_v60 = vld [vmem:[#allocation25 + $0x1d0] sm:$0xff] }
 0x5b1   :  { %3462 = vmatprep.subr.mxu1 %v1341_v57  ;;  %3533 = vmatprep.subr.mxu0 %v1343_v61  ;;  %v1549_v57 = vld [vmem:[#allocation25 + $0x1a8] sm:$0xff]  ;;  %v1551_v61 = vld [vmem:[#allocation25 + $0x1b8] sm:$0xff] }
 0x5b2   :  { %3463 = vmatpush2.msra.mxu1 %v1340_v62  ;;  %3534 = vmatpush2.msra.mxu0 %v1342_v1  ;;  %v1548_v62 = vld [vmem:[#allocation25 + $0x1a0] sm:$0xff]  ;;  %v1550_v1 = vld [vmem:[#allocation25 + $0x1b0] sm:$0xff] }
 0x5b3   :  { %3464 = vmatprep.subr.mxu1 %v1337_v2  ;;  %3535 = vmatprep.subr.mxu0 %v1339_v3  ;;  %v1547_v2 = vld [vmem:[#allocation25 + $0x198] sm:$0xff]  ;;  %v1544_v3 = vld [vmem:[#allocation25 + $0x180] sm:$0xff] }
 0x5b4   :  { %3465 = vmatpush2.msra.mxu1 %v1336_v4  ;;  %3536 = vmatpush2.msra.mxu0 %v1338_v41  ;;  %v1546_v4 = vld [vmem:[#allocation25 + $0x190] sm:$0xff]  ;;  %v1541_v41 = vld [vmem:[#allocation25 + $0x168] sm:$0xff] }
 0x5b5   :  { %3466 = vmatprep.subr.mxu1 %v1333_v6  ;;  %3537 = vmatprep.subr.mxu0 %v1335_v9  ;;  %v1543_v6 = vld [vmem:[#allocation25 + $0x178] sm:$0xff]  ;;  %v1540_v9 = vld [vmem:[#allocation25 + $0x160] sm:$0xff] }
 0x5b6   :  { %3467 = vmatpush2.msra.mxu1 %v1332_v11  ;;  %3538 = vmatpush2.msra.mxu0 %v1334_v12  ;;  %v1542_v11 = vld [vmem:[#allocation25 + $0x170] sm:$0xff]  ;;  %v1537_v12 = vld [vmem:[#allocation25 + $0x148] sm:$0xff] }
 0x5b7   :  { %3468 = vmatprep.subr.mxu1 %v1329_v13  ;;  %3539 = vmatprep.subr.mxu0 %v1331_v16  ;;  %v1539_v13 = vld [vmem:[#allocation25 + $0x158] sm:$0xff]  ;;  %v1536_v16 = vld [vmem:[#allocation25 + $0x140] sm:$0xff] }
 0x5b8   :  { %3469 = vmatpush2.msra.mxu1 %v1328_v17  ;;  %3540 = vmatpush2.msra.mxu0 %v1330_v18  ;;  %v1538_v17 = vld [vmem:[#allocation25 + $0x150] sm:$0xff]  ;;  %v1533_v18 = vld [vmem:[#allocation25 + $0x128] sm:$0xff] }
 0x5b9   :  { %3470 = vmatprep.subr.mxu1 %v1325_v19  ;;  %3541 = vmatprep.subr.mxu0 %v1327_v21  ;;  %v1535_v19 = vld [vmem:[#allocation25 + $0x138] sm:$0xff]  ;;  %v1532_v21 = vld [vmem:[#allocation25 + $0x120] sm:$0xff] }
 0x5ba   :  { %3471 = vmatpush2.msra.mxu1 %v1324_v23  ;;  %3542 = vmatpush2.msra.mxu0 %v1326_v25  ;;  %v1534_v23 = vld [vmem:[#allocation25 + $0x130] sm:$0xff]  ;;  %v1529_v25 = vld [vmem:[#allocation25 + $0x108] sm:$0xff] }
 0x5bb   :  { %3472 = vmatprep.subr.mxu1 %v1321_v26  ;;  %3543 = vmatprep.subr.mxu0 %v1323_v29  ;;  %v1531_v26 = vld [vmem:[#allocation25 + $0x118] sm:$0xff]  ;;  %v1528_v29 = vld [vmem:[#allocation25 + $0x100] sm:$0xff] }
 0x5bc   :  { %3473 = vmatpush2.msra.mxu1 %v1320_v32  ;;  %3544 = vmatpush2.msra.mxu0 %v1322_v33  ;;  %v1530_v32 = vld [vmem:[#allocation25 + $0x110] sm:$0xff]  ;;  %v1525_v33 = vld [vmem:[#allocation25 + $0xe8] sm:$0xff] }
 0x5bd   :  { %3474 = vmatprep.subr.mxu1 %v1317_v35  ;;  %3545 = vmatprep.subr.mxu0 %v1319_v27  ;;  %v1527_v35 = vld [vmem:[#allocation25 + $0xf8] sm:$0xff]  ;;  %v1524_v27 = vld [vmem:[#allocation25 + $0xe0] sm:$0xff] }
 0x5be   :  { %3475 = vmatpush2.msra.mxu1 %v1316_v38  ;;  %3546 = vmatpush2.msra.mxu0 %v1318_v39  ;;  %v1526_v38 = vld [vmem:[#allocation25 + $0xf0] sm:$0xff]  ;;  %v1521_v39 = vld [vmem:[#allocation25 + $0xc8] sm:$0xff] }
 0x5bf   :  { %3476 = vmatprep.subr.mxu1 %v1313_v40  ;;  %3547 = vmatprep.subr.mxu0 %v1315_v42  ;;  %v1523_v40 = vld [vmem:[#allocation25 + $0xd8] sm:$0xff]  ;;  %v1520_v42 = vld [vmem:[#allocation25 + $0xc0] sm:$0xff] }
 0x5c0   :  { %3477 = vmatpush2.msra.mxu1 %v1312_v36  ;;  %3548 = vmatpush2.msra.mxu0 %v1314_v43  ;;  %v1522_v36 = vld [vmem:[#allocation25 + $0xd0] sm:$0xff]  ;;  %v1517_v43 = vld [vmem:[#allocation25 + $0xa8] sm:$0xff] }
 0x5c1   :  { %3478 = vmatprep.subr.mxu1 %v1309_v44  ;;  %3549 = vmatprep.subr.mxu0 %v1311_v45  ;;  %v1519_v44 = vld [vmem:[#allocation25 + $0xb8] sm:$0xff]  ;;  %v1516_v45 = vld [vmem:[#allocation25 + $0xa0] sm:$0xff] }
 0x5c2   :  { %3479 = vmatpush2.msra.mxu1 %v1308_v63  ;;  %3550 = vmatpush2.msra.mxu0 %v1310_v46  ;;  %v1518_v63 = vld [vmem:[#allocation25 + $0xb0] sm:$0xff]  ;;  %v1513_v46 = vld [vmem:[#allocation25 + $0x88] sm:$0xff] }
 0x5c3   :  { %3480 = vmatprep.subr.mxu1 %v1305_v47  ;;  %3551 = vmatprep.subr.mxu0 %v1307_v48  ;;  %v1515_v47 = vld [vmem:[#allocation25 + $0x98] sm:$0xff]  ;;  %v1512_v48 = vld [vmem:[#allocation25 + $0x80] sm:$0xff] }
 0x5c4   :  { %3481 = vmatpush2.msra.mxu1 %v1304_v49  ;;  %3552 = vmatpush2.msra.mxu0 %v1306_v10  ;;  %v1514_v49 = vld [vmem:[#allocation25 + $0x90] sm:$0xff]  ;;  %v1509_v10 = vld [vmem:[#allocation25 + $0x68] sm:$0xff] }
 0x5c5   :  { %7833 = vmatmul.mubr.msk.f32.vlgmr.msra.gmra.mxu1 %vm10460_vm5, %v3264_v50  ;;  %7837 = vmatmul.mubr.msk.f32.vlgmr.msra.gmra.mxu0 %vm10460_vm5, %v3264_v50  ;;  %v1511_v50 = vld [vmem:[#allocation25 + $0x78] sm:$0xff] }
 0x5c6   :  { %3560 = vmatprep.subr.mxu1 %v1557_v51  ;;  %3631 = vmatprep.subr.mxu0 %v1559_v52  ;;  %v1508_v51 = vld [vmem:[#allocation25 + $0x60] sm:$0xff]  ;;  %v1510_v52 = vld [vmem:[#allocation25 + $0x70] sm:$0xff] }
 0x5c7   :  { %3561 = vmatpush1.msra.mxu1 %v1556_v22  ;;  %7838 = vmatprep.mubr.msk.f32.mxu1 %vm2154_vm4, %v3271_v53  ;;  %v1505_v22 = vld [vmem:[#allocation25 + $0x48] sm:$0xff] }
 0x5c8   :  { %3632 = vmatpush1.msra.mxu0 %v1558_v55  ;;  %7840 = vmatprep.mubr.msk.f32.mxu0 %vm2154_vm4, %v3271_v53  ;;  %v1507_v53 = vld [vmem:[#allocation25 + $0x58] sm:$0xff]  ;;  %v1504_v55 = vld [vmem:[#allocation25 + $0x40] sm:$0xff] }
 0x5c9   :  { %3562 = vmatprep.subr.mxu1 %v1553_v56  ;;  %3633 = vmatprep.subr.mxu0 %v1555_v58  ;;  %v1506_v56 = vld [vmem:[#allocation25 + $0x50] sm:$0xff]  ;;  %v1501_v58 = vld [vmem:[#allocation25 + $0x28] sm:$0xff] }
 0x5ca   :  { %3563 = vmatpush1.msra.mxu1 %v1552_v59  ;;  %3634 = vmatpush1.msra.mxu0 %v1554_v60  ;;  %v1503_v59 = vld [vmem:[#allocation25 + $0x38] sm:$0xff]  ;;  %v1500_v60 = vld [vmem:[#allocation25 + $0x20] sm:$0xff] }
 0x5cb   :  { %3564 = vmatprep.subr.mxu1 %v1549_v57  ;;  %3635 = vmatprep.subr.mxu0 %v1551_v61  ;;  %v1502_v57 = vld [vmem:[#allocation25 + $0x30] sm:$0xff]  ;;  %v1497_v61 = vld [vmem:[#allocation25 + $0x8] sm:$0xff] }
 0x5cc   :  { %3565 = vmatpush1.msra.mxu1 %v1548_v62  ;;  %3636 = vmatpush1.msra.mxu0 %v1550_v1  ;;  %v1499_v62 = vld [vmem:[#allocation25 + $0x18] sm:$0xff]  ;;  %v1496_v1 = vld [vmem:[#allocation25] sm:$0xff] }
 0x5cd   :  { %3566 = vmatprep.subr.mxu1 %v1545_v14  ;;  %3637 = vmatprep.subr.mxu0 %v1547_v2  ;;  %v1498_v14 = vld [vmem:[#allocation25 + $0x10] sm:$0xff]  ;;  %v1621_v2 = vld [vmem:[#allocation25 + $0x3e8] sm:$0xff] }
 0x5ce   :  { %3567 = vmatpush1.msra.mxu1 %v1544_v3  ;;  %3638 = vmatpush1.msra.mxu0 %v1546_v4  ;;  %v1623_v3 = vld [vmem:[#allocation25 + $0x3f8] sm:$0xff]  ;;  %v1620_v4 = vld [vmem:[#allocation25 + $0x3e0] sm:$0xff] }
 0x5cf   :  { %3568 = vmatprep.subr.mxu1 %v1541_v41  ;;  %3639 = vmatprep.subr.mxu0 %v1543_v6  ;;  %v1622_v41 = vld [vmem:[#allocation25 + $0x3f0] sm:$0xff]  ;;  %v1617_v6 = vld [vmem:[#allocation25 + $0x3c8] sm:$0xff] }
 0x5d0   :  { %3569 = vmatpush1.msra.mxu1 %v1540_v9  ;;  %3640 = vmatpush1.msra.mxu0 %v1542_v11  ;;  %v1619_v9 = vld [vmem:[#allocation25 + $0x3d8] sm:$0xff]  ;;  %v1616_v11 = vld [vmem:[#allocation25 + $0x3c0] sm:$0xff] }
 0x5d1   :  { %3570 = vmatprep.subr.mxu1 %v1537_v12  ;;  %3641 = vmatprep.subr.mxu0 %v1539_v13  ;;  %v1618_v12 = vld [vmem:[#allocation25 + $0x3d0] sm:$0xff]  ;;  %v1613_v13 = vld [vmem:[#allocation25 + $0x3a8] sm:$0xff] }
 0x5d2   :  { %3571 = vmatpush1.msra.mxu1 %v1536_v16  ;;  %3642 = vmatpush1.msra.mxu0 %v1538_v17  ;;  %v1615_v16 = vld [vmem:[#allocation25 + $0x3b8] sm:$0xff]  ;;  %v1612_v17 = vld [vmem:[#allocation25 + $0x3a0] sm:$0xff] }
 0x5d3   :  { %3572 = vmatprep.subr.mxu1 %v1533_v18  ;;  %3643 = vmatprep.subr.mxu0 %v1535_v19  ;;  %v1614_v18 = vld [vmem:[#allocation25 + $0x3b0] sm:$0xff]  ;;  %v1609_v19 = vld [vmem:[#allocation25 + $0x388] sm:$0xff] }
 0x5d4   :  { %3573 = vmatpush1.msra.mxu1 %v1532_v21  ;;  %3644 = vmatpush1.msra.mxu0 %v1534_v23  ;;  %v1611_v21 = vld [vmem:[#allocation25 + $0x398] sm:$0xff]  ;;  %v1608_v23 = vld [vmem:[#allocation25 + $0x380] sm:$0xff] }
 0x5d5   :  { %3574 = vmatprep.subr.mxu1 %v1529_v25  ;;  %3645 = vmatprep.subr.mxu0 %v1531_v26  ;;  %v1610_v25 = vld [vmem:[#allocation25 + $0x390] sm:$0xff]  ;;  %v1605_v26 = vld [vmem:[#allocation25 + $0x368] sm:$0xff] }
 0x5d6   :  { %3575 = vmatpush1.msra.mxu1 %v1528_v29  ;;  %3646 = vmatpush1.msra.mxu0 %v1530_v32  ;;  %v1607_v29 = vld [vmem:[#allocation25 + $0x378] sm:$0xff]  ;;  %v1604_v32 = vld [vmem:[#allocation25 + $0x360] sm:$0xff] }
 0x5d7   :  { %3576 = vmatprep.subr.mxu1 %v1525_v33  ;;  %3647 = vmatprep.subr.mxu0 %v1527_v35  ;;  %v1606_v33 = vld [vmem:[#allocation25 + $0x370] sm:$0xff]  ;;  %v1601_v35 = vld [vmem:[#allocation25 + $0x348] sm:$0xff] }
 0x5d8   :  { %3577 = vmatpush1.msra.mxu1 %v1524_v27  ;;  %3648 = vmatpush1.msra.mxu0 %v1526_v38  ;;  %v1603_v27 = vld [vmem:[#allocation25 + $0x358] sm:$0xff]  ;;  %v1600_v38 = vld [vmem:[#allocation25 + $0x340] sm:$0xff] }
 0x5d9   :  { %3578 = vmatprep.subr.mxu1 %v1521_v39  ;;  %3649 = vmatprep.subr.mxu0 %v1523_v40  ;;  %v1602_v39 = vld [vmem:[#allocation25 + $0x350] sm:$0xff]  ;;  %v1597_v40 = vld [vmem:[#allocation25 + $0x328] sm:$0xff] }
 0x5da   :  { %3579 = vmatpush1.msra.mxu1 %v1520_v42  ;;  %3650 = vmatpush1.msra.mxu0 %v1522_v36  ;;  %v1599_v42 = vld [vmem:[#allocation25 + $0x338] sm:$0xff]  ;;  %v1596_v36 = vld [vmem:[#allocation25 + $0x320] sm:$0xff] }
 0x5db   :  { %3580 = vmatprep.subr.mxu1 %v1517_v43  ;;  %3651 = vmatprep.subr.mxu0 %v1519_v44  ;;  %v1598_v43 = vld [vmem:[#allocation25 + $0x330] sm:$0xff]  ;;  %v1593_v44 = vld [vmem:[#allocation25 + $0x308] sm:$0xff] }
 0x5dc   :  { %3581 = vmatpush1.msra.mxu1 %v1516_v45  ;;  %3652 = vmatpush1.msra.mxu0 %v1518_v63  ;;  %v1595_v45 = vld [vmem:[#allocation25 + $0x318] sm:$0xff]  ;;  %v1592_v63 = vld [vmem:[#allocation25 + $0x300] sm:$0xff] }
 0x5dd   :  { %3582 = vmatprep.subr.mxu1 %v1513_v46  ;;  %3653 = vmatprep.subr.mxu0 %v1515_v47  ;;  %v1594_v46 = vld [vmem:[#allocation25 + $0x310] sm:$0xff]  ;;  %v1589_v47 = vld [vmem:[#allocation25 + $0x2e8] sm:$0xff] }
 0x5de   :  { %3583 = vmatpush1.msra.mxu1 %v1512_v48  ;;  %3654 = vmatpush1.msra.mxu0 %v1514_v49  ;;  %v1591_v48 = vld [vmem:[#allocation25 + $0x2f8] sm:$0xff]  ;;  %v1588_v49 = vld [vmem:[#allocation25 + $0x2e0] sm:$0xff] }
 0x5df   :  { %3584 = vmatprep.subr.mxu1 %v1509_v10  ;;  %3655 = vmatprep.subr.mxu0 %v1511_v50  ;;  %v1590_v10 = vld [vmem:[#allocation25 + $0x2f0] sm:$0xff]  ;;  %v1585_v50 = vld [vmem:[#allocation25 + $0x2c8] sm:$0xff] }
 0x5e0   :  { %3585 = vmatpush1.msra.mxu1 %v1508_v51  ;;  %3656 = vmatpush1.msra.mxu0 %v1510_v52  ;;  %v1587_v51 = vld [vmem:[#allocation25 + $0x2d8] sm:$0xff]  ;;  %v1584_v52 = vld [vmem:[#allocation25 + $0x2c0] sm:$0xff] }
 0x5e1   :  { %3586 = vmatprep.subr.mxu1 %v1505_v22  ;;  %3657 = vmatprep.subr.mxu0 %v1507_v53  ;;  %v1586_v22 = vld [vmem:[#allocation25 + $0x2d0] sm:$0xff]  ;;  %v1581_v53 = vld [vmem:[#allocation25 + $0x2a8] sm:$0xff] }
 0x5e2   :  { %3587 = vmatpush1.msra.mxu1 %v1504_v55  ;;  %3658 = vmatpush1.msra.mxu0 %v1506_v56  ;;  %v1583_v55 = vld [vmem:[#allocation25 + $0x2b8] sm:$0xff]  ;;  %v1580_v56 = vld [vmem:[#allocation25 + $0x2a0] sm:$0xff] }
 0x5e3   :  { %3588 = vmatprep.subr.mxu1 %v1501_v58  ;;  %3659 = vmatprep.subr.mxu0 %v1503_v59  ;;  %v1582_v58 = vld [vmem:[#allocation25 + $0x2b0] sm:$0xff]  ;;  %v1577_v59 = vld [vmem:[#allocation25 + $0x288] sm:$0xff] }
 0x5e4   :  { %3589 = vmatpush1.msra.mxu1 %v1500_v60  ;;  %3660 = vmatpush1.msra.mxu0 %v1502_v57  ;;  %v1579_v60 = vld [vmem:[#allocation25 + $0x298] sm:$0xff]  ;;  %v1576_v57 = vld [vmem:[#allocation25 + $0x280] sm:$0xff] }
 0x5e5   :  { %3590 = vmatprep.subr.mxu1 %v1497_v61  ;;  %3661 = vmatprep.subr.mxu0 %v1499_v62  ;;  %v1578_v61 = vld [vmem:[#allocation25 + $0x290] sm:$0xff]  ;;  %v1573_v62 = vld [vmem:[#allocation25 + $0x268] sm:$0xff] }
 0x5e6   :  { %3591 = vmatpush1.msra.mxu1 %v1496_v1  ;;  %3662 = vmatpush1.msra.mxu0 %v1498_v14  ;;  %v1575_v1 = vld [vmem:[#allocation25 + $0x278] sm:$0xff]  ;;  %v1572_v14 = vld [vmem:[#allocation25 + $0x260] sm:$0xff] }
 0x5e7   :  { %3592 = vmatprep.subr.mxu1 %v1621_v2  ;;  %3663 = vmatprep.subr.mxu0 %v1623_v3  ;;  %v1574_v2 = vld [vmem:[#allocation25 + $0x270] sm:$0xff]  ;;  %v1569_v3 = vld [vmem:[#allocation25 + $0x248] sm:$0xff] }
 0x5e8   :  { %3593 = vmatpush2.msra.mxu1 %v1620_v4  ;;  %3664 = vmatpush2.msra.mxu0 %v1622_v41  ;;  %v1571_v4 = vld [vmem:[#allocation25 + $0x258] sm:$0xff]  ;;  %v1568_v41 = vld [vmem:[#allocation25 + $0x240] sm:$0xff] }
 0x5e9   :  { %3594 = vmatprep.subr.mxu1 %v1617_v6  ;;  %3665 = vmatprep.subr.mxu0 %v1619_v9  ;;  %v1570_v6 = vld [vmem:[#allocation25 + $0x250] sm:$0xff]  ;;  %v1565_v9 = vld [vmem:[#allocation25 + $0x228] sm:$0xff] }
 0x5ea   :  { %3595 = vmatpush2.msra.mxu1 %v1616_v11  ;;  %3666 = vmatpush2.msra.mxu0 %v1618_v12  ;;  %v1567_v11 = vld [vmem:[#allocation25 + $0x238] sm:$0xff]  ;;  %v1564_v12 = vld [vmem:[#allocation25 + $0x220] sm:$0xff] }
 0x5eb   :  { %3596 = vmatprep.subr.mxu1 %v1613_v13  ;;  %3667 = vmatprep.subr.mxu0 %v1615_v16  ;;  %v1566_v13 = vld [vmem:[#allocation25 + $0x230] sm:$0xff]  ;;  %v1561_v16 = vld [vmem:[#allocation25 + $0x208] sm:$0xff] }
 0x5ec   :  { %3597 = vmatpush2.msra.mxu1 %v1612_v17  ;;  %3668 = vmatpush2.msra.mxu0 %v1614_v18  ;;  %v1563_v17 = vld [vmem:[#allocation25 + $0x218] sm:$0xff]  ;;  %v1560_v18 = vld [vmem:[#allocation25 + $0x200] sm:$0xff] }
 0x5ed   :  { %3598 = vmatprep.subr.mxu1 %v1609_v19  ;;  %3669 = vmatprep.subr.mxu0 %v1611_v21  ;;  %v1562_v19 = vld [vmem:[#allocation25 + $0x210] sm:$0xff]  ;;  %v3270_v21 = vrot.slane %v10454_v15, 1 }
 0x5ee   :  { %3599 = vmatpush2.msra.mxu1 %v1608_v23  ;;  %3670 = vmatpush2.msra.mxu0 %v1610_v25 }
 0x5ef   :  { %3600 = vmatprep.subr.mxu1 %v1605_v26  ;;  %3671 = vmatprep.subr.mxu0 %v1607_v29 }
 0x5f0   :  { %3601 = vmatpush2.msra.mxu1 %v1604_v32  ;;  %3672 = vmatpush2.msra.mxu0 %v1606_v33 }
 0x5f1   :  { %3602 = vmatprep.subr.mxu1 %v1601_v35  ;;  %3673 = vmatprep.subr.mxu0 %v1603_v27  ;;  %v1625_v35 = vld [vmem:[#allocation26] sm:$0xf] }
 0x5f2   :  { %3603 = vmatpush2.msra.mxu1 %v1600_v38  ;;  %3674 = vmatpush2.msra.mxu0 %v1602_v39 }
 0x5f3   :  { %3604 = vmatprep.subr.mxu1 %v1597_v40  ;;  %3675 = vmatprep.subr.mxu0 %v1599_v42  ;;  %v10484_v42 = vrot.slane %v1625_v35, %v10323_v28 }
 0x5f4   :  { %3605 = vmatpush2.msra.mxu1 %v1596_v36  ;;  %3676 = vmatpush2.msra.mxu0 %v1598_v43  ;;  %v10487_v43 = vrot.slane %v1625_v35, %v10326_v30 }
 0x5f5   :  { %3606 = vmatprep.subr.mxu1 %v1593_v44  ;;  %3677 = vmatprep.subr.mxu0 %v1595_v45 }
 0x5f6   :  { %3607 = vmatpush2.msra.mxu1 %v1592_v63  ;;  %3678 = vmatpush2.msra.mxu0 %v1594_v46  ;;  %v10490_v46 = vrot.slane %v1625_v35, %v10338_v54 }
 0x5f7   :  { %3608 = vmatprep.subr.mxu1 %v1589_v47  ;;  %3679 = vmatprep.subr.mxu0 %v1591_v48  ;;  %v10493_v48 = vrot.slane %v1625_v35, %v10348_v24  ;;  %v1903_v35 = vld [vmem:[%s11038_s28 + $0x88] sm:$0xff] }
 0x5f8   :  { %3609 = vmatpush2.msra.mxu1 %v1588_v49  ;;  %3680 = vmatpush2.msra.mxu0 %v1590_v10 }
 0x5f9   :  { %3610 = vmatprep.subr.mxu1 %v1585_v50  ;;  %3681 = vmatprep.subr.mxu0 %v1587_v51 }
 0x5fa   :  { %3611 = vmatpush2.msra.mxu1 %v1584_v52  ;;  %3682 = vmatpush2.msra.mxu0 %v1586_v22 }
 0x5fb   :  { %3612 = vmatprep.subr.mxu1 %v1581_v53  ;;  %3683 = vmatprep.subr.mxu0 %v1583_v55 }
 0x5fc   :  { %3613 = vmatpush2.msra.mxu1 %v1580_v56  ;;  %3684 = vmatpush2.msra.mxu0 %v1582_v58  ;;  %v1884_v58 = vld [vmem:[#allocation28] sm:$0xf] }
 0x5fd   :  { %3614 = vmatprep.subr.mxu1 %v1577_v59  ;;  %3685 = vmatprep.subr.mxu0 %v1579_v60  ;;  %v1885_v60 = vld [vmem:[#allocation29] sm:$0xf] }
 0x5fe   :  { %3615 = vmatpush2.msra.mxu1 %v1576_v57  ;;  %3686 = vmatpush2.msra.mxu0 %v1578_v61  ;;  %v1917_v61 = vld [vmem:[%s11038_s28 + $0xf8] sm:$0xff] }
 0x5ff   :  { %3616 = vmatprep.subr.mxu1 %v1573_v62  ;;  %3687 = vmatprep.subr.mxu0 %v1575_v1  ;;  %v1916_v62 = vld [vmem:[%s11038_s28 + $0xf0] sm:$0xff]  ;;  %v1915_v1 = vld [vmem:[%s11038_s28 + $0xe8] sm:$0xff] }
 0x600   :  { %3617 = vmatpush2.msra.mxu1 %v1572_v14  ;;  %3688 = vmatpush2.msra.mxu0 %v1574_v2  ;;  %v1981_v14 = vld [vmem:[%s11038_s28 + $0x2f8] sm:$0xff]  ;;  %v1914_v2 = vld [vmem:[%s11038_s28 + $0xe0] sm:$0xff] }
 0x601   :  { %3618 = vmatprep.subr.mxu1 %v1569_v3  ;;  %3689 = vmatprep.subr.mxu0 %v1571_v4  ;;  %v1913_v3 = vld [vmem:[%s11038_s28 + $0xd8] sm:$0xff]  ;;  %v1912_v4 = vld [vmem:[%s11038_s28 + $0xd0] sm:$0xff] }
 0x602   :  { %3619 = vmatpush2.msra.mxu1 %v1568_v41  ;;  %3690 = vmatpush2.msra.mxu0 %v1570_v6  ;;  %v1980_v41 = vld [vmem:[%s11038_s28 + $0x2f0] sm:$0xff]  ;;  %v1911_v6 = vld [vmem:[%s11038_s28 + $0xc8] sm:$0xff] }
 0x603   :  { %3620 = vmatprep.subr.mxu1 %v1565_v9  ;;  %3691 = vmatprep.subr.mxu0 %v1567_v11  ;;  %v1979_v9 = vld [vmem:[%s11038_s28 + $0x2e8] sm:$0xff]  ;;  %v1910_v11 = vld [vmem:[%s11038_s28 + $0xc0] sm:$0xff] }
 0x604   :  { %3621 = vmatpush2.msra.mxu1 %v1564_v12  ;;  %3692 = vmatpush2.msra.mxu0 %v1566_v13  ;;  %v1978_v12 = vld [vmem:[%s11038_s28 + $0x2e0] sm:$0xff]  ;;  %v1909_v13 = vld [vmem:[%s11038_s28 + $0xb8] sm:$0xff] }
 0x605   :  { %3622 = vmatprep.subr.mxu1 %v1561_v16  ;;  %3693 = vmatprep.subr.mxu0 %v1563_v17  ;;  %v1977_v16 = vld [vmem:[%s11038_s28 + $0x2d8] sm:$0xff]  ;;  %v1908_v17 = vld [vmem:[%s11038_s28 + $0xb0] sm:$0xff] }
 0x606   :  { %3623 = vmatpush2.msra.mxu1 %v1560_v18  ;;  %3694 = vmatpush2.msra.mxu0 %v1562_v19  ;;  %v1976_v18 = vld [vmem:[%s11038_s28 + $0x2d0] sm:$0xff]  ;;  %v1907_v19 = vld [vmem:[%s11038_s28 + $0xa8] sm:$0xff] }
 0x607   :  { %7839 = vmatmul.mubr.msk.f32.vlgmr.msra.gmra.mxu1 %vm2154_vm4, %v3270_v21  ;;  %7841 = vmatmul.mubr.msk.f32.vlgmr.msra.gmra.mxu0 %vm2154_vm4, %v3270_v21  ;;  %v1975_v21 = vld [vmem:[%s11038_s28 + $0x2c8] sm:$0xff] }
 0x608   :  { %3803 = vmatprep.mubr.f32.mxu1 %v10010_v0  ;;  %3948 = vmatprep.mubr.f32.mxu0 %v10010_v0 }
 0x644   :  { %v3342_v23 = vpop.f32.mrf.mxu1  ;;  %v3413_v25 = vpop.f32.mrf.mxu0 }
 0x646   :  { %v3344_v26 = vpop.f32.mrf.mxu1  ;;  %v3415_v29 = vpop.f32.mrf.mxu0 }
 0x685   :  { %v3484_v32 = vpop.f32.mrf.mxu1  ;;  %v3555_v33 = vpop.f32.mrf.mxu0 }
 0x686   :  { %v3485_v38 = vadd.f32 %v3484_v32, %v3342_v23  ;;  %v3556_v39 = vadd.f32 %v3555_v33, %v3413_v25  ;;  %v1906_v23 = vld [vmem:[%s11038_s28 + $0xa0] sm:$0xff]  ;;  %v1904_v32 = vld [vmem:[%s11038_s28 + $0x90] sm:$0xff] }
 0x687   :  { %v3486_v15 = vpop.f32.mrf.mxu1  ;;  %v3557_v27 = vpop.f32.mrf.mxu0  ;;  %v1974_v25 = vld [vmem:[%s11038_s28 + $0x2c0] sm:$0xff]  ;;  %v1972_v33 = vld [vmem:[%s11038_s28 + $0x2b0] sm:$0xff] }
 0x688   :  { %v3487_v44 = vadd.f32 %v3486_v15, %v3344_v26  ;;  %v3558_v45 = vadd.f32 %v3557_v27, %v3415_v29  ;;  %v1905_v26 = vld [vmem:[%s11038_s28 + $0x98] sm:$0xff]  ;;  %v1971_v15 = vld [vmem:[%s11038_s28 + $0x2a8] sm:$0xff]  ;;  %v1902_v27 = vld [vmem:[%s11038_s28 + $0x80] sm:$0xff] }
 0x689   :  { %v1973_v29 = vld [vmem:[%s11038_s28 + $0x2b8] sm:$0xff] }
 0x6c7   :  { %v3626_v40 = vpop.f32.mrf.mxu1  ;;  %v3697_v36 = vpop.f32.mrf.mxu0 }
 0x6c8   :  { %v3702_v63 = vadd.f32 %v3626_v40, %v3485_v38  ;;  %v3704_v47 = vadd.f32 %v3697_v36, %v3556_v39  ;;  %v1970_v38 = vld [vmem:[%s11038_s28 + $0x2a0] sm:$0xff]  ;;  %v1901_v39 = vld [vmem:[%s11038_s28 + $0x78] sm:$0xff]  ;;  %v1900_v36 = vld [vmem:[%s11038_s28 + $0x70] sm:$0xff] }
 0x6c9   :  { %v3628_v49 = vpop.f32.mrf.mxu1  ;;  %v3699_v10 = vpop.f32.mrf.mxu0  ;;  %v1969_v40 = vld [vmem:[%s11038_s28 + $0x298] sm:$0xff] }
 0x6ca   :  { %v3703_v50 = vadd.f32 %v3628_v49, %v3487_v44  ;;  %v3705_v51 = vadd.f32 %v3699_v10, %v3558_v45  ;;  %v3727_v52 = vadd.f32 %v10484_v42, %v3702_v63  ;;  %v3729_v55 = vadd.f32 %v10493_v48, %v3704_v47  ;;  %v1968_v44 = vld [vmem:[%s11038_s28 + $0x290] sm:$0xff]  ;;  %v1899_v45 = vld [vmem:[%s11038_s28 + $0x68] sm:$0xff]  ;;  %v1898_v47 = vld [vmem:[%s11038_s28 + $0x60] sm:$0xff] }
 0x6cb   :  { %v1967_v63 = vld [vmem:[%s11038_s28 + $0x288] sm:$0xff]  ;;  %v1966_v49 = vld [vmem:[%s11038_s28 + $0x280] sm:$0xff]  ;;  %v1897_v10 = vld [vmem:[%s11038_s28 + $0x58] sm:$0xff] }
 0x6cc   :  { %v3728_v22 = vadd.f32 %v10487_v43, %v3703_v50  ;;  %v3730_v53 = vadd.f32 %v10490_v46, %v3705_v51  ;;  %v3731_v54 = vmax.f32 %v3727_v52, 0.0  ;;  %v3733_v57 = vmax.f32 %v3729_v55, 0.0  ;;  %v1965_v50 = vld [vmem:[%s11038_s28 + $0x278] sm:$0xff]  ;;  %v1896_v51 = vld [vmem:[%s11038_s28 + $0x50] sm:$0xff]  ;;  %v1894_v55 = vld [vmem:[%s11038_s28 + $0x40] sm:$0xff] }
 0x6cd   :  { %v1964_v52 = vld [vmem:[%s11038_s28 + $0x270] sm:$0xff] }
 0x6ce   :  { %v3732_v56 = vmax.f32 %v3728_v22, 0.0  ;;  %v3734_v59 = vmax.f32 %v3730_v53, 0.0  ;;  %v1895_v22 = vld [vmem:[%s11038_s28 + $0x48] sm:$0xff] }
 0x6cf   :  { %v1963_v53 = vld [vmem:[%s11038_s28 + $0x268] sm:$0xff] }
 0x6d0   :  { %3769 = vmatprep.subr.mxu1 %v3732_v56  ;;  %3914 = vmatprep.subr.mxu0 %v3732_v56  ;;  %v1962_v56 = vld [vmem:[%s11038_s28 + $0x260] sm:$0xff] }
 0x6d1   :  { %3770 = vmatpush1.msra.mxu1 %v3731_v54  ;;  %3915 = vmatpush1.msra.mxu0 %v3731_v54  ;;  %v1893_v54 = vld [vmem:[%s11038_s28 + $0x38] sm:$0xff] }
 0x6d2   :  { %7842 = vmatmul.mubr.msk.f32.vlgmr.msra.gmra.mxu1 %vm3735_vm6, %v1884_v58  ;;  %3840 = vmatprep.subr.mxu1 %v3734_v59 }
 0x6d3   :  { %7844 = vmatmul.mubr.msk.f32.vlgmr.msra.gmra.mxu0 %vm3735_vm6, %v1885_v60  ;;  %3841 = vmatpush1.msra.mxu1 %v3733_v57 }
 0x6d4   :  { %3985 = vmatprep.subr.mxu1 %v3734_v59  ;;  %3874 = vmatprep.mubr.f32.mxu1 %v10010_v0  ;;  %v1892_v59 = vld [vmem:[%s11038_s28 + $0x30] sm:$0xff] }
 0x6d5   :  { %4030 = vmatprep.subr.mxu0 %v1917_v61  ;;  %v1959_v61 = vld [vmem:[%s11038_s28 + $0x248] sm:$0xff] }
 0x6d6   :  { %7843 = vmatmul.mubr.msk.f32.vlgmr.msra.gmra.mxu1 %vm3735_vm6, %v1884_v58  ;;  %4031 = vmatpush1.msra.mxu0 %v1916_v62  ;;  %v1961_v58 = vld [vmem:[%s11038_s28 + $0x258] sm:$0xff]  ;;  %v1890_v62 = vld [vmem:[%s11038_s28 + $0x20] sm:$0xff] }
 0x6d7   :  { %3986 = vmatpush1.msra.mxu1 %v3733_v57  ;;  %4019 = vmatprep.mubr.f32.mxu1 %v10010_v0  ;;  %v1891_v57 = vld [vmem:[%s11038_s28 + $0x28] sm:$0xff] }
 0x6d8   :  { %4032 = vmatprep.subr.mxu0 %v1915_v1  ;;  %4101 = vmatprep.subr.mxu1 %v1981_v14  ;;  %v1958_v1 = vld [vmem:[%s11038_s28 + $0x240] sm:$0xff]  ;;  %v1889_v14 = vld [vmem:[%s11038_s28 + $0x18] sm:$0xff] }
 0x6d9   :  { %4033 = vmatpush1.msra.mxu0 %v1914_v2  ;;  %v1957_v2 = vld [vmem:[%s11038_s28 + $0x238] sm:$0xff] }
 0x6da   :  { %7845 = vmatmul.mubr.msk.f32.vlgmr.msra.gmra.mxu1 %vm3735_vm6, %v1885_v60  ;;  %4034 = vmatprep.subr.mxu0 %v1913_v3  ;;  %v1960_v60 = vld [vmem:[%s11038_s28 + $0x250] sm:$0xff] }
 0x6db   :  { %4035 = vmatpush1.msra.mxu0 %v1912_v4  ;;  %4102 = vmatpush1.msra.mxu1 %v1980_v41  ;;  %v1888_v3 = vld [vmem:[%s11038_s28 + $0x10] sm:$0xff]  ;;  %v1887_v41 = vld [vmem:[%s11038_s28 + $0x8] sm:$0xff] }
 0x6dc   :  { %4036 = vmatprep.subr.mxu0 %v1911_v6  ;;  %4103 = vmatprep.subr.mxu1 %v1979_v9  ;;  %v1956_v4 = vld [vmem:[%s11038_s28 + $0x230] sm:$0xff]  ;;  %v1955_v6 = vld [vmem:[%s11038_s28 + $0x228] sm:$0xff]  ;;  %v1886_v9 = vld [vmem:[%s11038_s28] sm:$0xff] }
 0x6dd   :  { %4037 = vmatpush1.msra.mxu0 %v1910_v11  ;;  %4104 = vmatpush1.msra.mxu1 %v1978_v12  ;;  %v1954_v11 = vld [vmem:[%s11038_s28 + $0x220] sm:$0xff]  ;;  %v1949_v12 = vld [vmem:[%s11038_s28 + $0x1f8] sm:$0xff] }
 0x6de   :  { %4038 = vmatprep.subr.mxu0 %v1909_v13  ;;  %4105 = vmatprep.subr.mxu1 %v1977_v16  ;;  %v1953_v13 = vld [vmem:[%s11038_s28 + $0x218] sm:$0xff]  ;;  %v1948_v16 = vld [vmem:[%s11038_s28 + $0x1f0] sm:$0xff] }
 0x6df   :  { %4039 = vmatpush1.msra.mxu0 %v1908_v17  ;;  %4106 = vmatpush1.msra.mxu1 %v1976_v18  ;;  %v1952_v17 = vld [vmem:[%s11038_s28 + $0x210] sm:$0xff]  ;;  %v1947_v18 = vld [vmem:[%s11038_s28 + $0x1e8] sm:$0xff] }
 0x6e0   :  { %4040 = vmatprep.subr.mxu0 %v1907_v19  ;;  %4107 = vmatprep.subr.mxu1 %v1975_v21  ;;  %v1951_v19 = vld [vmem:[%s11038_s28 + $0x208] sm:$0xff]  ;;  %v1946_v21 = vld [vmem:[%s11038_s28 + $0x1e0] sm:$0xff] }
 0x6e1   :  { %4041 = vmatpush1.msra.mxu0 %v1906_v23  ;;  %4108 = vmatpush1.msra.mxu1 %v1974_v25  ;;  %v1950_v23 = vld [vmem:[%s11038_s28 + $0x200] sm:$0xff]  ;;  %v1945_v25 = vld [vmem:[%s11038_s28 + $0x1d8] sm:$0xff] }
 0x6e2   :  { %4042 = vmatprep.subr.mxu0 %v1905_v26  ;;  %4109 = vmatprep.subr.mxu1 %v1973_v29  ;;  %v2013_v26 = vld [vmem:[%s11038_s28 + $0x3f8] sm:$0xff]  ;;  %v1944_v29 = vld [vmem:[%s11038_s28 + $0x1d0] sm:$0xff] }
 0x6e3   :  { %4043 = vmatpush1.msra.mxu0 %v1904_v32  ;;  %4110 = vmatpush1.msra.mxu1 %v1972_v33  ;;  %v2012_v32 = vld [vmem:[%s11038_s28 + $0x3f0] sm:$0xff]  ;;  %v1943_v33 = vld [vmem:[%s11038_s28 + $0x1c8] sm:$0xff] }
 0x6e4   :  { %4044 = vmatprep.subr.mxu0 %v1903_v35  ;;  %4111 = vmatprep.subr.mxu1 %v1971_v15  ;;  %v2011_v35 = vld [vmem:[%s11038_s28 + $0x3e8] sm:$0xff]  ;;  %v1942_v15 = vld [vmem:[%s11038_s28 + $0x1c0] sm:$0xff] }
 0x6e5   :  { %4045 = vmatpush1.msra.mxu0 %v1902_v27  ;;  %4112 = vmatpush1.msra.mxu1 %v1970_v38  ;;  %v2010_v27 = vld [vmem:[%s11038_s28 + $0x3e0] sm:$0xff]  ;;  %v1941_v38 = vld [vmem:[%s11038_s28 + $0x1b8] sm:$0xff] }
 0x6e6   :  { %4046 = vmatprep.subr.mxu0 %v1901_v39  ;;  %4113 = vmatprep.subr.mxu1 %v1969_v40  ;;  %v2009_v39 = vld [vmem:[%s11038_s28 + $0x3d8] sm:$0xff]  ;;  %v1940_v40 = vld [vmem:[%s11038_s28 + $0x1b0] sm:$0xff] }
 0x6e7   :  { %4047 = vmatpush1.msra.mxu0 %v1900_v36  ;;  %4114 = vmatpush1.msra.mxu1 %v1968_v44  ;;  %v2008_v36 = vld [vmem:[%s11038_s28 + $0x3d0] sm:$0xff]  ;;  %v1939_v44 = vld [vmem:[%s11038_s28 + $0x1a8] sm:$0xff] }
 0x6e8   :  { %4048 = vmatprep.subr.mxu0 %v1899_v45  ;;  %4115 = vmatprep.subr.mxu1 %v1967_v63  ;;  %v2007_v45 = vld [vmem:[%s11038_s28 + $0x3c8] sm:$0xff]  ;;  %v1938_v63 = vld [vmem:[%s11038_s28 + $0x1a0] sm:$0xff] }
 0x6e9   :  { %4049 = vmatpush1.msra.mxu0 %v1898_v47  ;;  %4116 = vmatpush1.msra.mxu1 %v1966_v49  ;;  %v2006_v47 = vld [vmem:[%s11038_s28 + $0x3c0] sm:$0xff]  ;;  %v1937_v49 = vld [vmem:[%s11038_s28 + $0x198] sm:$0xff] }
 0x6ea   :  { %4050 = vmatprep.subr.mxu0 %v1897_v10  ;;  %4117 = vmatprep.subr.mxu1 %v1965_v50  ;;  %v2005_v10 = vld [vmem:[%s11038_s28 + $0x3b8] sm:$0xff]  ;;  %v1936_v50 = vld [vmem:[%s11038_s28 + $0x190] sm:$0xff] }
 0x6eb   :  { %4051 = vmatpush1.msra.mxu0 %v1896_v51  ;;  %4118 = vmatpush1.msra.mxu1 %v1964_v52  ;;  %v2004_v51 = vld [vmem:[%s11038_s28 + $0x3b0] sm:$0xff]  ;;  %v1935_v52 = vld [vmem:[%s11038_s28 + $0x188] sm:$0xff] }
 0x6ec   :  { %4052 = vmatprep.subr.mxu0 %v1895_v22  ;;  %4119 = vmatprep.subr.mxu1 %v1963_v53  ;;  %v2003_v22 = vld [vmem:[%s11038_s28 + $0x3a8] sm:$0xff]  ;;  %v1934_v53 = vld [vmem:[%s11038_s28 + $0x180] sm:$0xff] }
 0x6ed   :  { %4053 = vmatpush1.msra.mxu0 %v1894_v55  ;;  %4120 = vmatpush1.msra.mxu1 %v1962_v56  ;;  %v2002_v55 = vld [vmem:[%s11038_s28 + $0x3a0] sm:$0xff]  ;;  %v1933_v56 = vld [vmem:[%s11038_s28 + $0x178] sm:$0xff] }
 0x6ee   :  { %4054 = vmatprep.subr.mxu0 %v1893_v54  ;;  %4121 = vmatprep.subr.mxu1 %v1961_v58  ;;  %v2001_v54 = vld [vmem:[%s11038_s28 + $0x398] sm:$0xff]  ;;  %v1932_v58 = vld [vmem:[%s11038_s28 + $0x170] sm:$0xff] }
 0x6ef   :  { %4055 = vmatpush1.msra.mxu0 %v1892_v59  ;;  %4122 = vmatpush1.msra.mxu1 %v1960_v60  ;;  %v2000_v59 = vld [vmem:[%s11038_s28 + $0x390] sm:$0xff]  ;;  %v1931_v60 = vld [vmem:[%s11038_s28 + $0x168] sm:$0xff] }
 0x6f0   :  { %4056 = vmatprep.subr.mxu0 %v1891_v57  ;;  %4123 = vmatprep.subr.mxu1 %v1959_v61  ;;  %v1999_v57 = vld [vmem:[%s11038_s28 + $0x388] sm:$0xff]  ;;  %v1930_v61 = vld [vmem:[%s11038_s28 + $0x160] sm:$0xff] }
 0x6f1   :  { %4057 = vmatpush1.msra.mxu0 %v1890_v62  ;;  %4124 = vmatpush1.msra.mxu1 %v1958_v1  ;;  %v1998_v62 = vld [vmem:[%s11038_s28 + $0x380] sm:$0xff]  ;;  %v1929_v1 = vld [vmem:[%s11038_s28 + $0x158] sm:$0xff] }
 0x6f2   :  { %4058 = vmatprep.subr.mxu0 %v1889_v14  ;;  %4125 = vmatprep.subr.mxu1 %v1957_v2  ;;  %v1997_v14 = vld [vmem:[%s11038_s28 + $0x378] sm:$0xff]  ;;  %v1928_v2 = vld [vmem:[%s11038_s28 + $0x150] sm:$0xff] }
 0x6f3   :  { %4059 = vmatpush1.msra.mxu0 %v1888_v3  ;;  %4126 = vmatpush1.msra.mxu1 %v1956_v4  ;;  %v1996_v3 = vld [vmem:[%s11038_s28 + $0x370] sm:$0xff]  ;;  %v1927_v4 = vld [vmem:[%s11038_s28 + $0x148] sm:$0xff] }
 0x6f4   :  { %4060 = vmatprep.subr.mxu0 %v1887_v41  ;;  %4127 = vmatprep.subr.mxu1 %v1955_v6  ;;  %v1995_v41 = vld [vmem:[%s11038_s28 + $0x368] sm:$0xff]  ;;  %v1926_v6 = vld [vmem:[%s11038_s28 + $0x140] sm:$0xff] }
 0x6f5   :  { %4061 = vmatpush1.msra.mxu0 %v1886_v9  ;;  %4128 = vmatpush1.msra.mxu1 %v1954_v11  ;;  %v1925_v9 = vld [vmem:[%s11038_s28 + $0x138] sm:$0xff]  ;;  %v1924_v11 = vld [vmem:[%s11038_s28 + $0x130] sm:$0xff] }
 0x6f6   :  { %4062 = vmatprep.subr.mxu0 %v1949_v12  ;;  %4129 = vmatprep.subr.mxu1 %v1953_v13  ;;  %v1923_v12 = vld [vmem:[%s11038_s28 + $0x128] sm:$0xff]  ;;  %v1922_v13 = vld [vmem:[%s11038_s28 + $0x120] sm:$0xff] }
 0x6f7   :  { %4063 = vmatpush2.msra.mxu0 %v1948_v16  ;;  %4130 = vmatpush1.msra.mxu1 %v1952_v17  ;;  %v1994_v16 = vld [vmem:[%s11038_s28 + $0x360] sm:$0xff]  ;;  %v1921_v17 = vld [vmem:[%s11038_s28 + $0x118] sm:$0xff] }
 0x6f8   :  { %4064 = vmatprep.subr.mxu0 %v1947_v18  ;;  %4131 = vmatprep.subr.mxu1 %v1951_v19  ;;  %v1993_v18 = vld [vmem:[%s11038_s28 + $0x358] sm:$0xff]  ;;  %v1920_v19 = vld [vmem:[%s11038_s28 + $0x110] sm:$0xff] }
 0x6f9   :  { %4065 = vmatpush2.msra.mxu0 %v1946_v21  ;;  %4132 = vmatpush1.msra.mxu1 %v1950_v23  ;;  %v1992_v21 = vld [vmem:[%s11038_s28 + $0x350] sm:$0xff]  ;;  %v1919_v23 = vld [vmem:[%s11038_s28 + $0x108] sm:$0xff] }
 0x6fa   :  { %4066 = vmatprep.subr.mxu0 %v1945_v25  ;;  %4133 = vmatprep.subr.mxu1 %v2013_v26  ;;  %v1991_v25 = vld [vmem:[%s11038_s28 + $0x348] sm:$0xff]  ;;  %v1918_v26 = vld [vmem:[%s11038_s28 + $0x100] sm:$0xff] }
 0x6fb   :  { %4067 = vmatpush2.msra.mxu0 %v1944_v29  ;;  %4134 = vmatpush2.msra.mxu1 %v2012_v32  ;;  %v1990_v29 = vld [vmem:[%s11038_s28 + $0x340] sm:$0xff]  ;;  %v1989_v32 = vld [vmem:[%s11038_s28 + $0x338] sm:$0xff] }
 0x6fc   :  { %4068 = vmatprep.subr.mxu0 %v1943_v33  ;;  %4135 = vmatprep.subr.mxu1 %v2011_v35  ;;  %v2045_v33 = vld [vmem:[#allocation31 + $0xf8] sm:$0xff]  ;;  %v1988_v35 = vld [vmem:[%s11038_s28 + $0x330] sm:$0xff] }
 0x6fd   :  { %4069 = vmatpush2.msra.mxu0 %v1942_v15  ;;  %4136 = vmatpush2.msra.mxu1 %v2010_v27  ;;  %v1987_v15 = vld [vmem:[%s11038_s28 + $0x328] sm:$0xff]  ;;  %v1986_v27 = vld [vmem:[%s11038_s28 + $0x320] sm:$0xff] }
 0x6fe   :  { %4070 = vmatprep.subr.mxu0 %v1941_v38  ;;  %4137 = vmatprep.subr.mxu1 %v2009_v39  ;;  %v1985_v38 = vld [vmem:[%s11038_s28 + $0x318] sm:$0xff]  ;;  %v1984_v39 = vld [vmem:[%s11038_s28 + $0x310] sm:$0xff] }
 0x6ff   :  { %4071 = vmatpush2.msra.mxu0 %v1940_v40  ;;  %4138 = vmatpush2.msra.mxu1 %v2008_v36  ;;  %v1983_v40 = vld [vmem:[%s11038_s28 + $0x308] sm:$0xff]  ;;  %v1982_v36 = vld [vmem:[%s11038_s28 + $0x300] sm:$0xff] }
 0x700   :  { %4072 = vmatprep.subr.mxu0 %v1939_v44  ;;  %4139 = vmatprep.subr.mxu1 %v2007_v45  ;;  %v2109_v44 = vld [vmem:[#allocation31 + $0x2f8] sm:$0xff] }
 0x701   :  { %4073 = vmatpush2.msra.mxu0 %v1938_v63  ;;  %4140 = vmatpush2.msra.mxu1 %v2006_v47 }
 0x702   :  { %4074 = vmatprep.subr.mxu0 %v1937_v49  ;;  %4141 = vmatprep.subr.mxu1 %v2005_v10 }
 0x703   :  { %4075 = vmatpush2.msra.mxu0 %v1936_v50  ;;  %4142 = vmatpush2.msra.mxu1 %v2004_v51 }
 0x704   :  { %4076 = vmatprep.subr.mxu0 %v1935_v52  ;;  %4143 = vmatprep.subr.mxu1 %v2003_v22  ;;  %v2044_v52 = vld [vmem:[#allocation31 + $0xf0] sm:$0xff] }
 0x705   :  { %4077 = vmatpush2.msra.mxu0 %v1934_v53  ;;  %4144 = vmatpush2.msra.mxu1 %v2002_v55  ;;  %v2043_v53 = vld [vmem:[#allocation31 + $0xe8] sm:$0xff]  ;;  %v2042_v55 = vld [vmem:[#allocation31 + $0xe0] sm:$0xff] }
 0x706   :  { %4078 = vmatprep.subr.mxu0 %v1933_v56  ;;  %4145 = vmatprep.subr.mxu1 %v2001_v54  ;;  %v2041_v54 = vld [vmem:[#allocation31 + $0xd8] sm:$0xff] }
 0x707   :  { %4079 = vmatpush2.msra.mxu0 %v1932_v58  ;;  %4146 = vmatpush2.msra.mxu1 %v2000_v59  ;;  %v2040_v58 = vld [vmem:[#allocation31 + $0xd0] sm:$0xff] }
 0x708   :  { %4080 = vmatprep.subr.mxu0 %v1931_v60  ;;  %4147 = vmatprep.subr.mxu1 %v1999_v57  ;;  %v2039_v60 = vld [vmem:[#allocation31 + $0xc8] sm:$0xff] }
 0x709   :  { %4081 = vmatpush2.msra.mxu0 %v1930_v61  ;;  %4148 = vmatpush2.msra.mxu1 %v1998_v62  ;;  %v2038_v61 = vld [vmem:[#allocation31 + $0xc0] sm:$0xff] }
 0x70a   :  { %4082 = vmatprep.subr.mxu0 %v1929_v1  ;;  %4149 = vmatprep.subr.mxu1 %v1997_v14  ;;  %v2037_v1 = vld [vmem:[#allocation31 + $0xb8] sm:$0xff]  ;;  %v2108_v14 = vld [vmem:[#allocation31 + $0x2f0] sm:$0xff] }
 0x70b   :  { %4083 = vmatpush2.msra.mxu0 %v1928_v2  ;;  %4150 = vmatpush2.msra.mxu1 %v1996_v3  ;;  %v2036_v2 = vld [vmem:[#allocation31 + $0xb0] sm:$0xff]  ;;  %v2107_v3 = vld [vmem:[#allocation31 + $0x2e8] sm:$0xff] }
 0x70c   :  { %4084 = vmatprep.subr.mxu0 %v1927_v4  ;;  %4151 = vmatprep.subr.mxu1 %v1995_v41  ;;  %v2035_v4 = vld [vmem:[#allocation31 + $0xa8] sm:$0xff]  ;;  %v2034_v41 = vld [vmem:[#allocation31 + $0xa0] sm:$0xff] }
 0x70d   :  { %4085 = vmatpush2.msra.mxu0 %v1926_v6  ;;  %4152 = vmatpush2.msra.mxu1 %v1994_v16  ;;  %v2106_v6 = vld [vmem:[#allocation31 + $0x2e0] sm:$0xff]  ;;  %v2031_v16 = vld [vmem:[#allocation31 + $0x88] sm:$0xff] }
 0x70e   :  { %4086 = vmatprep.subr.mxu0 %v1925_v9  ;;  %4153 = vmatprep.subr.mxu1 %v1993_v18  ;;  %v2033_v9 = vld [vmem:[#allocation31 + $0x98] sm:$0xff]  ;;  %v2030_v18 = vld [vmem:[#allocation31 + $0x80] sm:$0xff] }
 0x70f   :  { %4087 = vmatpush2.msra.mxu0 %v1924_v11  ;;  %4154 = vmatpush2.msra.mxu1 %v1992_v21  ;;  %v2105_v11 = vld [vmem:[#allocation31 + $0x2d8] sm:$0xff] }
 0x710   :  { %4088 = vmatprep.subr.mxu0 %v1923_v12  ;;  %4155 = vmatprep.subr.mxu1 %v1991_v25  ;;  %v2032_v12 = vld [vmem:[#allocation31 + $0x90] sm:$0xff]  ;;  %v2029_v21 = vld [vmem:[#allocation31 + $0x78] sm:$0xff] }
 0x711   :  { %4089 = vmatpush2.msra.mxu0 %v1922_v13  ;;  %4156 = vmatpush2.msra.mxu1 %v1990_v29  ;;  %v2104_v13 = vld [vmem:[#allocation31 + $0x2d0] sm:$0xff]  ;;  %v2027_v29 = vld [vmem:[#allocation31 + $0x68] sm:$0xff] }
 0x712   :  { %4090 = vmatprep.subr.mxu0 %v1921_v17  ;;  %4157 = vmatprep.subr.mxu1 %v1989_v32  ;;  %v2103_v17 = vld [vmem:[#allocation31 + $0x2c8] sm:$0xff]  ;;  %v2028_v25 = vld [vmem:[#allocation31 + $0x70] sm:$0xff] }
 0x713   :  { %4091 = vmatpush2.msra.mxu0 %v1920_v19  ;;  %4158 = vmatpush2.msra.mxu1 %v1988_v35  ;;  %v2102_v19 = vld [vmem:[#allocation31 + $0x2c0] sm:$0xff]  ;;  %v2099_v32 = vld [vmem:[#allocation31 + $0x2a8] sm:$0xff] }
 0x714   :  { %4092 = vmatprep.subr.mxu0 %v1919_v23  ;;  %4159 = vmatprep.subr.mxu1 %v1987_v15  ;;  %v2101_v23 = vld [vmem:[#allocation31 + $0x2b8] sm:$0xff]  ;;  %v2098_v35 = vld [vmem:[#allocation31 + $0x2a0] sm:$0xff] }
 0x715   :  { %4093 = vmatpush2.msra.mxu0 %v1918_v26  ;;  %4160 = vmatpush2.msra.mxu1 %v1986_v27  ;;  %v2100_v26 = vld [vmem:[#allocation31 + $0x2b0] sm:$0xff]  ;;  %v2025_v15 = vld [vmem:[#allocation31 + $0x58] sm:$0xff] }
 0x716   :  { %4172 = vmatprep.subr.mxu0 %v2045_v33  ;;  %4161 = vmatprep.subr.mxu1 %v1985_v38  ;;  %v2026_v33 = vld [vmem:[#allocation31 + $0x60] sm:$0xff]  ;;  %v2097_v27 = vld [vmem:[#allocation31 + $0x298] sm:$0xff]  ;;  %v2024_v38 = vld [vmem:[#allocation31 + $0x50] sm:$0xff] }
 0x717   :  { %4162 = vmatpush2.msra.mxu1 %v1984_v39  ;;  %v2096_v39 = vld [vmem:[#allocation31 + $0x290] sm:$0xff] }
 0x718   :  { %4163 = vmatprep.subr.mxu1 %v1983_v40  ;;  %v2023_v40 = vld [vmem:[#allocation31 + $0x48] sm:$0xff] }
 0x719   :  { %4164 = vmatpush2.msra.mxu1 %v1982_v36  ;;  %v2095_v36 = vld [vmem:[#allocation31 + $0x288] sm:$0xff] }
 0x71a   :  { %4243 = vmatprep.subr.mxu1 %v2109_v44  ;;  %v2022_v44 = vld [vmem:[#allocation31 + $0x40] sm:$0xff] }
 0x792   :  { %v3805_v45 = vpop.f32.mrf.mxu1 }
 0x793   :  { %v3950_v63 = vpop.f32.mrf.mxu0 }
 0x794   :  { %v3807_v47 = vpop.f32.mrf.mxu1  ;;  %v10633_v51 = vmax.f32 %v3805_v45, %v3950_v63  ;;  %v2094_v45 = vld [vmem:[#allocation31 + $0x280] sm:$0xff]  ;;  %v2021_v63 = vld [vmem:[#allocation31 + $0x38] sm:$0xff] }
 0x795   :  { %v3952_v49 = vpop.f32.mrf.mxu0 }
 0x796   :  { %v4027_v10 = vmax.f32 %v3807_v47, %v3952_v49  ;;  %v3876_v50 = vpop.f32.mrf.mxu1  ;;  %v2093_v47 = vld [vmem:[#allocation31 + $0x278] sm:$0xff]  ;;  %v2020_v49 = vld [vmem:[#allocation31 + $0x30] sm:$0xff] }
 0x798   :  { %4094 = vmatprep.mubr.f32.mxu0 %v4027_v10  ;;  %v3878_v22 = vpop.f32.mrf.mxu1 }
 0x799   :  { %4095 = vmatmul.mubr.f32.vlgmr.msra.gmra.mxu0 %v10633_v51 }
 0x79a   :  { %4173 = vmatpush1.msra.mxu0 %v2044_v52  ;;  %4236 = vmatprep.mubr.f32.mxu0 %v4027_v10  ;;  %v4021_v56 = vpop.f32.mrf.mxu1  ;;  %v2092_v10 = vld [vmem:[#allocation31 + $0x270] sm:$0xff]  ;;  %v2091_v52 = vld [vmem:[#allocation31 + $0x268] sm:$0xff] }
 0x79b   :  { %4174 = vmatprep.subr.mxu0 %v2043_v53  ;;  %v10636_v62 = vmax.f32 %v3876_v50, %v4021_v56  ;;  %v2019_v50 = vld [vmem:[#allocation31 + $0x28] sm:$0xff]  ;;  %v2090_v53 = vld [vmem:[#allocation31 + $0x260] sm:$0xff]  ;;  %v2089_v56 = vld [vmem:[#allocation31 + $0x258] sm:$0xff] }
 0x79c   :  { %4175 = vmatpush1.msra.mxu0 %v2042_v55  ;;  %v4023_v59 = vpop.f32.mrf.mxu1  ;;  %v2017_v55 = vld [vmem:[#allocation31 + $0x18] sm:$0xff] }
 0x79d   :  { %4176 = vmatprep.subr.mxu0 %v2041_v54  ;;  %v4029_v57 = vmax.f32 %v3878_v22, %v4023_v59  ;;  %v2018_v22 = vld [vmem:[#allocation31 + $0x20] sm:$0xff]  ;;  %v2016_v54 = vld [vmem:[#allocation31 + $0x10] sm:$0xff]  ;;  %v2015_v59 = vld [vmem:[#allocation31 + $0x8] sm:$0xff] }
 0x79e   :  { %4177 = vmatpush1.msra.mxu0 %v2040_v58  ;;  %v2088_v58 = vld [vmem:[#allocation31 + $0x250] sm:$0xff] }
 0x79f   :  { %4178 = vmatprep.subr.mxu0 %v2039_v60  ;;  %4165 = vmatprep.mubr.f32.mxu1 %v4029_v57  ;;  %v2087_v60 = vld [vmem:[#allocation31 + $0x248] sm:$0xff] }
 0x7a0   :  { %4179 = vmatpush1.msra.mxu0 %v2038_v61  ;;  %4166 = vmatmul.mubr.f32.vlgmr.msra.gmra.mxu1 %v10636_v62  ;;  %v2086_v61 = vld [vmem:[#allocation31 + $0x240] sm:$0xff] }
 0x7a1   :  { %4180 = vmatprep.subr.mxu0 %v2037_v1  ;;  %4244 = vmatpush1.msra.mxu1 %v2108_v14  ;;  %v2077_v1 = vld [vmem:[#allocation31 + $0x1f8] sm:$0xff] }
 0x7a2   :  { %4181 = vmatpush1.msra.mxu0 %v2036_v2  ;;  %4245 = vmatprep.subr.mxu1 %v2107_v3  ;;  %v2085_v14 = vld [vmem:[#allocation31 + $0x238] sm:$0xff]  ;;  %v2076_v2 = vld [vmem:[#allocation31 + $0x1f0] sm:$0xff] }
 0x7a3   :  { %4182 = vmatprep.subr.mxu0 %v2035_v4  ;;  %4307 = vmatprep.mubr.f32.mxu1 %v4029_v57  ;;  %v2014_v57 = vld [vmem:[#allocation31] sm:$0xff]  ;;  %v2084_v3 = vld [vmem:[#allocation31 + $0x230] sm:$0xff]  ;;  %v2075_v4 = vld [vmem:[#allocation31 + $0x1e8] sm:$0xff] }
 0x7a4   :  { %4183 = vmatpush1.msra.mxu0 %v2034_v41  ;;  %4246 = vmatpush1.msra.mxu1 %v2106_v6  ;;  %v2083_v41 = vld [vmem:[#allocation31 + $0x228] sm:$0xff]  ;;  %v2074_v6 = vld [vmem:[#allocation31 + $0x1e0] sm:$0xff] }
 0x7a5   :  { %4184 = vmatprep.subr.mxu0 %v2033_v9  ;;  %4247 = vmatprep.subr.mxu1 %v2105_v11  ;;  %v2082_v9 = vld [vmem:[#allocation31 + $0x220] sm:$0xff]  ;;  %v2073_v11 = vld [vmem:[#allocation31 + $0x1d8] sm:$0xff] }
 0x7a6   :  { %4185 = vmatpush1.msra.mxu0 %v2032_v12  ;;  %4248 = vmatpush1.msra.mxu1 %v2104_v13  ;;  %v2081_v12 = vld [vmem:[#allocation31 + $0x218] sm:$0xff]  ;;  %v2072_v13 = vld [vmem:[#allocation31 + $0x1d0] sm:$0xff] }
 0x7a7   :  { %4186 = vmatprep.subr.mxu0 %v2031_v16  ;;  %4249 = vmatprep.subr.mxu1 %v2103_v17  ;;  %v2080_v16 = vld [vmem:[#allocation31 + $0x210] sm:$0xff]  ;;  %v2071_v17 = vld [vmem:[#allocation31 + $0x1c8] sm:$0xff] }
 0x7a8   :  { %4187 = vmatpush1.msra.mxu0 %v2030_v18  ;;  %4250 = vmatpush1.msra.mxu1 %v2102_v19  ;;  %v2079_v18 = vld [vmem:[#allocation31 + $0x208] sm:$0xff]  ;;  %v2070_v19 = vld [vmem:[#allocation31 + $0x1c0] sm:$0xff] }
 0x7a9   :  { %4188 = vmatprep.subr.mxu0 %v2029_v21  ;;  %4251 = vmatprep.subr.mxu1 %v2101_v23  ;;  %v2078_v21 = vld [vmem:[#allocation31 + $0x200] sm:$0xff]  ;;  %v2069_v23 = vld [vmem:[#allocation31 + $0x1b8] sm:$0xff] }
 0x7aa   :  { %4189 = vmatpush1.msra.mxu0 %v2028_v25  ;;  %4252 = vmatpush1.msra.mxu1 %v2100_v26  ;;  %v2141_v25 = vld [vmem:[#allocation31 + $0x3f8] sm:$0xff]  ;;  %v2068_v26 = vld [vmem:[#allocation31 + $0x1b0] sm:$0xff] }
 0x7ab   :  { %4190 = vmatprep.subr.mxu0 %v2027_v29  ;;  %4253 = vmatprep.subr.mxu1 %v2099_v32  ;;  %v2140_v29 = vld [vmem:[#allocation31 + $0x3f0] sm:$0xff]  ;;  %v2067_v32 = vld [vmem:[#allocation31 + $0x1a8] sm:$0xff] }
 0x7ac   :  { %4191 = vmatpush1.msra.mxu0 %v2026_v33  ;;  %4254 = vmatpush1.msra.mxu1 %v2098_v35  ;;  %v2139_v33 = vld [vmem:[#allocation31 + $0x3e8] sm:$0xff]  ;;  %v2066_v35 = vld [vmem:[#allocation31 + $0x1a0] sm:$0xff] }
 0x7ad   :  { %4192 = vmatprep.subr.mxu0 %v2025_v15  ;;  %4255 = vmatprep.subr.mxu1 %v2097_v27  ;;  %v2138_v15 = vld [vmem:[#allocation31 + $0x3e0] sm:$0xff]  ;;  %v2065_v27 = vld [vmem:[#allocation31 + $0x198] sm:$0xff] }
 0x7ae   :  { %4193 = vmatpush1.msra.mxu0 %v2024_v38  ;;  %4256 = vmatpush1.msra.mxu1 %v2096_v39  ;;  %v2137_v38 = vld [vmem:[#allocation31 + $0x3d8] sm:$0xff]  ;;  %v2064_v39 = vld [vmem:[#allocation31 + $0x190] sm:$0xff] }
 0x7af   :  { %4194 = vmatprep.subr.mxu0 %v2023_v40  ;;  %4257 = vmatprep.subr.mxu1 %v2095_v36  ;;  %v2136_v40 = vld [vmem:[#allocation31 + $0x3d0] sm:$0xff]  ;;  %v2063_v36 = vld [vmem:[#allocation31 + $0x188] sm:$0xff] }
 0x7b0   :  { %4195 = vmatpush1.msra.mxu0 %v2022_v44  ;;  %4258 = vmatpush1.msra.mxu1 %v2094_v45  ;;  %v2135_v44 = vld [vmem:[#allocation31 + $0x3c8] sm:$0xff]  ;;  %v2062_v45 = vld [vmem:[#allocation31 + $0x180] sm:$0xff] }
 0x7b1   :  { %4196 = vmatprep.subr.mxu0 %v2021_v63  ;;  %4259 = vmatprep.subr.mxu1 %v2093_v47  ;;  %v2134_v63 = vld [vmem:[#allocation31 + $0x3c0] sm:$0xff]  ;;  %v2061_v47 = vld [vmem:[#allocation31 + $0x178] sm:$0xff] }
 0x7b2   :  { %4197 = vmatpush1.msra.mxu0 %v2020_v49  ;;  %4260 = vmatpush1.msra.mxu1 %v2092_v10  ;;  %v2133_v49 = vld [vmem:[#allocation31 + $0x3b8] sm:$0xff]  ;;  %v2060_v10 = vld [vmem:[#allocation31 + $0x170] sm:$0xff] }
 0x7b3   :  { %4198 = vmatprep.subr.mxu0 %v2019_v50  ;;  %4261 = vmatprep.subr.mxu1 %v2091_v52  ;;  %v2132_v50 = vld [vmem:[#allocation31 + $0x3b0] sm:$0xff]  ;;  %v2059_v52 = vld [vmem:[#allocation31 + $0x168] sm:$0xff] }
 0x7b4   :  { %4199 = vmatpush1.msra.mxu0 %v2018_v22  ;;  %4262 = vmatpush1.msra.mxu1 %v2090_v53  ;;  %v2131_v22 = vld [vmem:[#allocation31 + $0x3a8] sm:$0xff]  ;;  %v2058_v53 = vld [vmem:[#allocation31 + $0x160] sm:$0xff] }
 0x7b5   :  { %4200 = vmatprep.subr.mxu0 %v2017_v55  ;;  %4263 = vmatprep.subr.mxu1 %v2089_v56  ;;  %v2130_v55 = vld [vmem:[#allocation31 + $0x3a0] sm:$0xff]  ;;  %v2057_v56 = vld [vmem:[#allocation31 + $0x158] sm:$0xff] }
 0x7b6   :  { %4201 = vmatpush1.msra.mxu0 %v2016_v54  ;;  %4264 = vmatpush1.msra.mxu1 %v2088_v58  ;;  %v2129_v54 = vld [vmem:[#allocation31 + $0x398] sm:$0xff]  ;;  %v2056_v58 = vld [vmem:[#allocation31 + $0x150] sm:$0xff] }
 0x7b7   :  { %4202 = vmatprep.subr.mxu0 %v2015_v59  ;;  %4265 = vmatprep.subr.mxu1 %v2087_v60  ;;  %v2128_v59 = vld [vmem:[#allocation31 + $0x390] sm:$0xff]  ;;  %v2055_v60 = vld [vmem:[#allocation31 + $0x148] sm:$0xff] }
 0x7b8   :  { %4203 = vmatpush1.msra.mxu0 %v2014_v57  ;;  %4266 = vmatpush1.msra.mxu1 %v2086_v61  ;;  %v2127_v57 = vld [vmem:[#allocation31 + $0x388] sm:$0xff]  ;;  %v2054_v61 = vld [vmem:[#allocation31 + $0x140] sm:$0xff] }
 0x7b9   :  { %4204 = vmatprep.subr.mxu0 %v2077_v1  ;;  %4267 = vmatprep.subr.mxu1 %v2085_v14  ;;  %v2126_v1 = vld [vmem:[#allocation31 + $0x380] sm:$0xff]  ;;  %v2053_v14 = vld [vmem:[#allocation31 + $0x138] sm:$0xff] }
 0x7ba   :  { %4205 = vmatpush2.msra.mxu0 %v2076_v2  ;;  %4268 = vmatpush1.msra.mxu1 %v2084_v3  ;;  %v2125_v2 = vld [vmem:[#allocation31 + $0x378] sm:$0xff]  ;;  %v2052_v3 = vld [vmem:[#allocation31 + $0x130] sm:$0xff] }
 0x7bb   :  { %4206 = vmatprep.subr.mxu0 %v2075_v4  ;;  %4269 = vmatprep.subr.mxu1 %v2083_v41  ;;  %v2124_v4 = vld [vmem:[#allocation31 + $0x370] sm:$0xff]  ;;  %v2051_v41 = vld [vmem:[#allocation31 + $0x128] sm:$0xff] }
 0x7bc   :  { %4207 = vmatpush2.msra.mxu0 %v2074_v6  ;;  %4270 = vmatpush1.msra.mxu1 %v2082_v9  ;;  %v2123_v6 = vld [vmem:[#allocation31 + $0x368] sm:$0xff]  ;;  %v2050_v9 = vld [vmem:[#allocation31 + $0x120] sm:$0xff] }
 0x7bd   :  { %4208 = vmatprep.subr.mxu0 %v2073_v11  ;;  %4271 = vmatprep.subr.mxu1 %v2081_v12  ;;  %v2122_v11 = vld [vmem:[#allocation31 + $0x360] sm:$0xff]  ;;  %v2049_v12 = vld [vmem:[#allocation31 + $0x118] sm:$0xff] }
 0x7be   :  { %4209 = vmatpush2.msra.mxu0 %v2072_v13  ;;  %4272 = vmatpush1.msra.mxu1 %v2080_v16  ;;  %v2121_v13 = vld [vmem:[#allocation31 + $0x358] sm:$0xff]  ;;  %v2048_v16 = vld [vmem:[#allocation31 + $0x110] sm:$0xff] }
 0x7bf   :  { %4210 = vmatprep.subr.mxu0 %v2071_v17  ;;  %4273 = vmatprep.subr.mxu1 %v2079_v18  ;;  %v2120_v17 = vld [vmem:[#allocation31 + $0x350] sm:$0xff]  ;;  %v2047_v18 = vld [vmem:[#allocation31 + $0x108] sm:$0xff] }
 0x7c0   :  { %4211 = vmatpush2.msra.mxu0 %v2070_v19  ;;  %4274 = vmatpush1.msra.mxu1 %v2078_v21  ;;  %v2119_v19 = vld [vmem:[#allocation31 + $0x348] sm:$0xff]  ;;  %v2046_v21 = vld [vmem:[#allocation31 + $0x100] sm:$0xff] }
 0x7c1   :  { %4212 = vmatprep.subr.mxu0 %v2069_v23  ;;  %4275 = vmatprep.subr.mxu1 %v2141_v25  ;;  %v2118_v23 = vld [vmem:[#allocation31 + $0x340] sm:$0xff]  ;;  %v2117_v25 = vld [vmem:[#allocation31 + $0x338] sm:$0xff] }
 0x7c2   :  { %4213 = vmatpush2.msra.mxu0 %v2068_v26  ;;  %4276 = vmatpush2.msra.mxu1 %v2140_v29  ;;  %v2116_v26 = vld [vmem:[#allocation31 + $0x330] sm:$0xff]  ;;  %v2115_v29 = vld [vmem:[#allocation31 + $0x328] sm:$0xff] }
 0x7c3   :  { %4214 = vmatprep.subr.mxu0 %v2067_v32  ;;  %4277 = vmatprep.subr.mxu1 %v2139_v33  ;;  %v2114_v32 = vld [vmem:[#allocation31 + $0x320] sm:$0xff]  ;;  %v8262_v33 = vld [vmem:[#allocation11 + $0xe8] sm:$0xff] }
 0x7c4   :  { %4215 = vmatpush2.msra.mxu0 %v2066_v35  ;;  %4278 = vmatpush2.msra.mxu1 %v2138_v15  ;;  %v2113_v35 = vld [vmem:[#allocation31 + $0x318] sm:$0xff]  ;;  %v8263_v15 = vld [vmem:[#allocation11 + $0xe0] sm:$0xff] }
 0x7c5   :  { %4216 = vmatprep.subr.mxu0 %v2065_v27  ;;  %4279 = vmatprep.subr.mxu1 %v2137_v38  ;;  %v2112_v27 = vld [vmem:[#allocation31 + $0x310] sm:$0xff]  ;;  %v8264_v38 = vld [vmem:[#allocation11 + $0xc8] sm:$0xff] }
 0x7c6   :  { %4217 = vmatpush2.msra.mxu0 %v2064_v39  ;;  %4280 = vmatpush2.msra.mxu1 %v2136_v40  ;;  %v2111_v39 = vld [vmem:[#allocation31 + $0x308] sm:$0xff]  ;;  %v8265_v40 = vld [vmem:[#allocation11 + $0xc0] sm:$0xff] }
 0x7c7   :  { %4218 = vmatprep.subr.mxu0 %v2063_v36  ;;  %4281 = vmatprep.subr.mxu1 %v2135_v44  ;;  %v2110_v36 = vld [vmem:[#allocation31 + $0x300] sm:$0xff]  ;;  %v8266_v44 = vld [vmem:[#allocation11 + $0xa8] sm:$0xff] }
 0x7c8   :  { %4219 = vmatpush2.msra.mxu0 %v2062_v45  ;;  %4282 = vmatpush2.msra.mxu1 %v2134_v63  ;;  %v8268_v45 = vld [vmem:[#allocation11 + $0x88] sm:$0xff]  ;;  %v8269_v63 = vld [vmem:[#allocation11 + $0x80] sm:$0xff] }
 0x7c9   :  { %4220 = vmatprep.subr.mxu0 %v2061_v47  ;;  %4283 = vmatprep.subr.mxu1 %v2133_v49  ;;  %v8270_v47 = vld [vmem:[#allocation11 + $0x68] sm:$0xff]  ;;  %v8271_v49 = vld [vmem:[#allocation11 + $0xf8] sm:$0xff] }
 0x7ca   :  { %4221 = vmatpush2.msra.mxu0 %v2060_v10  ;;  %4284 = vmatpush2.msra.mxu1 %v2132_v50  ;;  %v8272_v10 = vld [vmem:[#allocation11 + $0x60] sm:$0xff]  ;;  %v8273_v50 = vld [vmem:[#allocation11 + $0xf0] sm:$0xff] }
 0x7cb   :  { %4222 = vmatprep.subr.mxu0 %v2059_v52  ;;  %4285 = vmatprep.subr.mxu1 %v2131_v22  ;;  %v8274_v52 = vld [vmem:[#allocation11 + $0x48] sm:$0xff]  ;;  %v8275_v22 = vld [vmem:[#allocation11 + $0xd8] sm:$0xff] }
 0x7cc   :  { %4223 = vmatpush2.msra.mxu0 %v2058_v53  ;;  %4286 = vmatpush2.msra.mxu1 %v2130_v55  ;;  %v8276_v53 = vld [vmem:[#allocation11 + $0x40] sm:$0xff]  ;;  %v8277_v55 = vld [vmem:[#allocation11 + $0xd0] sm:$0xff] }
 0x7cd   :  { %4224 = vmatprep.subr.mxu0 %v2057_v56  ;;  %4287 = vmatprep.subr.mxu1 %v2129_v54  ;;  %v8278_v56 = vld [vmem:[#allocation11 + $0x28] sm:$0xff]  ;;  %v8280_v54 = vld [vmem:[#allocation11 + $0x20] sm:$0xff] }
 0x7ce   :  { %4225 = vmatpush2.msra.mxu0 %v2056_v58  ;;  %4288 = vmatpush2.msra.mxu1 %v2128_v59  ;;  %v8281_v58 = vld [vmem:[#allocation11 + $0xb0] sm:$0xff]  ;;  %v8282_v59 = vld [vmem:[#allocation11 + $0x8] sm:$0xff] }
 0x7cf   :  { %4226 = vmatprep.subr.mxu0 %v2055_v60  ;;  %4289 = vmatprep.subr.mxu1 %v2127_v57  ;;  %v8283_v60 = vld [vmem:[#allocation11 + $0x98] sm:$0xff]  ;;  %v10642_v57 = vld [vmem:[%s11035_s4 + $0x10] sm:$0xff] }
 0x7d0   :  { %4227 = vmatpush2.msra.mxu0 %v2054_v61  ;;  %4290 = vmatpush2.msra.mxu1 %v2126_v1  ;;  %v8284_v61 = vld [vmem:[#allocation11] sm:$0xff]  ;;  %v8285_v1 = vld [vmem:[#allocation11 + $0x90] sm:$0xff] }
 0x7d1   :  { %4228 = vmatprep.subr.mxu0 %v2053_v14  ;;  %4291 = vmatprep.subr.mxu1 %v2125_v2  ;;  %v8286_v14 = vld [vmem:[#allocation11 + $0x78] sm:$0xff]  ;;  %v8287_v2 = vld [vmem:[#allocation10 + $0xe8] sm:$0xff] }
 0x7d2   :  { %4229 = vmatpush2.msra.mxu0 %v2052_v3  ;;  %4292 = vmatpush2.msra.mxu1 %v2124_v4  ;;  %v8288_v3 = vld [vmem:[#allocation11 + $0x70] sm:$0xff]  ;;  %v8289_v4 = vld [vmem:[#allocation10 + $0xe0] sm:$0xff] }
 0x7d3   :  { %4230 = vmatprep.subr.mxu0 %v2051_v41  ;;  %4293 = vmatprep.subr.mxu1 %v2123_v6  ;;  %v8290_v41 = vld [vmem:[#allocation11 + $0x58] sm:$0xff]  ;;  %v8291_v6 = vld [vmem:[#allocation10 + $0xc8] sm:$0xff] }
 0x7d4   :  { %4231 = vmatpush2.msra.mxu0 %v2050_v9  ;;  %4294 = vmatpush2.msra.mxu1 %v2122_v11  ;;  %v8292_v9 = vld [vmem:[#allocation11 + $0x50] sm:$0xff]  ;;  %v8293_v11 = vld [vmem:[#allocation10 + $0xc0] sm:$0xff] }
 0x7d5   :  { %4232 = vmatprep.subr.mxu0 %v2049_v12  ;;  %4295 = vmatprep.subr.mxu1 %v2121_v13  ;;  %v8294_v12 = vld [vmem:[#allocation11 + $0x38] sm:$0xff]  ;;  %v8295_v13 = vld [vmem:[#allocation10 + $0xa8] sm:$0xff] }
 0x7d6   :  { %4233 = vmatpush2.msra.mxu0 %v2048_v16  ;;  %4296 = vmatpush2.msra.mxu1 %v2120_v17  ;;  %v8296_v16 = vld [vmem:[#allocation11 + $0x30] sm:$0xff]  ;;  %v8297_v17 = vld [vmem:[#allocation10 + $0xa0] sm:$0xff] }
 0x7d7   :  { %4234 = vmatprep.subr.mxu0 %v2047_v18  ;;  %4297 = vmatprep.subr.mxu1 %v2119_v19  ;;  %v8298_v18 = vld [vmem:[#allocation11 + $0x18] sm:$0xff]  ;;  %v8299_v19 = vld [vmem:[#allocation10 + $0x88] sm:$0xff] }
 0x7d8   :  { %4235 = vmatpush2.msra.mxu0 %v2046_v21  ;;  %4298 = vmatpush2.msra.mxu1 %v2118_v23  ;;  %v8300_v21 = vld [vmem:[#allocation11 + $0x10] sm:$0xff]  ;;  %v8301_v23 = vld [vmem:[#allocation10 + $0x80] sm:$0xff] }
 0x7d9   :  { %4237 = vmatmul.mubr.f32.vlgmr.msra.gmra.mxu0 %v10633_v51  ;;  %4299 = vmatprep.subr.mxu1 %v2117_v25  ;;  %v8267_v51 = vld [vmem:[#allocation11 + $0xa0] sm:$0xff]  ;;  %v8302_v25 = vld [vmem:[#allocation10 + $0x68] sm:$0xff] }
 0x7da   :  { %4362 = vmatprep.subr.mxu0 %v8262_v33  ;;  %4300 = vmatpush2.msra.mxu1 %v2116_v26  ;;  %v8303_v26 = vld [vmem:[#allocation10 + $0xf8] sm:$0xff] }
 0x7db   :  { %4363 = vmatpush1.msra.mxu0 %v8263_v15  ;;  %4301 = vmatprep.subr.mxu1 %v2115_v29  ;;  %v8304_v29 = vld [vmem:[#allocation10 + $0x60] sm:$0xff]  ;;  %v10651_v33 = vld [vmem:[%s11035_s4 + $0x18] sm:$0xff]  ;;  %v8306_v15 = vld [vmem:[#allocation10 + $0x48] sm:$0xff] }
 0x7dc   :  { %4364 = vmatprep.subr.mxu0 %v8264_v38  ;;  %4302 = vmatpush2.msra.mxu1 %v2114_v32  ;;  %v8305_v32 = vld [vmem:[#allocation10 + $0xf0] sm:$0xff]  ;;  %v8308_v38 = vld [vmem:[#allocation10 + $0x40] sm:$0xff] }
 0x7dd   :  { %4365 = vmatpush1.msra.mxu0 %v8265_v40  ;;  %4303 = vmatprep.subr.mxu1 %v2113_v35  ;;  %v4332_v35 = vrot.slane %v10642_v57, 7  ;;  %v8310_v40 = vld [vmem:[#allocation10 + $0x28] sm:$0xff] }
 0x7de   :  { %4366 = vmatprep.subr.mxu0 %v8266_v44  ;;  %4304 = vmatpush2.msra.mxu1 %v2112_v27  ;;  %v8307_v27 = vld [vmem:[#allocation10 + $0xd8] sm:$0xff]  ;;  %v8312_v44 = vld [vmem:[#allocation10 + $0x20] sm:$0xff] }
 0x7df   :  { %4367 = vmatpush1.msra.mxu0 %v8267_v51  ;;  %4305 = vmatprep.subr.mxu1 %v2111_v39  ;;  %v8309_v39 = vld [vmem:[#allocation10 + $0xd0] sm:$0xff] }
 0x7e0   :  { %4368 = vmatprep.subr.mxu0 %v8268_v45  ;;  %4306 = vmatpush2.msra.mxu1 %v2110_v36  ;;  %v8311_v36 = vld [vmem:[#allocation10 + $0xb8] sm:$0xff]  ;;  %v8313_v51 = vld [vmem:[#allocation10 + $0xb0] sm:$0xff]  ;;  %v4336_v45 = vsel %vm2148_vm2, 0.0, %v4332_v35 }
 0x7e1   :  { %4369 = vmatpush1.msra.mxu0 %v8269_v63  ;;  %4308 = vmatmul.mubr.f32.vlgmr.msra.gmra.mxu1 %v10636_v62  ;;  %v8279_v62 = vld [vmem:[#allocation11 + $0xb8] sm:$0xff]  ;;  %v8314_v63 = vld [vmem:[#allocation10 + $0x8] sm:$0xff] }
 0x7e2   :  { %4370 = vmatprep.subr.mxu0 %v8270_v47  ;;  %4439 = vmatprep.subr.mxu1 %v8271_v49  ;;  %v8315_v47 = vld [vmem:[#allocation10 + $0x98] sm:$0xff]  ;;  %v8316_v49 = vld [vmem:[#allocation10] sm:$0xff] }
 0x7e3   :  { %4371 = vmatpush1.msra.mxu0 %v8272_v10  ;;  %4440 = vmatpush1.msra.mxu1 %v8273_v50  ;;  %v4333_v10 = vrot.slane %v10651_v33, 7  ;;  %v8317_v50 = vld [vmem:[#allocation10 + $0x90] sm:$0xff] }
 0x7e4   :  { %4372 = vmatprep.subr.mxu0 %v8274_v52  ;;  %4441 = vmatprep.subr.mxu1 %v8275_v22  ;;  %v8318_v52 = vld [vmem:[#allocation10 + $0x78] sm:$0xff]  ;;  %v8319_v22 = vld [vmem:[#allocation13 + $0xe8] sm:$0xff] }
 0x7e5   :  { %4373 = vmatpush1.msra.mxu0 %v8276_v53  ;;  %4442 = vmatpush1.msra.mxu1 %v8277_v55  ;;  %v8320_v53 = vld [vmem:[#allocation10 + $0x70] sm:$0xff]  ;;  %v8321_v55 = vld [vmem:[#allocation13 + $0xe0] sm:$0xff] }
 0x7e6   :  { %4374 = vmatprep.subr.mxu0 %v8278_v56  ;;  %4443 = vmatprep.subr.mxu1 %v8279_v62  ;;  %v8322_v56 = vld [vmem:[#allocation10 + $0x58] sm:$0xff]  ;;  %v8323_v62 = vld [vmem:[#allocation13 + $0xc8] sm:$0xff] }
 0x7e7   :  { %4375 = vmatpush1.msra.mxu0 %v8280_v54  ;;  %4444 = vmatpush1.msra.mxu1 %v8281_v58  ;;  %v4334_v54 = vsel %vm2148_vm2, %v4332_v35, %v4333_v10  ;;  %v8324_v58 = vld [vmem:[#allocation10 + $0x50] sm:$0xff]  ;;  %v8348_v35 = vld [vmem:[#allocation13] sm:$0xff] }
 0x7e8   :  { %4376 = vmatprep.subr.mxu0 %v8282_v59  ;;  %4445 = vmatprep.subr.mxu1 %v8283_v60  ;;  %v8325_v59 = vld [vmem:[#allocation13 + $0xc0] sm:$0xff]  ;;  %v8326_v60 = vld [vmem:[#allocation10 + $0x38] sm:$0xff] }
 0x7e9   :  { %4377 = vmatpush1.msra.mxu0 %v8284_v61  ;;  %4446 = vmatpush1.msra.mxu1 %v8285_v1  ;;  %v8327_v61 = vld [vmem:[#allocation13 + $0xa8] sm:$0xff]  ;;  %v8328_v1 = vld [vmem:[#allocation10 + $0x30] sm:$0xff] }
 0x7ea   :  { %4410 = vmatprep.mubr.f32.mxu0 %v10010_v0  ;;  %4447 = vmatprep.subr.mxu1 %v8286_v14  ;;  %v8329_v14 = vld [vmem:[#allocation13 + $0xa0] sm:$0xff] }
 0x7eb   :  { %4521 = vmatprep.subr.mxu0 %v8287_v2  ;;  %7846 = vmatmul.mubr.msk.f32.vlgmr.msra.gmra.mxu0 %vm2160_vm3, %v10642_v57  ;;  %v8330_v2 = vld [vmem:[#allocation10 + $0x18] sm:$0xff] }
 0x7ec   :  { %4448 = vmatpush1.msra.mxu1 %v8288_v3  ;;  %4522 = vmatpush1.msra.mxu0 %v8289_v4  ;;  %v8331_v3 = vld [vmem:[#allocation13 + $0x88] sm:$0xff]  ;;  %v8332_v4 = vld [vmem:[#allocation10 + $0x10] sm:$0xff] }
 0x7ed   :  { %4449 = vmatprep.subr.mxu1 %v8290_v41  ;;  %4523 = vmatprep.subr.mxu0 %v8291_v6  ;;  %v8333_v41 = vld [vmem:[#allocation13 + $0x80] sm:$0xff]  ;;  %v8334_v6 = vld [vmem:[#allocation13 + $0x68] sm:$0xff] }
 0x7ee   :  { %4450 = vmatpush1.msra.mxu1 %v8292_v9  ;;  %4524 = vmatpush1.msra.mxu0 %v8293_v11  ;;  %v8335_v9 = vld [vmem:[#allocation13 + $0xf8] sm:$0xff]  ;;  %v8336_v11 = vld [vmem:[#allocation13 + $0x60] sm:$0xff] }
 0x7ef   :  { %4451 = vmatprep.subr.mxu1 %v8294_v12  ;;  %4525 = vmatprep.subr.mxu0 %v8295_v13  ;;  %v8337_v12 = vld [vmem:[#allocation13 + $0xf0] sm:$0xff]  ;;  %v4337_v13 = vrot.slane %v10642_v57, 1 }
 0x7f0   :  { %4452 = vmatpush1.msra.mxu1 %v8296_v16  ;;  %4526 = vmatpush1.msra.mxu0 %v8297_v17  ;;  %v4338_v16 = vrot.slane %v10651_v33, 1  ;;  %v8338_v17 = vld [vmem:[#allocation13 + $0x48] sm:$0xff] }
 0x7f1   :  { %4453 = vmatprep.subr.mxu1 %v8298_v18  ;;  %4527 = vmatprep.subr.mxu0 %v8299_v19  ;;  %v8339_v18 = vld [vmem:[#allocation13 + $0xd8] sm:$0xff]  ;;  %v8340_v19 = vld [vmem:[#allocation13 + $0x40] sm:$0xff] }
 0x7f2   :  { %4454 = vmatpush1.msra.mxu1 %v8300_v21  ;;  %4487 = vmatprep.mubr.f32.mxu1 %v10010_v0  ;;  %v8341_v21 = vld [vmem:[#allocation13 + $0xd0] sm:$0xff] }
 0x7f3   :  { %4528 = vmatpush1.msra.mxu0 %v8301_v23  ;;  %7848 = vmatmul.mubr.msk.f32.vlgmr.msra.gmra.mxu1 %vm2160_vm3, %v10642_v57  ;;  %v8342_v23 = vld [vmem:[#allocation13 + $0x28] sm:$0xff]  ;;  %v8345_v57 = vld [vmem:[#allocation13 + $0xb0] sm:$0xff] }
 0x7f4   :  { %4529 = vmatprep.subr.mxu0 %v8302_v25  ;;  %4598 = vmatprep.subr.mxu1 %v8303_v26  ;;  %v8343_v25 = vld [vmem:[#allocation13 + $0xb8] sm:$0xff]  ;;  %v8344_v26 = vld [vmem:[#allocation13 + $0x20] sm:$0xff] }
 0x7f5   :  { %4530 = vmatpush1.msra.mxu0 %v8304_v29  ;;  %4599 = vmatpush1.msra.mxu1 %v8305_v32  ;;  %v4339_v29 = vsel %vm2154_vm4, %v4337_v13, %v4338_v16  ;;  %v8346_v32 = vld [vmem:[#allocation13 + $0x8] sm:$0xff] }
 0x7f6   :  { %4531 = vmatprep.subr.mxu0 %v8306_v15  ;;  %4600 = vmatprep.subr.mxu1 %v8307_v27  ;;  %v8349_v15 = vld [vmem:[#allocation13 + $0x90] sm:$0xff]  ;;  %v8350_v27 = vld [vmem:[#allocation13 + $0x78] sm:$0xff] }
 0x7f7   :  { %4416 = vmatprep.mubr.f32.mxu0 %v10010_v0  ;;  %4532 = vmatpush1.msra.mxu0 %v8308_v38  ;;  %v4341_v38 = vsel %vm2154_vm4, %v4338_v16, 0.0 }
 0x7f8   :  { %4601 = vmatpush1.msra.mxu1 %v8309_v39  ;;  %7847 = vmatmul.mubr.msk.f32.gmra.mxu0 %vm2160_vm3, %v10651_v33  ;;  %v8351_v39 = vld [vmem:[#allocation13 + $0x70] sm:$0xff] }
 0x7f9   :  { %4533 = vmatprep.subr.mxu0 %v8310_v40  ;;  %4602 = vmatprep.subr.mxu1 %v8311_v36  ;;  %v8352_v40 = vld [vmem:[#allocation13 + $0x58] sm:$0xff]  ;;  %v8353_v36 = vld [vmem:[#allocation13 + $0x50] sm:$0xff] }
 0x7fa   :  { %4534 = vmatpush1.msra.mxu0 %v8312_v44  ;;  %4603 = vmatpush1.msra.mxu1 %v8313_v51  ;;  %v8354_v44 = vld [vmem:[#allocation13 + $0x38] sm:$0xff]  ;;  %v8355_v51 = vld [vmem:[#allocation13 + $0x30] sm:$0xff] }
 0x7fb   :  { %4535 = vmatprep.subr.mxu0 %v8314_v63  ;;  %4604 = vmatprep.subr.mxu1 %v8315_v47  ;;  %v8357_v63 = vld [vmem:[#allocation13 + $0x10] sm:$0xff] }
 0x7fc   :  { %4536 = vmatpush1.msra.mxu0 %v8316_v49  ;;  %4569 = vmatprep.mubr.f32.mxu0 %v10010_v0 }
 0x7fd   :  { %4605 = vmatpush1.msra.mxu1 %v8317_v50  ;;  %7850 = vmatmul.mubr.msk.f32.vlgmr.msra.gmra.mxu0 %vm2160_vm3, %v4336_v45 }
 0x7fe   :  { %4606 = vmatprep.subr.mxu1 %v8318_v52  ;;  %4680 = vmatprep.subr.mxu0 %v8319_v22 }
 0x7ff   :  { %4607 = vmatpush1.msra.mxu1 %v8320_v53  ;;  %4681 = vmatpush1.msra.mxu0 %v8321_v55 }
 0x800   :  { %4493 = vmatprep.mubr.f32.mxu1 %v10010_v0  ;;  %4608 = vmatprep.subr.mxu1 %v8322_v56 }
 0x801   :  { %4682 = vmatprep.subr.mxu0 %v8323_v62  ;;  %7849 = vmatmul.mubr.msk.f32.gmra.mxu1 %vm2160_vm3, %v10651_v33  ;;  %v8347_v33 = vld [vmem:[#allocation13 + $0x98] sm:$0xff] }
 0x802   :  { %4575 = vmatprep.mubr.f32.mxu0 %v10010_v0  ;;  %4609 = vmatpush1.msra.mxu1 %v8324_v58 }
 0x803   :  { %4683 = vmatpush1.msra.mxu0 %v8325_v59  ;;  %4610 = vmatprep.subr.mxu1 %v8326_v60 }
 0x804   :  { %7851 = vmatmul.mubr.msk.f32.gmra.mxu0 %vm2160_vm3, %v4334_v54  ;;  %4684 = vmatprep.subr.mxu0 %v8327_v61 }
 0x805   :  { %4611 = vmatpush1.msra.mxu1 %v8328_v1  ;;  %4685 = vmatpush1.msra.mxu0 %v8329_v14 }
 0x806   :  { %4612 = vmatprep.subr.mxu1 %v8330_v2  ;;  %4686 = vmatprep.subr.mxu0 %v8331_v3 }
 0x807   :  { %4613 = vmatpush1.msra.mxu1 %v8332_v4  ;;  %4646 = vmatprep.mubr.f32.mxu1 %v10010_v0 }
 0x808   :  { %4687 = vmatpush1.msra.mxu0 %v8333_v41  ;;  %7852 = vmatmul.mubr.msk.f32.vlgmr.msra.gmra.mxu1 %vm2160_vm3, %v4336_v45  ;;  %v8356_v45 = vld [vmem:[#allocation13 + $0x18] sm:$0xff] }
 0x809   :  { %4688 = vmatprep.subr.mxu0 %v8334_v6  ;;  %4757 = vmatprep.subr.mxu1 %v8335_v9 }
 0x80a   :  { %4689 = vmatpush1.msra.mxu0 %v8336_v11  ;;  %4758 = vmatpush1.msra.mxu1 %v8337_v12 }
 0x80b   :  { %4690 = vmatprep.subr.mxu0 %v8338_v17  ;;  %4759 = vmatprep.subr.mxu1 %v8339_v18 }
 0x80c   :  { %4652 = vmatprep.mubr.f32.mxu1 %v10010_v0  ;;  %4691 = vmatpush1.msra.mxu0 %v8340_v19 }
 0x80d   :  { %4760 = vmatpush1.msra.mxu1 %v8341_v21  ;;  %4692 = vmatprep.subr.mxu0 %v8342_v23 }
 0x80e   :  { %7853 = vmatmul.mubr.msk.f32.gmra.mxu1 %vm2160_vm3, %v4334_v54  ;;  %4761 = vmatprep.subr.mxu1 %v8343_v25 }
 0x80f   :  { %4693 = vmatpush1.msra.mxu0 %v8344_v26  ;;  %4762 = vmatpush1.msra.mxu1 %v8345_v57 }
 0x810   :  { %4694 = vmatprep.subr.mxu0 %v8346_v32  ;;  %4763 = vmatprep.subr.mxu1 %v8347_v33 }
 0x811   :  { %4695 = vmatpush1.msra.mxu0 %v8348_v35  ;;  %4728 = vmatprep.mubr.f32.mxu0 %v10010_v0 }
 0x812   :  { %4764 = vmatpush1.msra.mxu1 %v8349_v15  ;;  %7854 = vmatmul.mubr.msk.f32.vlgmr.msra.gmra.mxu0 %vm2160_vm3, %v4339_v29 }
 0x813   :  { %4765 = vmatprep.subr.mxu1 %v8350_v27  ;;  %4734 = vmatprep.mubr.f32.mxu0 %v10010_v0 }
 0x814   :  { %4766 = vmatpush1.msra.mxu1 %v8351_v39  ;;  %4805 = vmatprep.mubr.f32.mxu1 %v10010_v0 }
 0x815   :  { %4767 = vmatprep.subr.mxu1 %v8352_v40 }
 0x816   :  { %4768 = vmatpush1.msra.mxu1 %v8353_v36  ;;  %7855 = vmatmul.mubr.msk.f32.gmra.mxu0 %vm2160_vm3, %v4341_v38 }
 0x817   :  { %4769 = vmatprep.subr.mxu1 %v8354_v44  ;;  %4906 = vmatprep.mubr.f32.mxu0 %v10010_v0 }
 0x818   :  { %4770 = vmatpush1.msra.mxu1 %v8355_v51 }
 0x819   :  { %4771 = vmatprep.subr.mxu1 %v8356_v45 }
 0x81a   :  { %4772 = vmatpush1.msra.mxu1 %v8357_v63 }
 0x81b   :  { %7856 = vmatmul.mubr.msk.f32.vlgmr.msra.gmra.mxu1 %vm2160_vm3, %v4339_v29 }
 0x81c   :  { %4811 = vmatprep.mubr.f32.mxu1 %v10010_v0 }
 0x81f   :  { %7857 = vmatmul.mubr.msk.f32.gmra.mxu1 %vm2160_vm3, %v4341_v38 }
 0x820   :  { %4977 = vmatprep.mubr.f32.mxu1 %v10010_v0 }
 0x859   :  { %v4096_v47 = vpop.f32.mrf.mxu0 }
 0x85b   :  { %v4098_v50 = vpop.f32.mrf.mxu0 }
 0x860   :  { %v4167_v49 = vpop.f32.mrf.mxu1 }
 0x861   :  { %v4168_v10 = vadd.f32 %v4167_v49, %v4096_v47 }
 0x862   :  { %v4169_v52 = vpop.f32.mrf.mxu1 }
 0x863   :  { %v4170_v22 = vadd.f32 %v4169_v52, %v4098_v50 }
 0x899   :  { %v4238_v53 = vpop.f32.mrf.mxu0 }
 0x89b   :  { %v4240_v62 = vpop.f32.mrf.mxu0 }
 0x8a1   :  { %v4309_v55 = vpop.f32.mrf.mxu1 }
 0x8a2   :  { %v4310_v56 = vadd.f32 %v4309_v55, %v4238_v53 }
 0x8a3   :  { %v4311_v54 = vpop.f32.mrf.mxu1 }
 0x8a4   :  { %v10685_v58 = vmax.f32 %v4168_v10, %v4310_v56  ;;  %v4312_v59 = vadd.f32 %v4311_v54, %v4240_v62 }
 0x8a6   :  { %v10687_v60 = vmax.f32 %v4170_v22, %v4312_v59 }
 0x8ab   :  { %v4412_v61 = vpop.f32.mrf.mxu0 }
 0x8ad   :  { %v4414_v1 = vpop.f32.mrf.mxu0 }
 0x8b3   :  { %v4489_v2 = vpop.f32.mrf.mxu1 }
 0x8b5   :  { %v4491_v4 = vpop.f32.mrf.mxu1 }
 0x8b8   :  { %v4418_v14 = vpop.f32.mrf.mxu0 }
 0x8ba   :  { %v4420_v3 = vpop.f32.mrf.mxu0 }
 0x8bd   :  { %v4571_v41 = vpop.f32.mrf.mxu0 }
 0x8be   :  { %v4572_v26 = vadd.f32 %v4571_v41, %v4412_v61  ;;  %v8358_v61 = vld [vmem:[#allocation16] sm:$0xff]  ;;  %v8359_v41 = vld [vmem:[#allocation17] sm:$0xff] }
 0x8bf   :  { %v4573_v9 = vpop.f32.mrf.mxu0 }
 0x8c0   :  { %v4574_v21 = vadd.f32 %v4573_v9, %v4414_v1 }
 0x8c1   :  { %v4495_v6 = vpop.f32.mrf.mxu1 }
 0x8c3   :  { %v4497_v11 = vpop.f32.mrf.mxu1 }
 0x8c4   :  { %v4577_v12 = vpop.f32.mrf.mxu0 }
 0x8c5   :  { %v4578_v23 = vadd.f32 %v4577_v12, %v4418_v14 }
 0x8c6   :  { %v4579_v16 = vpop.f32.mrf.mxu0 }
 0x8c7   :  { %v4580_v29 = vadd.f32 %v4579_v16, %v4420_v3  ;;  %v8365_v16 = vld [vmem:[#allocation19 + $0xd0] sm:$0xff] }
 0x8c8   :  { %v4648_v13 = vpop.f32.mrf.mxu1 }
 0x8c9   :  { %v4649_v50 = vadd.f32 %v4648_v13, %v4489_v2  ;;  %v8363_v13 = vld [vmem:[#allocation19 + $0xe0] sm:$0xff] }
 0x8ca   :  { %v4650_v17 = vpop.f32.mrf.mxu1 }
 0x8cb   :  { %v4651_v47 = vadd.f32 %v4650_v17, %v4491_v4  ;;  %v8366_v17 = vld [vmem:[#allocation19 + $0xc8] sm:$0xff] }
 0x8ce   :  { %v4654_v25 = vpop.f32.mrf.mxu1 }
 0x8cf   :  { %v4655_v49 = vadd.f32 %v4654_v25, %v4495_v6  ;;  %v8360_v6 = vld [vmem:[#allocation19 + $0xf8] sm:$0xff]  ;;  %v8371_v25 = vld [vmem:[#allocation19 + $0x2f0] sm:$0xff] }
 0x8d0   :  { %v4656_v27 = vpop.f32.mrf.mxu1 }
 0x8d1   :  { %v4657_v53 = vadd.f32 %v4656_v27, %v4497_v11  ;;  %v8361_v11 = vld [vmem:[#allocation19 + $0xf0] sm:$0xff] }
 0x8d2   :  { %v4730_v18 = vpop.f32.mrf.mxu0  ;;  %v8379_v27 = vld [vmem:[#allocation19 + $0x2d0] sm:$0xff] }
 0x8d3   :  { %v4818_v35 = vadd.f32 %v4730_v18, %v4572_v26  ;;  %v8367_v18 = vld [vmem:[#allocation19 + $0xc0] sm:$0xff]  ;;  %v8372_v26 = vld [vmem:[#allocation19 + $0xa8] sm:$0xff] }
 0x8d4   :  { %v4732_v19 = vpop.f32.mrf.mxu0 }
 0x8d5   :  { %v4819_v32 = vadd.f32 %v4732_v19, %v4574_v21  ;;  %v4826_v51 = vadd.f32 %v4818_v35, %v10418_v34  ;;  %v8368_v19 = vld [vmem:[#allocation19 + $0xb8] sm:$0xff] }
 0x8d6   :  { %v4736_v57 = vpop.f32.mrf.mxu0  ;;  %v8369_v21 = vld [vmem:[#allocation19 + $0x2f8] sm:$0xff] }
 0x8d7   :  { %v4822_v33 = vadd.f32 %v4736_v57, %v4578_v23  ;;  %v4827_v40 = vadd.f32 %v4819_v32, %v10421_v37  ;;  %v4834_v55 = vmax.f32 %v4826_v51, 0.0  ;;  %v8370_v23 = vld [vmem:[#allocation19 + $0xb0] sm:$0xff]  ;;  %v8373_v57 = vld [vmem:[#allocation19 + $0x2e8] sm:$0xff]  ;;  %v8375_v32 = vld [vmem:[#allocation19 + $0x2e0] sm:$0xff] }
 0x8d8   :  { %v4738_v15 = vpop.f32.mrf.mxu0  ;;  %v8377_v35 = vld [vmem:[#allocation19 + $0x2d8] sm:$0xff] }
 0x8d9   :  { %v4823_v38 = vadd.f32 %v4738_v15, %v4580_v29  ;;  %v4830_v39 = vadd.f32 %v4822_v33, %v10418_v34  ;;  %v4835_v52 = vmax.f32 %v4827_v40, 0.0  ;;  %v8374_v29 = vld [vmem:[#allocation19 + $0xa0] sm:$0xff]  ;;  %v8376_v33 = vld [vmem:[#allocation19 + $0x98] sm:$0xff]  ;;  %v8378_v15 = vld [vmem:[#allocation19 + $0x90] sm:$0xff] }
 0x8da   :  { %v8382_v40 = vld [vmem:[#allocation19 + $0x80] sm:$0xff]  ;;  %v8385_v51 = vld [vmem:[#allocation19 + $0x2b8] sm:$0xff] }
 0x8db   :  { %v4831_v36 = vadd.f32 %v4823_v38, %v10421_v37  ;;  %v4807_v44 = vpop.f32.mrf.mxu1  ;;  %v4838_v10 = vmax.f32 %v4830_v39, 0.0  ;;  %v8380_v38 = vld [vmem:[#allocation19 + $0x88] sm:$0xff] }
 0x8dc   :  { %v4820_v54 = vadd.f32 %v4807_v44, %v4649_v50  ;;  %v8381_v39 = vld [vmem:[#allocation19 + $0x2c8] sm:$0xff]  ;;  %v8384_v44 = vld [vmem:[#allocation19 + $0x78] sm:$0xff]  ;;  %v8391_v50 = vld [vmem:[#allocation19 + $0x2a0] sm:$0xff] }
 0x8dd   :  { %v4839_v45 = vmax.f32 %v4831_v36, 0.0  ;;  %v4809_v63 = vpop.f32.mrf.mxu1  ;;  %v8383_v36 = vld [vmem:[#allocation19 + $0x2c0] sm:$0xff] }
 0x8de   :  { %v4821_v56 = vadd.f32 %v4809_v63, %v4651_v47  ;;  %v4828_v2 = vadd.f32 %v4820_v54, %v10433_v7  ;;  %v8387_v63 = vld [vmem:[#allocation19 + $0x2b0] sm:$0xff]  ;;  %v8388_v47 = vld [vmem:[#allocation19 + $0x68] sm:$0xff]  ;;  %v8398_v54 = vld [vmem:[#allocation19 + $0x40] sm:$0xff] }
 0x8df   :  { %v4813_v22 = vpop.f32.mrf.mxu1  ;;  %4870 = vmatprep.subr.mxu0 %v4839_v45 }
 0x8e0   :  { %v4824_v62 = vadd.f32 %v4813_v22, %v4655_v49  ;;  %4871 = vmatpush1.msra.mxu0 %v4838_v10  ;;  %v4829_v1 = vadd.f32 %v4821_v56, %v10430_v5  ;;  %v4836_v12 = vmax.f32 %v4828_v2, 0.0  ;;  %v8389_v49 = vld [vmem:[#allocation19 + $0x2a8] sm:$0xff]  ;;  %v8393_v22 = vld [vmem:[#allocation19 + $0x298] sm:$0xff] }
 0x8e1   :  { %v4815_v59 = vpop.f32.mrf.mxu1  ;;  %4872 = vmatprep.subr.mxu0 %v4835_v52  ;;  %v8396_v56 = vld [vmem:[#allocation19 + $0x48] sm:$0xff] }
 0x8e2   :  { %v4825_v37 = vadd.f32 %v4815_v59, %v4657_v53  ;;  %4873 = vmatpush1.msra.mxu0 %v4834_v55  ;;  %v4832_v34 = vadd.f32 %v4824_v62, %v10433_v7  ;;  %v4837_v9 = vmax.f32 %v4829_v1, 0.0  ;;  %v8364_v7 = vld [vmem:[#allocation19 + $0xd8] sm:$0xff]  ;;  %v8394_v53 = vld [vmem:[#allocation19 + $0x50] sm:$0xff]  ;;  %v8397_v62 = vld [vmem:[#allocation19 + $0x288] sm:$0xff] }
 0x8e3   :  { %7858 = vmatmul.mubr.msk.f32.vlgmr.msra.gmra.mxu0 %vm558_vm0, %v8358_v61  ;;  %5012 = vmatprep.subr.mxu0 %v4839_v45  ;;  %v8386_v45 = vld [vmem:[#allocation19 + $0x70] sm:$0xff]  ;;  %v8399_v59 = vld [vmem:[#allocation19 + $0x280] sm:$0xff]  ;;  %v8405_v2 = vld [vmem:[#allocation19 + $0x268] sm:$0xff] }
 0x8e4   :  { %v4833_v14 = vadd.f32 %v4825_v37, %v10430_v5  ;;  %5013 = vmatpush1.msra.mxu0 %v4838_v10  ;;  %5048 = vmatprep.mubr.f32.mxu0 %v10010_v0  ;;  %v4840_v4 = vmax.f32 %v4832_v34, 0.0  ;;  %v8362_v5 = vld [vmem:[#allocation19 + $0xe8] sm:$0xff]  ;;  %v8390_v10 = vld [vmem:[#allocation19 + $0x60] sm:$0xff]  ;;  %v8400_v37 = vld [vmem:[#allocation19 + $0x38] sm:$0xff] }
 0x8e5   :  { %5014 = vmatprep.subr.mxu0 %v4835_v52  ;;  %v8392_v52 = vld [vmem:[#allocation19 + $0x58] sm:$0xff]  ;;  %v8403_v1 = vld [vmem:[#allocation19 + $0x270] sm:$0xff] }
 0x8e6   :  { %v4841_v3 = vmax.f32 %v4833_v14, 0.0  ;;  %5015 = vmatpush1.msra.mxu0 %v4834_v55  ;;  %v8395_v55 = vld [vmem:[#allocation19 + $0x290] sm:$0xff]  ;;  %v8401_v34 = vld [vmem:[#allocation19 + $0x278] sm:$0xff]  ;;  %v8404_v14 = vld [vmem:[#allocation19 + $0x28] sm:$0xff] }
 0x8e7   :  { %7860 = vmatmul.mubr.msk.f32.vlgmr.msra.gmra.mxu0 %vm558_vm0, %v8359_v41  ;;  %5130 = vmatprep.subr.mxu0 %v8360_v6  ;;  %v8409_v6 = vld [vmem:[#allocation19 + $0x258] sm:$0xff] }
 0x8e8   :  { %4941 = vmatprep.subr.mxu1 %v4841_v3  ;;  %5131 = vmatpush1.msra.mxu0 %v8361_v11  ;;  %v8411_v11 = vld [vmem:[#allocation19 + $0x250] sm:$0xff] }
 0x8e9   :  { %4942 = vmatpush1.msra.mxu1 %v4840_v4  ;;  %5132 = vmatprep.subr.mxu0 %v8362_v5  ;;  %v8413_v5 = vld [vmem:[#allocation19 + $0x248] sm:$0xff] }
 0x8ea   :  { %4943 = vmatprep.subr.mxu1 %v4837_v9  ;;  %5133 = vmatpush1.msra.mxu0 %v8363_v13  ;;  %v8414_v13 = vld [vmem:[#allocation19] sm:$0xff] }
 0x8eb   :  { %4944 = vmatpush1.msra.mxu1 %v4836_v12  ;;  %5134 = vmatprep.subr.mxu0 %v8364_v7  ;;  %v8415_v7 = vld [vmem:[#allocation19 + $0x240] sm:$0xff] }
 0x8ec   :  { %7859 = vmatmul.mubr.msk.f32.vlgmr.msra.gmra.mxu1 %vm558_vm0, %v8358_v61  ;;  %5083 = vmatprep.subr.mxu1 %v4841_v3  ;;  %v8402_v61 = vld [vmem:[#allocation19 + $0x30] sm:$0xff]  ;;  %v8406_v3 = vld [vmem:[#allocation19 + $0x20] sm:$0xff] }
 0x8ed   :  { %5084 = vmatpush1.msra.mxu1 %v4840_v4  ;;  %5119 = vmatprep.mubr.f32.mxu1 %v10010_v0  ;;  %v8407_v4 = vld [vmem:[#allocation19 + $0x260] sm:$0xff] }
 0x8ee   :  { %5085 = vmatprep.subr.mxu1 %v4837_v9  ;;  %5135 = vmatpush1.msra.mxu0 %v8365_v16  ;;  %v8410_v9 = vld [vmem:[#allocation19 + $0x10] sm:$0xff]  ;;  %v8416_v16 = vld [vmem:[#allocation19 + $0x1f8] sm:$0xff] }
 0x8ef   :  { %5086 = vmatpush1.msra.mxu1 %v4836_v12  ;;  %5136 = vmatprep.subr.mxu0 %v8366_v17  ;;  %v8412_v12 = vld [vmem:[#allocation19 + $0x8] sm:$0xff]  ;;  %v8417_v17 = vld [vmem:[#allocation19 + $0x238] sm:$0xff] }
 0x8f0   :  { %7861 = vmatmul.mubr.msk.f32.vlgmr.msra.gmra.mxu1 %vm558_vm0, %v8359_v41  ;;  %5137 = vmatpush1.msra.mxu0 %v8367_v18  ;;  %v8408_v41 = vld [vmem:[#allocation19 + $0x18] sm:$0xff]  ;;  %v8418_v18 = vld [vmem:[#allocation19 + $0x1f0] sm:$0xff] }
 0x8f1   :  { %5138 = vmatprep.subr.mxu0 %v8368_v19  ;;  %5201 = vmatprep.subr.mxu1 %v8369_v21  ;;  %v8419_v19 = vld [vmem:[#allocation19 + $0x230] sm:$0xff]  ;;  %v8420_v21 = vld [vmem:[#allocation19 + $0x1e8] sm:$0xff] }
 0x8f2   :  { %5139 = vmatpush1.msra.mxu0 %v8370_v23  ;;  %5202 = vmatpush1.msra.mxu1 %v8371_v25  ;;  %v8421_v23 = vld [vmem:[#allocation19 + $0x228] sm:$0xff]  ;;  %v8422_v25 = vld [vmem:[#allocation19 + $0x1e0] sm:$0xff] }
 0x8f3   :  { %5140 = vmatprep.subr.mxu0 %v8372_v26  ;;  %5203 = vmatprep.subr.mxu1 %v8373_v57  ;;  %v8423_v26 = vld [vmem:[#allocation19 + $0x220] sm:$0xff]  ;;  %v8424_v57 = vld [vmem:[#allocation19 + $0x1d8] sm:$0xff] }
 0x8f4   :  { %5141 = vmatpush1.msra.mxu0 %v8374_v29  ;;  %5204 = vmatpush1.msra.mxu1 %v8375_v32  ;;  %v8425_v29 = vld [vmem:[#allocation19 + $0x218] sm:$0xff]  ;;  %v8426_v32 = vld [vmem:[#allocation19 + $0x1d0] sm:$0xff] }
 0x8f5   :  { %5142 = vmatprep.subr.mxu0 %v8376_v33  ;;  %5205 = vmatprep.subr.mxu1 %v8377_v35  ;;  %v8427_v33 = vld [vmem:[#allocation19 + $0x210] sm:$0xff]  ;;  %v8428_v35 = vld [vmem:[#allocation19 + $0x1c8] sm:$0xff] }
 0x8f6   :  { %5143 = vmatpush1.msra.mxu0 %v8378_v15  ;;  %5206 = vmatpush1.msra.mxu1 %v8379_v27  ;;  %v8429_v15 = vld [vmem:[#allocation19 + $0x208] sm:$0xff]  ;;  %v8430_v27 = vld [vmem:[#allocation19 + $0x1c0] sm:$0xff] }
 0x8f7   :  { %5144 = vmatprep.subr.mxu0 %v8380_v38  ;;  %5207 = vmatprep.subr.mxu1 %v8381_v39  ;;  %v8431_v38 = vld [vmem:[#allocation19 + $0x200] sm:$0xff]  ;;  %v8432_v39 = vld [vmem:[#allocation19 + $0x1b8] sm:$0xff] }
 0x8f8   :  { %5145 = vmatpush1.msra.mxu0 %v8382_v40  ;;  %5208 = vmatpush1.msra.mxu1 %v8383_v36  ;;  %v8433_v40 = vld [vmem:[#allocation19 + $0x3f8] sm:$0xff]  ;;  %v8434_v36 = vld [vmem:[#allocation19 + $0x1b0] sm:$0xff] }
 0x8f9   :  { %5146 = vmatprep.subr.mxu0 %v8384_v44  ;;  %5209 = vmatprep.subr.mxu1 %v8385_v51  ;;  %v8435_v44 = vld [vmem:[#allocation19 + $0x3f0] sm:$0xff]  ;;  %v8436_v51 = vld [vmem:[#allocation19 + $0x1a8] sm:$0xff] }
 0x8fa   :  { %5147 = vmatpush1.msra.mxu0 %v8386_v45  ;;  %5210 = vmatpush1.msra.mxu1 %v8387_v63  ;;  %v8437_v45 = vld [vmem:[#allocation19 + $0x3e8] sm:$0xff]  ;;  %v8438_v63 = vld [vmem:[#allocation19 + $0x1a0] sm:$0xff] }
 0x8fb   :  { %5148 = vmatprep.subr.mxu0 %v8388_v47  ;;  %5211 = vmatprep.subr.mxu1 %v8389_v49  ;;  %v8439_v47 = vld [vmem:[#allocation19 + $0x3e0] sm:$0xff]  ;;  %v8440_v49 = vld [vmem:[#allocation19 + $0x198] sm:$0xff] }
 0x8fc   :  { %5149 = vmatpush1.msra.mxu0 %v8390_v10  ;;  %5212 = vmatpush1.msra.mxu1 %v8391_v50  ;;  %v8441_v10 = vld [vmem:[#allocation19 + $0x3d8] sm:$0xff]  ;;  %v8442_v50 = vld [vmem:[#allocation19 + $0x190] sm:$0xff] }
 0x8fd   :  { %5150 = vmatprep.subr.mxu0 %v8392_v52  ;;  %5213 = vmatprep.subr.mxu1 %v8393_v22  ;;  %v8443_v52 = vld [vmem:[#allocation19 + $0x3d0] sm:$0xff]  ;;  %v8444_v22 = vld [vmem:[#allocation19 + $0x188] sm:$0xff] }
 0x8fe   :  { %5151 = vmatpush1.msra.mxu0 %v8394_v53  ;;  %5214 = vmatpush1.msra.mxu1 %v8395_v55  ;;  %v8445_v53 = vld [vmem:[#allocation19 + $0x3c8] sm:$0xff]  ;;  %v8446_v55 = vld [vmem:[#allocation19 + $0x180] sm:$0xff] }
 0x8ff   :  { %5152 = vmatprep.subr.mxu0 %v8396_v56  ;;  %5215 = vmatprep.subr.mxu1 %v8397_v62  ;;  %v8447_v56 = vld [vmem:[#allocation19 + $0x3c0] sm:$0xff]  ;;  %v8448_v62 = vld [vmem:[#allocation19 + $0x178] sm:$0xff] }
 0x900   :  { %5153 = vmatpush1.msra.mxu0 %v8398_v54  ;;  %5216 = vmatpush1.msra.mxu1 %v8399_v59  ;;  %v8449_v54 = vld [vmem:[#allocation19 + $0x3b8] sm:$0xff]  ;;  %v8450_v59 = vld [vmem:[#allocation19 + $0x170] sm:$0xff] }
 0x901   :  { %5154 = vmatprep.subr.mxu0 %v8400_v37  ;;  %5217 = vmatprep.subr.mxu1 %v8401_v34  ;;  %v8451_v37 = vld [vmem:[#allocation19 + $0x3b0] sm:$0xff]  ;;  %v8452_v34 = vld [vmem:[#allocation19 + $0x168] sm:$0xff] }
 0x902   :  { %5155 = vmatpush1.msra.mxu0 %v8402_v61  ;;  %5218 = vmatpush1.msra.mxu1 %v8403_v1  ;;  %v8453_v61 = vld [vmem:[#allocation19 + $0x3a8] sm:$0xff]  ;;  %v8454_v1 = vld [vmem:[#allocation19 + $0x160] sm:$0xff] }
 0x903   :  { %5156 = vmatprep.subr.mxu0 %v8404_v14  ;;  %5219 = vmatprep.subr.mxu1 %v8405_v2  ;;  %v8455_v14 = vld [vmem:[#allocation19 + $0x3a0] sm:$0xff]  ;;  %v8456_v2 = vld [vmem:[#allocation19 + $0x158] sm:$0xff] }
 0x904   :  { %5157 = vmatpush1.msra.mxu0 %v8406_v3  ;;  %5220 = vmatpush1.msra.mxu1 %v8407_v4  ;;  %v8457_v3 = vld [vmem:[#allocation19 + $0x398] sm:$0xff]  ;;  %v8458_v4 = vld [vmem:[#allocation19 + $0x150] sm:$0xff] }
 0x905   :  { %5158 = vmatprep.subr.mxu0 %v8408_v41  ;;  %5221 = vmatprep.subr.mxu1 %v8409_v6  ;;  %v8459_v41 = vld [vmem:[#allocation19 + $0x390] sm:$0xff]  ;;  %v8460_v6 = vld [vmem:[#allocation19 + $0x148] sm:$0xff] }
 0x906   :  { %5159 = vmatpush1.msra.mxu0 %v8410_v9  ;;  %5222 = vmatpush1.msra.mxu1 %v8411_v11  ;;  %v8461_v9 = vld [vmem:[#allocation19 + $0x388] sm:$0xff]  ;;  %v8462_v11 = vld [vmem:[#allocation19 + $0x140] sm:$0xff] }
 0x907   :  { %5160 = vmatprep.subr.mxu0 %v8412_v12  ;;  %5223 = vmatprep.subr.mxu1 %v8413_v5  ;;  %v8463_v12 = vld [vmem:[#allocation19 + $0x380] sm:$0xff]  ;;  %v8464_v5 = vld [vmem:[#allocation19 + $0x138] sm:$0xff] }
 0x908   :  { %5161 = vmatpush1.msra.mxu0 %v8414_v13  ;;  %5224 = vmatpush1.msra.mxu1 %v8415_v7  ;;  %v8465_v13 = vld [vmem:[#allocation19 + $0x378] sm:$0xff]  ;;  %v8466_v7 = vld [vmem:[#allocation19 + $0x130] sm:$0xff] }
 0x909   :  { %5162 = vmatprep.subr.mxu0 %v8416_v16  ;;  %5225 = vmatprep.subr.mxu1 %v8417_v17  ;;  %v8467_v16 = vld [vmem:[#allocation19 + $0x370] sm:$0xff]  ;;  %v8468_v17 = vld [vmem:[#allocation19 + $0x128] sm:$0xff] }
 0x90a   :  { %5163 = vmatpush2.msra.mxu0 %v8418_v18  ;;  %5226 = vmatpush1.msra.mxu1 %v8419_v19  ;;  %v8469_v18 = vld [vmem:[#allocation19 + $0x368] sm:$0xff]  ;;  %v8470_v19 = vld [vmem:[#allocation19 + $0x120] sm:$0xff] }
 0x90b   :  { %5164 = vmatprep.subr.mxu0 %v8420_v21  ;;  %5227 = vmatprep.subr.mxu1 %v8421_v23  ;;  %v8471_v21 = vld [vmem:[#allocation19 + $0x360] sm:$0xff]  ;;  %v8472_v23 = vld [vmem:[#allocation19 + $0x118] sm:$0xff] }
 0x90c   :  { %5165 = vmatpush2.msra.mxu0 %v8422_v25  ;;  %5228 = vmatpush1.msra.mxu1 %v8423_v26  ;;  %v8473_v25 = vld [vmem:[#allocation19 + $0x358] sm:$0xff]  ;;  %v8474_v26 = vld [vmem:[#allocation19 + $0x110] sm:$0xff] }
 0x90d   :  { %5166 = vmatprep.subr.mxu0 %v8424_v57  ;;  %5229 = vmatprep.subr.mxu1 %v8425_v29  ;;  %v8475_v57 = vld [vmem:[#allocation19 + $0x350] sm:$0xff]  ;;  %v8476_v29 = vld [vmem:[#allocation19 + $0x108] sm:$0xff] }
 0x90e   :  { %5167 = vmatpush2.msra.mxu0 %v8426_v32  ;;  %5230 = vmatpush1.msra.mxu1 %v8427_v33  ;;  %v8477_v32 = vld [vmem:[#allocation19 + $0x348] sm:$0xff]  ;;  %v8478_v33 = vld [vmem:[#allocation19 + $0x100] sm:$0xff] }
 0x90f   :  { %5168 = vmatprep.subr.mxu0 %v8428_v35  ;;  %5231 = vmatprep.subr.mxu1 %v8429_v15  ;;  %v8479_v35 = vld [vmem:[#allocation19 + $0x340] sm:$0xff]  ;;  %v8480_v15 = vld [vmem:[#allocation19 + $0x338] sm:$0xff] }
 0x910   :  { %5169 = vmatpush2.msra.mxu0 %v8430_v27  ;;  %5232 = vmatpush1.msra.mxu1 %v8431_v38  ;;  %v8481_v27 = vld [vmem:[#allocation20 + $0xf8] sm:$0xff]  ;;  %v8482_v38 = vld [vmem:[#allocation19 + $0x330] sm:$0xff] }
 0x911   :  { %5170 = vmatprep.subr.mxu0 %v8432_v39  ;;  %5233 = vmatprep.subr.mxu1 %v8433_v40  ;;  %v8483_v39 = vld [vmem:[#allocation19 + $0x328] sm:$0xff]  ;;  %v8484_v40 = vld [vmem:[#allocation19 + $0x320] sm:$0xff] }
 0x912   :  { %5171 = vmatpush2.msra.mxu0 %v8434_v36  ;;  %5234 = vmatpush2.msra.mxu1 %v8435_v44  ;;  %v8485_v36 = vld [vmem:[#allocation19 + $0x318] sm:$0xff]  ;;  %v8486_v44 = vld [vmem:[#allocation19 + $0x310] sm:$0xff] }
 0x913   :  { %5172 = vmatprep.subr.mxu0 %v8436_v51  ;;  %5235 = vmatprep.subr.mxu1 %v8437_v45  ;;  %v8487_v51 = vld [vmem:[#allocation19 + $0x308] sm:$0xff]  ;;  %v8488_v45 = vld [vmem:[#allocation19 + $0x300] sm:$0xff] }
 0x914   :  { %5173 = vmatpush2.msra.mxu0 %v8438_v63  ;;  %5236 = vmatpush2.msra.mxu1 %v8439_v47  ;;  %v8489_v63 = vld [vmem:[#allocation20 + $0x2f8] sm:$0xff] }
 0x915   :  { %5174 = vmatprep.subr.mxu0 %v8440_v49  ;;  %5237 = vmatprep.subr.mxu1 %v8441_v10 }
 0x916   :  { %5175 = vmatpush2.msra.mxu0 %v8442_v50  ;;  %5238 = vmatpush2.msra.mxu1 %v8443_v52 }
 0x917   :  { %5176 = vmatprep.subr.mxu0 %v8444_v22  ;;  %5239 = vmatprep.subr.mxu1 %v8445_v53 }
 0x918   :  { %5177 = vmatpush2.msra.mxu0 %v8446_v55  ;;  %5240 = vmatpush2.msra.mxu1 %v8447_v56  ;;  %v8490_v56 = vld [vmem:[#allocation20 + $0xf0] sm:$0xff] }
 0x919   :  { %5178 = vmatprep.subr.mxu0 %v8448_v62  ;;  %5241 = vmatprep.subr.mxu1 %v8449_v54  ;;  %v8491_v62 = vld [vmem:[#allocation20 + $0xe8] sm:$0xff] }
 0x91a   :  { %5179 = vmatpush2.msra.mxu0 %v8450_v59  ;;  %5242 = vmatpush2.msra.mxu1 %v8451_v37  ;;  %v8492_v59 = vld [vmem:[#allocation20 + $0xe0] sm:$0xff]  ;;  %v8493_v37 = vld [vmem:[#allocation20 + $0xd8] sm:$0xff] }
 0x91b   :  { %5180 = vmatprep.subr.mxu0 %v8452_v34  ;;  %5243 = vmatprep.subr.mxu1 %v8453_v61  ;;  %v8494_v61 = vld [vmem:[#allocation20 + $0xd0] sm:$0xff] }
 0x91c   :  { %5181 = vmatpush2.msra.mxu0 %v8454_v1  ;;  %5244 = vmatpush2.msra.mxu1 %v8455_v14  ;;  %v8495_v14 = vld [vmem:[#allocation20 + $0xc8] sm:$0xff] }
 0x91d   :  { %5182 = vmatprep.subr.mxu0 %v8456_v2  ;;  %5245 = vmatprep.subr.mxu1 %v8457_v3  ;;  %v8496_v3 = vld [vmem:[#allocation20 + $0xc0] sm:$0xff] }
 0x91e   :  { %5183 = vmatpush2.msra.mxu0 %v8458_v4  ;;  %5246 = vmatpush2.msra.mxu1 %v8459_v41  ;;  %v8497_v4 = vld [vmem:[#allocation20 + $0xb8] sm:$0xff]  ;;  %v8498_v41 = vld [vmem:[#allocation20 + $0xb0] sm:$0xff] }
 0x91f   :  { %5184 = vmatprep.subr.mxu0 %v8460_v6  ;;  %5247 = vmatprep.subr.mxu1 %v8461_v9  ;;  %v8499_v6 = vld [vmem:[#allocation20 + $0x2f0] sm:$0xff]  ;;  %v8500_v9 = vld [vmem:[#allocation20 + $0xa8] sm:$0xff] }
 0x920   :  { %5185 = vmatpush2.msra.mxu0 %v8462_v11  ;;  %5248 = vmatpush2.msra.mxu1 %v8463_v12  ;;  %v8501_v11 = vld [vmem:[#allocation20 + $0x2e8] sm:$0xff]  ;;  %v8502_v12 = vld [vmem:[#allocation20 + $0xa0] sm:$0xff] }
 0x921   :  { %5186 = vmatprep.subr.mxu0 %v8464_v5  ;;  %5249 = vmatprep.subr.mxu1 %v8465_v13  ;;  %v8503_v5 = vld [vmem:[#allocation20 + $0x2e0] sm:$0xff]  ;;  %v8504_v13 = vld [vmem:[#allocation20 + $0x98] sm:$0xff] }
 0x922   :  { %5187 = vmatpush2.msra.mxu0 %v8466_v7  ;;  %5250 = vmatpush2.msra.mxu1 %v8467_v16  ;;  %v8505_v7 = vld [vmem:[#allocation20 + $0x2d8] sm:$0xff]  ;;  %v8506_v16 = vld [vmem:[#allocation20 + $0x90] sm:$0xff] }
 0x923   :  { %5188 = vmatprep.subr.mxu0 %v8468_v17  ;;  %5251 = vmatprep.subr.mxu1 %v8469_v18  ;;  %v8507_v17 = vld [vmem:[#allocation20 + $0x2d0] sm:$0xff]  ;;  %v8508_v18 = vld [vmem:[#allocation20 + $0x88] sm:$0xff] }
 0x924   :  { %5189 = vmatpush2.msra.mxu0 %v8470_v19  ;;  %5252 = vmatpush2.msra.mxu1 %v8471_v21  ;;  %v8509_v19 = vld [vmem:[#allocation20 + $0x2c8] sm:$0xff]  ;;  %v8510_v21 = vld [vmem:[#allocation20 + $0x80] sm:$0xff] }
 0x925   :  { %5190 = vmatprep.subr.mxu0 %v8472_v23  ;;  %5253 = vmatprep.subr.mxu1 %v8473_v25  ;;  %v8511_v23 = vld [vmem:[#allocation20 + $0x2c0] sm:$0xff]  ;;  %v8512_v25 = vld [vmem:[#allocation20 + $0x78] sm:$0xff] }
 0x926   :  { %5191 = vmatpush2.msra.mxu0 %v8474_v26  ;;  %5254 = vmatpush2.msra.mxu1 %v8475_v57  ;;  %v8513_v26 = vld [vmem:[#allocation20 + $0x2b8] sm:$0xff]  ;;  %v8514_v57 = vld [vmem:[#allocation20 + $0x70] sm:$0xff] }
 0x927   :  { %5192 = vmatprep.subr.mxu0 %v8476_v29  ;;  %5255 = vmatprep.subr.mxu1 %v8477_v32  ;;  %v8515_v29 = vld [vmem:[#allocation20 + $0x2b0] sm:$0xff]  ;;  %v8516_v32 = vld [vmem:[#allocation20 + $0x68] sm:$0xff] }
 0x928   :  { %5193 = vmatpush2.msra.mxu0 %v8478_v33  ;;  %5256 = vmatpush2.msra.mxu1 %v8479_v35  ;;  %v8517_v33 = vld [vmem:[#allocation20 + $0x2a8] sm:$0xff]  ;;  %v8518_v35 = vld [vmem:[#allocation20 + $0x60] sm:$0xff] }
 0x929   :  { %5257 = vmatprep.subr.mxu1 %v8480_v15  ;;  %5272 = vmatprep.subr.mxu0 %v8481_v27  ;;  %v8519_v15 = vld [vmem:[#allocation20 + $0x2a0] sm:$0xff]  ;;  %v8520_v27 = vld [vmem:[#allocation20 + $0x58] sm:$0xff] }
 0x92a   :  { %5258 = vmatpush2.msra.mxu1 %v8482_v38  ;;  %v8521_v38 = vld [vmem:[#allocation20 + $0x298] sm:$0xff] }
 0x92b   :  { %5259 = vmatprep.subr.mxu1 %v8483_v39  ;;  %v8522_v39 = vld [vmem:[#allocation20 + $0x50] sm:$0xff] }
 0x92c   :  { %5260 = vmatpush2.msra.mxu1 %v8484_v40  ;;  %v8523_v40 = vld [vmem:[#allocation20 + $0x290] sm:$0xff] }
 0x92d   :  { %5261 = vmatprep.subr.mxu1 %v8485_v36  ;;  %v8524_v36 = vld [vmem:[#allocation20 + $0x48] sm:$0xff] }
 0x92e   :  { %5262 = vmatpush2.msra.mxu1 %v8486_v44  ;;  %v8525_v44 = vld [vmem:[#allocation20 + $0x288] sm:$0xff] }
 0x92f   :  { %5263 = vmatprep.subr.mxu1 %v8487_v51  ;;  %v8526_v51 = vld [vmem:[#allocation20 + $0x40] sm:$0xff] }
 0x930   :  { %5264 = vmatpush2.msra.mxu1 %v8488_v45  ;;  %v8527_v45 = vld [vmem:[#allocation20 + $0x280] sm:$0xff] }
 0x931   :  { %5343 = vmatprep.subr.mxu1 %v8489_v63  ;;  %v8528_v63 = vld [vmem:[#allocation20 + $0x38] sm:$0xff] }
 0x9a3   :  { %v4908_v47 = vpop.f32.mrf.mxu0 }
 0x9a5   :  { %v4910_v49 = vpop.f32.mrf.mxu0 }
 0x9a7   :  { %v5050_v10 = vpop.f32.mrf.mxu0 }
 0x9a8   :  { %v10703_v50 = vmax.f32 %v4908_v47, %v5050_v10  ;;  %v8529_v47 = vld [vmem:[#allocation20 + $0x278] sm:$0xff]  ;;  %v8531_v10 = vld [vmem:[#allocation20 + $0x270] sm:$0xff] }
 0x9a9   :  { %v5052_v52 = vpop.f32.mrf.mxu0 }
 0x9aa   :  { %v5127_v22 = vmax.f32 %v4910_v49, %v5052_v52  ;;  %v8530_v49 = vld [vmem:[#allocation20 + $0x30] sm:$0xff]  ;;  %v8532_v52 = vld [vmem:[#allocation20 + $0x28] sm:$0xff] }
 0x9ac   :  { %v4979_v53 = vpop.f32.mrf.mxu1  ;;  %5194 = vmatprep.mubr.f32.mxu0 %v5127_v22 }
 0x9ad   :  { %5195 = vmatmul.mubr.f32.vlgmr.msra.gmra.mxu0 %v10703_v50 }
 0x9ae   :  { %v4981_v55 = vpop.f32.mrf.mxu1  ;;  %5273 = vmatpush1.msra.mxu0 %v8490_v56  ;;  %5336 = vmatprep.mubr.f32.mxu0 %v5127_v22  ;;  %v8533_v22 = vld [vmem:[#allocation20 + $0x268] sm:$0xff]  ;;  %v8536_v56 = vld [vmem:[#allocation20 + $0x18] sm:$0xff] }
 0x9af   :  { %5274 = vmatprep.subr.mxu0 %v8491_v62  ;;  %v8537_v62 = vld [vmem:[#allocation20 + $0x258] sm:$0xff] }
 0x9b0   :  { %v5121_v54 = vpop.f32.mrf.mxu1  ;;  %5275 = vmatpush1.msra.mxu0 %v8492_v59  ;;  %v8539_v59 = vld [vmem:[#allocation20 + $0x250] sm:$0xff] }
 0x9b1   :  { %5276 = vmatprep.subr.mxu0 %v8493_v37  ;;  %v10706_v2 = vmax.f32 %v4979_v53, %v5121_v54  ;;  %v8534_v53 = vld [vmem:[#allocation20 + $0x20] sm:$0xff]  ;;  %v8538_v54 = vld [vmem:[#allocation20 + $0x10] sm:$0xff]  ;;  %v8540_v37 = vld [vmem:[#allocation20 + $0x8] sm:$0xff] }
 0x9b2   :  { %v5123_v34 = vpop.f32.mrf.mxu1  ;;  %5277 = vmatpush1.msra.mxu0 %v8494_v61  ;;  %v8542_v61 = vld [vmem:[#allocation20] sm:$0xff] }
 0x9b3   :  { %v5129_v1 = vmax.f32 %v4981_v55, %v5123_v34  ;;  %5278 = vmatprep.subr.mxu0 %v8495_v14  ;;  %v8535_v55 = vld [vmem:[#allocation20 + $0x260] sm:$0xff]  ;;  %v8541_v34 = vld [vmem:[#allocation20 + $0x248] sm:$0xff]  ;;  %v8544_v14 = vld [vmem:[#allocation20 + $0x1f8] sm:$0xff] }
 0x9b4   :  { %5279 = vmatpush1.msra.mxu0 %v8496_v3  ;;  %v8545_v3 = vld [vmem:[#allocation20 + $0x238] sm:$0xff] }
 0x9b5   :  { %5265 = vmatprep.mubr.f32.mxu1 %v5129_v1  ;;  %5280 = vmatprep.subr.mxu0 %v8497_v4  ;;  %v8546_v4 = vld [vmem:[#allocation20 + $0x1f0] sm:$0xff] }
 0x9b6   :  { %5266 = vmatmul.mubr.f32.vlgmr.msra.gmra.mxu1 %v10706_v2  ;;  %5281 = vmatpush1.msra.mxu0 %v8498_v41  ;;  %v8547_v41 = vld [vmem:[#allocation20 + $0x230] sm:$0xff] }
 0x9b7   :  { %5344 = vmatpush1.msra.mxu1 %v8499_v6  ;;  %5282 = vmatprep.subr.mxu0 %v8500_v9  ;;  %v8548_v6 = vld [vmem:[#allocation20 + $0x1e8] sm:$0xff] }
 0x9b8   :  { %5345 = vmatprep.subr.mxu1 %v8501_v11  ;;  %5407 = vmatprep.mubr.f32.mxu1 %v5129_v1  ;;  %v8543_v1 = vld [vmem:[#allocation20 + $0x240] sm:$0xff]  ;;  %v8549_v9 = vld [vmem:[#allocation20 + $0x228] sm:$0xff] }
 0x9b9   :  { %5283 = vmatpush1.msra.mxu0 %v8502_v12  ;;  %5346 = vmatpush1.msra.mxu1 %v8503_v5  ;;  %v8550_v11 = vld [vmem:[#allocation20 + $0x1e0] sm:$0xff]  ;;  %v8552_v5 = vld [vmem:[#allocation20 + $0x1d8] sm:$0xff] }
 0x9ba   :  { %5284 = vmatprep.subr.mxu0 %v8504_v13  ;;  %5347 = vmatprep.subr.mxu1 %v8505_v7  ;;  %v8551_v12 = vld [vmem:[#allocation20 + $0x220] sm:$0xff]  ;;  %v8553_v13 = vld [vmem:[#allocation20 + $0x218] sm:$0xff]  ;;  %v8554_v7 = vld [vmem:[#allocation20 + $0x1d0] sm:$0xff] }
 0x9bb   :  { %5285 = vmatpush1.msra.mxu0 %v8506_v16  ;;  %5348 = vmatpush1.msra.mxu1 %v8507_v17  ;;  %v8555_v16 = vld [vmem:[#allocation20 + $0x210] sm:$0xff]  ;;  %v8556_v17 = vld [vmem:[#allocation20 + $0x1c8] sm:$0xff] }
 0x9bc   :  { %5286 = vmatprep.subr.mxu0 %v8508_v18  ;;  %5349 = vmatprep.subr.mxu1 %v8509_v19  ;;  %v8557_v18 = vld [vmem:[#allocation20 + $0x208] sm:$0xff]  ;;  %v8558_v19 = vld [vmem:[#allocation20 + $0x1c0] sm:$0xff] }
 0x9bd   :  { %5287 = vmatpush1.msra.mxu0 %v8510_v21  ;;  %5350 = vmatpush1.msra.mxu1 %v8511_v23  ;;  %v8559_v21 = vld [vmem:[#allocation20 + $0x200] sm:$0xff]  ;;  %v8560_v23 = vld [vmem:[#allocation20 + $0x1b8] sm:$0xff] }
 0x9be   :  { %5288 = vmatprep.subr.mxu0 %v8512_v25  ;;  %5351 = vmatprep.subr.mxu1 %v8513_v26  ;;  %v8561_v25 = vld [vmem:[#allocation20 + $0x3f8] sm:$0xff]  ;;  %v8562_v26 = vld [vmem:[#allocation20 + $0x1b0] sm:$0xff] }
 0x9bf   :  { %5289 = vmatpush1.msra.mxu0 %v8514_v57  ;;  %5352 = vmatpush1.msra.mxu1 %v8515_v29  ;;  %v8563_v57 = vld [vmem:[#allocation20 + $0x3f0] sm:$0xff]  ;;  %v8564_v29 = vld [vmem:[#allocation20 + $0x1a8] sm:$0xff] }
 0x9c0   :  { %5290 = vmatprep.subr.mxu0 %v8516_v32  ;;  %5353 = vmatprep.subr.mxu1 %v8517_v33  ;;  %v8565_v32 = vld [vmem:[#allocation20 + $0x3e8] sm:$0xff]  ;;  %v8566_v33 = vld [vmem:[#allocation20 + $0x1a0] sm:$0xff] }
 0x9c1   :  { %5291 = vmatpush1.msra.mxu0 %v8518_v35  ;;  %5354 = vmatpush1.msra.mxu1 %v8519_v15  ;;  %v8567_v35 = vld [vmem:[#allocation20 + $0x3e0] sm:$0xff]  ;;  %v8568_v15 = vld [vmem:[#allocation20 + $0x198] sm:$0xff] }
 0x9c2   :  { %5292 = vmatprep.subr.mxu0 %v8520_v27  ;;  %5355 = vmatprep.subr.mxu1 %v8521_v38  ;;  %v8569_v27 = vld [vmem:[#allocation20 + $0x3d8] sm:$0xff]  ;;  %v8570_v38 = vld [vmem:[#allocation20 + $0x190] sm:$0xff] }
 0x9c3   :  { %5293 = vmatpush1.msra.mxu0 %v8522_v39  ;;  %5356 = vmatpush1.msra.mxu1 %v8523_v40  ;;  %v8571_v39 = vld [vmem:[#allocation20 + $0x3d0] sm:$0xff]  ;;  %v8572_v40 = vld [vmem:[#allocation20 + $0x188] sm:$0xff] }
 0x9c4   :  { %5294 = vmatprep.subr.mxu0 %v8524_v36  ;;  %5357 = vmatprep.subr.mxu1 %v8525_v44  ;;  %v8573_v36 = vld [vmem:[#allocation20 + $0x3c8] sm:$0xff]  ;;  %v8574_v44 = vld [vmem:[#allocation20 + $0x180] sm:$0xff] }
 0x9c5   :  { %5295 = vmatpush1.msra.mxu0 %v8526_v51  ;;  %5358 = vmatpush1.msra.mxu1 %v8527_v45  ;;  %v8575_v51 = vld [vmem:[#allocation20 + $0x3c0] sm:$0xff]  ;;  %v8576_v45 = vld [vmem:[#allocation20 + $0x178] sm:$0xff] }
 0x9c6   :  { %5296 = vmatprep.subr.mxu0 %v8528_v63  ;;  %5359 = vmatprep.subr.mxu1 %v8529_v47  ;;  %v8577_v63 = vld [vmem:[#allocation20 + $0x3b8] sm:$0xff]  ;;  %v8578_v47 = vld [vmem:[#allocation20 + $0x170] sm:$0xff] }
 0x9c7   :  { %5297 = vmatpush1.msra.mxu0 %v8530_v49  ;;  %5360 = vmatpush1.msra.mxu1 %v8531_v10  ;;  %v8579_v49 = vld [vmem:[#allocation20 + $0x3b0] sm:$0xff]  ;;  %v8580_v10 = vld [vmem:[#allocation20 + $0x168] sm:$0xff] }
 0x9c8   :  { %5298 = vmatprep.subr.mxu0 %v8532_v52  ;;  %5361 = vmatprep.subr.mxu1 %v8533_v22  ;;  %v8581_v52 = vld [vmem:[#allocation20 + $0x3a8] sm:$0xff]  ;;  %v8582_v22 = vld [vmem:[#allocation20 + $0x160] sm:$0xff] }
 0x9c9   :  { %5299 = vmatpush1.msra.mxu0 %v8534_v53  ;;  %5362 = vmatpush1.msra.mxu1 %v8535_v55  ;;  %v8583_v53 = vld [vmem:[#allocation20 + $0x3a0] sm:$0xff]  ;;  %v8584_v55 = vld [vmem:[#allocation20 + $0x158] sm:$0xff] }
 0x9ca   :  { %5300 = vmatprep.subr.mxu0 %v8536_v56  ;;  %5363 = vmatprep.subr.mxu1 %v8537_v62  ;;  %v8585_v56 = vld [vmem:[#allocation20 + $0x398] sm:$0xff]  ;;  %v8586_v62 = vld [vmem:[#allocation20 + $0x150] sm:$0xff] }
 0x9cb   :  { %5301 = vmatpush1.msra.mxu0 %v8538_v54  ;;  %5364 = vmatpush1.msra.mxu1 %v8539_v59  ;;  %v8587_v54 = vld [vmem:[#allocation20 + $0x390] sm:$0xff]  ;;  %v8588_v59 = vld [vmem:[#allocation20 + $0x148] sm:$0xff] }
 0x9cc   :  { %5302 = vmatprep.subr.mxu0 %v8540_v37  ;;  %5365 = vmatprep.subr.mxu1 %v8541_v34  ;;  %v8589_v37 = vld [vmem:[#allocation20 + $0x388] sm:$0xff]  ;;  %v8590_v34 = vld [vmem:[#allocation20 + $0x140] sm:$0xff] }
 0x9cd   :  { %5303 = vmatpush1.msra.mxu0 %v8542_v61  ;;  %5366 = vmatpush1.msra.mxu1 %v8543_v1  ;;  %v8591_v61 = vld [vmem:[#allocation20 + $0x380] sm:$0xff]  ;;  %v8592_v1 = vld [vmem:[#allocation20 + $0x138] sm:$0xff] }
 0x9ce   :  { %5304 = vmatprep.subr.mxu0 %v8544_v14  ;;  %5367 = vmatprep.subr.mxu1 %v8545_v3  ;;  %v8593_v14 = vld [vmem:[#allocation20 + $0x378] sm:$0xff]  ;;  %v8594_v3 = vld [vmem:[#allocation20 + $0x130] sm:$0xff] }
 0x9cf   :  { %5305 = vmatpush2.msra.mxu0 %v8546_v4  ;;  %5368 = vmatpush1.msra.mxu1 %v8547_v41  ;;  %v8595_v4 = vld [vmem:[#allocation20 + $0x370] sm:$0xff]  ;;  %v8596_v41 = vld [vmem:[#allocation20 + $0x128] sm:$0xff] }
 0x9d0   :  { %5306 = vmatprep.subr.mxu0 %v8548_v6  ;;  %5369 = vmatprep.subr.mxu1 %v8549_v9  ;;  %v8597_v6 = vld [vmem:[#allocation20 + $0x368] sm:$0xff]  ;;  %v8598_v9 = vld [vmem:[#allocation20 + $0x120] sm:$0xff] }
 0x9d1   :  { %5307 = vmatpush2.msra.mxu0 %v8550_v11  ;;  %5370 = vmatpush1.msra.mxu1 %v8551_v12  ;;  %v8599_v11 = vld [vmem:[#allocation20 + $0x360] sm:$0xff]  ;;  %v8600_v12 = vld [vmem:[#allocation20 + $0x118] sm:$0xff] }
 0x9d2   :  { %5308 = vmatprep.subr.mxu0 %v8552_v5  ;;  %5371 = vmatprep.subr.mxu1 %v8553_v13  ;;  %v8601_v5 = vld [vmem:[#allocation20 + $0x358] sm:$0xff]  ;;  %v8602_v13 = vld [vmem:[#allocation20 + $0x110] sm:$0xff] }
 0x9d3   :  { %5309 = vmatpush2.msra.mxu0 %v8554_v7  ;;  %5372 = vmatpush1.msra.mxu1 %v8555_v16  ;;  %v8603_v7 = vld [vmem:[#allocation20 + $0x350] sm:$0xff]  ;;  %v8604_v16 = vld [vmem:[#allocation20 + $0x108] sm:$0xff] }
 0x9d4   :  { %5310 = vmatprep.subr.mxu0 %v8556_v17  ;;  %5373 = vmatprep.subr.mxu1 %v8557_v18  ;;  %v8605_v17 = vld [vmem:[#allocation20 + $0x348] sm:$0xff]  ;;  %v8606_v18 = vld [vmem:[#allocation20 + $0x100] sm:$0xff] }
 0x9d5   :  { %5311 = vmatpush2.msra.mxu0 %v8558_v19  ;;  %5374 = vmatpush1.msra.mxu1 %v8559_v21  ;;  %v8607_v19 = vld [vmem:[#allocation20 + $0x340] sm:$0xff]  ;;  %v8608_v21 = vld [vmem:[#allocation20 + $0x338] sm:$0xff] }
 0x9d6   :  { %5312 = vmatprep.subr.mxu0 %v8560_v23  ;;  %5375 = vmatprep.subr.mxu1 %v8561_v25  ;;  %v8609_v23 = vld [vmem:[#allocation20 + $0x330] sm:$0xff]  ;;  %v8610_v25 = vld [vmem:[#allocation23 + $0x1e8] sm:$0xff] }
 0x9d7   :  { %5313 = vmatpush2.msra.mxu0 %v8562_v26  ;;  %5376 = vmatpush2.msra.mxu1 %v8563_v57  ;;  %v8611_v26 = vld [vmem:[#allocation20 + $0x328] sm:$0xff]  ;;  %v8612_v57 = vld [vmem:[#allocation23 + $0x1e0] sm:$0xff] }
 0x9d8   :  { %5314 = vmatprep.subr.mxu0 %v8564_v29  ;;  %5377 = vmatprep.subr.mxu1 %v8565_v32  ;;  %v8613_v29 = vld [vmem:[#allocation20 + $0x320] sm:$0xff]  ;;  %v8614_v32 = vld [vmem:[#allocation23 + $0x1c8] sm:$0xff] }
 0x9d9   :  { %5315 = vmatpush2.msra.mxu0 %v8566_v33  ;;  %5378 = vmatpush2.msra.mxu1 %v8567_v35  ;;  %v8615_v33 = vld [vmem:[#allocation20 + $0x318] sm:$0xff]  ;;  %v8616_v35 = vld [vmem:[#allocation23 + $0x1c0] sm:$0xff] }
 0x9da   :  { %5316 = vmatprep.subr.mxu0 %v8568_v15  ;;  %5379 = vmatprep.subr.mxu1 %v8569_v27  ;;  %v8617_v15 = vld [vmem:[#allocation20 + $0x310] sm:$0xff]  ;;  %v8619_v27 = vld [vmem:[#allocation20 + $0x308] sm:$0xff] }
 0x9db   :  { %5317 = vmatpush2.msra.mxu0 %v8570_v38  ;;  %5380 = vmatpush2.msra.mxu1 %v8571_v39  ;;  %v8620_v38 = vld [vmem:[#allocation23 + $0x1a0] sm:$0xff] }
 0x9dc   :  { %5318 = vmatprep.subr.mxu0 %v8572_v40  ;;  %5381 = vmatprep.subr.mxu1 %v8573_v36  ;;  %v8621_v39 = vld [vmem:[#allocation20 + $0x300] sm:$0xff]  ;;  %v8622_v40 = vld [vmem:[#allocation23 + $0x188] sm:$0xff]  ;;  %v8623_v36 = vld [vmem:[#allocation23 + $0x1f8] sm:$0xff] }
 0x9dd   :  { %5319 = vmatpush2.msra.mxu0 %v8574_v44  ;;  %5382 = vmatpush2.msra.mxu1 %v8575_v51  ;;  %v8624_v44 = vld [vmem:[#allocation23 + $0x1f0] sm:$0xff]  ;;  %v8625_v51 = vld [vmem:[#allocation23 + $0x180] sm:$0xff] }
 0x9de   :  { %5320 = vmatprep.subr.mxu0 %v8576_v45  ;;  %5383 = vmatprep.subr.mxu1 %v8577_v63  ;;  %v8626_v45 = vld [vmem:[#allocation23 + $0x1d8] sm:$0xff]  ;;  %v8627_v63 = vld [vmem:[#allocation23 + $0x168] sm:$0xff] }
 0x9df   :  { %5321 = vmatpush2.msra.mxu0 %v8578_v47  ;;  %5384 = vmatpush2.msra.mxu1 %v8579_v49  ;;  %v8628_v47 = vld [vmem:[#allocation23 + $0x1d0] sm:$0xff]  ;;  %v8629_v49 = vld [vmem:[#allocation23 + $0x160] sm:$0xff] }
 0x9e0   :  { %5322 = vmatprep.subr.mxu0 %v8580_v10  ;;  %5385 = vmatprep.subr.mxu1 %v8581_v52  ;;  %v8630_v10 = vld [vmem:[#allocation23 + $0x1b8] sm:$0xff]  ;;  %v8631_v52 = vld [vmem:[#allocation23 + $0x148] sm:$0xff] }
 0x9e1   :  { %5323 = vmatpush2.msra.mxu0 %v8582_v22  ;;  %5386 = vmatpush2.msra.mxu1 %v8583_v53  ;;  %v8632_v22 = vld [vmem:[#allocation23 + $0x1b0] sm:$0xff]  ;;  %v8634_v53 = vld [vmem:[#allocation23 + $0x198] sm:$0xff] }
 0x9e2   :  { %5324 = vmatprep.subr.mxu0 %v8584_v55  ;;  %5387 = vmatprep.subr.mxu1 %v8585_v56  ;;  %v8635_v55 = vld [vmem:[#allocation23 + $0x128] sm:$0xff]  ;;  %v8636_v56 = vld [vmem:[#allocation23 + $0x190] sm:$0xff] }
 0x9e3   :  { %5325 = vmatpush2.msra.mxu0 %v8586_v62  ;;  %5388 = vmatpush2.msra.mxu1 %v8587_v54  ;;  %v8637_v62 = vld [vmem:[#allocation23 + $0x120] sm:$0xff]  ;;  %v8638_v54 = vld [vmem:[#allocation23 + $0x178] sm:$0xff] }
 0x9e4   :  { %5326 = vmatprep.subr.mxu0 %v8588_v59  ;;  %5389 = vmatprep.subr.mxu1 %v8589_v37  ;;  %v8639_v59 = vld [vmem:[#allocation23 + $0x108] sm:$0xff]  ;;  %v8640_v37 = vld [vmem:[#allocation23 + $0x170] sm:$0xff] }
 0x9e5   :  { %5327 = vmatpush2.msra.mxu0 %v8590_v34  ;;  %5390 = vmatpush2.msra.mxu1 %v8591_v61  ;;  %v8641_v34 = vld [vmem:[#allocation23 + $0x100] sm:$0xff]  ;;  %v8642_v61 = vld [vmem:[#allocation23 + $0x158] sm:$0xff] }
 0x9e6   :  { %5328 = vmatprep.subr.mxu0 %v8592_v1  ;;  %5391 = vmatprep.subr.mxu1 %v8593_v14  ;;  %v8643_v1 = vld [vmem:[#allocation23 + $0xe8] sm:$0xff]  ;;  %v8644_v14 = vld [vmem:[#allocation23 + $0x150] sm:$0xff] }
 0x9e7   :  { %5329 = vmatpush2.msra.mxu0 %v8594_v3  ;;  %5392 = vmatpush2.msra.mxu1 %v8595_v4  ;;  %v8645_v3 = vld [vmem:[#allocation23 + $0xe0] sm:$0xff]  ;;  %v8646_v4 = vld [vmem:[#allocation23 + $0x138] sm:$0xff] }
 0x9e8   :  { %5330 = vmatprep.subr.mxu0 %v8596_v41  ;;  %5393 = vmatprep.subr.mxu1 %v8597_v6  ;;  %v8647_v41 = vld [vmem:[#allocation23 + $0xc8] sm:$0xff]  ;;  %v8648_v6 = vld [vmem:[#allocation23 + $0x130] sm:$0xff] }
 0x9e9   :  { %5331 = vmatpush2.msra.mxu0 %v8598_v9  ;;  %5394 = vmatpush2.msra.mxu1 %v8599_v11  ;;  %v8649_v9 = vld [vmem:[#allocation23 + $0xc0] sm:$0xff]  ;;  %v8650_v11 = vld [vmem:[#allocation23 + $0x118] sm:$0xff] }
 0x9ea   :  { %5332 = vmatprep.subr.mxu0 %v8600_v12  ;;  %5395 = vmatprep.subr.mxu1 %v8601_v5  ;;  %v8651_v12 = vld [vmem:[#allocation23 + $0xa8] sm:$0xff]  ;;  %v8652_v5 = vld [vmem:[#allocation23 + $0x110] sm:$0xff] }
 0x9eb   :  { %5333 = vmatpush2.msra.mxu0 %v8602_v13  ;;  %5396 = vmatpush2.msra.mxu1 %v8603_v7  ;;  %v8653_v13 = vld [vmem:[#allocation23 + $0xa0] sm:$0xff]  ;;  %v8654_v7 = vld [vmem:[#allocation23 + $0xf8] sm:$0xff] }
 0x9ec   :  { %5334 = vmatprep.subr.mxu0 %v8604_v16  ;;  %5397 = vmatprep.subr.mxu1 %v8605_v17  ;;  %v8655_v16 = vld [vmem:[#allocation23 + $0x88] sm:$0xff]  ;;  %v8656_v17 = vld [vmem:[#allocation23 + $0xf0] sm:$0xff] }
 0x9ed   :  { %5335 = vmatpush2.msra.mxu0 %v8606_v18  ;;  %5398 = vmatpush2.msra.mxu1 %v8607_v19  ;;  %v8657_v18 = vld [vmem:[#allocation23 + $0x80] sm:$0xff]  ;;  %v8658_v19 = vld [vmem:[#allocation23 + $0xd8] sm:$0xff] }
 0x9ee   :  { %5337 = vmatmul.mubr.f32.vlgmr.msra.gmra.mxu0 %v10703_v50  ;;  %5399 = vmatprep.subr.mxu1 %v8608_v21  ;;  %v8618_v50 = vld [vmem:[#allocation23 + $0x1a8] sm:$0xff] }
 0x9ef   :  { %5400 = vmatpush2.msra.mxu1 %v8609_v23  ;;  %5430 = vmatprep.subr.mxu0 %v8610_v25  ;;  %v8659_v21 = vld [vmem:[#allocation23 + $0x68] sm:$0xff]  ;;  %v8660_v23 = vld [vmem:[#allocation23 + $0xd0] sm:$0xff]  ;;  %v8661_v25 = vld [vmem:[#allocation23 + $0x60] sm:$0xff] }
 0x9f0   :  { %5401 = vmatprep.subr.mxu1 %v8611_v26  ;;  %5431 = vmatpush1.msra.mxu0 %v8612_v57  ;;  %v8662_v26 = vld [vmem:[#allocation23 + $0xb8] sm:$0xff]  ;;  %v8663_v57 = vld [vmem:[#allocation23 + $0x48] sm:$0xff] }
 0x9f1   :  { %5402 = vmatpush2.msra.mxu1 %v8613_v29  ;;  %5432 = vmatprep.subr.mxu0 %v8614_v32  ;;  %v8664_v29 = vld [vmem:[#allocation23 + $0xb0] sm:$0xff]  ;;  %v8665_v32 = vld [vmem:[#allocation23 + $0x40] sm:$0xff] }
 0x9f2   :  { %5403 = vmatprep.subr.mxu1 %v8615_v33  ;;  %5433 = vmatpush1.msra.mxu0 %v8616_v35  ;;  %v8666_v33 = vld [vmem:[#allocation23 + $0x98] sm:$0xff]  ;;  %v8667_v35 = vld [vmem:[#allocation23 + $0x28] sm:$0xff] }
 0x9f3   :  { %5404 = vmatpush2.msra.mxu1 %v8617_v15  ;;  %5434 = vmatprep.subr.mxu0 %v8618_v50  ;;  %v8668_v15 = vld [vmem:[#allocation23 + $0x90] sm:$0xff]  ;;  %v8669_v50 = vld [vmem:[#allocation23 + $0x20] sm:$0xff] }
 0x9f4   :  { %5405 = vmatprep.subr.mxu1 %v8619_v27  ;;  %5435 = vmatpush1.msra.mxu0 %v8620_v38  ;;  %v8670_v27 = vld [vmem:[#allocation23 + $0x78] sm:$0xff]  ;;  %v8671_v38 = vld [vmem:[#allocation23 + $0x8] sm:$0xff] }
 0x9f5   :  { %5406 = vmatpush2.msra.mxu1 %v8621_v39  ;;  %5436 = vmatprep.subr.mxu0 %v8622_v40  ;;  %v8672_v39 = vld [vmem:[#allocation23 + $0x70] sm:$0xff]  ;;  %v8673_v40 = vld [vmem:[#allocation23] sm:$0xff] }
 0x9f6   :  { %5408 = vmatmul.mubr.f32.vlgmr.msra.gmra.mxu1 %v10706_v2  ;;  %5501 = vmatprep.subr.mxu1 %v8623_v36  ;;  %v8633_v2 = vld [vmem:[#allocation23 + $0x140] sm:$0xff]  ;;  %v8674_v36 = vld [vmem:[#allocation23 + $0x58] sm:$0xff] }
 0x9f7   :  { %5502 = vmatpush1.msra.mxu1 %v8624_v44  ;;  %5437 = vmatpush1.msra.mxu0 %v8625_v51  ;;  %v8675_v44 = vld [vmem:[#allocation23 + $0x3e8] sm:$0xff]  ;;  %v8676_v51 = vld [vmem:[#allocation23 + $0x50] sm:$0xff] }
 0x9f8   :  { %5503 = vmatprep.subr.mxu1 %v8626_v45  ;;  %5438 = vmatprep.subr.mxu0 %v8627_v63  ;;  %v8677_v45 = vld [vmem:[#allocation23 + $0x3e0] sm:$0xff]  ;;  %v8678_v63 = vld [vmem:[#allocation23 + $0x38] sm:$0xff] }
 0x9f9   :  { %5504 = vmatpush1.msra.mxu1 %v8628_v47  ;;  %5439 = vmatpush1.msra.mxu0 %v8629_v49  ;;  %v8679_v47 = vld [vmem:[#allocation23 + $0x3c8] sm:$0xff]  ;;  %v8680_v49 = vld [vmem:[#allocation23 + $0x30] sm:$0xff] }
 0x9fa   :  { %5505 = vmatprep.subr.mxu1 %v8630_v10  ;;  %5440 = vmatprep.subr.mxu0 %v8631_v52  ;;  %v8681_v10 = vld [vmem:[#allocation23 + $0x3c0] sm:$0xff]  ;;  %v8682_v52 = vld [vmem:[#allocation23 + $0x18] sm:$0xff] }
 0x9fb   :  { %5506 = vmatpush1.msra.mxu1 %v8632_v22  ;;  %5441 = vmatpush1.msra.mxu0 %v8633_v2  ;;  %v8683_v22 = vld [vmem:[#allocation23 + $0x3a8] sm:$0xff]  ;;  %v8684_v2 = vld [vmem:[#allocation23 + $0x10] sm:$0xff] }
 0x9fc   :  { %5507 = vmatprep.subr.mxu1 %v8634_v53  ;;  %5442 = vmatprep.subr.mxu0 %v8635_v55  ;;  %v8685_v53 = vld [vmem:[#allocation23 + $0x3a0] sm:$0xff]  ;;  %v8686_v55 = vld [vmem:[#allocation23 + $0x3f8] sm:$0xff] }
 0x9fd   :  { %5508 = vmatpush1.msra.mxu1 %v8636_v56  ;;  %5443 = vmatpush1.msra.mxu0 %v8637_v62  ;;  %v8687_v56 = vld [vmem:[#allocation23 + $0x388] sm:$0xff]  ;;  %v8688_v62 = vld [vmem:[#allocation23 + $0x3f0] sm:$0xff] }
 0x9fe   :  { %5509 = vmatprep.subr.mxu1 %v8638_v54  ;;  %5444 = vmatprep.subr.mxu0 %v8639_v59  ;;  %v8689_v54 = vld [vmem:[#allocation23 + $0x380] sm:$0xff]  ;;  %v8690_v59 = vld [vmem:[#allocation23 + $0x3d8] sm:$0xff] }
 0x9ff   :  { %5510 = vmatpush1.msra.mxu1 %v8640_v37  ;;  %5445 = vmatpush1.msra.mxu0 %v8641_v34  ;;  %v8691_v37 = vld [vmem:[#allocation23 + $0x368] sm:$0xff]  ;;  %v8692_v34 = vld [vmem:[#allocation23 + $0x3d0] sm:$0xff] }
 0xa00   :  { %5511 = vmatprep.subr.mxu1 %v8642_v61  ;;  %5446 = vmatprep.subr.mxu0 %v8643_v1  ;;  %v8693_v61 = vld [vmem:[#allocation23 + $0x360] sm:$0xff]  ;;  %v8694_v1 = vld [vmem:[#allocation23 + $0x3b8] sm:$0xff] }
 0xa01   :  { %5512 = vmatpush1.msra.mxu1 %v8644_v14  ;;  %5447 = vmatpush1.msra.mxu0 %v8645_v3  ;;  %v8695_v14 = vld [vmem:[#allocation23 + $0x348] sm:$0xff]  ;;  %v8696_v3 = vld [vmem:[#allocation23 + $0x3b0] sm:$0xff] }
 0xa02   :  { %5513 = vmatprep.subr.mxu1 %v8646_v4  ;;  %5448 = vmatprep.subr.mxu0 %v8647_v41  ;;  %v8697_v4 = vld [vmem:[#allocation23 + $0x340] sm:$0xff]  ;;  %v8698_v41 = vld [vmem:[#allocation23 + $0x398] sm:$0xff] }
 0xa03   :  { %5514 = vmatpush1.msra.mxu1 %v8648_v6  ;;  %5449 = vmatpush1.msra.mxu0 %v8649_v9  ;;  %v8699_v6 = vld [vmem:[#allocation23 + $0x328] sm:$0xff]  ;;  %v8700_v9 = vld [vmem:[#allocation23 + $0x390] sm:$0xff] }
 0xa04   :  { %5515 = vmatprep.subr.mxu1 %v8650_v11  ;;  %5450 = vmatprep.subr.mxu0 %v8651_v12  ;;  %v8701_v11 = vld [vmem:[#allocation23 + $0x320] sm:$0xff]  ;;  %v8702_v12 = vld [vmem:[#allocation23 + $0x378] sm:$0xff] }
 0xa05   :  { %5516 = vmatpush1.msra.mxu1 %v8652_v5  ;;  %5451 = vmatpush1.msra.mxu0 %v8653_v13  ;;  %v8703_v5 = vld [vmem:[#allocation23 + $0x308] sm:$0xff]  ;;  %v8704_v13 = vld [vmem:[#allocation23 + $0x370] sm:$0xff] }
 0xa06   :  { %5517 = vmatprep.subr.mxu1 %v8654_v7  ;;  %5452 = vmatprep.subr.mxu0 %v8655_v16  ;;  %v8705_v7 = vld [vmem:[#allocation23 + $0x300] sm:$0xff]  ;;  %v8706_v16 = vld [vmem:[#allocation23 + $0x358] sm:$0xff] }
 0xa07   :  { %5518 = vmatpush1.msra.mxu1 %v8656_v17  ;;  %5453 = vmatpush1.msra.mxu0 %v8657_v18  ;;  %v8707_v17 = vld [vmem:[#allocation23 + $0x2e8] sm:$0xff]  ;;  %v8708_v18 = vld [vmem:[#allocation23 + $0x350] sm:$0xff] }
 0xa08   :  { %5519 = vmatprep.subr.mxu1 %v8658_v19  ;;  %5454 = vmatprep.subr.mxu0 %v8659_v21  ;;  %v8709_v19 = vld [vmem:[#allocation23 + $0x2e0] sm:$0xff]  ;;  %v8710_v21 = vld [vmem:[#allocation23 + $0x338] sm:$0xff] }
 0xa09   :  { %5520 = vmatpush1.msra.mxu1 %v8660_v23  ;;  %5455 = vmatpush1.msra.mxu0 %v8661_v25  ;;  %v8711_v23 = vld [vmem:[#allocation23 + $0x2c8] sm:$0xff]  ;;  %v8712_v25 = vld [vmem:[#allocation23 + $0x330] sm:$0xff] }
 0xa0a   :  { %5521 = vmatprep.subr.mxu1 %v8662_v26  ;;  %5456 = vmatprep.subr.mxu0 %v8663_v57  ;;  %v8713_v26 = vld [vmem:[#allocation23 + $0x2c0] sm:$0xff]  ;;  %v8714_v57 = vld [vmem:[#allocation23 + $0x318] sm:$0xff] }
 0xa0b   :  { %5522 = vmatpush1.msra.mxu1 %v8664_v29  ;;  %5457 = vmatpush1.msra.mxu0 %v8665_v32  ;;  %v8715_v29 = vld [vmem:[#allocation23 + $0x2a8] sm:$0xff]  ;;  %v8716_v32 = vld [vmem:[#allocation23 + $0x310] sm:$0xff] }
 0xa0c   :  { %5523 = vmatprep.subr.mxu1 %v8666_v33  ;;  %5458 = vmatprep.subr.mxu0 %v8667_v35  ;;  %v8717_v33 = vld [vmem:[#allocation23 + $0x2a0] sm:$0xff]  ;;  %v8718_v35 = vld [vmem:[#allocation23 + $0x2f8] sm:$0xff] }
 0xa0d   :  { %5524 = vmatpush1.msra.mxu1 %v8668_v15  ;;  %5459 = vmatpush1.msra.mxu0 %v8669_v50  ;;  %v8719_v15 = vld [vmem:[#allocation23 + $0x288] sm:$0xff]  ;;  %v8720_v50 = vld [vmem:[#allocation23 + $0x2f0] sm:$0xff] }
 0xa0e   :  { %5525 = vmatprep.subr.mxu1 %v8670_v27  ;;  %5460 = vmatprep.subr.mxu0 %v8671_v38  ;;  %v8721_v27 = vld [vmem:[#allocation23 + $0x280] sm:$0xff]  ;;  %v8722_v38 = vld [vmem:[#allocation23 + $0x2d8] sm:$0xff] }
 0xa0f   :  { %5526 = vmatpush1.msra.mxu1 %v8672_v39  ;;  %5461 = vmatpush1.msra.mxu0 %v8673_v40  ;;  %v8723_v39 = vld [vmem:[#allocation23 + $0x268] sm:$0xff]  ;;  %v8724_v40 = vld [vmem:[#allocation23 + $0x2d0] sm:$0xff] }
 0xa10   :  { %5527 = vmatprep.subr.mxu1 %v8674_v36  ;;  %5462 = vmatprep.subr.mxu0 %v8675_v44  ;;  %v8725_v36 = vld [vmem:[#allocation23 + $0x260] sm:$0xff]  ;;  %v8726_v44 = vld [vmem:[#allocation23 + $0x2b8] sm:$0xff] }
 0xa11   :  { %5528 = vmatpush1.msra.mxu1 %v8676_v51  ;;  %5463 = vmatpush2.msra.mxu0 %v8677_v45  ;;  %v8727_v51 = vld [vmem:[#allocation23 + $0x248] sm:$0xff]  ;;  %v8728_v45 = vld [vmem:[#allocation23 + $0x2b0] sm:$0xff] }
 0xa12   :  { %5529 = vmatprep.subr.mxu1 %v8678_v63  ;;  %5464 = vmatprep.subr.mxu0 %v8679_v47  ;;  %v8729_v63 = vld [vmem:[#allocation23 + $0x240] sm:$0xff]  ;;  %v8730_v47 = vld [vmem:[#allocation23 + $0x298] sm:$0xff] }
 0xa13   :  { %5530 = vmatpush1.msra.mxu1 %v8680_v49  ;;  %5465 = vmatpush2.msra.mxu0 %v8681_v10  ;;  %v8731_v49 = vld [vmem:[#allocation23 + $0x228] sm:$0xff]  ;;  %v8732_v10 = vld [vmem:[#allocation23 + $0x290] sm:$0xff] }
 0xa14   :  { %5531 = vmatprep.subr.mxu1 %v8682_v52  ;;  %5466 = vmatprep.subr.mxu0 %v8683_v22  ;;  %v8733_v52 = vld [vmem:[#allocation23 + $0x220] sm:$0xff]  ;;  %v8734_v22 = vld [vmem:[#allocation23 + $0x278] sm:$0xff] }
 0xa15   :  { %5532 = vmatpush1.msra.mxu1 %v8684_v2  ;;  %5467 = vmatpush2.msra.mxu0 %v8685_v53  ;;  %v8735_v2 = vld [vmem:[#allocation23 + $0x208] sm:$0xff]  ;;  %v8736_v53 = vld [vmem:[#allocation23 + $0x270] sm:$0xff] }
 0xa16   :  { %5533 = vmatprep.subr.mxu1 %v8686_v55  ;;  %5468 = vmatprep.subr.mxu0 %v8687_v56  ;;  %v8737_v55 = vld [vmem:[#allocation23 + $0x200] sm:$0xff]  ;;  %v8738_v56 = vld [vmem:[#allocation23 + $0x258] sm:$0xff] }
 0xa17   :  { %5534 = vmatpush2.msra.mxu1 %v8688_v62  ;;  %5469 = vmatpush2.msra.mxu0 %v8689_v54  ;;  %v8739_v62 = vld [vmem:[#allocation22 + $0x1e8] sm:$0xff]  ;;  %v8740_v54 = vld [vmem:[#allocation23 + $0x250] sm:$0xff] }
 0xa18   :  { %5535 = vmatprep.subr.mxu1 %v8690_v59  ;;  %5470 = vmatprep.subr.mxu0 %v8691_v37  ;;  %v8741_v59 = vld [vmem:[#allocation23 + $0x238] sm:$0xff]  ;;  %v8742_v37 = vld [vmem:[#allocation23 + $0x230] sm:$0xff] }
 0xa19   :  { %5536 = vmatpush2.msra.mxu1 %v8692_v34  ;;  %5471 = vmatpush2.msra.mxu0 %v8693_v61  ;;  %v8743_v34 = vld [vmem:[#allocation23 + $0x218] sm:$0xff]  ;;  %v8744_v61 = vld [vmem:[#allocation23 + $0x210] sm:$0xff] }
 0xa1a   :  { %5537 = vmatprep.subr.mxu1 %v8694_v1  ;;  %5472 = vmatprep.subr.mxu0 %v8695_v14  ;;  %v8745_v1 = vld [vmem:[#allocation22 + $0x1f8] sm:$0xff] }
 0xa1b   :  { %5538 = vmatpush2.msra.mxu1 %v8696_v3  ;;  %5473 = vmatpush2.msra.mxu0 %v8697_v4 }
 0xa1c   :  { %5539 = vmatprep.subr.mxu1 %v8698_v41  ;;  %5474 = vmatprep.subr.mxu0 %v8699_v6 }
 0xa1d   :  { %5540 = vmatpush2.msra.mxu1 %v8700_v9  ;;  %5475 = vmatpush2.msra.mxu0 %v8701_v11 }
 0xa1e   :  { %5541 = vmatprep.subr.mxu1 %v8702_v12  ;;  %5476 = vmatprep.subr.mxu0 %v8703_v5 }
 0xa1f   :  { %5542 = vmatpush2.msra.mxu1 %v8704_v13  ;;  %5477 = vmatpush2.msra.mxu0 %v8705_v7 }
 0xa20   :  { %5543 = vmatprep.subr.mxu1 %v8706_v16  ;;  %5478 = vmatprep.subr.mxu0 %v8707_v17 }
 0xa21   :  { %5544 = vmatpush2.msra.mxu1 %v8708_v18  ;;  %5479 = vmatpush2.msra.mxu0 %v8709_v19 }
 0xa22   :  { %5545 = vmatprep.subr.mxu1 %v8710_v21  ;;  %5480 = vmatprep.subr.mxu0 %v8711_v23  ;;  %v8746_v21 = vld [vmem:[#allocation22 + $0x1e0] sm:$0xff]  ;;  %v8747_v23 = vld [vmem:[#allocation22 + $0x1f0] sm:$0xff] }
 0xa23   :  { %5546 = vmatpush2.msra.mxu1 %v8712_v25  ;;  %5481 = vmatpush2.msra.mxu0 %v8713_v26  ;;  %v8748_v25 = vld [vmem:[#allocation22 + $0x1c8] sm:$0xff]  ;;  %v8749_v26 = vld [vmem:[#allocation22 + $0x1d8] sm:$0xff] }
 0xa24   :  { %5547 = vmatprep.subr.mxu1 %v8714_v57  ;;  %5482 = vmatprep.subr.mxu0 %v8715_v29  ;;  %v8750_v57 = vld [vmem:[#allocation22 + $0x1c0] sm:$0xff]  ;;  %v8751_v29 = vld [vmem:[#allocation22 + $0x1d0] sm:$0xff] }
 0xa25   :  { %5548 = vmatpush2.msra.mxu1 %v8716_v32  ;;  %5483 = vmatpush2.msra.mxu0 %v8717_v33  ;;  %v8752_v32 = vld [vmem:[#allocation22 + $0x1a8] sm:$0xff]  ;;  %v8753_v33 = vld [vmem:[#allocation22 + $0x1b8] sm:$0xff] }
 0xa26   :  { %5549 = vmatprep.subr.mxu1 %v8718_v35  ;;  %5484 = vmatprep.subr.mxu0 %v8719_v15  ;;  %v8754_v35 = vld [vmem:[#allocation22 + $0x1a0] sm:$0xff]  ;;  %v8755_v15 = vld [vmem:[#allocation22 + $0x1b0] sm:$0xff] }
 0xa27   :  { %5550 = vmatpush2.msra.mxu1 %v8720_v50  ;;  %5485 = vmatpush2.msra.mxu0 %v8721_v27  ;;  %v8756_v50 = vld [vmem:[#allocation22 + $0x188] sm:$0xff]  ;;  %v8757_v27 = vld [vmem:[#allocation22 + $0x198] sm:$0xff] }
 0xa28   :  { %5551 = vmatprep.subr.mxu1 %v8722_v38  ;;  %5486 = vmatprep.subr.mxu0 %v8723_v39  ;;  %v8758_v38 = vld [vmem:[#allocation22 + $0x180] sm:$0xff]  ;;  %v8759_v39 = vld [vmem:[#allocation22 + $0x190] sm:$0xff] }
 0xa29   :  { %5552 = vmatpush2.msra.mxu1 %v8724_v40  ;;  %5487 = vmatpush2.msra.mxu0 %v8725_v36  ;;  %v8760_v40 = vld [vmem:[#allocation22 + $0x168] sm:$0xff]  ;;  %v8761_v36 = vld [vmem:[#allocation22 + $0x178] sm:$0xff] }
 0xa2a   :  { %5553 = vmatprep.subr.mxu1 %v8726_v44  ;;  %5488 = vmatprep.subr.mxu0 %v8727_v51  ;;  %v8762_v44 = vld [vmem:[#allocation22 + $0x160] sm:$0xff]  ;;  %v8763_v51 = vld [vmem:[#allocation22 + $0x170] sm:$0xff] }
 0xa2b   :  { %5554 = vmatpush2.msra.mxu1 %v8728_v45  ;;  %5489 = vmatpush2.msra.mxu0 %v8729_v63  ;;  %v8764_v45 = vld [vmem:[#allocation22 + $0x148] sm:$0xff]  ;;  %v8765_v63 = vld [vmem:[#allocation22 + $0x158] sm:$0xff] }
 0xa2c   :  { %5555 = vmatprep.subr.mxu1 %v8730_v47  ;;  %5490 = vmatprep.subr.mxu0 %v8731_v49  ;;  %v8766_v47 = vld [vmem:[#allocation22 + $0x140] sm:$0xff]  ;;  %v8767_v49 = vld [vmem:[#allocation22 + $0x150] sm:$0xff] }
 0xa2d   :  { %5556 = vmatpush2.msra.mxu1 %v8732_v10  ;;  %5491 = vmatpush2.msra.mxu0 %v8733_v52  ;;  %v8768_v10 = vld [vmem:[#allocation22 + $0x128] sm:$0xff]  ;;  %v8769_v52 = vld [vmem:[#allocation22 + $0x138] sm:$0xff] }
 0xa2e   :  { %5557 = vmatprep.subr.mxu1 %v8734_v22  ;;  %5492 = vmatprep.subr.mxu0 %v8735_v2  ;;  %v8770_v22 = vld [vmem:[#allocation22 + $0x120] sm:$0xff]  ;;  %v8771_v2 = vld [vmem:[#allocation22 + $0x130] sm:$0xff] }
 0xa2f   :  { %5558 = vmatpush2.msra.mxu1 %v8736_v53  ;;  %5493 = vmatpush2.msra.mxu0 %v8737_v55  ;;  %v8772_v53 = vld [vmem:[#allocation22 + $0x108] sm:$0xff]  ;;  %v8773_v55 = vld [vmem:[#allocation22 + $0x118] sm:$0xff] }
 0xa30   :  { %5559 = vmatprep.subr.mxu1 %v8738_v56  ;;  %5572 = vmatprep.subr.mxu0 %v8739_v62  ;;  %v8774_v56 = vld [vmem:[#allocation22 + $0x100] sm:$0xff]  ;;  %v8775_v62 = vld [vmem:[#allocation22 + $0x110] sm:$0xff] }
 0xa31   :  { %5560 = vmatpush2.msra.mxu1 %v8740_v54  ;;  %v8776_v54 = vld [vmem:[#allocation22 + $0xe8] sm:$0xff] }
 0xa32   :  { %5561 = vmatprep.subr.mxu1 %v8741_v59  ;;  %v8777_v59 = vld [vmem:[#allocation22 + $0xf8] sm:$0xff] }
 0xa33   :  { %5562 = vmatpush2.msra.mxu1 %v8742_v37  ;;  %v8778_v37 = vld [vmem:[#allocation22 + $0xe0] sm:$0xff] }
 0xa34   :  { %5563 = vmatprep.subr.mxu1 %v8743_v34  ;;  %v8779_v34 = vld [vmem:[#allocation22 + $0xf0] sm:$0xff] }
 0xa35   :  { %5564 = vmatpush2.msra.mxu1 %v8744_v61  ;;  %v8780_v61 = vld [vmem:[#allocation22 + $0xc8] sm:$0xff] }
 0xa36   :  { %5643 = vmatprep.subr.mxu1 %v8745_v1  ;;  %v8781_v1 = vld [vmem:[#allocation22 + $0xd8] sm:$0xff] }
 0xa6d   :  { %v5196_v14 = vpop.f32.mrf.mxu0 }
 0xa6f   :  { %v5198_v4 = vpop.f32.mrf.mxu0 }
 0xa76   :  { %v5267_v3 = vpop.f32.mrf.mxu1 }
 0xa77   :  { %v5268_v16 = vadd.f32 %v5267_v3, %v5196_v14  ;;  %v8782_v14 = vld [vmem:[#allocation22 + $0xc0] sm:$0xff]  ;;  %v8783_v3 = vld [vmem:[#allocation22 + $0xd0] sm:$0xff] }
 0xa78   :  { %v5269_v41 = vpop.f32.mrf.mxu1 }
 0xa79   :  { %v5270_v13 = vadd.f32 %v5269_v41, %v5198_v4  ;;  %v8784_v4 = vld [vmem:[#allocation22 + $0xa8] sm:$0xff]  ;;  %v8785_v41 = vld [vmem:[#allocation22 + $0xb8] sm:$0xff] }
 0xaae   :  { %v5338_v6 = vpop.f32.mrf.mxu0 }
 0xab0   :  { %v5340_v11 = vpop.f32.mrf.mxu0 }
 0xab6   :  { %v5409_v9 = vpop.f32.mrf.mxu1 }
 0xab7   :  { %v5410_v12 = vadd.f32 %v5409_v9, %v5338_v6  ;;  %v8786_v6 = vld [vmem:[#allocation22 + $0xa0] sm:$0xff]  ;;  %v8787_v9 = vld [vmem:[#allocation22 + $0xb0] sm:$0xff] }
 0xab8   :  { %v5411_v5 = vpop.f32.mrf.mxu1 }
 0xab9   :  { %v5412_v7 = vadd.f32 %v5411_v5, %v5340_v11  ;;  %v10713_v18 = vmax.f32 %v5268_v16, %v5410_v12  ;;  %v8788_v11 = vld [vmem:[#allocation22 + $0x88] sm:$0xff]  ;;  %v8789_v12 = vld [vmem:[#allocation22 + $0x98] sm:$0xff]  ;;  %v8790_v5 = vld [vmem:[#allocation22 + $0x80] sm:$0xff] }
 0xaba   :  { %v8793_v16 = vld [vmem:[#allocation22 + $0x78] sm:$0xff] }
 0xabb   :  { %v10711_v17 = vmax.f32 %v5270_v13, %v5412_v7  ;;  %v8791_v13 = vld [vmem:[#allocation22 + $0x90] sm:$0xff]  ;;  %v8792_v7 = vld [vmem:[#allocation22 + $0x68] sm:$0xff] }
 0xabd   :  { %5494 = vmatprep.mubr.f32.mxu0 %v10711_v17  ;;  %5565 = vmatprep.mubr.f32.mxu1 %v10711_v17  ;;  %v5419_v19 = vrot.slane %v10711_v17, 7 }
 0xabe   :  { %5495 = vmatmul.mubr.f32.vlgmr.msra.gmra.mxu0 %v10713_v18  ;;  %5566 = vmatmul.mubr.f32.vlgmr.msra.gmra.mxu1 %v10713_v18 }
 0xabf   :  { %5573 = vmatpush1.msra.mxu0 %v8746_v21  ;;  %5644 = vmatpush1.msra.mxu1 %v8747_v23  ;;  %v8795_v21 = vld [vmem:[#allocation22 + $0x70] sm:$0xff]  ;;  %v8796_v23 = vld [vmem:[#allocation22 + $0x48] sm:$0xff] }
 0xac0   :  { %5574 = vmatprep.subr.mxu0 %v8748_v25  ;;  %7863 = vmatprep.mubr.msk.f32.mxu0 %vm10460_vm5, %v5419_v19  ;;  %v8797_v25 = vld [vmem:[#allocation22 + $0x58] sm:$0xff] }
 0xac1   :  { %5645 = vmatprep.subr.mxu1 %v8749_v26  ;;  %7867 = vmatprep.mubr.msk.f32.mxu1 %vm10460_vm5, %v5419_v19  ;;  %v8794_v19 = vld [vmem:[#allocation22 + $0x60] sm:$0xff] }
 0xac2   :  { %5575 = vmatpush1.msra.mxu0 %v8750_v57  ;;  %5646 = vmatpush1.msra.mxu1 %v8751_v29  ;;  %v8798_v26 = vld [vmem:[#allocation22 + $0x40] sm:$0xff]  ;;  %v8799_v57 = vld [vmem:[#allocation22 + $0x50] sm:$0xff]  ;;  %v8800_v29 = vld [vmem:[#allocation22 + $0x28] sm:$0xff] }
 0xac3   :  { %5576 = vmatprep.subr.mxu0 %v8752_v32  ;;  %5647 = vmatprep.subr.mxu1 %v8753_v33  ;;  %v8801_v32 = vld [vmem:[#allocation22 + $0x38] sm:$0xff]  ;;  %v8802_v33 = vld [vmem:[#allocation22 + $0x20] sm:$0xff] }
 0xac4   :  { %5577 = vmatpush1.msra.mxu0 %v8754_v35  ;;  %5648 = vmatpush1.msra.mxu1 %v8755_v15  ;;  %v8803_v35 = vld [vmem:[#allocation22 + $0x30] sm:$0xff]  ;;  %v8804_v15 = vld [vmem:[#allocation22 + $0x8] sm:$0xff] }
 0xac5   :  { %5578 = vmatprep.subr.mxu0 %v8756_v50  ;;  %5649 = vmatprep.subr.mxu1 %v8757_v27  ;;  %v8805_v50 = vld [vmem:[#allocation22 + $0x18] sm:$0xff]  ;;  %v8806_v27 = vld [vmem:[#allocation22] sm:$0xff] }
 0xac6   :  { %5579 = vmatpush1.msra.mxu0 %v8758_v38  ;;  %5650 = vmatpush1.msra.mxu1 %v8759_v39  ;;  %v8807_v38 = vld [vmem:[#allocation22 + $0x10] sm:$0xff]  ;;  %v8808_v39 = vld [vmem:[#allocation22 + $0x3e8] sm:$0xff] }
 0xac7   :  { %5580 = vmatprep.subr.mxu0 %v8760_v40  ;;  %5651 = vmatprep.subr.mxu1 %v8761_v36  ;;  %v8809_v40 = vld [vmem:[#allocation22 + $0x3f8] sm:$0xff]  ;;  %v8810_v36 = vld [vmem:[#allocation22 + $0x3e0] sm:$0xff] }
 0xac8   :  { %5581 = vmatpush1.msra.mxu0 %v8762_v44  ;;  %5652 = vmatpush1.msra.mxu1 %v8763_v51  ;;  %v8811_v44 = vld [vmem:[#allocation22 + $0x3f0] sm:$0xff]  ;;  %v8812_v51 = vld [vmem:[#allocation22 + $0x3c8] sm:$0xff] }
 0xac9   :  { %5582 = vmatprep.subr.mxu0 %v8764_v45  ;;  %5653 = vmatprep.subr.mxu1 %v8765_v63  ;;  %v8813_v45 = vld [vmem:[#allocation22 + $0x3d8] sm:$0xff]  ;;  %v8814_v63 = vld [vmem:[#allocation22 + $0x3c0] sm:$0xff] }
 0xaca   :  { %5583 = vmatpush1.msra.mxu0 %v8766_v47  ;;  %5654 = vmatpush1.msra.mxu1 %v8767_v49  ;;  %v8815_v47 = vld [vmem:[#allocation22 + $0x3d0] sm:$0xff]  ;;  %v8816_v49 = vld [vmem:[#allocation22 + $0x3a8] sm:$0xff] }
 0xacb   :  { %5584 = vmatprep.subr.mxu0 %v8768_v10  ;;  %5655 = vmatprep.subr.mxu1 %v8769_v52  ;;  %v8817_v10 = vld [vmem:[#allocation22 + $0x3b8] sm:$0xff]  ;;  %v8818_v52 = vld [vmem:[#allocation22 + $0x3a0] sm:$0xff] }
 0xacc   :  { %5585 = vmatpush1.msra.mxu0 %v8770_v22  ;;  %5656 = vmatpush1.msra.mxu1 %v8771_v2  ;;  %v8819_v22 = vld [vmem:[#allocation22 + $0x3b0] sm:$0xff]  ;;  %v8820_v2 = vld [vmem:[#allocation22 + $0x388] sm:$0xff] }
 0xacd   :  { %5586 = vmatprep.subr.mxu0 %v8772_v53  ;;  %5657 = vmatprep.subr.mxu1 %v8773_v55  ;;  %v8821_v53 = vld [vmem:[#allocation22 + $0x398] sm:$0xff]  ;;  %v8822_v55 = vld [vmem:[#allocation22 + $0x380] sm:$0xff] }
 0xace   :  { %5587 = vmatpush1.msra.mxu0 %v8774_v56  ;;  %5658 = vmatpush1.msra.mxu1 %v8775_v62  ;;  %v8823_v56 = vld [vmem:[#allocation22 + $0x390] sm:$0xff]  ;;  %v8824_v62 = vld [vmem:[#allocation22 + $0x368] sm:$0xff] }
 0xacf   :  { %5588 = vmatprep.subr.mxu0 %v8776_v54  ;;  %5659 = vmatprep.subr.mxu1 %v8777_v59  ;;  %v8825_v54 = vld [vmem:[#allocation22 + $0x378] sm:$0xff]  ;;  %v8826_v59 = vld [vmem:[#allocation22 + $0x360] sm:$0xff] }
 0xad0   :  { %5589 = vmatpush1.msra.mxu0 %v8778_v37  ;;  %5660 = vmatpush1.msra.mxu1 %v8779_v34  ;;  %v8827_v37 = vld [vmem:[#allocation22 + $0x370] sm:$0xff]  ;;  %v8828_v34 = vld [vmem:[#allocation22 + $0x348] sm:$0xff] }
 0xad1   :  { %5590 = vmatprep.subr.mxu0 %v8780_v61  ;;  %5661 = vmatprep.subr.mxu1 %v8781_v1  ;;  %v8829_v61 = vld [vmem:[#allocation22 + $0x358] sm:$0xff]  ;;  %v8830_v1 = vld [vmem:[#allocation22 + $0x340] sm:$0xff] }
 0xad2   :  { %5591 = vmatpush1.msra.mxu0 %v8782_v14  ;;  %5662 = vmatpush1.msra.mxu1 %v8783_v3  ;;  %v8831_v14 = vld [vmem:[#allocation22 + $0x350] sm:$0xff]  ;;  %v8832_v3 = vld [vmem:[#allocation22 + $0x328] sm:$0xff] }
 0xad3   :  { %5592 = vmatprep.subr.mxu0 %v8784_v4  ;;  %5663 = vmatprep.subr.mxu1 %v8785_v41  ;;  %v8833_v4 = vld [vmem:[#allocation22 + $0x338] sm:$0xff]  ;;  %v8834_v41 = vld [vmem:[#allocation22 + $0x320] sm:$0xff] }
 0xad4   :  { %5593 = vmatpush1.msra.mxu0 %v8786_v6  ;;  %5664 = vmatpush1.msra.mxu1 %v8787_v9  ;;  %v8835_v6 = vld [vmem:[#allocation22 + $0x330] sm:$0xff]  ;;  %v8836_v9 = vld [vmem:[#allocation22 + $0x308] sm:$0xff] }
 0xad5   :  { %5594 = vmatprep.subr.mxu0 %v8788_v11  ;;  %5665 = vmatprep.subr.mxu1 %v8789_v12  ;;  %v8837_v11 = vld [vmem:[#allocation22 + $0x318] sm:$0xff]  ;;  %v8838_v12 = vld [vmem:[#allocation22 + $0x300] sm:$0xff] }
 0xad6   :  { %5595 = vmatpush1.msra.mxu0 %v8790_v5  ;;  %5666 = vmatpush1.msra.mxu1 %v8791_v13  ;;  %v8839_v5 = vld [vmem:[#allocation22 + $0x310] sm:$0xff]  ;;  %v8840_v13 = vld [vmem:[#allocation22 + $0x2e8] sm:$0xff] }
 0xad7   :  { %5596 = vmatprep.subr.mxu0 %v8792_v7  ;;  %5667 = vmatprep.subr.mxu1 %v8793_v16  ;;  %v8841_v7 = vld [vmem:[#allocation22 + $0x2f8] sm:$0xff]  ;;  %v8842_v16 = vld [vmem:[#allocation22 + $0x2e0] sm:$0xff] }
 0xad8   :  { %5597 = vmatpush1.msra.mxu0 %v8794_v19  ;;  %5668 = vmatpush1.msra.mxu1 %v8795_v21  ;;  %v8843_v19 = vld [vmem:[#allocation22 + $0x2f0] sm:$0xff]  ;;  %v8844_v21 = vld [vmem:[#allocation22 + $0x2c8] sm:$0xff] }
 0xad9   :  { %5598 = vmatprep.subr.mxu0 %v8796_v23  ;;  %5669 = vmatprep.subr.mxu1 %v8797_v25  ;;  %v8845_v23 = vld [vmem:[#allocation22 + $0x2d8] sm:$0xff]  ;;  %v8846_v25 = vld [vmem:[#allocation22 + $0x2c0] sm:$0xff] }
 0xada   :  { %5599 = vmatpush1.msra.mxu0 %v8798_v26  ;;  %5670 = vmatpush1.msra.mxu1 %v8799_v57  ;;  %v8847_v26 = vld [vmem:[#allocation22 + $0x2d0] sm:$0xff]  ;;  %v8848_v57 = vld [vmem:[#allocation22 + $0x2a8] sm:$0xff] }
 0xadb   :  { %5600 = vmatprep.subr.mxu0 %v8800_v29  ;;  %5671 = vmatprep.subr.mxu1 %v8801_v32  ;;  %v8849_v29 = vld [vmem:[#allocation22 + $0x2b8] sm:$0xff]  ;;  %v8850_v32 = vld [vmem:[#allocation22 + $0x2a0] sm:$0xff] }
 0xadc   :  { %5601 = vmatpush1.msra.mxu0 %v8802_v33  ;;  %5672 = vmatpush1.msra.mxu1 %v8803_v35  ;;  %v8851_v33 = vld [vmem:[#allocation22 + $0x2b0] sm:$0xff]  ;;  %v8852_v35 = vld [vmem:[#allocation22 + $0x288] sm:$0xff] }
 0xadd   :  { %5602 = vmatprep.subr.mxu0 %v8804_v15  ;;  %5673 = vmatprep.subr.mxu1 %v8805_v50  ;;  %v8853_v15 = vld [vmem:[#allocation22 + $0x298] sm:$0xff]  ;;  %v8854_v50 = vld [vmem:[#allocation22 + $0x280] sm:$0xff] }
 0xade   :  { %5603 = vmatpush1.msra.mxu0 %v8806_v27  ;;  %5674 = vmatpush1.msra.mxu1 %v8807_v38  ;;  %v8855_v27 = vld [vmem:[#allocation22 + $0x290] sm:$0xff]  ;;  %v8856_v38 = vld [vmem:[#allocation22 + $0x268] sm:$0xff] }
 0xadf   :  { %5604 = vmatprep.subr.mxu0 %v8808_v39  ;;  %5675 = vmatprep.subr.mxu1 %v8809_v40  ;;  %v8857_v39 = vld [vmem:[#allocation22 + $0x278] sm:$0xff]  ;;  %v8858_v40 = vld [vmem:[#allocation22 + $0x260] sm:$0xff] }
 0xae0   :  { %5605 = vmatpush2.msra.mxu0 %v8810_v36  ;;  %5676 = vmatpush2.msra.mxu1 %v8811_v44  ;;  %v8859_v36 = vld [vmem:[#allocation22 + $0x270] sm:$0xff]  ;;  %v8860_v44 = vld [vmem:[#allocation22 + $0x248] sm:$0xff] }
 0xae1   :  { %5606 = vmatprep.subr.mxu0 %v8812_v51  ;;  %5677 = vmatprep.subr.mxu1 %v8813_v45  ;;  %v8861_v51 = vld [vmem:[#allocation22 + $0x258] sm:$0xff]  ;;  %v8862_v45 = vld [vmem:[#allocation22 + $0x240] sm:$0xff] }
 0xae2   :  { %5607 = vmatpush2.msra.mxu0 %v8814_v63  ;;  %5678 = vmatpush2.msra.mxu1 %v8815_v47  ;;  %v8863_v63 = vld [vmem:[#allocation22 + $0x250] sm:$0xff]  ;;  %v8864_v47 = vld [vmem:[#allocation22 + $0x228] sm:$0xff] }
 0xae3   :  { %5608 = vmatprep.subr.mxu0 %v8816_v49  ;;  %5679 = vmatprep.subr.mxu1 %v8817_v10  ;;  %v8865_v49 = vld [vmem:[#allocation22 + $0x238] sm:$0xff]  ;;  %v8866_v10 = vld [vmem:[#allocation22 + $0x220] sm:$0xff] }
 0xae4   :  { %5609 = vmatpush2.msra.mxu0 %v8818_v52  ;;  %5680 = vmatpush2.msra.mxu1 %v8819_v22  ;;  %v8867_v52 = vld [vmem:[#allocation22 + $0x230] sm:$0xff]  ;;  %v5418_v22 = vrot.slane %v10713_v18, 7 }
 0xae5   :  { %5610 = vmatprep.subr.mxu0 %v8820_v2  ;;  %5681 = vmatprep.subr.mxu1 %v8821_v53  ;;  %v8868_v2 = vld [vmem:[#allocation22 + $0x208] sm:$0xff]  ;;  %v8869_v53 = vld [vmem:[#allocation22 + $0x218] sm:$0xff] }
 0xae6   :  { %5611 = vmatpush2.msra.mxu0 %v8822_v55  ;;  %5682 = vmatpush2.msra.mxu1 %v8823_v56  ;;  %v8870_v55 = vld [vmem:[#allocation22 + $0x200] sm:$0xff]  ;;  %v8871_v56 = vld [vmem:[#allocation22 + $0x210] sm:$0xff] }
 0xae7   :  { %5612 = vmatprep.subr.mxu0 %v8824_v62  ;;  %5683 = vmatprep.subr.mxu1 %v8825_v54  ;;  %v5425_v62 = vrot.slane %v10711_v17, 1  ;;  %v8872_v54 = vld [vmem:[#allocation25 + $0x1e8] sm:$0xff] }
 0xae8   :  { %5613 = vmatpush2.msra.mxu0 %v8826_v59  ;;  %5684 = vmatpush2.msra.mxu1 %v8827_v37  ;;  %v8873_v59 = vld [vmem:[#allocation25 + $0x1f8] sm:$0xff]  ;;  %v8874_v37 = vld [vmem:[#allocation25 + $0x1e0] sm:$0xff]  ;;  %v8880_v17 = vld [vmem:[#allocation25 + $0x1a8] sm:$0xff] }
 0xae9   :  { %5614 = vmatprep.subr.mxu0 %v8828_v34  ;;  %5685 = vmatprep.subr.mxu1 %v8829_v61  ;;  %v8875_v34 = vld [vmem:[#allocation25 + $0x1f0] sm:$0xff]  ;;  %v8876_v61 = vld [vmem:[#allocation25 + $0x1c8] sm:$0xff] }
 0xaea   :  { %5615 = vmatpush2.msra.mxu0 %v8830_v1  ;;  %5686 = vmatpush2.msra.mxu1 %v8831_v14  ;;  %v8877_v1 = vld [vmem:[#allocation25 + $0x1d8] sm:$0xff]  ;;  %v8879_v14 = vld [vmem:[#allocation25 + $0x1d0] sm:$0xff] }
 0xaeb   :  { %5616 = vmatprep.subr.mxu0 %v8832_v3  ;;  %5687 = vmatprep.subr.mxu1 %v8833_v4  ;;  %v8881_v3 = vld [vmem:[#allocation25 + $0x1b8] sm:$0xff]  ;;  %v8882_v4 = vld [vmem:[#allocation25 + $0x1a0] sm:$0xff] }
 0xaec   :  { %5617 = vmatpush2.msra.mxu0 %v8834_v41  ;;  %5688 = vmatpush2.msra.mxu1 %v8835_v6  ;;  %v8883_v41 = vld [vmem:[#allocation25 + $0x1b0] sm:$0xff]  ;;  %v8884_v6 = vld [vmem:[#allocation25 + $0x188] sm:$0xff] }
 0xaed   :  { %5618 = vmatprep.subr.mxu0 %v8836_v9  ;;  %5689 = vmatprep.subr.mxu1 %v8837_v11  ;;  %v8885_v9 = vld [vmem:[#allocation25 + $0x198] sm:$0xff]  ;;  %v8886_v11 = vld [vmem:[#allocation25 + $0x180] sm:$0xff] }
 0xaee   :  { %5619 = vmatpush2.msra.mxu0 %v8838_v12  ;;  %5690 = vmatpush2.msra.mxu1 %v8839_v5  ;;  %v8887_v12 = vld [vmem:[#allocation25 + $0x190] sm:$0xff]  ;;  %v8888_v5 = vld [vmem:[#allocation25 + $0x168] sm:$0xff] }
 0xaef   :  { %5620 = vmatprep.subr.mxu0 %v8840_v13  ;;  %5691 = vmatprep.subr.mxu1 %v8841_v7  ;;  %v8889_v13 = vld [vmem:[#allocation25 + $0x178] sm:$0xff]  ;;  %v8890_v7 = vld [vmem:[#allocation25 + $0x160] sm:$0xff] }
 0xaf0   :  { %5621 = vmatpush2.msra.mxu0 %v8842_v16  ;;  %5692 = vmatpush2.msra.mxu1 %v8843_v19  ;;  %v8891_v16 = vld [vmem:[#allocation25 + $0x170] sm:$0xff]  ;;  %v8892_v19 = vld [vmem:[#allocation25 + $0x148] sm:$0xff] }
 0xaf1   :  { %5622 = vmatprep.subr.mxu0 %v8844_v21  ;;  %5693 = vmatprep.subr.mxu1 %v8845_v23  ;;  %v8893_v21 = vld [vmem:[#allocation25 + $0x158] sm:$0xff]  ;;  %v8894_v23 = vld [vmem:[#allocation25 + $0x140] sm:$0xff] }
 0xaf2   :  { %5623 = vmatpush2.msra.mxu0 %v8846_v25  ;;  %5694 = vmatpush2.msra.mxu1 %v8847_v26  ;;  %v8895_v25 = vld [vmem:[#allocation25 + $0x150] sm:$0xff]  ;;  %v8896_v26 = vld [vmem:[#allocation25 + $0x128] sm:$0xff] }
 0xaf3   :  { %5624 = vmatprep.subr.mxu0 %v8848_v57  ;;  %5695 = vmatprep.subr.mxu1 %v8849_v29  ;;  %v8897_v57 = vld [vmem:[#allocation25 + $0x138] sm:$0xff]  ;;  %v8898_v29 = vld [vmem:[#allocation25 + $0x120] sm:$0xff] }
 0xaf4   :  { %5625 = vmatpush2.msra.mxu0 %v8850_v32  ;;  %5696 = vmatpush2.msra.mxu1 %v8851_v33  ;;  %v8899_v32 = vld [vmem:[#allocation25 + $0x130] sm:$0xff]  ;;  %v8900_v33 = vld [vmem:[#allocation25 + $0x108] sm:$0xff] }
 0xaf5   :  { %5626 = vmatprep.subr.mxu0 %v8852_v35  ;;  %5697 = vmatprep.subr.mxu1 %v8853_v15  ;;  %v8901_v35 = vld [vmem:[#allocation25 + $0x118] sm:$0xff]  ;;  %v8902_v15 = vld [vmem:[#allocation25 + $0x100] sm:$0xff] }
 0xaf6   :  { %5627 = vmatpush2.msra.mxu0 %v8854_v50  ;;  %5698 = vmatpush2.msra.mxu1 %v8855_v27  ;;  %v8903_v50 = vld [vmem:[#allocation25 + $0x110] sm:$0xff]  ;;  %v8904_v27 = vld [vmem:[#allocation25 + $0xe8] sm:$0xff] }
 0xaf7   :  { %5628 = vmatprep.subr.mxu0 %v8856_v38  ;;  %5699 = vmatprep.subr.mxu1 %v8857_v39  ;;  %v8905_v38 = vld [vmem:[#allocation25 + $0xf8] sm:$0xff]  ;;  %v8906_v39 = vld [vmem:[#allocation25 + $0xe0] sm:$0xff] }
 0xaf8   :  { %5629 = vmatpush2.msra.mxu0 %v8858_v40  ;;  %5700 = vmatpush2.msra.mxu1 %v8859_v36  ;;  %v8907_v40 = vld [vmem:[#allocation25 + $0xf0] sm:$0xff]  ;;  %v8908_v36 = vld [vmem:[#allocation25 + $0xc8] sm:$0xff] }
 0xaf9   :  { %5630 = vmatprep.subr.mxu0 %v8860_v44  ;;  %5701 = vmatprep.subr.mxu1 %v8861_v51  ;;  %v8909_v44 = vld [vmem:[#allocation25 + $0xd8] sm:$0xff]  ;;  %v8910_v51 = vld [vmem:[#allocation25 + $0xc0] sm:$0xff] }
 0xafa   :  { %5631 = vmatpush2.msra.mxu0 %v8862_v45  ;;  %5702 = vmatpush2.msra.mxu1 %v8863_v63  ;;  %v8911_v45 = vld [vmem:[#allocation25 + $0xd0] sm:$0xff]  ;;  %v8912_v63 = vld [vmem:[#allocation25 + $0xa8] sm:$0xff] }
 0xafb   :  { %5632 = vmatprep.subr.mxu0 %v8864_v47  ;;  %5703 = vmatprep.subr.mxu1 %v8865_v49  ;;  %v8913_v47 = vld [vmem:[#allocation25 + $0xb8] sm:$0xff]  ;;  %v8914_v49 = vld [vmem:[#allocation25 + $0xa0] sm:$0xff] }
 0xafc   :  { %5633 = vmatpush2.msra.mxu0 %v8866_v10  ;;  %5704 = vmatpush2.msra.mxu1 %v8867_v52  ;;  %v8915_v10 = vld [vmem:[#allocation25 + $0xb0] sm:$0xff]  ;;  %v8916_v52 = vld [vmem:[#allocation25 + $0x88] sm:$0xff] }
 0xafd   :  { %5634 = vmatprep.subr.mxu0 %v8868_v2  ;;  %5705 = vmatprep.subr.mxu1 %v8869_v53  ;;  %v8918_v2 = vld [vmem:[#allocation25 + $0x80] sm:$0xff]  ;;  %v8919_v53 = vld [vmem:[#allocation25 + $0x90] sm:$0xff] }
 0xafe   :  { %5635 = vmatpush2.msra.mxu0 %v8870_v55  ;;  %5706 = vmatpush2.msra.mxu1 %v8871_v56  ;;  %v8920_v55 = vld [vmem:[#allocation25 + $0x68] sm:$0xff]  ;;  %v8921_v56 = vld [vmem:[#allocation25 + $0x78] sm:$0xff] }
 0xaff   :  { %7865 = vmatmul.mubr.msk.f32.vlgmr.msra.gmra.mxu0 %vm10460_vm5, %v5418_v22  ;;  %7869 = vmatmul.mubr.msk.f32.vlgmr.msra.gmra.mxu1 %vm10460_vm5, %v5418_v22  ;;  %v8917_v22 = vld [vmem:[#allocation25 + $0x98] sm:$0xff] }
 0xb00   :  { %5714 = vmatprep.subr.mxu0 %v8872_v54  ;;  %5785 = vmatprep.subr.mxu1 %v8873_v59  ;;  %v8923_v54 = vld [vmem:[#allocation25 + $0x70] sm:$0xff]  ;;  %v8924_v59 = vld [vmem:[#allocation25 + $0x48] sm:$0xff] }
 0xb01   :  { %5715 = vmatpush1.msra.mxu0 %v8874_v37  ;;  %7870 = vmatprep.mubr.msk.f32.mxu0 %vm2154_vm4, %v5425_v62  ;;  %v8925_v37 = vld [vmem:[#allocation25 + $0x58] sm:$0xff] }
 0xb02   :  { %5786 = vmatpush1.msra.mxu1 %v8875_v34  ;;  %7872 = vmatprep.mubr.msk.f32.mxu1 %vm2154_vm4, %v5425_v62  ;;  %v8922_v62 = vld [vmem:[#allocation25 + $0x60] sm:$0xff] }
 0xb03   :  { %5716 = vmatprep.subr.mxu0 %v8876_v61  ;;  %5787 = vmatprep.subr.mxu1 %v8877_v1  ;;  %v8926_v34 = vld [vmem:[#allocation25 + $0x40] sm:$0xff]  ;;  %v8927_v61 = vld [vmem:[#allocation25 + $0x50] sm:$0xff]  ;;  %v8928_v1 = vld [vmem:[#allocation25 + $0x28] sm:$0xff] }
 0xb04   :  { %5717 = vmatpush1.msra.mxu0 %v8878_v20  ;;  %5788 = vmatpush1.msra.mxu1 %v8879_v14  ;;  %v8929_v20 = vld [vmem:[#allocation25 + $0x38] sm:$0xff]  ;;  %v8930_v14 = vld [vmem:[#allocation25 + $0x20] sm:$0xff] }
 0xb05   :  { %5718 = vmatprep.subr.mxu0 %v8880_v17  ;;  %5789 = vmatprep.subr.mxu1 %v8881_v3  ;;  %v8931_v17 = vld [vmem:[#allocation25 + $0x30] sm:$0xff]  ;;  %v8932_v3 = vld [vmem:[#allocation25 + $0x8] sm:$0xff] }
 0xb06   :  { %5719 = vmatpush1.msra.mxu0 %v8882_v4  ;;  %5790 = vmatpush1.msra.mxu1 %v8883_v41  ;;  %v8933_v4 = vld [vmem:[#allocation25 + $0x18] sm:$0xff]  ;;  %v8934_v41 = vld [vmem:[#allocation25] sm:$0xff] }
 0xb07   :  { %5720 = vmatprep.subr.mxu0 %v8884_v6  ;;  %5791 = vmatprep.subr.mxu1 %v8885_v9  ;;  %v8935_v6 = vld [vmem:[#allocation25 + $0x10] sm:$0xff]  ;;  %v8936_v9 = vld [vmem:[#allocation25 + $0x3e8] sm:$0xff] }
 0xb08   :  { %5721 = vmatpush1.msra.mxu0 %v8886_v11  ;;  %5792 = vmatpush1.msra.mxu1 %v8887_v12  ;;  %v8937_v11 = vld [vmem:[#allocation25 + $0x3f8] sm:$0xff]  ;;  %v8938_v12 = vld [vmem:[#allocation25 + $0x3e0] sm:$0xff] }
 0xb09   :  { %5722 = vmatprep.subr.mxu0 %v8888_v5  ;;  %5793 = vmatprep.subr.mxu1 %v8889_v13  ;;  %v8939_v5 = vld [vmem:[#allocation25 + $0x3f0] sm:$0xff]  ;;  %v8940_v13 = vld [vmem:[#allocation25 + $0x3c8] sm:$0xff] }
 0xb0a   :  { %5723 = vmatpush1.msra.mxu0 %v8890_v7  ;;  %5794 = vmatpush1.msra.mxu1 %v8891_v16  ;;  %v8941_v7 = vld [vmem:[#allocation25 + $0x3d8] sm:$0xff]  ;;  %v8942_v16 = vld [vmem:[#allocation25 + $0x3c0] sm:$0xff] }
 0xb0b   :  { %5724 = vmatprep.subr.mxu0 %v8892_v19  ;;  %5795 = vmatprep.subr.mxu1 %v8893_v21  ;;  %v8943_v19 = vld [vmem:[#allocation25 + $0x3d0] sm:$0xff]  ;;  %v8944_v21 = vld [vmem:[#allocation25 + $0x3a8] sm:$0xff] }
 0xb0c   :  { %5725 = vmatpush1.msra.mxu0 %v8894_v23  ;;  %5796 = vmatpush1.msra.mxu1 %v8895_v25  ;;  %v8945_v23 = vld [vmem:[#allocation25 + $0x3b8] sm:$0xff]  ;;  %v8946_v25 = vld [vmem:[#allocation25 + $0x3a0] sm:$0xff] }
 0xb0d   :  { %5726 = vmatprep.subr.mxu0 %v8896_v26  ;;  %5797 = vmatprep.subr.mxu1 %v8897_v57  ;;  %v8947_v26 = vld [vmem:[#allocation25 + $0x3b0] sm:$0xff]  ;;  %v8948_v57 = vld [vmem:[#allocation25 + $0x388] sm:$0xff] }
 0xb0e   :  { %5727 = vmatpush1.msra.mxu0 %v8898_v29  ;;  %5798 = vmatpush1.msra.mxu1 %v8899_v32  ;;  %v8949_v29 = vld [vmem:[#allocation25 + $0x398] sm:$0xff]  ;;  %v8950_v32 = vld [vmem:[#allocation25 + $0x380] sm:$0xff] }
 0xb0f   :  { %5728 = vmatprep.subr.mxu0 %v8900_v33  ;;  %5799 = vmatprep.subr.mxu1 %v8901_v35  ;;  %v8951_v33 = vld [vmem:[#allocation25 + $0x390] sm:$0xff]  ;;  %v8952_v35 = vld [vmem:[#allocation25 + $0x368] sm:$0xff] }
 0xb10   :  { %5729 = vmatpush1.msra.mxu0 %v8902_v15  ;;  %5800 = vmatpush1.msra.mxu1 %v8903_v50  ;;  %v8953_v15 = vld [vmem:[#allocation25 + $0x378] sm:$0xff]  ;;  %v8954_v50 = vld [vmem:[#allocation25 + $0x360] sm:$0xff] }
 0xb11   :  { %5730 = vmatprep.subr.mxu0 %v8904_v27  ;;  %5801 = vmatprep.subr.mxu1 %v8905_v38  ;;  %v8955_v27 = vld [vmem:[#allocation25 + $0x370] sm:$0xff]  ;;  %v8956_v38 = vld [vmem:[#allocation25 + $0x348] sm:$0xff] }
 0xb12   :  { %5731 = vmatpush1.msra.mxu0 %v8906_v39  ;;  %5802 = vmatpush1.msra.mxu1 %v8907_v40  ;;  %v8957_v39 = vld [vmem:[#allocation25 + $0x358] sm:$0xff]  ;;  %v8958_v40 = vld [vmem:[#allocation25 + $0x340] sm:$0xff] }
 0xb13   :  { %5732 = vmatprep.subr.mxu0 %v8908_v36  ;;  %5803 = vmatprep.subr.mxu1 %v8909_v44  ;;  %v8959_v36 = vld [vmem:[#allocation25 + $0x350] sm:$0xff]  ;;  %v8960_v44 = vld [vmem:[#allocation25 + $0x328] sm:$0xff] }
 0xb14   :  { %5733 = vmatpush1.msra.mxu0 %v8910_v51  ;;  %5804 = vmatpush1.msra.mxu1 %v8911_v45  ;;  %v8961_v51 = vld [vmem:[#allocation25 + $0x338] sm:$0xff]  ;;  %v8962_v45 = vld [vmem:[#allocation25 + $0x320] sm:$0xff] }
 0xb15   :  { %5734 = vmatprep.subr.mxu0 %v8912_v63  ;;  %5805 = vmatprep.subr.mxu1 %v8913_v47  ;;  %v8963_v63 = vld [vmem:[#allocation25 + $0x330] sm:$0xff]  ;;  %v8964_v47 = vld [vmem:[#allocation25 + $0x308] sm:$0xff] }
 0xb16   :  { %5735 = vmatpush1.msra.mxu0 %v8914_v49  ;;  %5806 = vmatpush1.msra.mxu1 %v8915_v10  ;;  %v8965_v49 = vld [vmem:[#allocation25 + $0x318] sm:$0xff]  ;;  %v8966_v10 = vld [vmem:[#allocation25 + $0x300] sm:$0xff] }
 0xb17   :  { %5736 = vmatprep.subr.mxu0 %v8916_v52  ;;  %5807 = vmatprep.subr.mxu1 %v8917_v22  ;;  %v8967_v52 = vld [vmem:[#allocation25 + $0x310] sm:$0xff]  ;;  %v8968_v22 = vld [vmem:[#allocation25 + $0x2e8] sm:$0xff] }
 0xb18   :  { %5737 = vmatpush1.msra.mxu0 %v8918_v2  ;;  %5808 = vmatpush1.msra.mxu1 %v8919_v53  ;;  %v8969_v2 = vld [vmem:[#allocation25 + $0x2f8] sm:$0xff]  ;;  %v8970_v53 = vld [vmem:[#allocation25 + $0x2e0] sm:$0xff] }
 0xb19   :  { %5738 = vmatprep.subr.mxu0 %v8920_v55  ;;  %5809 = vmatprep.subr.mxu1 %v8921_v56  ;;  %v8971_v55 = vld [vmem:[#allocation25 + $0x2f0] sm:$0xff]  ;;  %v8972_v56 = vld [vmem:[#allocation25 + $0x2c8] sm:$0xff] }
 0xb1a   :  { %5739 = vmatpush1.msra.mxu0 %v8922_v62  ;;  %5810 = vmatpush1.msra.mxu1 %v8923_v54  ;;  %v8973_v62 = vld [vmem:[#allocation25 + $0x2d8] sm:$0xff]  ;;  %v8974_v54 = vld [vmem:[#allocation25 + $0x2c0] sm:$0xff] }
 0xb1b   :  { %5740 = vmatprep.subr.mxu0 %v8924_v59  ;;  %5811 = vmatprep.subr.mxu1 %v8925_v37  ;;  %v8975_v59 = vld [vmem:[#allocation25 + $0x2d0] sm:$0xff]  ;;  %v8976_v37 = vld [vmem:[#allocation25 + $0x2a8] sm:$0xff] }
 0xb1c   :  { %5741 = vmatpush1.msra.mxu0 %v8926_v34  ;;  %5812 = vmatpush1.msra.mxu1 %v8927_v61  ;;  %v8977_v34 = vld [vmem:[#allocation25 + $0x2b8] sm:$0xff]  ;;  %v8978_v61 = vld [vmem:[#allocation25 + $0x2a0] sm:$0xff] }
 0xb1d   :  { %5742 = vmatprep.subr.mxu0 %v8928_v1  ;;  %5813 = vmatprep.subr.mxu1 %v8929_v20  ;;  %v8979_v1 = vld [vmem:[#allocation25 + $0x2b0] sm:$0xff]  ;;  %v8980_v20 = vld [vmem:[#allocation25 + $0x288] sm:$0xff] }
 0xb1e   :  { %5743 = vmatpush1.msra.mxu0 %v8930_v14  ;;  %5814 = vmatpush1.msra.mxu1 %v8931_v17  ;;  %v8981_v14 = vld [vmem:[#allocation25 + $0x298] sm:$0xff]  ;;  %v8982_v17 = vld [vmem:[#allocation25 + $0x280] sm:$0xff] }
 0xb1f   :  { %5744 = vmatprep.subr.mxu0 %v8932_v3  ;;  %5815 = vmatprep.subr.mxu1 %v8933_v4  ;;  %v8983_v3 = vld [vmem:[#allocation25 + $0x290] sm:$0xff]  ;;  %v8984_v4 = vld [vmem:[#allocation25 + $0x268] sm:$0xff] }
 0xb20   :  { %5745 = vmatpush1.msra.mxu0 %v8934_v41  ;;  %5816 = vmatpush1.msra.mxu1 %v8935_v6  ;;  %v8985_v41 = vld [vmem:[#allocation25 + $0x278] sm:$0xff]  ;;  %v8986_v6 = vld [vmem:[#allocation25 + $0x260] sm:$0xff] }
 0xb21   :  { %5746 = vmatprep.subr.mxu0 %v8936_v9  ;;  %5817 = vmatprep.subr.mxu1 %v8937_v11  ;;  %v8987_v9 = vld [vmem:[#allocation25 + $0x270] sm:$0xff]  ;;  %v8988_v11 = vld [vmem:[#allocation25 + $0x248] sm:$0xff] }
 0xb22   :  { %5747 = vmatpush2.msra.mxu0 %v8938_v12  ;;  %5818 = vmatpush2.msra.mxu1 %v8939_v5  ;;  %v8989_v12 = vld [vmem:[#allocation25 + $0x258] sm:$0xff]  ;;  %v8990_v5 = vld [vmem:[#allocation25 + $0x240] sm:$0xff] }
 0xb23   :  { %5748 = vmatprep.subr.mxu0 %v8940_v13  ;;  %5819 = vmatprep.subr.mxu1 %v8941_v7  ;;  %v8991_v13 = vld [vmem:[#allocation25 + $0x250] sm:$0xff]  ;;  %v8992_v7 = vld [vmem:[#allocation25 + $0x228] sm:$0xff] }
 0xb24   :  { %5749 = vmatpush2.msra.mxu0 %v8942_v16  ;;  %5820 = vmatpush2.msra.mxu1 %v8943_v19  ;;  %v8993_v16 = vld [vmem:[#allocation25 + $0x238] sm:$0xff]  ;;  %v8994_v19 = vld [vmem:[#allocation25 + $0x220] sm:$0xff] }
 0xb25   :  { %5750 = vmatprep.subr.mxu0 %v8944_v21  ;;  %5821 = vmatprep.subr.mxu1 %v8945_v23  ;;  %v8995_v21 = vld [vmem:[#allocation25 + $0x230] sm:$0xff]  ;;  %v5424_v23 = vrot.slane %v10713_v18, 1 }
 0xb26   :  { %5751 = vmatpush2.msra.mxu0 %v8946_v25  ;;  %5822 = vmatpush2.msra.mxu1 %v8947_v26  ;;  %v8996_v25 = vld [vmem:[#allocation25 + $0x208] sm:$0xff]  ;;  %v8997_v26 = vld [vmem:[#allocation25 + $0x218] sm:$0xff] }
 0xb27   :  { %5752 = vmatprep.subr.mxu0 %v8948_v57  ;;  %5823 = vmatprep.subr.mxu1 %v8949_v29  ;;  %v8998_v57 = vld [vmem:[#allocation25 + $0x200] sm:$0xff]  ;;  %v8999_v29 = vld [vmem:[#allocation25 + $0x210] sm:$0xff] }
 0xb28   :  { %5753 = vmatpush2.msra.mxu0 %v8950_v32  ;;  %5824 = vmatpush2.msra.mxu1 %v8951_v33 }
 0xb29   :  { %5754 = vmatprep.subr.mxu0 %v8952_v35  ;;  %5825 = vmatprep.subr.mxu1 %v8953_v15 }
 0xb2a   :  { %5755 = vmatpush2.msra.mxu0 %v8954_v50  ;;  %5826 = vmatpush2.msra.mxu1 %v8955_v27 }
 0xb2b   :  { %5756 = vmatprep.subr.mxu0 %v8956_v38  ;;  %5827 = vmatprep.subr.mxu1 %v8957_v39 }
 0xb2c   :  { %5757 = vmatpush2.msra.mxu0 %v8958_v40  ;;  %5828 = vmatpush2.msra.mxu1 %v8959_v36 }
 0xb2d   :  { %5758 = vmatprep.subr.mxu0 %v8960_v44  ;;  %5829 = vmatprep.subr.mxu1 %v8961_v51 }
 0xb2e   :  { %5759 = vmatpush2.msra.mxu0 %v8962_v45  ;;  %5830 = vmatpush2.msra.mxu1 %v8963_v63 }
 0xb2f   :  { %5760 = vmatprep.subr.mxu0 %v8964_v47  ;;  %5831 = vmatprep.subr.mxu1 %v8965_v49 }
 0xb30   :  { %5761 = vmatpush2.msra.mxu0 %v8966_v10  ;;  %5832 = vmatpush2.msra.mxu1 %v8967_v52 }
 0xb31   :  { %5762 = vmatprep.subr.mxu0 %v8968_v22  ;;  %5833 = vmatprep.subr.mxu1 %v8969_v2 }
 0xb32   :  { %5763 = vmatpush2.msra.mxu0 %v8970_v53  ;;  %5834 = vmatpush2.msra.mxu1 %v8971_v55 }
 0xb33   :  { %5764 = vmatprep.subr.mxu0 %v8972_v56  ;;  %5835 = vmatprep.subr.mxu1 %v8973_v62 }
 0xb34   :  { %5765 = vmatpush2.msra.mxu0 %v8974_v54  ;;  %5836 = vmatpush2.msra.mxu1 %v8975_v59 }
 0xb35   :  { %5766 = vmatprep.subr.mxu0 %v8976_v37  ;;  %5837 = vmatprep.subr.mxu1 %v8977_v34  ;;  %v9000_v34 = vld [vmem:[#allocation28] sm:$0xf] }
 0xb36   :  { %5767 = vmatpush2.msra.mxu0 %v8978_v61  ;;  %5838 = vmatpush2.msra.mxu1 %v8979_v1  ;;  %v9005_v61 = vld [vmem:[%s11038_s28 + $0x2f0] sm:$0xff]  ;;  %v9006_v1 = vld [vmem:[%s11038_s28 + $0xe8] sm:$0xff] }
 0xb37   :  { %5768 = vmatprep.subr.mxu0 %v8980_v20  ;;  %5839 = vmatprep.subr.mxu1 %v8981_v14  ;;  %v9007_v20 = vld [vmem:[%s11038_s28 + $0x2e8] sm:$0xff]  ;;  %v9008_v14 = vld [vmem:[%s11038_s28 + $0xe0] sm:$0xff] }
 0xb38   :  { %5769 = vmatpush2.msra.mxu0 %v8982_v17  ;;  %5840 = vmatpush2.msra.mxu1 %v8983_v3  ;;  %v9009_v17 = vld [vmem:[%s11038_s28 + $0x2e0] sm:$0xff]  ;;  %v9010_v3 = vld [vmem:[%s11038_s28 + $0xd8] sm:$0xff] }
 0xb39   :  { %5770 = vmatprep.subr.mxu0 %v8984_v4  ;;  %5841 = vmatprep.subr.mxu1 %v8985_v41  ;;  %v9011_v4 = vld [vmem:[%s11038_s28 + $0x2d8] sm:$0xff]  ;;  %v9012_v41 = vld [vmem:[%s11038_s28 + $0xd0] sm:$0xff] }
 0xb3a   :  { %5771 = vmatpush2.msra.mxu0 %v8986_v6  ;;  %5842 = vmatpush2.msra.mxu1 %v8987_v9  ;;  %v9013_v6 = vld [vmem:[%s11038_s28 + $0x2d0] sm:$0xff]  ;;  %v9014_v9 = vld [vmem:[%s11038_s28 + $0xc8] sm:$0xff] }
 0xb3b   :  { %5772 = vmatprep.subr.mxu0 %v8988_v11  ;;  %5843 = vmatprep.subr.mxu1 %v8989_v12  ;;  %v9015_v11 = vld [vmem:[%s11038_s28 + $0x2c8] sm:$0xff]  ;;  %v9016_v12 = vld [vmem:[%s11038_s28 + $0xc0] sm:$0xff] }
 0xb3c   :  { %5773 = vmatpush2.msra.mxu0 %v8990_v5  ;;  %5844 = vmatpush2.msra.mxu1 %v8991_v13  ;;  %v9017_v5 = vld [vmem:[%s11038_s28 + $0x2c0] sm:$0xff]  ;;  %v9018_v13 = vld [vmem:[%s11038_s28 + $0xb8] sm:$0xff] }
 0xb3d   :  { %5774 = vmatprep.subr.mxu0 %v8992_v7  ;;  %5845 = vmatprep.subr.mxu1 %v8993_v16  ;;  %v9019_v7 = vld [vmem:[%s11038_s28 + $0x2b8] sm:$0xff]  ;;  %v9020_v16 = vld [vmem:[%s11038_s28 + $0xb0] sm:$0xff] }
 0xb3e   :  { %5775 = vmatpush2.msra.mxu0 %v8994_v19  ;;  %5846 = vmatpush2.msra.mxu1 %v8995_v21  ;;  %v9021_v19 = vld [vmem:[%s11038_s28 + $0x2b0] sm:$0xff]  ;;  %v9022_v21 = vld [vmem:[%s11038_s28 + $0xa8] sm:$0xff] }
 0xb3f   :  { %5776 = vmatprep.subr.mxu0 %v8996_v25  ;;  %5847 = vmatprep.subr.mxu1 %v8997_v26  ;;  %v9024_v25 = vld [vmem:[%s11038_s28 + $0xa0] sm:$0xff] }
 0xb40   :  { %5777 = vmatpush2.msra.mxu0 %v8998_v57  ;;  %5848 = vmatpush2.msra.mxu1 %v8999_v29  ;;  %v9025_v26 = vld [vmem:[%s11038_s28 + $0x2a0] sm:$0xff]  ;;  %v9026_v57 = vld [vmem:[%s11038_s28 + $0x98] sm:$0xff] }
 0xb41   :  { %7871 = vmatmul.mubr.msk.f32.vlgmr.msra.gmra.mxu0 %vm2154_vm4, %v5424_v23  ;;  %7873 = vmatmul.mubr.msk.f32.vlgmr.msra.gmra.mxu1 %vm2154_vm4, %v5424_v23  ;;  %v9023_v23 = vld [vmem:[%s11038_s28 + $0x2a8] sm:$0xff]  ;;  %v9027_v29 = vld [vmem:[%s11038_s28 + $0x298] sm:$0xff] }
 0xb42   :  { %5932 = vmatprep.mubr.f32.mxu0 %v10010_v0  ;;  %6003 = vmatprep.mubr.f32.mxu1 %v10010_v0 }
 0xb7e   :  { %v5496_v32 = vpop.f32.mrf.mxu0  ;;  %v5567_v33 = vpop.f32.mrf.mxu1 }
 0xb80   :  { %v5498_v35 = vpop.f32.mrf.mxu0  ;;  %v5569_v18 = vpop.f32.mrf.mxu1 }
 0xbbf   :  { %v5638_v15 = vpop.f32.mrf.mxu0  ;;  %v5709_v50 = vpop.f32.mrf.mxu1 }
 0xbc0   :  { %v5639_v39 = vadd.f32 %v5638_v15, %v5496_v32  ;;  %v5710_v40 = vadd.f32 %v5709_v50, %v5567_v33  ;;  %v9028_v32 = vld [vmem:[%s11038_s28 + $0x90] sm:$0xff]  ;;  %v9032_v15 = vld [vmem:[%s11038_s28 + $0x80] sm:$0xff] }
 0xbc1   :  { %v5640_v27 = vpop.f32.mrf.mxu0  ;;  %v5711_v38 = vpop.f32.mrf.mxu1  ;;  %v9029_v33 = vld [vmem:[%s11038_s28 + $0x290] sm:$0xff]  ;;  %v9033_v50 = vld [vmem:[%s11038_s28 + $0x280] sm:$0xff] }
 0xbc2   :  { %v5641_v51 = vadd.f32 %v5640_v27, %v5498_v35  ;;  %v5712_v45 = vadd.f32 %v5711_v38, %v5569_v18  ;;  %v9030_v35 = vld [vmem:[%s11038_s28 + $0x88] sm:$0xff]  ;;  %v9034_v27 = vld [vmem:[%s11038_s28 + $0x78] sm:$0xff] }
 0xbc3   :  { %v9031_v18 = vld [vmem:[%s11038_s28 + $0x288] sm:$0xff]  ;;  %v9035_v38 = vld [vmem:[%s11038_s28 + $0x278] sm:$0xff] }
 0xc01   :  { %v5780_v36 = vpop.f32.mrf.mxu0  ;;  %v5851_v44 = vpop.f32.mrf.mxu1 }
 0xc02   :  { %v5856_v63 = vadd.f32 %v5780_v36, %v5639_v39  ;;  %v5858_v47 = vadd.f32 %v5851_v44, %v5710_v40  ;;  %v9036_v39 = vld [vmem:[%s11038_s28 + $0x70] sm:$0xff]  ;;  %v9038_v36 = vld [vmem:[%s11038_s28 + $0x68] sm:$0xff] }
 0xc03   :  { %v5782_v49 = vpop.f32.mrf.mxu0  ;;  %v5853_v10 = vpop.f32.mrf.mxu1  ;;  %v9037_v40 = vld [vmem:[%s11038_s28 + $0x270] sm:$0xff]  ;;  %v9039_v44 = vld [vmem:[%s11038_s28 + $0x268] sm:$0xff] }
 0xc04   :  { %v5857_v52 = vadd.f32 %v5782_v49, %v5641_v51  ;;  %v5859_v22 = vadd.f32 %v5853_v10, %v5712_v45  ;;  %v5860_v2 = vadd.f32 %v5856_v63, %v10484_v42  ;;  %v5862_v53 = vadd.f32 %v5858_v47, %v10493_v48  ;;  %v9001_v42 = vld [vmem:[#allocation29] sm:$0xf]  ;;  %v9004_v48 = vld [vmem:[%s11038_s28 + $0xf0] sm:$0xff]  ;;  %v9042_v63 = vld [vmem:[%s11038_s28 + $0x58] sm:$0xff] }
 0xc05   :  { %v9040_v51 = vld [vmem:[%s11038_s28 + $0x60] sm:$0xff]  ;;  %v9043_v47 = vld [vmem:[%s11038_s28 + $0x258] sm:$0xff]  ;;  %v9044_v49 = vld [vmem:[%s11038_s28 + $0x50] sm:$0xff] }
 0xc06   :  { %v5861_v55 = vadd.f32 %v5857_v52, %v10487_v43  ;;  %v5863_v56 = vadd.f32 %v5859_v22, %v10490_v46  ;;  %v5864_v59 = vmax.f32 %v5860_v2, 0.0  ;;  %v5866_v37 = vmax.f32 %v5862_v53, 0.0  ;;  %v9002_v43 = vld [vmem:[%s11038_s28 + $0xf8] sm:$0xff]  ;;  %v9041_v45 = vld [vmem:[%s11038_s28 + $0x260] sm:$0xff]  ;;  %v9045_v10 = vld [vmem:[%s11038_s28 + $0x250] sm:$0xff] }
 0xc07   :  { %v9003_v46 = vld [vmem:[%s11038_s28 + $0x2f8] sm:$0xff]  ;;  %v9046_v52 = vld [vmem:[%s11038_s28 + $0x48] sm:$0xff]  ;;  %v9048_v2 = vld [vmem:[%s11038_s28 + $0x40] sm:$0xff] }
 0xc08   :  { %v5865_v62 = vmax.f32 %v5861_v55, 0.0  ;;  %v5867_v54 = vmax.f32 %v5863_v56, 0.0  ;;  %v9047_v22 = vld [vmem:[%s11038_s28 + $0x248] sm:$0xff]  ;;  %v9049_v53 = vld [vmem:[%s11038_s28 + $0x240] sm:$0xff]  ;;  %v9050_v55 = vld [vmem:[%s11038_s28 + $0x38] sm:$0xff] }
 0xc09   :  { %v9051_v56 = vld [vmem:[%s11038_s28 + $0x238] sm:$0xff] }
 0xc0a   :  { %5898 = vmatprep.subr.mxu0 %v5865_v62  ;;  %5969 = vmatprep.subr.mxu1 %v5867_v54 }
 0xc0b   :  { %5899 = vmatpush1.msra.mxu0 %v5864_v59  ;;  %5970 = vmatpush1.msra.mxu1 %v5866_v37 }
 0xc0c   :  { %7874 = vmatmul.mubr.msk.f32.vlgmr.msra.gmra.mxu0 %vm3735_vm6, %v9000_v34  ;;  %7875 = vmatmul.mubr.msk.f32.vlgmr.msra.gmra.mxu1 %vm3735_vm6, %v9000_v34  ;;  %v9056_v34 = vld [vmem:[%s11038_s28 + $0x20] sm:$0xff] }
 0xc0d   :  { %6040 = vmatprep.subr.mxu0 %v5865_v62  ;;  %6111 = vmatprep.subr.mxu1 %v5867_v54  ;;  %v9052_v62 = vld [vmem:[%s11038_s28 + $0x30] sm:$0xff] }
 0xc0e   :  { %6041 = vmatpush1.msra.mxu0 %v5864_v59  ;;  %6112 = vmatpush1.msra.mxu1 %v5866_v37  ;;  %v9053_v54 = vld [vmem:[%s11038_s28 + $0x230] sm:$0xff]  ;;  %v9054_v59 = vld [vmem:[%s11038_s28 + $0x28] sm:$0xff] }
 0xc0f   :  { %6074 = vmatprep.mubr.f32.mxu0 %v10010_v0  ;;  %6145 = vmatprep.mubr.f32.mxu1 %v10010_v0  ;;  %v9055_v37 = vld [vmem:[%s11038_s28 + $0x228] sm:$0xff] }
 0xc10   :  { %7876 = vmatmul.mubr.msk.f32.vlgmr.msra.gmra.mxu0 %vm3735_vm6, %v9001_v42  ;;  %7877 = vmatmul.mubr.msk.f32.vlgmr.msra.gmra.mxu1 %vm3735_vm6, %v9001_v42  ;;  %v9057_v42 = vld [vmem:[%s11038_s28 + $0x220] sm:$0xff] }
 0xc11   :  { %6156 = vmatprep.subr.mxu0 %v9002_v43  ;;  %6227 = vmatprep.subr.mxu1 %v9003_v46  ;;  %v9058_v43 = vld [vmem:[%s11038_s28 + $0x18] sm:$0xff] }
 0xc12   :  { %6157 = vmatpush1.msra.mxu0 %v9004_v48  ;;  %6228 = vmatpush1.msra.mxu1 %v9005_v61  ;;  %v9059_v46 = vld [vmem:[%s11038_s28 + $0x218] sm:$0xff]  ;;  %v9060_v48 = vld [vmem:[%s11038_s28 + $0x10] sm:$0xff] }
 0xc13   :  { %6158 = vmatprep.subr.mxu0 %v9006_v1  ;;  %6229 = vmatprep.subr.mxu1 %v9007_v20  ;;  %v9061_v61 = vld [vmem:[%s11038_s28 + $0x210] sm:$0xff]  ;;  %v9062_v1 = vld [vmem:[%s11038_s28 + $0x8] sm:$0xff] }
 0xc14   :  { %6159 = vmatpush1.msra.mxu0 %v9008_v14  ;;  %6230 = vmatpush1.msra.mxu1 %v9009_v17  ;;  %v9063_v20 = vld [vmem:[%s11038_s28 + $0x208] sm:$0xff]  ;;  %v9064_v14 = vld [vmem:[%s11038_s28] sm:$0xff] }
 0xc15   :  { %6160 = vmatprep.subr.mxu0 %v9010_v3  ;;  %6231 = vmatprep.subr.mxu1 %v9011_v4  ;;  %v9065_v17 = vld [vmem:[%s11038_s28 + $0x200] sm:$0xff]  ;;  %v9066_v3 = vld [vmem:[%s11038_s28 + $0x1f8] sm:$0xff] }
 0xc16   :  { %6161 = vmatpush1.msra.mxu0 %v9012_v41  ;;  %6232 = vmatpush1.msra.mxu1 %v9013_v6  ;;  %v9067_v4 = vld [vmem:[%s11038_s28 + $0x3f8] sm:$0xff]  ;;  %v9068_v41 = vld [vmem:[%s11038_s28 + $0x1f0] sm:$0xff] }
 0xc17   :  { %6162 = vmatprep.subr.mxu0 %v9014_v9  ;;  %6233 = vmatprep.subr.mxu1 %v9015_v11  ;;  %v9069_v6 = vld [vmem:[%s11038_s28 + $0x3f0] sm:$0xff]  ;;  %v9070_v9 = vld [vmem:[%s11038_s28 + $0x1e8] sm:$0xff] }
 0xc18   :  { %6163 = vmatpush1.msra.mxu0 %v9016_v12  ;;  %6234 = vmatpush1.msra.mxu1 %v9017_v5  ;;  %v9071_v11 = vld [vmem:[%s11038_s28 + $0x3e8] sm:$0xff]  ;;  %v9072_v12 = vld [vmem:[%s11038_s28 + $0x1e0] sm:$0xff] }
 0xc19   :  { %6164 = vmatprep.subr.mxu0 %v9018_v13  ;;  %6235 = vmatprep.subr.mxu1 %v9019_v7  ;;  %v9073_v5 = vld [vmem:[%s11038_s28 + $0x3e0] sm:$0xff]  ;;  %v9074_v13 = vld [vmem:[%s11038_s28 + $0x1d8] sm:$0xff] }
 0xc1a   :  { %6165 = vmatpush1.msra.mxu0 %v9020_v16  ;;  %6236 = vmatpush1.msra.mxu1 %v9021_v19  ;;  %v9075_v7 = vld [vmem:[%s11038_s28 + $0x3d8] sm:$0xff]  ;;  %v9076_v16 = vld [vmem:[%s11038_s28 + $0x1d0] sm:$0xff] }
 0xc1b   :  { %6166 = vmatprep.subr.mxu0 %v9022_v21  ;;  %6237 = vmatprep.subr.mxu1 %v9023_v23  ;;  %v9077_v19 = vld [vmem:[%s11038_s28 + $0x3d0] sm:$0xff]  ;;  %v9078_v21 = vld [vmem:[%s11038_s28 + $0x1c8] sm:$0xff] }
 0xc1c   :  { %6167 = vmatpush1.msra.mxu0 %v9024_v25  ;;  %6238 = vmatpush1.msra.mxu1 %v9025_v26  ;;  %v9079_v23 = vld [vmem:[%s11038_s28 + $0x3c8] sm:$0xff]  ;;  %v9080_v25 = vld [vmem:[%s11038_s28 + $0x1c0] sm:$0xff] }
 0xc1d   :  { %6168 = vmatprep.subr.mxu0 %v9026_v57  ;;  %6239 = vmatprep.subr.mxu1 %v9027_v29  ;;  %v9081_v26 = vld [vmem:[%s11038_s28 + $0x3c0] sm:$0xff]  ;;  %v9082_v57 = vld [vmem:[%s11038_s28 + $0x1b8] sm:$0xff] }
 0xc1e   :  { %6169 = vmatpush1.msra.mxu0 %v9028_v32  ;;  %6240 = vmatpush1.msra.mxu1 %v9029_v33  ;;  %v9083_v29 = vld [vmem:[%s11038_s28 + $0x3b8] sm:$0xff]  ;;  %v9084_v32 = vld [vmem:[%s11038_s28 + $0x1b0] sm:$0xff] }
 0xc1f   :  { %6170 = vmatprep.subr.mxu0 %v9030_v35  ;;  %6241 = vmatprep.subr.mxu1 %v9031_v18  ;;  %v9085_v33 = vld [vmem:[%s11038_s28 + $0x3b0] sm:$0xff]  ;;  %v9086_v35 = vld [vmem:[%s11038_s28 + $0x1a8] sm:$0xff] }
 0xc20   :  { %6171 = vmatpush1.msra.mxu0 %v9032_v15  ;;  %6242 = vmatpush1.msra.mxu1 %v9033_v50  ;;  %v9087_v18 = vld [vmem:[%s11038_s28 + $0x3a8] sm:$0xff]  ;;  %v9088_v15 = vld [vmem:[%s11038_s28 + $0x1a0] sm:$0xff] }
 0xc21   :  { %6172 = vmatprep.subr.mxu0 %v9034_v27  ;;  %6243 = vmatprep.subr.mxu1 %v9035_v38  ;;  %v9089_v50 = vld [vmem:[%s11038_s28 + $0x3a0] sm:$0xff]  ;;  %v9090_v27 = vld [vmem:[%s11038_s28 + $0x198] sm:$0xff] }
 0xc22   :  { %6173 = vmatpush1.msra.mxu0 %v9036_v39  ;;  %6244 = vmatpush1.msra.mxu1 %v9037_v40  ;;  %v9091_v38 = vld [vmem:[%s11038_s28 + $0x398] sm:$0xff]  ;;  %v9092_v39 = vld [vmem:[%s11038_s28 + $0x190] sm:$0xff] }
 0xc23   :  { %6174 = vmatprep.subr.mxu0 %v9038_v36  ;;  %6245 = vmatprep.subr.mxu1 %v9039_v44  ;;  %v9093_v40 = vld [vmem:[%s11038_s28 + $0x390] sm:$0xff]  ;;  %v9094_v36 = vld [vmem:[%s11038_s28 + $0x188] sm:$0xff] }
 0xc24   :  { %6175 = vmatpush1.msra.mxu0 %v9040_v51  ;;  %6246 = vmatpush1.msra.mxu1 %v9041_v45  ;;  %v9095_v44 = vld [vmem:[%s11038_s28 + $0x388] sm:$0xff]  ;;  %v9096_v51 = vld [vmem:[%s11038_s28 + $0x180] sm:$0xff] }
 0xc25   :  { %6176 = vmatprep.subr.mxu0 %v9042_v63  ;;  %6247 = vmatprep.subr.mxu1 %v9043_v47  ;;  %v9097_v45 = vld [vmem:[%s11038_s28 + $0x380] sm:$0xff]  ;;  %v9098_v63 = vld [vmem:[%s11038_s28 + $0x178] sm:$0xff] }
 0xc26   :  { %6177 = vmatpush1.msra.mxu0 %v9044_v49  ;;  %6248 = vmatpush1.msra.mxu1 %v9045_v10  ;;  %v9099_v47 = vld [vmem:[%s11038_s28 + $0x378] sm:$0xff]  ;;  %v9100_v49 = vld [vmem:[%s11038_s28 + $0x170] sm:$0xff] }
 0xc27   :  { %6178 = vmatprep.subr.mxu0 %v9046_v52  ;;  %6249 = vmatprep.subr.mxu1 %v9047_v22  ;;  %v9101_v10 = vld [vmem:[%s11038_s28 + $0x370] sm:$0xff]  ;;  %v9102_v52 = vld [vmem:[%s11038_s28 + $0x168] sm:$0xff] }
 0xc28   :  { %6179 = vmatpush1.msra.mxu0 %v9048_v2  ;;  %6250 = vmatpush1.msra.mxu1 %v9049_v53  ;;  %v9103_v22 = vld [vmem:[%s11038_s28 + $0x368] sm:$0xff]  ;;  %v9104_v2 = vld [vmem:[%s11038_s28 + $0x160] sm:$0xff] }
 0xc29   :  { %6180 = vmatprep.subr.mxu0 %v9050_v55  ;;  %6251 = vmatprep.subr.mxu1 %v9051_v56  ;;  %v9105_v53 = vld [vmem:[%s11038_s28 + $0x360] sm:$0xff]  ;;  %v9106_v55 = vld [vmem:[%s11038_s28 + $0x158] sm:$0xff] }
 0xc2a   :  { %6181 = vmatpush1.msra.mxu0 %v9052_v62  ;;  %6252 = vmatpush1.msra.mxu1 %v9053_v54  ;;  %v9107_v56 = vld [vmem:[%s11038_s28 + $0x358] sm:$0xff]  ;;  %v9108_v62 = vld [vmem:[%s11038_s28 + $0x150] sm:$0xff] }
 0xc2b   :  { %6182 = vmatprep.subr.mxu0 %v9054_v59  ;;  %6253 = vmatprep.subr.mxu1 %v9055_v37  ;;  %v9109_v54 = vld [vmem:[%s11038_s28 + $0x350] sm:$0xff]  ;;  %v9110_v59 = vld [vmem:[%s11038_s28 + $0x148] sm:$0xff] }
 0xc2c   :  { %6183 = vmatpush1.msra.mxu0 %v9056_v34  ;;  %6254 = vmatpush1.msra.mxu1 %v9057_v42  ;;  %v9111_v37 = vld [vmem:[%s11038_s28 + $0x348] sm:$0xff]  ;;  %v9112_v34 = vld [vmem:[%s11038_s28 + $0x140] sm:$0xff] }
 0xc2d   :  { %6184 = vmatprep.subr.mxu0 %v9058_v43  ;;  %6255 = vmatprep.subr.mxu1 %v9059_v46  ;;  %v9113_v42 = vld [vmem:[%s11038_s28 + $0x340] sm:$0xff]  ;;  %v9114_v43 = vld [vmem:[%s11038_s28 + $0x138] sm:$0xff] }
 0xc2e   :  { %6185 = vmatpush1.msra.mxu0 %v9060_v48  ;;  %6256 = vmatpush1.msra.mxu1 %v9061_v61  ;;  %v9115_v46 = vld [vmem:[%s11038_s28 + $0x338] sm:$0xff]  ;;  %v9116_v48 = vld [vmem:[%s11038_s28 + $0x130] sm:$0xff] }
 0xc2f   :  { %6186 = vmatprep.subr.mxu0 %v9062_v1  ;;  %6257 = vmatprep.subr.mxu1 %v9063_v20  ;;  %v9117_v61 = vld [vmem:[%s11038_s28 + $0x330] sm:$0xff]  ;;  %v9118_v1 = vld [vmem:[%s11038_s28 + $0x128] sm:$0xff] }
 0xc30   :  { %6187 = vmatpush1.msra.mxu0 %v9064_v14  ;;  %6258 = vmatpush1.msra.mxu1 %v9065_v17  ;;  %v9119_v20 = vld [vmem:[%s11038_s28 + $0x328] sm:$0xff]  ;;  %v9120_v14 = vld [vmem:[%s11038_s28 + $0x120] sm:$0xff] }
 0xc31   :  { %6188 = vmatprep.subr.mxu0 %v9066_v3  ;;  %6259 = vmatprep.subr.mxu1 %v9067_v4  ;;  %v9121_v17 = vld [vmem:[%s11038_s28 + $0x320] sm:$0xff]  ;;  %v9122_v3 = vld [vmem:[%s11038_s28 + $0x118] sm:$0xff] }
 0xc32   :  { %6189 = vmatpush2.msra.mxu0 %v9068_v41  ;;  %6260 = vmatpush2.msra.mxu1 %v9069_v6  ;;  %v9123_v4 = vld [vmem:[%s11038_s28 + $0x318] sm:$0xff]  ;;  %v9124_v41 = vld [vmem:[%s11038_s28 + $0x110] sm:$0xff] }
 0xc33   :  { %6190 = vmatprep.subr.mxu0 %v9070_v9  ;;  %6261 = vmatprep.subr.mxu1 %v9071_v11  ;;  %v9125_v6 = vld [vmem:[%s11038_s28 + $0x310] sm:$0xff]  ;;  %v9126_v9 = vld [vmem:[%s11038_s28 + $0x108] sm:$0xff] }
 0xc34   :  { %6191 = vmatpush2.msra.mxu0 %v9072_v12  ;;  %6262 = vmatpush2.msra.mxu1 %v9073_v5  ;;  %v9127_v11 = vld [vmem:[%s11038_s28 + $0x308] sm:$0xff]  ;;  %v9128_v12 = vld [vmem:[%s11038_s28 + $0x100] sm:$0xff] }
 0xc35   :  { %6192 = vmatprep.subr.mxu0 %v9074_v13  ;;  %6263 = vmatprep.subr.mxu1 %v9075_v7  ;;  %v9129_v5 = vld [vmem:[%s11038_s28 + $0x300] sm:$0xff] }
 0xc36   :  { %6193 = vmatpush2.msra.mxu0 %v9076_v16  ;;  %6264 = vmatpush2.msra.mxu1 %v9077_v19  ;;  %v9130_v13 = vld [vmem:[#allocation31 + $0xf8] sm:$0xff] }
 0xc37   :  { %6194 = vmatprep.subr.mxu0 %v9078_v21  ;;  %6265 = vmatprep.subr.mxu1 %v9079_v23  ;;  %v9131_v7 = vld [vmem:[#allocation31 + $0x2f8] sm:$0xff] }
 0xc38   :  { %6195 = vmatpush2.msra.mxu0 %v9080_v25  ;;  %6266 = vmatpush2.msra.mxu1 %v9081_v26 }
 0xc39   :  { %6196 = vmatprep.subr.mxu0 %v9082_v57  ;;  %6267 = vmatprep.subr.mxu1 %v9083_v29 }
 0xc3a   :  { %6197 = vmatpush2.msra.mxu0 %v9084_v32  ;;  %6268 = vmatpush2.msra.mxu1 %v9085_v33 }
 0xc3b   :  { %6198 = vmatprep.subr.mxu0 %v9086_v35  ;;  %6269 = vmatprep.subr.mxu1 %v9087_v18 }
 0xc3c   :  { %6199 = vmatpush2.msra.mxu0 %v9088_v15  ;;  %6270 = vmatpush2.msra.mxu1 %v9089_v50  ;;  %v9132_v15 = vld [vmem:[#allocation31 + $0xf0] sm:$0xff] }
 0xc3d   :  { %6200 = vmatprep.subr.mxu0 %v9090_v27  ;;  %6271 = vmatprep.subr.mxu1 %v9091_v38  ;;  %v9133_v50 = vld [vmem:[#allocation31 + $0x2f0] sm:$0xff]  ;;  %v9134_v27 = vld [vmem:[#allocation31 + $0xe8] sm:$0xff] }
 0xc3e   :  { %6201 = vmatpush2.msra.mxu0 %v9092_v39  ;;  %6272 = vmatpush2.msra.mxu1 %v9093_v40  ;;  %v9135_v38 = vld [vmem:[#allocation31 + $0x2e8] sm:$0xff]  ;;  %v9136_v39 = vld [vmem:[#allocation31 + $0xe0] sm:$0xff] }
 0xc3f   :  { %6202 = vmatprep.subr.mxu0 %v9094_v36  ;;  %6273 = vmatprep.subr.mxu1 %v9095_v44  ;;  %v9137_v40 = vld [vmem:[#allocation31 + $0x2e0] sm:$0xff]  ;;  %v9138_v36 = vld [vmem:[#allocation31 + $0xd8] sm:$0xff] }
 0xc40   :  { %6203 = vmatpush2.msra.mxu0 %v9096_v51  ;;  %6274 = vmatpush2.msra.mxu1 %v9097_v45  ;;  %v9139_v44 = vld [vmem:[#allocation31 + $0x2d8] sm:$0xff]  ;;  %v9140_v51 = vld [vmem:[#allocation31 + $0xd0] sm:$0xff] }
 0xc41   :  { %6204 = vmatprep.subr.mxu0 %v9098_v63  ;;  %6275 = vmatprep.subr.mxu1 %v9099_v47  ;;  %v9141_v45 = vld [vmem:[#allocation31 + $0x2d0] sm:$0xff]  ;;  %v9142_v63 = vld [vmem:[#allocation31 + $0xc8] sm:$0xff] }
 0xc42   :  { %6205 = vmatpush2.msra.mxu0 %v9100_v49  ;;  %6276 = vmatpush2.msra.mxu1 %v9101_v10  ;;  %v9143_v47 = vld [vmem:[#allocation31 + $0x2c8] sm:$0xff]  ;;  %v9144_v49 = vld [vmem:[#allocation31 + $0xc0] sm:$0xff] }
 0xc43   :  { %6206 = vmatprep.subr.mxu0 %v9102_v52  ;;  %6277 = vmatprep.subr.mxu1 %v9103_v22  ;;  %v9145_v10 = vld [vmem:[#allocation31 + $0x2c0] sm:$0xff]  ;;  %v9146_v52 = vld [vmem:[#allocation31 + $0xb8] sm:$0xff] }
 0xc44   :  { %6207 = vmatpush2.msra.mxu0 %v9104_v2  ;;  %6278 = vmatpush2.msra.mxu1 %v9105_v53  ;;  %v9147_v22 = vld [vmem:[#allocation31 + $0x2b8] sm:$0xff]  ;;  %v9148_v2 = vld [vmem:[#allocation31 + $0xb0] sm:$0xff] }
 0xc45   :  { %6208 = vmatprep.subr.mxu0 %v9106_v55  ;;  %6279 = vmatprep.subr.mxu1 %v9107_v56  ;;  %v9149_v53 = vld [vmem:[#allocation31 + $0x2b0] sm:$0xff]  ;;  %v9150_v55 = vld [vmem:[#allocation31 + $0xa8] sm:$0xff] }
 0xc46   :  { %6209 = vmatpush2.msra.mxu0 %v9108_v62  ;;  %6280 = vmatpush2.msra.mxu1 %v9109_v54  ;;  %v9151_v56 = vld [vmem:[#allocation31 + $0x2a8] sm:$0xff]  ;;  %v9152_v62 = vld [vmem:[#allocation31 + $0xa0] sm:$0xff] }
 0xc47   :  { %6210 = vmatprep.subr.mxu0 %v9110_v59  ;;  %6281 = vmatprep.subr.mxu1 %v9111_v37  ;;  %v9153_v54 = vld [vmem:[#allocation31 + $0x2a0] sm:$0xff]  ;;  %v9154_v59 = vld [vmem:[#allocation31 + $0x98] sm:$0xff] }
 0xc48   :  { %6211 = vmatpush2.msra.mxu0 %v9112_v34  ;;  %6282 = vmatpush2.msra.mxu1 %v9113_v42  ;;  %v9155_v37 = vld [vmem:[#allocation31 + $0x298] sm:$0xff]  ;;  %v9156_v34 = vld [vmem:[#allocation31 + $0x90] sm:$0xff] }
 0xc49   :  { %6212 = vmatprep.subr.mxu0 %v9114_v43  ;;  %6283 = vmatprep.subr.mxu1 %v9115_v46  ;;  %v9157_v42 = vld [vmem:[#allocation31 + $0x290] sm:$0xff]  ;;  %v9158_v43 = vld [vmem:[#allocation31 + $0x88] sm:$0xff] }
 0xc4a   :  { %6213 = vmatpush2.msra.mxu0 %v9116_v48  ;;  %6284 = vmatpush2.msra.mxu1 %v9117_v61  ;;  %v9159_v46 = vld [vmem:[#allocation31 + $0x288] sm:$0xff]  ;;  %v9160_v48 = vld [vmem:[#allocation31 + $0x80] sm:$0xff] }
 0xc4b   :  { %6214 = vmatprep.subr.mxu0 %v9118_v1  ;;  %6285 = vmatprep.subr.mxu1 %v9119_v20  ;;  %v9161_v61 = vld [vmem:[#allocation31 + $0x280] sm:$0xff]  ;;  %v9162_v1 = vld [vmem:[#allocation31 + $0x78] sm:$0xff] }
 0xc4c   :  { %6215 = vmatpush2.msra.mxu0 %v9120_v14  ;;  %6286 = vmatpush2.msra.mxu1 %v9121_v17  ;;  %v9163_v20 = vld [vmem:[#allocation31 + $0x278] sm:$0xff]  ;;  %v9164_v14 = vld [vmem:[#allocation31 + $0x70] sm:$0xff] }
 0xc4d   :  { %6216 = vmatprep.subr.mxu0 %v9122_v3  ;;  %6287 = vmatprep.subr.mxu1 %v9123_v4  ;;  %v9165_v17 = vld [vmem:[#allocation31 + $0x270] sm:$0xff]  ;;  %v9166_v3 = vld [vmem:[#allocation31 + $0x68] sm:$0xff] }
 0xc4e   :  { %6217 = vmatpush2.msra.mxu0 %v9124_v41  ;;  %6288 = vmatpush2.msra.mxu1 %v9125_v6  ;;  %v9167_v4 = vld [vmem:[#allocation31 + $0x268] sm:$0xff]  ;;  %v9168_v41 = vld [vmem:[#allocation31 + $0x60] sm:$0xff] }
 0xc4f   :  { %6218 = vmatprep.subr.mxu0 %v9126_v9  ;;  %6289 = vmatprep.subr.mxu1 %v9127_v11  ;;  %v9169_v6 = vld [vmem:[#allocation31 + $0x260] sm:$0xff]  ;;  %v9170_v9 = vld [vmem:[#allocation31 + $0x58] sm:$0xff] }
 0xc50   :  { %6219 = vmatpush2.msra.mxu0 %v9128_v12  ;;  %6290 = vmatpush2.msra.mxu1 %v9129_v5  ;;  %v9171_v11 = vld [vmem:[#allocation31 + $0x258] sm:$0xff]  ;;  %v9172_v12 = vld [vmem:[#allocation31 + $0x50] sm:$0xff] }
 0xc51   :  { %6298 = vmatprep.subr.mxu0 %v9130_v13  ;;  %6369 = vmatprep.subr.mxu1 %v9131_v7  ;;  %v9173_v5 = vld [vmem:[#allocation31 + $0x250] sm:$0xff]  ;;  %v9174_v13 = vld [vmem:[#allocation31 + $0x48] sm:$0xff] }
 0xc52   :  { %v9175_v7 = vld [vmem:[#allocation31 + $0x248] sm:$0xff] }
 0xccc   :  { %v5934_v16 = vpop.f32.mrf.mxu0  ;;  %v6005_v19 = vpop.f32.mrf.mxu1 }
 0xcce   :  { %v5936_v21 = vpop.f32.mrf.mxu0  ;;  %v6007_v23 = vpop.f32.mrf.mxu1 }
 0xcd0   :  { %v6076_v25 = vpop.f32.mrf.mxu0  ;;  %v6147_v26 = vpop.f32.mrf.mxu1 }
 0xcd1   :  { %v10875_v35 = vmax.f32 %v5934_v16, %v6076_v25  ;;  %v10877_v18 = vmax.f32 %v6005_v19, %v6147_v26  ;;  %v9176_v16 = vld [vmem:[#allocation31 + $0x40] sm:$0xff]  ;;  %v9180_v25 = vld [vmem:[#allocation31 + $0x30] sm:$0xff] }
 0xcd2   :  { %v6078_v57 = vpop.f32.mrf.mxu0  ;;  %v6149_v29 = vpop.f32.mrf.mxu1  ;;  %v9177_v19 = vld [vmem:[#allocation31 + $0x240] sm:$0xff]  ;;  %v9181_v26 = vld [vmem:[#allocation31 + $0x230] sm:$0xff] }
 0xcd3   :  { %v6153_v32 = vmax.f32 %v5936_v21, %v6078_v57  ;;  %v6155_v33 = vmax.f32 %v6007_v23, %v6149_v29  ;;  %v9178_v21 = vld [vmem:[#allocation31 + $0x38] sm:$0xff]  ;;  %v9182_v57 = vld [vmem:[#allocation31 + $0x28] sm:$0xff] }
 0xcd4   :  { %v9179_v23 = vld [vmem:[#allocation31 + $0x238] sm:$0xff]  ;;  %v9183_v29 = vld [vmem:[#allocation31 + $0x228] sm:$0xff] }
 0xcd5   :  { %6220 = vmatprep.mubr.f32.mxu0 %v6153_v32  ;;  %6291 = vmatprep.mubr.f32.mxu1 %v6155_v33 }
 0xcd6   :  { %6221 = vmatmul.mubr.f32.vlgmr.msra.gmra.mxu0 %v10875_v35  ;;  %6292 = vmatmul.mubr.f32.vlgmr.msra.gmra.mxu1 %v10877_v18 }
 0xcd7   :  { %6299 = vmatpush1.msra.mxu0 %v9132_v15  ;;  %6370 = vmatpush1.msra.mxu1 %v9133_v50  ;;  %v9186_v15 = vld [vmem:[#allocation31 + $0x18] sm:$0xff] }
 0xcd8   :  { %6300 = vmatprep.subr.mxu0 %v9134_v27  ;;  %6362 = vmatprep.mubr.f32.mxu0 %v6153_v32  ;;  %v9184_v32 = vld [vmem:[#allocation31 + $0x20] sm:$0xff]  ;;  %v9187_v50 = vld [vmem:[#allocation31 + $0x218] sm:$0xff]  ;;  %v9188_v27 = vld [vmem:[#allocation31 + $0x10] sm:$0xff] }
 0xcd9   :  { %6371 = vmatprep.subr.mxu1 %v9135_v38  ;;  %6433 = vmatprep.mubr.f32.mxu1 %v6155_v33  ;;  %v9185_v33 = vld [vmem:[#allocation31 + $0x220] sm:$0xff]  ;;  %v9189_v38 = vld [vmem:[#allocation31 + $0x210] sm:$0xff] }
 0xcda   :  { %6301 = vmatpush1.msra.mxu0 %v9136_v39  ;;  %6372 = vmatpush1.msra.mxu1 %v9137_v40  ;;  %v9190_v39 = vld [vmem:[#allocation31 + $0x8] sm:$0xff] }
 0xcdb   :  { %6302 = vmatprep.subr.mxu0 %v9138_v36  ;;  %6373 = vmatprep.subr.mxu1 %v9139_v44  ;;  %v9191_v40 = vld [vmem:[#allocation31 + $0x208] sm:$0xff]  ;;  %v9192_v36 = vld [vmem:[#allocation31] sm:$0xff] }
 0xcdc   :  { %6303 = vmatpush1.msra.mxu0 %v9140_v51  ;;  %6374 = vmatpush1.msra.mxu1 %v9141_v45  ;;  %v9193_v44 = vld [vmem:[#allocation31 + $0x200] sm:$0xff]  ;;  %v9194_v51 = vld [vmem:[#allocation31 + $0x1f8] sm:$0xff] }
 0xcdd   :  { %6304 = vmatprep.subr.mxu0 %v9142_v63  ;;  %6375 = vmatprep.subr.mxu1 %v9143_v47  ;;  %v9195_v45 = vld [vmem:[#allocation31 + $0x3f8] sm:$0xff]  ;;  %v9196_v63 = vld [vmem:[#allocation31 + $0x1f0] sm:$0xff] }
 0xcde   :  { %6305 = vmatpush1.msra.mxu0 %v9144_v49  ;;  %6376 = vmatpush1.msra.mxu1 %v9145_v10  ;;  %v9197_v47 = vld [vmem:[#allocation31 + $0x3f0] sm:$0xff]  ;;  %v9198_v49 = vld [vmem:[#allocation31 + $0x1e8] sm:$0xff] }
 0xcdf   :  { %6306 = vmatprep.subr.mxu0 %v9146_v52  ;;  %6377 = vmatprep.subr.mxu1 %v9147_v22  ;;  %v9199_v10 = vld [vmem:[#allocation31 + $0x3e8] sm:$0xff]  ;;  %v9200_v52 = vld [vmem:[#allocation31 + $0x1e0] sm:$0xff] }
 0xce0   :  { %6307 = vmatpush1.msra.mxu0 %v9148_v2  ;;  %6378 = vmatpush1.msra.mxu1 %v9149_v53  ;;  %v9201_v22 = vld [vmem:[#allocation31 + $0x3e0] sm:$0xff]  ;;  %v9202_v2 = vld [vmem:[#allocation31 + $0x1d8] sm:$0xff] }
 0xce1   :  { %6308 = vmatprep.subr.mxu0 %v9150_v55  ;;  %6379 = vmatprep.subr.mxu1 %v9151_v56  ;;  %v9203_v53 = vld [vmem:[#allocation31 + $0x3d8] sm:$0xff]  ;;  %v9204_v55 = vld [vmem:[#allocation31 + $0x1d0] sm:$0xff] }
 0xce2   :  { %6309 = vmatpush1.msra.mxu0 %v9152_v62  ;;  %6380 = vmatpush1.msra.mxu1 %v9153_v54  ;;  %v9205_v56 = vld [vmem:[#allocation31 + $0x3d0] sm:$0xff]  ;;  %v9206_v62 = vld [vmem:[#allocation31 + $0x1c8] sm:$0xff] }
 0xce3   :  { %6310 = vmatprep.subr.mxu0 %v9154_v59  ;;  %6381 = vmatprep.subr.mxu1 %v9155_v37  ;;  %v9207_v54 = vld [vmem:[#allocation31 + $0x3c8] sm:$0xff]  ;;  %v9208_v59 = vld [vmem:[#allocation31 + $0x1c0] sm:$0xff] }
 0xce4   :  { %6311 = vmatpush1.msra.mxu0 %v9156_v34  ;;  %6382 = vmatpush1.msra.mxu1 %v9157_v42  ;;  %v9209_v37 = vld [vmem:[#allocation31 + $0x3c0] sm:$0xff]  ;;  %v9210_v34 = vld [vmem:[#allocation31 + $0x1b8] sm:$0xff] }
 0xce5   :  { %6312 = vmatprep.subr.mxu0 %v9158_v43  ;;  %6383 = vmatprep.subr.mxu1 %v9159_v46  ;;  %v9211_v42 = vld [vmem:[#allocation31 + $0x3b8] sm:$0xff]  ;;  %v9212_v43 = vld [vmem:[#allocation31 + $0x1b0] sm:$0xff] }
 0xce6   :  { %6313 = vmatpush1.msra.mxu0 %v9160_v48  ;;  %6384 = vmatpush1.msra.mxu1 %v9161_v61  ;;  %v9213_v46 = vld [vmem:[#allocation31 + $0x3b0] sm:$0xff]  ;;  %v9214_v48 = vld [vmem:[#allocation31 + $0x1a8] sm:$0xff] }
 0xce7   :  { %6314 = vmatprep.subr.mxu0 %v9162_v1  ;;  %6385 = vmatprep.subr.mxu1 %v9163_v20  ;;  %v9215_v61 = vld [vmem:[#allocation31 + $0x3a8] sm:$0xff]  ;;  %v9216_v1 = vld [vmem:[#allocation31 + $0x1a0] sm:$0xff] }
 0xce8   :  { %6315 = vmatpush1.msra.mxu0 %v9164_v14  ;;  %6386 = vmatpush1.msra.mxu1 %v9165_v17  ;;  %v9217_v20 = vld [vmem:[#allocation31 + $0x3a0] sm:$0xff]  ;;  %v9218_v14 = vld [vmem:[#allocation31 + $0x198] sm:$0xff] }
 0xce9   :  { %6316 = vmatprep.subr.mxu0 %v9166_v3  ;;  %6387 = vmatprep.subr.mxu1 %v9167_v4  ;;  %v9219_v17 = vld [vmem:[#allocation31 + $0x398] sm:$0xff]  ;;  %v9220_v3 = vld [vmem:[#allocation31 + $0x190] sm:$0xff] }
 0xcea   :  { %6317 = vmatpush1.msra.mxu0 %v9168_v41  ;;  %6388 = vmatpush1.msra.mxu1 %v9169_v6  ;;  %v9221_v4 = vld [vmem:[#allocation31 + $0x390] sm:$0xff]  ;;  %v9222_v41 = vld [vmem:[#allocation31 + $0x188] sm:$0xff] }
 0xceb   :  { %6318 = vmatprep.subr.mxu0 %v9170_v9  ;;  %6389 = vmatprep.subr.mxu1 %v9171_v11  ;;  %v9223_v6 = vld [vmem:[#allocation31 + $0x388] sm:$0xff]  ;;  %v9224_v9 = vld [vmem:[#allocation31 + $0x180] sm:$0xff] }
 0xcec   :  { %6319 = vmatpush1.msra.mxu0 %v9172_v12  ;;  %6390 = vmatpush1.msra.mxu1 %v9173_v5  ;;  %v9225_v11 = vld [vmem:[#allocation31 + $0x380] sm:$0xff]  ;;  %v9226_v12 = vld [vmem:[#allocation31 + $0x178] sm:$0xff] }
 0xced   :  { %6320 = vmatprep.subr.mxu0 %v9174_v13  ;;  %6391 = vmatprep.subr.mxu1 %v9175_v7  ;;  %v9227_v5 = vld [vmem:[#allocation31 + $0x378] sm:$0xff]  ;;  %v9228_v13 = vld [vmem:[#allocation31 + $0x170] sm:$0xff] }
 0xcee   :  { %6321 = vmatpush1.msra.mxu0 %v9176_v16  ;;  %6392 = vmatpush1.msra.mxu1 %v9177_v19  ;;  %v9229_v7 = vld [vmem:[#allocation31 + $0x370] sm:$0xff]  ;;  %v9230_v16 = vld [vmem:[#allocation31 + $0x168] sm:$0xff] }
 0xcef   :  { %6322 = vmatprep.subr.mxu0 %v9178_v21  ;;  %6393 = vmatprep.subr.mxu1 %v9179_v23  ;;  %v9231_v19 = vld [vmem:[#allocation31 + $0x368] sm:$0xff]  ;;  %v9232_v21 = vld [vmem:[#allocation31 + $0x160] sm:$0xff] }
 0xcf0   :  { %6323 = vmatpush1.msra.mxu0 %v9180_v25  ;;  %6394 = vmatpush1.msra.mxu1 %v9181_v26  ;;  %v9233_v23 = vld [vmem:[#allocation31 + $0x360] sm:$0xff]  ;;  %v9234_v25 = vld [vmem:[#allocation31 + $0x158] sm:$0xff] }
 0xcf1   :  { %6324 = vmatprep.subr.mxu0 %v9182_v57  ;;  %6395 = vmatprep.subr.mxu1 %v9183_v29  ;;  %v9235_v26 = vld [vmem:[#allocation31 + $0x358] sm:$0xff]  ;;  %v9236_v57 = vld [vmem:[#allocation31 + $0x150] sm:$0xff] }
 0xcf2   :  { %6325 = vmatpush1.msra.mxu0 %v9184_v32  ;;  %6396 = vmatpush1.msra.mxu1 %v9185_v33  ;;  %v9237_v29 = vld [vmem:[#allocation31 + $0x350] sm:$0xff]  ;;  %v9238_v32 = vld [vmem:[#allocation31 + $0x148] sm:$0xff] }
 0xcf3   :  { %6326 = vmatprep.subr.mxu0 %v9186_v15  ;;  %6397 = vmatprep.subr.mxu1 %v9187_v50  ;;  %v9239_v33 = vld [vmem:[#allocation31 + $0x348] sm:$0xff]  ;;  %v9240_v15 = vld [vmem:[#allocation31 + $0x140] sm:$0xff] }
 0xcf4   :  { %6327 = vmatpush1.msra.mxu0 %v9188_v27  ;;  %6398 = vmatpush1.msra.mxu1 %v9189_v38  ;;  %v9241_v50 = vld [vmem:[#allocation31 + $0x340] sm:$0xff]  ;;  %v9242_v27 = vld [vmem:[#allocation31 + $0x138] sm:$0xff] }
 0xcf5   :  { %6328 = vmatprep.subr.mxu0 %v9190_v39  ;;  %6399 = vmatprep.subr.mxu1 %v9191_v40  ;;  %v9243_v38 = vld [vmem:[#allocation31 + $0x338] sm:$0xff]  ;;  %v9244_v39 = vld [vmem:[#allocation31 + $0x130] sm:$0xff] }
 0xcf6   :  { %6329 = vmatpush1.msra.mxu0 %v9192_v36  ;;  %6400 = vmatpush1.msra.mxu1 %v9193_v44  ;;  %v9245_v40 = vld [vmem:[#allocation31 + $0x330] sm:$0xff]  ;;  %v9246_v36 = vld [vmem:[#allocation31 + $0x128] sm:$0xff] }
 0xcf7   :  { %6330 = vmatprep.subr.mxu0 %v9194_v51  ;;  %6401 = vmatprep.subr.mxu1 %v9195_v45  ;;  %v9247_v44 = vld [vmem:[#allocation31 + $0x328] sm:$0xff]  ;;  %v9248_v51 = vld [vmem:[#allocation31 + $0x120] sm:$0xff] }
 0xcf8   :  { %6331 = vmatpush2.msra.mxu0 %v9196_v63  ;;  %6402 = vmatpush2.msra.mxu1 %v9197_v47  ;;  %v9249_v45 = vld [vmem:[#allocation31 + $0x320] sm:$0xff]  ;;  %v9250_v63 = vld [vmem:[#allocation31 + $0x118] sm:$0xff] }
 0xcf9   :  { %6332 = vmatprep.subr.mxu0 %v9198_v49  ;;  %6403 = vmatprep.subr.mxu1 %v9199_v10  ;;  %v9251_v47 = vld [vmem:[#allocation31 + $0x318] sm:$0xff]  ;;  %v9252_v49 = vld [vmem:[#allocation31 + $0x110] sm:$0xff] }
 0xcfa   :  { %6333 = vmatpush2.msra.mxu0 %v9200_v52  ;;  %6404 = vmatpush2.msra.mxu1 %v9201_v22  ;;  %v9253_v10 = vld [vmem:[#allocation31 + $0x310] sm:$0xff]  ;;  %v9254_v52 = vld [vmem:[#allocation31 + $0x108] sm:$0xff] }
 0xcfb   :  { %6334 = vmatprep.subr.mxu0 %v9202_v2  ;;  %6405 = vmatprep.subr.mxu1 %v9203_v53  ;;  %v9255_v22 = vld [vmem:[#allocation31 + $0x308] sm:$0xff]  ;;  %v9256_v2 = vld [vmem:[#allocation31 + $0x100] sm:$0xff] }
 0xcfc   :  { %6335 = vmatpush2.msra.mxu0 %v9204_v55  ;;  %6406 = vmatpush2.msra.mxu1 %v9205_v56  ;;  %v9257_v53 = vld [vmem:[#allocation31 + $0x300] sm:$0xff]  ;;  %v6537_v55 = vld [vmem:[#allocation32 + $0x1f8] sm:$0xff] }
 0xcfd   :  { %6336 = vmatprep.subr.mxu0 %v9206_v62  ;;  %6407 = vmatprep.subr.mxu1 %v9207_v54  ;;  %v6521_v56 = vld [vmem:[#allocation32 + $0x178] sm:$0xff]  ;;  %v6536_v54 = vld [vmem:[#allocation32 + $0x1f0] sm:$0xff] }
 0xcfe   :  { %6337 = vmatpush2.msra.mxu0 %v9208_v59  ;;  %6408 = vmatpush2.msra.mxu1 %v9209_v37  ;;  %v6505_v62 = vld [vmem:[#allocation32 + $0xf8] sm:$0xff]  ;;  %v6520_v37 = vld [vmem:[#allocation32 + $0x170] sm:$0xff] }
 0xcff   :  { %6338 = vmatprep.subr.mxu0 %v9210_v34  ;;  %6409 = vmatprep.subr.mxu1 %v9211_v42  ;;  %v6489_v59 = vld [vmem:[#allocation32 + $0x78] sm:$0xff]  ;;  %v6504_v34 = vld [vmem:[#allocation32 + $0xf0] sm:$0xff]  ;;  %v6535_v42 = vld [vmem:[#allocation32 + $0x1e8] sm:$0xff] }
 0xd00   :  { %6339 = vmatpush2.msra.mxu0 %v9212_v43  ;;  %6410 = vmatpush2.msra.mxu1 %v9213_v46  ;;  %v6488_v43 = vld [vmem:[#allocation32 + $0x70] sm:$0xff]  ;;  %v6519_v46 = vld [vmem:[#allocation32 + $0x168] sm:$0xff] }
 0xd01   :  { %6340 = vmatprep.subr.mxu0 %v9214_v48  ;;  %6411 = vmatprep.subr.mxu1 %v9215_v61  ;;  %v6503_v48 = vld [vmem:[#allocation32 + $0xe8] sm:$0xff]  ;;  %v6502_v61 = vld [vmem:[#allocation32 + $0xe0] sm:$0xff] }
 0xd02   :  { %6341 = vmatpush2.msra.mxu0 %v9216_v1  ;;  %6412 = vmatpush2.msra.mxu1 %v9217_v20  ;;  %v6518_v1 = vld [vmem:[#allocation32 + $0x160] sm:$0xff] }
 0xd03   :  { %6342 = vmatprep.subr.mxu0 %v9218_v14  ;;  %6413 = vmatprep.subr.mxu1 %v9219_v17  ;;  %v6486_v20 = vld [vmem:[#allocation32 + $0x60] sm:$0xff]  ;;  %v6533_v14 = vld [vmem:[#allocation32 + $0x1d8] sm:$0xff] }
 0xd04   :  { %6343 = vmatpush2.msra.mxu0 %v9220_v3  ;;  %6414 = vmatpush2.msra.mxu1 %v9221_v4  ;;  %v6501_v17 = vld [vmem:[#allocation32 + $0xd8] sm:$0xff] }
 0xd05   :  { %6344 = vmatprep.subr.mxu0 %v9222_v41  ;;  %6415 = vmatprep.subr.mxu1 %v9223_v6  ;;  %v6517_v3 = vld [vmem:[#allocation32 + $0x158] sm:$0xff]  ;;  %v6532_v41 = vld [vmem:[#allocation32 + $0x1d0] sm:$0xff] }
 0xd06   :  { %6345 = vmatpush2.msra.mxu0 %v9224_v9  ;;  %6416 = vmatpush2.msra.mxu1 %v9225_v11  ;;  %v6485_v4 = vld [vmem:[#allocation32 + $0x58] sm:$0xff]  ;;  %v6500_v6 = vld [vmem:[#allocation32 + $0xd0] sm:$0xff] }
 0xd07   :  { %6346 = vmatprep.subr.mxu0 %v9226_v12  ;;  %6417 = vmatprep.subr.mxu1 %v9227_v5  ;;  %v6516_v9 = vld [vmem:[#allocation32 + $0x150] sm:$0xff]  ;;  %v6531_v12 = vld [vmem:[#allocation32 + $0x1c8] sm:$0xff] }
 0xd08   :  { %6347 = vmatpush2.msra.mxu0 %v9228_v13  ;;  %6418 = vmatpush2.msra.mxu1 %v9229_v7  ;;  %v6484_v11 = vld [vmem:[#allocation32 + $0x50] sm:$0xff]  ;;  %v6499_v5 = vld [vmem:[#allocation32 + $0xc8] sm:$0xff] }
 0xd09   :  { %6348 = vmatprep.subr.mxu0 %v9230_v16  ;;  %6419 = vmatprep.subr.mxu1 %v9231_v19  ;;  %v6515_v13 = vld [vmem:[#allocation32 + $0x148] sm:$0xff]  ;;  %v6530_v16 = vld [vmem:[#allocation32 + $0x1c0] sm:$0xff] }
 0xd0a   :  { %6349 = vmatpush2.msra.mxu0 %v9232_v21  ;;  %6420 = vmatpush2.msra.mxu1 %v9233_v23  ;;  %v6483_v7 = vld [vmem:[#allocation32 + $0x48] sm:$0xff]  ;;  %v6498_v19 = vld [vmem:[#allocation32 + $0xc0] sm:$0xff] }
 0xd0b   :  { %6350 = vmatprep.subr.mxu0 %v9234_v25  ;;  %6421 = vmatprep.subr.mxu1 %v9235_v26  ;;  %v6514_v21 = vld [vmem:[#allocation32 + $0x140] sm:$0xff]  ;;  %v6529_v25 = vld [vmem:[#allocation32 + $0x1b8] sm:$0xff] }
 0xd0c   :  { %6351 = vmatpush2.msra.mxu0 %v9236_v57  ;;  %6422 = vmatpush2.msra.mxu1 %v9237_v29  ;;  %v6482_v23 = vld [vmem:[#allocation32 + $0x40] sm:$0xff]  ;;  %v6497_v26 = vld [vmem:[#allocation32 + $0xb8] sm:$0xff] }
 0xd0d   :  { %6352 = vmatprep.subr.mxu0 %v9238_v32  ;;  %6423 = vmatprep.subr.mxu1 %v9239_v33  ;;  %v6513_v57 = vld [vmem:[#allocation32 + $0x138] sm:$0xff]  ;;  %v6528_v32 = vld [vmem:[#allocation32 + $0x1b0] sm:$0xff] }
 0xd0e   :  { %6353 = vmatpush2.msra.mxu0 %v9240_v15  ;;  %6424 = vmatpush2.msra.mxu1 %v9241_v50  ;;  %v6481_v29 = vld [vmem:[#allocation32 + $0x38] sm:$0xff]  ;;  %v6496_v33 = vld [vmem:[#allocation32 + $0xb0] sm:$0xff] }
 0xd0f   :  { %6354 = vmatprep.subr.mxu0 %v9242_v27  ;;  %6425 = vmatprep.subr.mxu1 %v9243_v38  ;;  %v6512_v15 = vld [vmem:[#allocation32 + $0x130] sm:$0xff]  ;;  %v6527_v27 = vld [vmem:[#allocation32 + $0x1a8] sm:$0xff] }
 0xd10   :  { %6355 = vmatpush2.msra.mxu0 %v9244_v39  ;;  %6426 = vmatpush2.msra.mxu1 %v9245_v40  ;;  %v6480_v50 = vld [vmem:[#allocation32 + $0x30] sm:$0xff]  ;;  %v6495_v38 = vld [vmem:[#allocation32 + $0xa8] sm:$0xff] }
 0xd11   :  { %6356 = vmatprep.subr.mxu0 %v9246_v36  ;;  %6427 = vmatprep.subr.mxu1 %v9247_v44  ;;  %v6511_v39 = vld [vmem:[#allocation32 + $0x128] sm:$0xff]  ;;  %v6526_v36 = vld [vmem:[#allocation32 + $0x1a0] sm:$0xff] }
 0xd12   :  { %6357 = vmatpush2.msra.mxu0 %v9248_v51  ;;  %6428 = vmatpush2.msra.mxu1 %v9249_v45  ;;  %v6479_v40 = vld [vmem:[#allocation32 + $0x28] sm:$0xff]  ;;  %v6510_v44 = vld [vmem:[#allocation32 + $0x120] sm:$0xff]  ;;  %v6525_v45 = vld [vmem:[#allocation32 + $0x198] sm:$0xff] }
 0xd13   :  { %6358 = vmatprep.subr.mxu0 %v9250_v63  ;;  %6429 = vmatprep.subr.mxu1 %v9251_v47  ;;  %v6494_v51 = vld [vmem:[#allocation32 + $0xa0] sm:$0xff]  ;;  %v6509_v47 = vld [vmem:[#allocation32 + $0x118] sm:$0xff] }
 0xd14   :  { %6359 = vmatpush2.msra.mxu0 %v9252_v49  ;;  %6430 = vmatpush2.msra.mxu1 %v9253_v10  ;;  %v6478_v63 = vld [vmem:[#allocation32 + $0x20] sm:$0xff]  ;;  %v6493_v49 = vld [vmem:[#allocation32 + $0x98] sm:$0xff]  ;;  %v6524_v10 = vld [vmem:[#allocation32 + $0x190] sm:$0xff] }
 0xd15   :  { %6360 = vmatprep.subr.mxu0 %v9254_v52  ;;  %6431 = vmatprep.subr.mxu1 %v9255_v22  ;;  %v6477_v52 = vld [vmem:[#allocation32 + $0x18] sm:$0xff]  ;;  %v6508_v22 = vld [vmem:[#allocation32 + $0x110] sm:$0xff] }
 0xd16   :  { %6361 = vmatpush2.msra.mxu0 %v9256_v2  ;;  %6432 = vmatpush2.msra.mxu1 %v9257_v53  ;;  %v6492_v2 = vld [vmem:[#allocation32 + $0x90] sm:$0xff]  ;;  %v6523_v53 = vld [vmem:[#allocation32 + $0x188] sm:$0xff] }
 0xd17   :  { %6363 = vmatmul.mubr.f32.vlgmr.msra.gmra.mxu0 %v10875_v35  ;;  %6434 = vmatmul.mubr.f32.vlgmr.msra.gmra.mxu1 %v10877_v18  ;;  %v6534_v35 = vld [vmem:[#allocation32 + $0x1e0] sm:$0xff]  ;;  %v6487_v18 = vld [vmem:[#allocation32 + $0x68] sm:$0xff] }
 0xd18   :  { %8028 = vmatprep.subr.mxu1 %v6537_v55  ;;  %7993 = vmatprep.subr.mxu0 %v6505_v62  ;;  %v6476_v55 = vld [vmem:[#allocation32 + $0x10] sm:$0xff]  ;;  %v6491_v62 = vld [vmem:[#allocation32 + $0x88] sm:$0xff] }
 0xd19   :  { %8029 = vmatpush3.msra.mxu1 %v6521_v56  ;;  %7994 = vmatpush3.msra.mxu0 %v6489_v59  ;;  %v6507_v56 = vld [vmem:[#allocation32 + $0x108] sm:$0xff] }
 0xd1a   :  { %8030 = vmatprep.subr.mxu1 %v6536_v54  ;;  %7995 = vmatprep.subr.mxu0 %v6504_v34  ;;  %v6522_v54 = vld [vmem:[#allocation32 + $0x180] sm:$0xff]  ;;  %v6475_v59 = vld [vmem:[#allocation32 + $0x8] sm:$0xff] }
 0xd1b   :  { %8031 = vmatpush3.msra.mxu1 %v6520_v37  ;;  %7996 = vmatpush3.msra.mxu0 %v6488_v43  ;;  %v6506_v37 = vld [vmem:[#allocation32 + $0x100] sm:$0xff] }
 0xd1c   :  { %8032 = vmatprep.subr.mxu1 %v6535_v42  ;;  %7997 = vmatprep.subr.mxu0 %v6503_v48  ;;  %v6490_v34 = vld [vmem:[#allocation32 + $0x80] sm:$0xff]  ;;  %v6601_v42 = vld [vmem:[#allocation32 + $0x3f8] sm:$0xff] }
 0xd1d   :  { %8033 = vmatpush3.msra.mxu1 %v6519_v46  ;;  %7998 = vmatpush3.msra.mxu0 %v6487_v18  ;;  %v6474_v43 = vld [vmem:[#allocation32] sm:$0xff]  ;;  %v6569_v46 = vld [vmem:[#allocation32 + $0x2f8] sm:$0xff] }
 0xd1e   :  { %8034 = vmatprep.subr.mxu1 %v6534_v35  ;;  %7999 = vmatprep.subr.mxu0 %v6502_v61 }
 0xd1f   :  { %8035 = vmatpush3.msra.mxu1 %v6518_v1  ;;  %8000 = vmatpush3.msra.mxu0 %v6486_v20 }
 0xd20   :  { %8036 = vmatprep.subr.mxu1 %v6533_v14  ;;  %8001 = vmatprep.subr.mxu0 %v6501_v17 }
 0xd21   :  { %8037 = vmatpush3.msra.mxu1 %v6517_v3  ;;  %8002 = vmatpush3.msra.mxu0 %v6485_v4 }
 0xd22   :  { %8038 = vmatprep.subr.mxu1 %v6532_v41  ;;  %8003 = vmatprep.subr.mxu0 %v6500_v6 }
 0xd23   :  { %8039 = vmatpush3.msra.mxu1 %v6516_v9  ;;  %8004 = vmatpush3.msra.mxu0 %v6484_v11 }
 0xd24   :  { %8040 = vmatprep.subr.mxu1 %v6531_v12  ;;  %8005 = vmatprep.subr.mxu0 %v6499_v5  ;;  %v4319_v12 = vrot.slane %v10687_v60, 1  ;;  %v4318_v5 = vrot.slane %v10685_v58, 1 }
 0xd25   :  { %8041 = vmatpush3.msra.mxu1 %v6515_v13  ;;  %8006 = vmatpush3.msra.mxu0 %v6483_v7  ;;  %v4327_v13 = vrot.slane %v10687_v60, 3 }
 0xd26   :  { %8042 = vmatprep.subr.mxu1 %v6530_v16  ;;  %8007 = vmatprep.subr.mxu0 %v6498_v19  ;;  %v6585_v16 = vld [vmem:[#allocation32 + $0x378] sm:$0xff] }
 0xd27   :  { %8043 = vmatpush3.msra.mxu1 %v6514_v21  ;;  %8008 = vmatpush3.msra.mxu0 %v6482_v23 }
 0xd28   :  { %8044 = vmatprep.subr.mxu1 %v6529_v25  ;;  %8009 = vmatprep.subr.mxu0 %v6497_v26  ;;  %v6600_v26 = vld [vmem:[#allocation32 + $0x3f0] sm:$0xff] }
 0xd29   :  { %8045 = vmatpush3.msra.mxu1 %v6513_v57  ;;  %8010 = vmatpush3.msra.mxu0 %v6481_v29 }
 0xd2a   :  { %8046 = vmatprep.subr.mxu1 %v6528_v32  ;;  %8011 = vmatprep.subr.mxu0 %v6496_v33  ;;  %v6584_v33 = vld [vmem:[#allocation32 + $0x370] sm:$0xff] }
 0xd2b   :  { %8047 = vmatpush3.msra.mxu1 %v6512_v15  ;;  %8012 = vmatpush3.msra.mxu0 %v6480_v50  ;;  %v6553_v15 = vld [vmem:[#allocation32 + $0x278] sm:$0xff]  ;;  %v4323_v50 = vrot.slane %v10687_v60, 2 }
 0xd2c   :  { %8048 = vmatprep.subr.mxu1 %v6527_v27  ;;  %8013 = vmatprep.subr.mxu0 %v6495_v38  ;;  %v6568_v38 = vld [vmem:[#allocation32 + $0x2f0] sm:$0xff] }
 0xd2d   :  { %8049 = vmatpush3.msra.mxu1 %v6511_v39  ;;  %8014 = vmatpush3.msra.mxu0 %v6479_v40  ;;  %v6599_v39 = vld [vmem:[#allocation32 + $0x3e8] sm:$0xff] }
 0xd2e   :  { %8050 = vmatprep.subr.mxu1 %v6526_v36  ;;  %8015 = vmatprep.subr.mxu0 %v6494_v51  ;;  %v6552_v36 = vld [vmem:[#allocation32 + $0x270] sm:$0xff]  ;;  %v6567_v51 = vld [vmem:[#allocation32 + $0x2e8] sm:$0xff] }
 0xd2f   :  { %8051 = vmatpush3.msra.mxu1 %v6510_v44  ;;  %8016 = vmatpush3.msra.mxu0 %v6478_v63  ;;  %v6583_v44 = vld [vmem:[#allocation32 + $0x368] sm:$0xff]  ;;  %v6582_v63 = vld [vmem:[#allocation32 + $0x360] sm:$0xff] }
 0xd30   :  { %8052 = vmatprep.subr.mxu1 %v6525_v45  ;;  %8017 = vmatprep.subr.mxu0 %v6493_v49  ;;  %v6598_v45 = vld [vmem:[#allocation32 + $0x3e0] sm:$0xff]  ;;  %v6597_v49 = vld [vmem:[#allocation32 + $0x3d8] sm:$0xff] }
 0xd31   :  { %8053 = vmatpush3.msra.mxu1 %v6509_v47  ;;  %8018 = vmatpush3.msra.mxu0 %v6477_v52  ;;  %v6566_v47 = vld [vmem:[#allocation32 + $0x2e0] sm:$0xff]  ;;  %v6581_v52 = vld [vmem:[#allocation32 + $0x358] sm:$0xff] }
 0xd32   :  { %8054 = vmatprep.subr.mxu1 %v6524_v10  ;;  %8019 = vmatprep.subr.mxu0 %v6492_v2  ;;  %v6550_v10 = vld [vmem:[#allocation32 + $0x260] sm:$0xff]  ;;  %v6596_v2 = vld [vmem:[#allocation32 + $0x3d0] sm:$0xff] }
 0xd33   :  { %8055 = vmatpush3.msra.mxu1 %v6508_v22  ;;  %8020 = vmatpush3.msra.mxu0 %v6476_v55  ;;  %v6565_v22 = vld [vmem:[#allocation32 + $0x2d8] sm:$0xff]  ;;  %v6580_v55 = vld [vmem:[#allocation32 + $0x350] sm:$0xff] }
 0xd34   :  { %8056 = vmatprep.subr.mxu1 %v6523_v53  ;;  %8021 = vmatprep.subr.mxu0 %v6491_v62  ;;  %v6549_v53 = vld [vmem:[#allocation32 + $0x258] sm:$0xff]  ;;  %v6595_v62 = vld [vmem:[#allocation32 + $0x3c8] sm:$0xff] }
 0xd35   :  { %8057 = vmatpush3.msra.mxu1 %v6507_v56  ;;  %8022 = vmatpush3.msra.mxu0 %v6475_v59  ;;  %v6564_v56 = vld [vmem:[#allocation32 + $0x2d0] sm:$0xff]  ;;  %v6579_v59 = vld [vmem:[#allocation32 + $0x348] sm:$0xff] }
 0xd36   :  { %8058 = vmatprep.subr.mxu1 %v6522_v54  ;;  %8023 = vmatprep.subr.mxu0 %v6490_v34  ;;  %v6548_v54 = vld [vmem:[#allocation32 + $0x250] sm:$0xff]  ;;  %v6594_v34 = vld [vmem:[#allocation32 + $0x3c0] sm:$0xff] }
 0xd37   :  { %8059 = vmatpush3.msra.mxu1 %v6506_v37  ;;  %8024 = vmatpush3.msra.mxu0 %v6474_v43  ;;  %v6563_v37 = vld [vmem:[#allocation32 + $0x2c8] sm:$0xff]  ;;  %v6578_v43 = vld [vmem:[#allocation32 + $0x340] sm:$0xff] }
 0xd38   :  { %8098 = vmatprep.subr.mxu1 %v6601_v42  ;;  %8063 = vmatprep.subr.mxu0 %v6569_v46  ;;  %v6547_v42 = vld [vmem:[#allocation32 + $0x248] sm:$0xff]  ;;  %v6562_v46 = vld [vmem:[#allocation32 + $0x2c0] sm:$0xff] }
 0xd96   :  { %v6222_v48 = vpop.f32.mrf.mxu0  ;;  %v6293_v35 = vpop.f32.mrf.mxu1 }
 0xd97   :  { %v6294_v14 = vadd.f32 %v6293_v35, %v6222_v48  ;;  %v6593_v48 = vld [vmem:[#allocation32 + $0x3b8] sm:$0xff]  ;;  %v6546_v35 = vld [vmem:[#allocation32 + $0x240] sm:$0xff] }
 0xd98   :  { %v6224_v18 = vpop.f32.mrf.mxu0  ;;  %v6295_v61 = vpop.f32.mrf.mxu1 }
 0xd99   :  { %v6296_v41 = vadd.f32 %v6295_v61, %v6224_v18  ;;  %v6577_v18 = vld [vmem:[#allocation32 + $0x338] sm:$0xff] }
 0xd9a   :  { %v6561_v61 = vld [vmem:[#allocation32 + $0x2b8] sm:$0xff] }
 0xdd7   :  { %v6364_v1 = vpop.f32.mrf.mxu0  ;;  %v6435_v20 = vpop.f32.mrf.mxu1 }
 0xdd8   :  { %v6436_v17 = vadd.f32 %v6435_v20, %v6364_v1  ;;  %v6592_v1 = vld [vmem:[#allocation32 + $0x3b0] sm:$0xff]  ;;  %v6545_v20 = vld [vmem:[#allocation32 + $0x238] sm:$0xff] }
 0xdd9   :  { %v6366_v3 = vpop.f32.mrf.mxu0  ;;  %v6437_v4 = vpop.f32.mrf.mxu1 }
 0xdda   :  { %v10883_v6 = vmax.f32 %v6294_v14, %v6436_v17  ;;  %v6438_v9 = vadd.f32 %v6437_v4, %v6366_v3  ;;  %v6576_v14 = vld [vmem:[#allocation32 + $0x330] sm:$0xff]  ;;  %v6591_v3 = vld [vmem:[#allocation32 + $0x3a8] sm:$0xff] }
 0xddb   :  { %v6560_v17 = vld [vmem:[#allocation32 + $0x2b0] sm:$0xff] }
 0xddc   :  { %v6441_v11 = vmax.f32 %v6296_v41, %v6438_v9  ;;  %v6450_v23 = vrot.slane %v10883_v6, 7  ;;  %v6468_v25 = vsel %vm2148_vm2, %v4318_v5, %v10883_v6  ;;  %v6544_v4 = vld [vmem:[#allocation32 + $0x230] sm:$0xff]  ;;  %v6575_v41 = vld [vmem:[#allocation32 + $0x328] sm:$0xff]  ;;  %v6574_v5 = vld [vmem:[#allocation32 + $0x320] sm:$0xff] }
 0xddd   :  { %v6559_v9 = vld [vmem:[#allocation32 + $0x2a8] sm:$0xff] }
 0xdde   :  { %v6469_v7 = vsel %vm2148_vm2, %v4319_v12, %v6441_v11  ;;  %v6451_v19 = vrot.slane %v6441_v11, 7  ;;  %v7883_v21 = vrot.slane %v6441_v11, 10  ;;  %v7881_v57 = vrot.slane %v6441_v11, 9  ;;  %v6590_v11 = vld [vmem:[#allocation32 + $0x3a0] sm:$0xff]  ;;  %v6543_v12 = vld [vmem:[#allocation32 + $0x228] sm:$0xff] }
 0xddf   :  { %6743 = vmatprep.mubr.f32.mxu1 %v6469_v7  ;;  %v6466_v27 = vsel %vm2148_vm2, %v10685_v58, %v6450_v23  ;;  %v6589_v7 = vld [vmem:[#allocation32 + $0x398] sm:$0xff]  ;;  %v6588_v23 = vld [vmem:[#allocation32 + $0x390] sm:$0xff] }
 0xde0   :  { %6744 = vmatmul.mubr.f32.vlgmr.msra.gmra.mxu1 %v6468_v25  ;;  %v6467_v29 = vsel %vm2148_vm2, %v10687_v60, %v6451_v19  ;;  %v6473_v32 = vsel %vm2148_vm2, %v4327_v13, %v7883_v21  ;;  %v6471_v40 = vsel %vm2148_vm2, %v4323_v50, %v7881_v57  ;;  %v6551_v60 = vld [vmem:[#allocation32 + $0x268] sm:$0xff]  ;;  %v6558_v13 = vld [vmem:[#allocation32 + $0x2a0] sm:$0xff]  ;;  %v6573_v19 = vld [vmem:[#allocation32 + $0x318] sm:$0xff] }
 0xde1   :  { %8099 = vmatpush3.msra.mxu1 %v6585_v16  ;;  %6673 = vmatprep.mubr.f32.mxu0 %v6467_v29  ;;  %v6542_v16 = vld [vmem:[#allocation32 + $0x220] sm:$0xff]  ;;  %v6557_v21 = vld [vmem:[#allocation32 + $0x298] sm:$0xff]  ;;  %v6556_v57 = vld [vmem:[#allocation32 + $0x290] sm:$0xff] }
 0xde2   :  { %8100 = vmatprep.subr.mxu1 %v6600_v26  ;;  %6883 = vmatprep.mubr.f32.mxu1 %v6473_v32  ;;  %v6541_v25 = vld [vmem:[#allocation32 + $0x218] sm:$0xff]  ;;  %v6572_v26 = vld [vmem:[#allocation32 + $0x310] sm:$0xff]  ;;  %v6587_v29 = vld [vmem:[#allocation32 + $0x388] sm:$0xff] }
 0xde3   :  { %6674 = vmatmul.mubr.f32.vlgmr.msra.gmra.mxu0 %v6466_v27  ;;  %8101 = vmatpush3.msra.mxu1 %v6584_v33  ;;  %v6540_v32 = vld [vmem:[#allocation32 + $0x210] sm:$0xff]  ;;  %v6571_v33 = vld [vmem:[#allocation32 + $0x308] sm:$0xff]  ;;  %v6586_v50 = vld [vmem:[#allocation32 + $0x380] sm:$0xff]  ;;  %v7882_v27 = vrot.slane %v10883_v6, 10 }
 0xde4   :  { %8064 = vmatpush3.msra.mxu0 %v6553_v15  ;;  %6813 = vmatprep.mubr.f32.mxu0 %v6471_v40  ;;  %v6555_v15 = vld [vmem:[#allocation32 + $0x288] sm:$0xff]  ;;  %v6554_v40 = vld [vmem:[#allocation32 + $0x280] sm:$0xff] }
 0xde5   :  { %8065 = vmatprep.subr.mxu0 %v6568_v38  ;;  %8102 = vmatprep.subr.mxu1 %v6599_v39  ;;  %v6539_v38 = vld [vmem:[#allocation32 + $0x208] sm:$0xff]  ;;  %v6570_v39 = vld [vmem:[#allocation32 + $0x300] sm:$0xff] }
 0xde6   :  { %8066 = vmatpush3.msra.mxu0 %v6552_v36  ;;  %8103 = vmatpush3.msra.mxu1 %v6583_v44  ;;  %v4326_v36 = vrot.slane %v10685_v58, 3  ;;  %v7880_v44 = vrot.slane %v10883_v6, 9  ;;  %v6916_v6 = vld [vmem:[#allocation40 + $0xd8] sm:$0xff] }
 0xde7   :  { %8067 = vmatprep.subr.mxu0 %v6567_v51  ;;  %8104 = vmatprep.subr.mxu1 %v6598_v45  ;;  %v6920_v51 = vld [vmem:[#allocation40 + $0xf8] sm:$0xff] }
 0xde8   :  { %8068 = vmatpush3.msra.mxu0 %v6551_v60  ;;  %8105 = vmatpush3.msra.mxu1 %v6582_v63  ;;  %v6538_v45 = vld [vmem:[#allocation32 + $0x200] sm:$0xff]  ;;  %v6472_v60 = vsel %vm2148_vm2, %v4326_v36, %v7882_v27  ;;  %v6919_v63 = vld [vmem:[#allocation40 + $0xf0] sm:$0xff] }
 0xde9   :  { %8069 = vmatprep.subr.mxu0 %v6566_v47  ;;  %8106 = vmatprep.subr.mxu1 %v6597_v49  ;;  %v4322_v47 = vrot.slane %v10685_v58, 2  ;;  %v6918_v49 = vld [vmem:[#allocation40 + $0xe8] sm:$0xff]  ;;  %v6913_v58 = vld [vmem:[#allocation40 + $0xc0] sm:$0xff] }
 0xdea   :  { %8070 = vmatpush3.msra.mxu0 %v6550_v10  ;;  %8107 = vmatpush3.msra.mxu1 %v6581_v52  ;;  %v6917_v52 = vld [vmem:[#allocation40 + $0xe0] sm:$0xff] }
 0xdeb   :  { %8071 = vmatprep.subr.mxu0 %v6565_v22  ;;  %8108 = vmatprep.subr.mxu1 %v6596_v2  ;;  %v6470_v10 = vsel %vm2148_vm2, %v4322_v47, %v7880_v44  ;;  %v6915_v22 = vld [vmem:[#allocation40 + $0xd0] sm:$0xff]  ;;  %v6914_v2 = vld [vmem:[#allocation40 + $0xc8] sm:$0xff]  ;;  %v6937_v27 = vld [vmem:[#allocation41 + $0x80] sm:$0xff] }
 0xdec   :  { %8072 = vmatpush3.msra.mxu0 %v6549_v53  ;;  %8109 = vmatpush3.msra.mxu1 %v6580_v55  ;;  %v6912_v53 = vld [vmem:[#allocation40 + $0xb8] sm:$0xff]  ;;  %v6911_v55 = vld [vmem:[#allocation40 + $0xb0] sm:$0xff]  ;;  %v6933_v36 = vld [vmem:[#allocation41 + $0x60] sm:$0xff] }
 0xded   :  { %8073 = vmatprep.subr.mxu0 %v6564_v56  ;;  %8110 = vmatprep.subr.mxu1 %v6595_v62  ;;  %v6910_v56 = vld [vmem:[#allocation40 + $0xa8] sm:$0xff]  ;;  %v6909_v62 = vld [vmem:[#allocation40 + $0xa0] sm:$0xff]  ;;  %v6932_v44 = vld [vmem:[#allocation41 + $0x58] sm:$0xff] }
 0xdee   :  { %8074 = vmatpush3.msra.mxu0 %v6548_v54  ;;  %8111 = vmatpush3.msra.mxu1 %v6579_v59  ;;  %v6908_v54 = vld [vmem:[#allocation40 + $0x98] sm:$0xff]  ;;  %v6907_v59 = vld [vmem:[#allocation40 + $0x90] sm:$0xff] }
 0xdef   :  { %8075 = vmatprep.subr.mxu0 %v6563_v37  ;;  %8112 = vmatprep.subr.mxu1 %v6594_v34  ;;  %v6906_v37 = vld [vmem:[#allocation40 + $0x88] sm:$0xff]  ;;  %v6905_v34 = vld [vmem:[#allocation40 + $0x80] sm:$0xff]  ;;  %v6927_v47 = vld [vmem:[#allocation41 + $0x30] sm:$0xff] }
 0xdf0   :  { %8076 = vmatpush3.msra.mxu0 %v6547_v42  ;;  %8113 = vmatpush3.msra.mxu1 %v6578_v43  ;;  %v6904_v42 = vld [vmem:[#allocation40 + $0x78] sm:$0xff]  ;;  %v6903_v43 = vld [vmem:[#allocation40 + $0x70] sm:$0xff] }
 0xdf1   :  { %8077 = vmatprep.subr.mxu0 %v6562_v46  ;;  %8114 = vmatprep.subr.mxu1 %v6593_v48  ;;  %v6902_v46 = vld [vmem:[#allocation40 + $0x68] sm:$0xff]  ;;  %v6901_v48 = vld [vmem:[#allocation40 + $0x60] sm:$0xff] }
 0xdf2   :  { %8078 = vmatpush3.msra.mxu0 %v6546_v35  ;;  %8115 = vmatpush3.msra.mxu1 %v6577_v18  ;;  %v6900_v35 = vld [vmem:[#allocation40 + $0x58] sm:$0xff]  ;;  %v6899_v18 = vld [vmem:[#allocation40 + $0x50] sm:$0xff] }
 0xdf3   :  { %8079 = vmatprep.subr.mxu0 %v6561_v61  ;;  %8116 = vmatprep.subr.mxu1 %v6592_v1  ;;  %v6898_v61 = vld [vmem:[#allocation40 + $0x48] sm:$0xff]  ;;  %v6897_v1 = vld [vmem:[#allocation40 + $0x40] sm:$0xff] }
 0xdf4   :  { %8080 = vmatpush3.msra.mxu0 %v6545_v20  ;;  %8117 = vmatpush3.msra.mxu1 %v6576_v14  ;;  %v6896_v20 = vld [vmem:[#allocation40 + $0x38] sm:$0xff]  ;;  %v6895_v14 = vld [vmem:[#allocation40 + $0x30] sm:$0xff] }
 0xdf5   :  { %8081 = vmatprep.subr.mxu0 %v6560_v17  ;;  %8118 = vmatprep.subr.mxu1 %v6591_v3  ;;  %v6894_v17 = vld [vmem:[#allocation40 + $0x28] sm:$0xff]  ;;  %v6893_v3 = vld [vmem:[#allocation40 + $0x20] sm:$0xff] }
 0xdf6   :  { %8082 = vmatpush3.msra.mxu0 %v6544_v4  ;;  %8119 = vmatpush3.msra.mxu1 %v6575_v41  ;;  %v6892_v4 = vld [vmem:[#allocation40 + $0x18] sm:$0xff]  ;;  %v6891_v41 = vld [vmem:[#allocation40 + $0x10] sm:$0xff] }
 0xdf7   :  { %8083 = vmatprep.subr.mxu0 %v6559_v9  ;;  %8120 = vmatprep.subr.mxu1 %v6590_v11  ;;  %v7810_v9 = vld [vmem:[#allocation8] ss:$0 sm:$0xff]  ;;  %v6890_v11 = vld [vmem:[#allocation40 + $0x8] sm:$0xff] }
 0xdf8   :  { %8084 = vmatpush3.msra.mxu0 %v6543_v12  ;;  %8121 = vmatpush3.msra.mxu1 %v6574_v5  ;;  %v6889_v12 = vld [vmem:[#allocation40] sm:$0xff]  ;;  %v741_v5 = vadd.f32 %v10413_v31, %v7810_v9  ;;  %v6943_v31 = vld [vmem:[#allocation41 + $0xb0] sm:$0xff]  ;;  %v7120_v9 = vld [vmem:[#allocation43 + $0xc8] sm:$0xff] }
 0xdf9   :  { %8085 = vmatprep.subr.mxu0 %v6558_v13  ;;  %8122 = vmatprep.subr.mxu1 %v6589_v7  ;;  %v6952_v13 = vld [vmem:[#allocation41 + $0xf8] sm:$0xff]  ;;  %v6951_v7 = vld [vmem:[#allocation41 + $0xf0] sm:$0xff] }
 0xdfa   :  { %8086 = vmatpush3.msra.mxu0 %v6542_v16  ;;  %8123 = vmatpush3.msra.mxu1 %v6573_v19  ;;  %v6950_v16 = vld [vmem:[#allocation41 + $0xe8] sm:$0xff]  ;;  %v6949_v19 = vld [vmem:[#allocation41 + $0xe0] sm:$0xff] }
 0xdfb   :  { %8087 = vmatprep.subr.mxu0 %v6557_v21  ;;  %8124 = vmatprep.subr.mxu1 %v6588_v23  ;;  %v6948_v21 = vld [vmem:[#allocation41 + $0xd8] sm:$0xff]  ;;  %v6947_v23 = vld [vmem:[#allocation41 + $0xd0] sm:$0xff] }
 0xdfc   :  { %8088 = vmatpush3.msra.mxu0 %v6541_v25  ;;  %8125 = vmatpush3.msra.mxu1 %v6572_v26  ;;  %v6946_v25 = vld [vmem:[#allocation41 + $0xc8] sm:$0xff]  ;;  %v6945_v26 = vld [vmem:[#allocation41 + $0xc0] sm:$0xff] }
 0xdfd   :  { %8089 = vmatprep.subr.mxu0 %v6556_v57  ;;  %8126 = vmatprep.subr.mxu1 %v6587_v29  ;;  %v6944_v57 = vld [vmem:[#allocation41 + $0xb8] sm:$0xff]  ;;  %v6942_v29 = vld [vmem:[#allocation41 + $0xa8] sm:$0xff] }
 0xdfe   :  { %8090 = vmatpush3.msra.mxu0 %v6540_v32  ;;  %8127 = vmatpush3.msra.mxu1 %v6571_v33  ;;  %v6941_v32 = vld [vmem:[#allocation41 + $0xa0] sm:$0xff]  ;;  %v6940_v33 = vld [vmem:[#allocation41 + $0x98] sm:$0xff] }
 0xdff   :  { %8091 = vmatprep.subr.mxu0 %v6555_v15  ;;  %8128 = vmatprep.subr.mxu1 %v6586_v50  ;;  %v6939_v15 = vld [vmem:[#allocation41 + $0x90] sm:$0xff]  ;;  %v6938_v50 = vld [vmem:[#allocation41 + $0x88] sm:$0xff] }
 0xe00   :  { %8092 = vmatpush3.msra.mxu0 %v6539_v38  ;;  %8129 = vmatpush3.msra.mxu1 %v6570_v39  ;;  %v6936_v38 = vld [vmem:[#allocation41 + $0x78] sm:$0xff]  ;;  %v6935_v39 = vld [vmem:[#allocation41 + $0x70] sm:$0xff] }
 0xe01   :  { %8093 = vmatprep.subr.mxu0 %v6554_v40  ;;  %6884 = vmatmul.mubr.f32.vlgmr.msra.gmra.mxu1 %v6472_v60  ;;  %v6934_v40 = vld [vmem:[#allocation41 + $0x68] sm:$0xff]  ;;  %v6929_v60 = vld [vmem:[#allocation41 + $0x40] sm:$0xff] }
 0xe02   :  { %7024 = vmatprep.subr.mxu1 %v6920_v51  ;;  %8094 = vmatpush3.msra.mxu0 %v6538_v45  ;;  %v6931_v51 = vld [vmem:[#allocation41 + $0x50] sm:$0xff]  ;;  %v6930_v45 = vld [vmem:[#allocation41 + $0x48] sm:$0xff] }
 0xe03   :  { %7025 = vmatpush1.msra.mxu1 %v6919_v63  ;;  %6814 = vmatmul.mubr.f32.vlgmr.msra.gmra.mxu0 %v6470_v10  ;;  %v6928_v63 = vld [vmem:[#allocation41 + $0x38] sm:$0xff]  ;;  %v6925_v10 = vld [vmem:[#allocation41 + $0x20] sm:$0xff] }
 0xe04   :  { %7026 = vmatprep.subr.mxu1 %v6918_v49  ;;  %7088 = vmatprep.mubr.f32.mxu1 %v10010_v0  ;;  %v6926_v49 = vld [vmem:[#allocation41 + $0x28] sm:$0xff] }
 0xe05   :  { %7027 = vmatpush1.msra.mxu1 %v6917_v52  ;;  %7017 = vmatprep.mubr.f32.mxu0 %v10010_v0  ;;  %v6924_v52 = vld [vmem:[#allocation41 + $0x18] sm:$0xff] }
 0xe06   :  { %7028 = vmatprep.subr.mxu1 %v6916_v6  ;;  %6953 = vmatprep.subr.mxu0 %v6952_v13  ;;  %v6923_v6 = vld [vmem:[#allocation41 + $0x10] sm:$0xff]  ;;  %v7116_v13 = vld [vmem:[#allocation43 + $0xa8] sm:$0xff] }
 0xe07   :  { %7029 = vmatpush1.msra.mxu1 %v6915_v22  ;;  %6954 = vmatpush1.msra.mxu0 %v6951_v7  ;;  %v6922_v22 = vld [vmem:[#allocation41 + $0x8] sm:$0xff]  ;;  %v7115_v7 = vld [vmem:[#allocation43 + $0xa0] sm:$0xff] }
 0xe08   :  { %7030 = vmatprep.subr.mxu1 %v6914_v2  ;;  %6955 = vmatprep.subr.mxu0 %v6950_v16  ;;  %v6921_v2 = vld [vmem:[#allocation41] sm:$0xff]  ;;  %v7114_v16 = vld [vmem:[#allocation43 + $0x98] sm:$0xff] }
 0xe09   :  { %7031 = vmatpush1.msra.mxu1 %v6913_v58  ;;  %6956 = vmatpush1.msra.mxu0 %v6949_v19  ;;  %v7126_v58 = vld [vmem:[#allocation43 + $0xf8] sm:$0xff]  ;;  %v7113_v19 = vld [vmem:[#allocation43 + $0x90] sm:$0xff] }
 0xe0a   :  { %7032 = vmatprep.subr.mxu1 %v6912_v53  ;;  %6957 = vmatprep.subr.mxu0 %v6948_v21  ;;  %v7112_v21 = vld [vmem:[#allocation43 + $0x88] sm:$0xff] }
 0xe0b   :  { %7033 = vmatpush1.msra.mxu1 %v6911_v55  ;;  %6958 = vmatpush1.msra.mxu0 %v6947_v23  ;;  %v7111_v23 = vld [vmem:[#allocation43 + $0x80] sm:$0xff] }
 0xe0c   :  { %7034 = vmatprep.subr.mxu1 %v6910_v56  ;;  %6959 = vmatprep.subr.mxu0 %v6946_v25  ;;  %v7110_v25 = vld [vmem:[#allocation43 + $0x78] sm:$0xff] }
 0xe0d   :  { %7035 = vmatpush1.msra.mxu1 %v6909_v62  ;;  %6960 = vmatpush1.msra.mxu0 %v6945_v26  ;;  %v7109_v26 = vld [vmem:[#allocation43 + $0x70] sm:$0xff] }
 0xe0e   :  { %7036 = vmatprep.subr.mxu1 %v6908_v54  ;;  %6961 = vmatprep.subr.mxu0 %v6944_v57  ;;  %v7108_v57 = vld [vmem:[#allocation43 + $0x68] sm:$0xff] }
 0xe0f   :  { %7037 = vmatpush1.msra.mxu1 %v6907_v59  ;;  %6962 = vmatpush1.msra.mxu0 %v6943_v31  ;;  %v7884_v59 = vld [vmem:[#allocation34] ss:$0 sm:$0xff]  ;;  %v7107_v31 = vld [vmem:[#allocation43 + $0x60] sm:$0xff] }
 0xe10   :  { %7038 = vmatprep.subr.mxu1 %v6906_v37  ;;  %6963 = vmatprep.subr.mxu0 %v6942_v29  ;;  %v7106_v29 = vld [vmem:[#allocation43 + $0x58] sm:$0xff] }
 0xe11   :  { %7039 = vmatpush1.msra.mxu1 %v6905_v34  ;;  %6964 = vmatpush1.msra.mxu0 %v6941_v32  ;;  %v7105_v32 = vld [vmem:[#allocation43 + $0x50] sm:$0xff] }
 0xe12   :  { %7040 = vmatprep.subr.mxu1 %v6904_v42  ;;  %6965 = vmatprep.subr.mxu0 %v6940_v33  ;;  %v7104_v33 = vld [vmem:[#allocation43 + $0x48] sm:$0xff] }
 0xe13   :  { %7041 = vmatpush1.msra.mxu1 %v6903_v43  ;;  %6966 = vmatpush1.msra.mxu0 %v6939_v15  ;;  %v7103_v15 = vld [vmem:[#allocation43 + $0x40] sm:$0xff] }
 0xe14   :  { %7042 = vmatprep.subr.mxu1 %v6902_v46  ;;  %6967 = vmatprep.subr.mxu0 %v6938_v50  ;;  %v7102_v50 = vld [vmem:[#allocation43 + $0x38] sm:$0xff] }
 0xe15   :  { %7043 = vmatpush1.msra.mxu1 %v6901_v48  ;;  %6968 = vmatpush1.msra.mxu0 %v6937_v27  ;;  %v7101_v27 = vld [vmem:[#allocation43 + $0x30] sm:$0xff] }
 0xe16   :  { %7044 = vmatprep.subr.mxu1 %v6900_v35  ;;  %6969 = vmatprep.subr.mxu0 %v6936_v38  ;;  %v7100_v38 = vld [vmem:[#allocation43 + $0x28] sm:$0xff] }
 0xe17   :  { %7045 = vmatpush1.msra.mxu1 %v6899_v18  ;;  %6970 = vmatpush1.msra.mxu0 %v6935_v39  ;;  %v7099_v39 = vld [vmem:[#allocation43 + $0x20] sm:$0xff] }
 0xe18   :  { %7046 = vmatprep.subr.mxu1 %v6898_v61  ;;  %6971 = vmatprep.subr.mxu0 %v6934_v40  ;;  %v7098_v40 = vld [vmem:[#allocation43 + $0x18] sm:$0xff] }
 0xe19   :  { %7047 = vmatpush1.msra.mxu1 %v6897_v1  ;;  %6972 = vmatpush1.msra.mxu0 %v6933_v36  ;;  %v7097_v36 = vld [vmem:[#allocation43 + $0x10] sm:$0xff] }
 0xe1a   :  { %7048 = vmatprep.subr.mxu1 %v6896_v20  ;;  %6973 = vmatprep.subr.mxu0 %v6932_v44  ;;  %v7096_v44 = vld [vmem:[#allocation43 + $0x8] sm:$0xff] }
 0xe1b   :  { %7049 = vmatpush1.msra.mxu1 %v6895_v14  ;;  %6974 = vmatpush1.msra.mxu0 %v6931_v51  ;;  %v7125_v14 = vld [vmem:[#allocation43 + $0xf0] sm:$0xff]  ;;  %v7095_v51 = vld [vmem:[#allocation43] sm:$0xff] }
 0xe1c   :  { %7050 = vmatprep.subr.mxu1 %v6894_v17  ;;  %6975 = vmatprep.subr.mxu0 %v6930_v45  ;;  %v7124_v17 = vld [vmem:[#allocation43 + $0xe8] sm:$0xff]  ;;  %v7247_v45 = vld [vmem:[#allocation44 + $0xf8] sm:$0xff] }
 0xe1d   :  { %7051 = vmatpush1.msra.mxu1 %v6893_v3  ;;  %6976 = vmatpush1.msra.mxu0 %v6929_v60  ;;  %v7123_v3 = vld [vmem:[#allocation43 + $0xe0] sm:$0xff]  ;;  %v7231_v60 = vld [vmem:[#allocation44 + $0x78] sm:$0xff] }
 0xe1e   :  { %7052 = vmatprep.subr.mxu1 %v6892_v4  ;;  %6977 = vmatprep.subr.mxu0 %v6928_v63  ;;  %v7122_v4 = vld [vmem:[#allocation43 + $0xd8] sm:$0xff]  ;;  %v7246_v63 = vld [vmem:[#allocation44 + $0xf0] sm:$0xff] }
 0xe1f   :  { %7053 = vmatpush1.msra.mxu1 %v6891_v41  ;;  %6978 = vmatpush1.msra.mxu0 %v6927_v47  ;;  %v7121_v41 = vld [vmem:[#allocation43 + $0xd0] sm:$0xff] }
 0xe20   :  { %7054 = vmatprep.subr.mxu1 %v6890_v11  ;;  %6979 = vmatprep.subr.mxu0 %v6926_v49  ;;  %v7119_v11 = vld [vmem:[#allocation43 + $0xc0] sm:$0xff]  ;;  %v7230_v47 = vld [vmem:[#allocation44 + $0x70] sm:$0xff]  ;;  %v7245_v49 = vld [vmem:[#allocation44 + $0xe8] sm:$0xff] }
 0xe21   :  { %7055 = vmatpush1.msra.mxu1 %v6889_v12  ;;  %6980 = vmatpush1.msra.mxu0 %v6925_v10  ;;  %v7118_v12 = vld [vmem:[#allocation43 + $0xb8] sm:$0xff]  ;;  %v7229_v10 = vld [vmem:[#allocation44 + $0x68] sm:$0xff] }
 0xe22   :  { %7089 = vmatmul.mubr.f32.vlgmr.msra.gmra.mxu1 %v741_v5  ;;  %6981 = vmatprep.subr.mxu0 %v6924_v52  ;;  %v7117_v5 = vld [vmem:[#allocation43 + $0xb0] sm:$0xff]  ;;  %v7244_v52 = vld [vmem:[#allocation44 + $0xe0] sm:$0xff] }
 0xe23   :  { %6982 = vmatpush1.msra.mxu0 %v6923_v6  ;;  %8133 = vmatprep.subr.mxu1 %v7247_v45  ;;  %v7228_v6 = vld [vmem:[#allocation44 + $0x60] sm:$0xff] }
 0xe24   :  { %6983 = vmatprep.subr.mxu0 %v6922_v22  ;;  %8134 = vmatpush3.msra.mxu1 %v7231_v60  ;;  %v7243_v22 = vld [vmem:[#allocation44 + $0xd8] sm:$0xff] }
 0xe25   :  { %6984 = vmatpush1.msra.mxu0 %v6921_v2  ;;  %8135 = vmatprep.subr.mxu1 %v7246_v63  ;;  %v7227_v2 = vld [vmem:[#allocation44 + $0x58] sm:$0xff] }
 0xe26   :  { %7127 = vmatprep.subr.mxu0 %v7126_v58  ;;  %8136 = vmatpush3.msra.mxu1 %v7230_v47  ;;  %v7226_v58 = vld [vmem:[#allocation44 + $0x50] sm:$0xff] }
 0xe27   :  { %8137 = vmatprep.subr.mxu1 %v7245_v49 }
 0xe28   :  { %8138 = vmatpush3.msra.mxu1 %v7229_v10 }
 0xe29   :  { %8139 = vmatprep.subr.mxu1 %v7244_v52 }
 0xe2a   :  { %8140 = vmatpush3.msra.mxu1 %v7228_v6 }
 0xe2b   :  { %8141 = vmatprep.subr.mxu1 %v7243_v22 }
 0xe2c   :  { %8142 = vmatpush3.msra.mxu1 %v7227_v2 }
 0xea0   :  { %v8060_v55 = vpop.f32.mrf.mxu1 }
 0xea2   :  { %v8061_v54 = vpop.f32.mrf.mxu1 }
 0xea3   :  { %v8025_v53 = vpop.f32.mrf.mxu0  ;;  %v8062_v43 = vadd.f32 %v8061_v54, %v8060_v55  ;;  %v7225_v55 = vld [vmem:[#allocation44 + $0x48] sm:$0xff]  ;;  %v7239_v54 = vld [vmem:[#allocation44 + $0xb8] sm:$0xff] }
 0xea5   :  { %v8026_v56 = vpop.f32.mrf.mxu0 }
 0xea6   :  { %v8027_v62 = vadd.f32 %v8026_v56, %v8025_v53  ;;  %v7241_v53 = vld [vmem:[#allocation44 + $0xc8] sm:$0xff]  ;;  %v7240_v56 = vld [vmem:[#allocation44 + $0xc0] sm:$0xff] }
 0xea8   :  { %v6676_v34 = vadd.f32 %v8027_v62, %v7884_v59  ;;  %v7224_v62 = vld [vmem:[#allocation44 + $0x40] sm:$0xff]  ;;  %v7223_v59 = vld [vmem:[#allocation44 + $0x38] sm:$0xff] }
 0xeaa   :  { %v6746_v35 = vadd.f32 %v8062_v43, %v6676_v34  ;;  %v7222_v34 = vld [vmem:[#allocation44 + $0x30] sm:$0xff]  ;;  %v7221_v43 = vld [vmem:[#allocation44 + $0x28] sm:$0xff] }
 0xec1   :  { %v8130_v37 = vpop.f32.mrf.mxu1 }
 0xec3   :  { %v8095_v42 = vpop.f32.mrf.mxu0  ;;  %v8131_v46 = vpop.f32.mrf.mxu1 }
 0xec4   :  { %v8132_v61 = vadd.f32 %v8131_v46, %v8130_v37  ;;  %v7238_v37 = vld [vmem:[#allocation44 + $0xb0] sm:$0xff]  ;;  %v7236_v46 = vld [vmem:[#allocation44 + $0xa0] sm:$0xff] }
 0xec5   :  { %v8096_v48 = vpop.f32.mrf.mxu0 }
 0xec6   :  { %v8097_v18 = vadd.f32 %v8096_v48, %v8095_v42  ;;  %v7237_v42 = vld [vmem:[#allocation44 + $0xa8] sm:$0xff]  ;;  %v7220_v48 = vld [vmem:[#allocation44 + $0x20] sm:$0xff] }
 0xec8   :  { %v6816_v1 = vadd.f32 %v8097_v18, %v6746_v35  ;;  %v7235_v35 = vld [vmem:[#allocation44 + $0x98] sm:$0xff] }
 0xec9   :  { %v7219_v18 = vld [vmem:[#allocation44 + $0x18] sm:$0xff] }
 0xeca   :  { %v6886_v20 = vadd.f32 %v8132_v61, %v6816_v1  ;;  %v7234_v61 = vld [vmem:[#allocation44 + $0x90] sm:$0xff] }
 0xecb   :  { %v7218_v1 = vld [vmem:[#allocation44 + $0x10] sm:$0xff] }
 0xecc   :  { %7018 = vmatmul.mubr.f32.vlgmr.msra.gmra.mxu0 %v6886_v20  ;;  %v7233_v20 = vld [vmem:[#allocation44 + $0x88] sm:$0xff] }
 0xecd   :  { %7128 = vmatpush1.msra.mxu0 %v7125_v14  ;;  %7191 = vmatprep.mubr.f32.mxu0 %v10010_v0  ;;  %v7217_v14 = vld [vmem:[#allocation44 + $0x8] sm:$0xff] }
 0xece   :  { %7129 = vmatprep.subr.mxu0 %v7124_v17  ;;  %v7232_v17 = vld [vmem:[#allocation44 + $0x80] sm:$0xff] }
 0xecf   :  { %7130 = vmatpush1.msra.mxu0 %v7123_v3  ;;  %v7216_v3 = vld [vmem:[#allocation44] sm:$0xff] }
 0xed0   :  { %7131 = vmatprep.subr.mxu0 %v7122_v4  ;;  %v7356_v4 = vld [vmem:[%s11039_s21 + $0xf8] sm:$0xff] }
 0xed1   :  { %7132 = vmatpush1.msra.mxu0 %v7121_v41  ;;  %v7355_v41 = vld [vmem:[%s11039_s21 + $0xf0] sm:$0xff] }
 0xed2   :  { %7133 = vmatprep.subr.mxu0 %v7120_v9  ;;  %v7354_v9 = vld [vmem:[%s11039_s21 + $0xe8] sm:$0xff] }
 0xed3   :  { %7134 = vmatpush1.msra.mxu0 %v7119_v11  ;;  %v7353_v11 = vld [vmem:[%s11039_s21 + $0xe0] sm:$0xff] }
 0xed4   :  { %7135 = vmatprep.subr.mxu0 %v7118_v12  ;;  %v7352_v12 = vld [vmem:[%s11039_s21 + $0xd8] sm:$0xff] }
 0xed5   :  { %7136 = vmatpush1.msra.mxu0 %v7117_v5  ;;  %v7351_v5 = vld [vmem:[%s11039_s21 + $0xd0] sm:$0xff] }
 0xed6   :  { %7137 = vmatprep.subr.mxu0 %v7116_v13  ;;  %v7350_v13 = vld [vmem:[%s11039_s21 + $0xc8] sm:$0xff] }
 0xed7   :  { %7138 = vmatpush1.msra.mxu0 %v7115_v7  ;;  %v7349_v7 = vld [vmem:[%s11039_s21 + $0xc0] sm:$0xff] }
 0xed8   :  { %7139 = vmatprep.subr.mxu0 %v7114_v16  ;;  %v7348_v16 = vld [vmem:[%s11039_s21 + $0xb8] sm:$0xff] }
 0xed9   :  { %7140 = vmatpush1.msra.mxu0 %v7113_v19  ;;  %v7347_v19 = vld [vmem:[%s11039_s21 + $0xb0] sm:$0xff] }
 0xeda   :  { %7141 = vmatprep.subr.mxu0 %v7112_v21  ;;  %v7346_v21 = vld [vmem:[%s11039_s21 + $0xa8] sm:$0xff] }
 0xedb   :  { %7142 = vmatpush1.msra.mxu0 %v7111_v23  ;;  %v7345_v23 = vld [vmem:[%s11039_s21 + $0xa0] sm:$0xff] }
 0xedc   :  { %7143 = vmatprep.subr.mxu0 %v7110_v25  ;;  %v7344_v25 = vld [vmem:[%s11039_s21 + $0x98] sm:$0xff] }
 0xedd   :  { %7144 = vmatpush1.msra.mxu0 %v7109_v26  ;;  %v7343_v26 = vld [vmem:[%s11039_s21 + $0x90] sm:$0xff] }
 0xede   :  { %7145 = vmatprep.subr.mxu0 %v7108_v57  ;;  %v7342_v57 = vld [vmem:[%s11039_s21 + $0x88] sm:$0xff] }
 0xedf   :  { %7146 = vmatpush1.msra.mxu0 %v7107_v31  ;;  %v7341_v31 = vld [vmem:[%s11039_s21 + $0x80] sm:$0xff] }
 0xee0   :  { %7147 = vmatprep.subr.mxu0 %v7106_v29  ;;  %v7340_v29 = vld [vmem:[%s11039_s21 + $0x78] sm:$0xff] }
 0xee1   :  { %7148 = vmatpush1.msra.mxu0 %v7105_v32  ;;  %v7339_v32 = vld [vmem:[%s11039_s21 + $0x70] sm:$0xff] }
 0xee2   :  { %7149 = vmatprep.subr.mxu0 %v7104_v33  ;;  %v7338_v33 = vld [vmem:[%s11039_s21 + $0x68] sm:$0xff] }
 0xee3   :  { %7150 = vmatpush1.msra.mxu0 %v7103_v15  ;;  %v7337_v15 = vld [vmem:[%s11039_s21 + $0x60] sm:$0xff] }
 0xee4   :  { %7151 = vmatprep.subr.mxu0 %v7102_v50  ;;  %v7336_v50 = vld [vmem:[%s11039_s21 + $0x58] sm:$0xff] }
 0xee5   :  { %7152 = vmatpush1.msra.mxu0 %v7101_v27  ;;  %v7335_v27 = vld [vmem:[%s11039_s21 + $0x50] sm:$0xff] }
 0xee6   :  { %7153 = vmatprep.subr.mxu0 %v7100_v38  ;;  %v7334_v38 = vld [vmem:[%s11039_s21 + $0x48] sm:$0xff] }
 0xee7   :  { %7154 = vmatpush1.msra.mxu0 %v7099_v39  ;;  %v7333_v39 = vld [vmem:[%s11039_s21 + $0x40] sm:$0xff] }
 0xee8   :  { %7155 = vmatprep.subr.mxu0 %v7098_v40  ;;  %v7332_v40 = vld [vmem:[%s11039_s21 + $0x38] sm:$0xff] }
 0xee9   :  { %7156 = vmatpush1.msra.mxu0 %v7097_v36 }
 0xeea   :  { %7157 = vmatprep.subr.mxu0 %v7096_v44  ;;  %v7090_v44 = vpop.f32.mrf.mxu1 }
 0xeeb   :  { %7158 = vmatpush1.msra.mxu0 %v7095_v51  ;;  %v7200_v51 = vld [vmem:[%s11040_s2] sm:$0x3] }
 0xeec   :  { %7192 = vmatmul.mubr.f32.vlgmr.msra.gmra.mxu0 %v10415_v8  ;;  %v7242_v8 = vld [vmem:[#allocation44 + $0xd0] sm:$0xff]  ;;  %7369 = vmatprep.subr.mxu0 %v7356_v4  ;;  %v7092_v63 = vpop.f32.mrf.mxu1  ;;  %v7205_v49 = vrot.slane %v7200_v51, %v10323_v28  ;;  %v7209_v6 = vrot.slane %v7200_v51, %v10326_v30  ;;  %v7503_v51 = vld [vmem:[#allocation46 + $0x1e8] sm:$0xff] }
 0xeed   :  { %7433 = vmatprep.mubr.f32.mxu0 %v10010_v0  ;;  %8143 = vmatprep.subr.mxu1 %v7242_v8  ;;  %v7472_v4 = vld [vmem:[#allocation46 + $0xf0] sm:$0xff] }
 0xeee   :  { %8144 = vmatpush3.msra.mxu1 %v7226_v58  ;;  %7370 = vmatpush1.msra.mxu0 %v7355_v41  ;;  %v7470_v41 = vld [vmem:[#allocation46 + $0xe0] sm:$0xff] }
 0xeef   :  { %8145 = vmatprep.subr.mxu1 %v7241_v53  ;;  %7371 = vmatprep.subr.mxu0 %v7354_v9  ;;  %v7469_v9 = vld [vmem:[#allocation46 + $0xd8] sm:$0xff] }
 0xef0   :  { %8146 = vmatpush3.msra.mxu1 %v7225_v55  ;;  %7372 = vmatpush1.msra.mxu0 %v7353_v11  ;;  %v7467_v11 = vld [vmem:[#allocation46 + $0xc8] sm:$0xff] }
 0xef1   :  { %8147 = vmatprep.subr.mxu1 %v7240_v56  ;;  %7373 = vmatprep.subr.mxu0 %v7352_v12  ;;  %v7331_v56 = vld [vmem:[%s11039_s21 + $0x30] sm:$0xff]  ;;  %v7466_v12 = vld [vmem:[#allocation46 + $0xc0] sm:$0xff] }
 0xef2   :  { %8148 = vmatpush3.msra.mxu1 %v7224_v62  ;;  %7374 = vmatpush1.msra.mxu0 %v7351_v5  ;;  %v7330_v62 = vld [vmem:[%s11039_s21 + $0x28] sm:$0xff]  ;;  %v7464_v5 = vld [vmem:[#allocation46 + $0xb0] sm:$0xff] }
 0xef3   :  { %8149 = vmatprep.subr.mxu1 %v7239_v54  ;;  %7375 = vmatprep.subr.mxu0 %v7350_v13  ;;  %v7329_v54 = vld [vmem:[%s11039_s21 + $0x20] sm:$0xff]  ;;  %v7463_v13 = vld [vmem:[#allocation46 + $0xa8] sm:$0xff] }
 0xef4   :  { %8150 = vmatpush3.msra.mxu1 %v7223_v59  ;;  %7376 = vmatpush1.msra.mxu0 %v7349_v7  ;;  %v7328_v59 = vld [vmem:[%s11039_s21 + $0x18] sm:$0xff]  ;;  %v7461_v7 = vld [vmem:[#allocation46 + $0x98] sm:$0xff] }
 0xef5   :  { %8151 = vmatprep.subr.mxu1 %v7238_v37  ;;  %7377 = vmatprep.subr.mxu0 %v7348_v16  ;;  %v7327_v37 = vld [vmem:[%s11039_s21 + $0x10] sm:$0xff]  ;;  %v7460_v16 = vld [vmem:[#allocation46 + $0x90] sm:$0xff] }
 0xef6   :  { %8152 = vmatpush3.msra.mxu1 %v7222_v34  ;;  %7378 = vmatpush1.msra.mxu0 %v7347_v19  ;;  %v7326_v34 = vld [vmem:[%s11039_s21 + $0x8] sm:$0xff] }
 0xef7   :  { %8153 = vmatprep.subr.mxu1 %v7237_v42  ;;  %7379 = vmatprep.subr.mxu0 %v7346_v21  ;;  %v7325_v42 = vld [vmem:[%s11039_s21] sm:$0xff]  ;;  %v7458_v19 = vld [vmem:[#allocation46 + $0x80] sm:$0xff] }
 0xef8   :  { %8154 = vmatpush3.msra.mxu1 %v7221_v43  ;;  %7380 = vmatpush1.msra.mxu0 %v7345_v23  ;;  %v7488_v43 = vld [vmem:[#allocation46 + $0x170] sm:$0xff]  ;;  %v7457_v21 = vld [vmem:[#allocation46 + $0x78] sm:$0xff]  ;;  %v7455_v23 = vld [vmem:[#allocation46 + $0x68] sm:$0xff] }
 0xef9   :  { %8155 = vmatprep.subr.mxu1 %v7236_v46  ;;  %7381 = vmatprep.subr.mxu0 %v7344_v25  ;;  %v7487_v46 = vld [vmem:[#allocation46 + $0x168] sm:$0xff]  ;;  %v7454_v25 = vld [vmem:[#allocation46 + $0x60] sm:$0xff] }
 0xefa   :  { %8156 = vmatpush3.msra.mxu1 %v7220_v48  ;;  %7382 = vmatpush1.msra.mxu0 %v7343_v26  ;;  %v7485_v48 = vld [vmem:[#allocation46 + $0x158] sm:$0xff]  ;;  %v7452_v26 = vld [vmem:[#allocation46 + $0x50] sm:$0xff] }
 0xefb   :  { %8157 = vmatprep.subr.mxu1 %v7235_v35  ;;  %7383 = vmatprep.subr.mxu0 %v7342_v57  ;;  %v7484_v35 = vld [vmem:[#allocation46 + $0x150] sm:$0xff]  ;;  %v7451_v57 = vld [vmem:[#allocation46 + $0x48] sm:$0xff] }
 0xefc   :  { %8158 = vmatpush3.msra.mxu1 %v7219_v18  ;;  %7384 = vmatpush1.msra.mxu0 %v7341_v31  ;;  %v7482_v18 = vld [vmem:[#allocation46 + $0x140] sm:$0xff]  ;;  %v7449_v31 = vld [vmem:[#allocation46 + $0x38] sm:$0xff] }
 0xefd   :  { %8159 = vmatprep.subr.mxu1 %v7234_v61  ;;  %7385 = vmatprep.subr.mxu0 %v7340_v29  ;;  %v7481_v61 = vld [vmem:[#allocation46 + $0x138] sm:$0xff]  ;;  %v7448_v29 = vld [vmem:[#allocation46 + $0x30] sm:$0xff] }
 0xefe   :  { %8160 = vmatpush3.msra.mxu1 %v7218_v1  ;;  %7386 = vmatpush1.msra.mxu0 %v7339_v32  ;;  %v7479_v1 = vld [vmem:[#allocation46 + $0x128] sm:$0xff]  ;;  %v7446_v32 = vld [vmem:[#allocation46 + $0x20] sm:$0xff] }
 0xeff   :  { %8161 = vmatprep.subr.mxu1 %v7233_v20  ;;  %7387 = vmatprep.subr.mxu0 %v7338_v33  ;;  %v7478_v20 = vld [vmem:[#allocation46 + $0x120] sm:$0xff]  ;;  %v7445_v33 = vld [vmem:[#allocation46 + $0x18] sm:$0xff] }
 0xf00   :  { %8162 = vmatpush3.msra.mxu1 %v7217_v14  ;;  %7388 = vmatpush1.msra.mxu0 %v7337_v15  ;;  %v7476_v14 = vld [vmem:[#allocation46 + $0x110] sm:$0xff]  ;;  %v7443_v15 = vld [vmem:[#allocation46 + $0x8] sm:$0xff] }
 0xf01   :  { %8163 = vmatprep.subr.mxu1 %v7232_v17  ;;  %7389 = vmatprep.subr.mxu0 %v7336_v50  ;;  %v7475_v17 = vld [vmem:[#allocation46 + $0x108] sm:$0xff]  ;;  %v7442_v50 = vld [vmem:[#allocation46] sm:$0xff] }
 0xf02   :  { %8164 = vmatpush3.msra.mxu1 %v7216_v3  ;;  %7390 = vmatpush1.msra.mxu0 %v7335_v27  ;;  %v7473_v3 = vld [vmem:[#allocation46 + $0xf8] sm:$0xff]  ;;  %v7512_v27 = vld [vmem:[#allocation46 + $0x230] sm:$0xff] }
 0xf03   :  { %7391 = vmatprep.subr.mxu0 %v7334_v38  ;;  %7534 = vmatprep.subr.mxu1 %v7488_v43  ;;  %v7511_v38 = vld [vmem:[#allocation46 + $0x228] sm:$0xff]  ;;  %v7444_v43 = vld [vmem:[#allocation46 + $0x10] sm:$0xff] }
 0xf04   :  { %7392 = vmatpush1.msra.mxu0 %v7333_v39  ;;  %v7509_v39 = vld [vmem:[#allocation46 + $0x218] sm:$0xff] }
 0xf05   :  { %7393 = vmatprep.subr.mxu0 %v7332_v40  ;;  %v7508_v40 = vld [vmem:[#allocation46 + $0x210] sm:$0xff] }
 0xf06   :  { %7394 = vmatpush1.msra.mxu0 %v7331_v56  ;;  %v7465_v56 = vld [vmem:[#allocation46 + $0xb8] sm:$0xff] }
 0xf07   :  { %7395 = vmatprep.subr.mxu0 %v7330_v62  ;;  %v7462_v62 = vld [vmem:[#allocation46 + $0xa0] sm:$0xff] }
 0xf08   :  { %7396 = vmatpush1.msra.mxu0 %v7329_v54  ;;  %v7459_v54 = vld [vmem:[#allocation46 + $0x88] sm:$0xff] }
 0xf09   :  { %7397 = vmatprep.subr.mxu0 %v7328_v59  ;;  %v7456_v59 = vld [vmem:[#allocation46 + $0x70] sm:$0xff] }
 0xf0a   :  { %7398 = vmatpush1.msra.mxu0 %v7327_v37  ;;  %v7453_v37 = vld [vmem:[#allocation46 + $0x58] sm:$0xff] }
 0xf0b   :  { %7399 = vmatprep.subr.mxu0 %v7326_v34  ;;  %v7450_v34 = vld [vmem:[#allocation46 + $0x40] sm:$0xff] }
 0xf0c   :  { %7400 = vmatpush1.msra.mxu0 %v7325_v42  ;;  %v7447_v42 = vld [vmem:[#allocation46 + $0x28] sm:$0xff] }
 0xf0d   :  { %7605 = vmatprep.subr.mxu0 %v10010_v0 }
 0xf8c   :  { %v7019_v36 = vpop.f32.mrf.mxu0 }
 0xf8d   :  { %v7091_v60 = vadd.f32 %v7090_v44, %v7019_v36  ;;  %v7506_v36 = vld [vmem:[#allocation46 + $0x200] sm:$0xff]  ;;  %v7505_v44 = vld [vmem:[#allocation46 + $0x1f8] sm:$0xff] }
 0xf8e   :  { %v7021_v45 = vpop.f32.mrf.mxu0 }
 0xf8f   :  { %v7093_v10 = vadd.f32 %v7092_v63, %v7021_v45  ;;  %v7502_v45 = vld [vmem:[#allocation46 + $0x1e0] sm:$0xff]  ;;  %v7885_v63 = vld [vmem:[%s11041_s1] ss:$0 sm:$0xff] }
 0xfac   :  { %v7193_v47 = vpop.f32.mrf.mxu0 }
 0xfad   :  { %v7198_v52 = vadd.f32 %v7193_v47, %v7091_v60 }
 0xfae   :  { %v7195_v22 = vpop.f32.mrf.mxu0 }
 0xfaf   :  { %v7199_v2 = vadd.f32 %v7195_v22, %v7093_v10  ;;  %v7212_v8 = vadd.f32 %v7205_v49, %v7198_v52  ;;  %v7489_v52 = vld [vmem:[#allocation46 + $0x178] sm:$0xff]  ;;  %v7483_v22 = vld [vmem:[#allocation46 + $0x148] sm:$0xff] }
 0xfb1   :  { %v7213_v58 = vadd.f32 %v7209_v6, %v7199_v2  ;;  %v7214_v55 = vmax.f32 %v7212_v8, 0.0  ;;  %v7486_v6 = vld [vmem:[#allocation46 + $0x160] sm:$0xff]  ;;  %v7480_v2 = vld [vmem:[#allocation46 + $0x130] sm:$0xff]  ;;  %v7477_v8 = vld [vmem:[#allocation46 + $0x118] sm:$0xff] }
 0xfb3   :  { %v7215_v53 = vmax.f32 %v7213_v58, 0.0  ;;  %v7474_v58 = vld [vmem:[#allocation46 + $0x100] sm:$0xff] }
 0xfb5   :  { %7319 = vmatprep.mubr.f32.mxu1 %v7215_v53  ;;  %v7471_v53 = vld [vmem:[#allocation46 + $0xe8] sm:$0xff] }
 0xfb6   :  { %7320 = vmatmul.mubr.f32.vlgmr.msra.gmra.mxu1 %v7214_v55  ;;  %v7468_v55 = vld [vmem:[#allocation46 + $0xd0] sm:$0xff] }
 0xfb7   :  { %7535 = vmatpush1.msra.mxu1 %v7487_v46  ;;  %v7513_v46 = vld [vmem:[#allocation46 + $0x238] sm:$0xff] }
 0xfb8   :  { %7536 = vmatprep.subr.mxu1 %v7485_v48  ;;  %v7510_v48 = vld [vmem:[#allocation46 + $0x220] sm:$0xff] }
 0xfb9   :  { %7537 = vmatpush1.msra.mxu1 %v7484_v35  ;;  %v7507_v35 = vld [vmem:[#allocation46 + $0x208] sm:$0xff] }
 0xfba   :  { %7538 = vmatprep.subr.mxu1 %v7482_v18  ;;  %v7504_v18 = vld [vmem:[#allocation46 + $0x1f0] sm:$0xff] }
 0xfbb   :  { %7539 = vmatpush1.msra.mxu1 %v7481_v61  ;;  %v7500_v61 = vld [vmem:[#allocation46 + $0x1d0] sm:$0xff] }
 0xfbc   :  { %7540 = vmatprep.subr.mxu1 %v7479_v1  ;;  %v7499_v1 = vld [vmem:[#allocation46 + $0x1c8] sm:$0xff] }
 0xfbd   :  { %7541 = vmatpush1.msra.mxu1 %v7478_v20  ;;  %v7501_v20 = vld [vmem:[#allocation46 + $0x1d8] sm:$0xff] }
 0xfbe   :  { %7542 = vmatprep.subr.mxu1 %v7476_v14  ;;  %v7497_v14 = vld [vmem:[#allocation46 + $0x1b8] sm:$0xff] }
 0xfbf   :  { %7543 = vmatpush1.msra.mxu1 %v7475_v17  ;;  %v7496_v17 = vld [vmem:[#allocation46 + $0x1b0] sm:$0xff] }
 0xfc0   :  { %7544 = vmatprep.subr.mxu1 %v7473_v3  ;;  %v7498_v3 = vld [vmem:[#allocation46 + $0x1c0] sm:$0xff] }
 0xfc1   :  { %7545 = vmatpush1.msra.mxu1 %v7472_v4  ;;  %v7494_v4 = vld [vmem:[#allocation46 + $0x1a0] sm:$0xff] }
 0xfc2   :  { %7546 = vmatprep.subr.mxu1 %v7470_v41  ;;  %v7493_v41 = vld [vmem:[#allocation46 + $0x198] sm:$0xff] }
 0xfc3   :  { %7547 = vmatpush1.msra.mxu1 %v7469_v9  ;;  %v7495_v9 = vld [vmem:[#allocation46 + $0x1a8] sm:$0xff] }
 0xfc4   :  { %7548 = vmatprep.subr.mxu1 %v7467_v11  ;;  %v7491_v11 = vld [vmem:[#allocation46 + $0x188] sm:$0xff] }
 0xfc5   :  { %7549 = vmatpush1.msra.mxu1 %v7466_v12  ;;  %v7490_v12 = vld [vmem:[#allocation46 + $0x180] sm:$0xff] }
 0xfc6   :  { %7550 = vmatprep.subr.mxu1 %v7464_v5  ;;  %v7492_v5 = vld [vmem:[#allocation46 + $0x190] sm:$0xff] }
 0xfc7   :  { %7551 = vmatpush1.msra.mxu1 %v7463_v13  ;;  %v7357_v13 = vld [vmem:[%s11042_s29] sm:$0x3] }
 0xfc8   :  { %7552 = vmatprep.subr.mxu1 %v7461_v7  ;;  %v7362_v7 = vrot.slane %v7357_v13, %v10323_v28 }
 0xfc9   :  { %7553 = vmatpush1.msra.mxu1 %v7460_v16  ;;  %v7366_v16 = vrot.slane %v7357_v13, %v10326_v30 }
 0xfca   :  { %7554 = vmatprep.subr.mxu1 %v7458_v19 }
 0xfcb   :  { %7555 = vmatpush1.msra.mxu1 %v7457_v21 }
 0xfcc   :  { %7556 = vmatprep.subr.mxu1 %v7455_v23 }
 0xfcd   :  { %7557 = vmatpush1.msra.mxu1 %v7454_v25 }
 0xfce   :  { %7558 = vmatprep.subr.mxu1 %v7452_v26 }
 0xfcf   :  { %7559 = vmatpush1.msra.mxu1 %v7451_v57 }
 0xfd0   :  { %7560 = vmatprep.subr.mxu1 %v7449_v31 }
 0xfd1   :  { %7561 = vmatpush1.msra.mxu1 %v7448_v29 }
 0xfd2   :  { %7562 = vmatprep.subr.mxu1 %v7446_v32 }
 0xfd3   :  { %7563 = vmatpush1.msra.mxu1 %v7445_v33 }
 0xfd4   :  { %7564 = vmatprep.subr.mxu1 %v7443_v15 }
 0xfd5   :  { %7565 = vmatpush1.msra.mxu1 %v7442_v50 }
 0xfd6   :  { %7582 = vmatprep.subr.mxu1 %v7512_v27 }
 0xfd7   :  { %7583 = vmatpush2.msra.mxu1 %v7511_v38 }
 0xfd8   :  { %7584 = vmatprep.subr.mxu1 %v7509_v39 }
 0xfd9   :  { %7585 = vmatpush2.msra.mxu1 %v7508_v40 }
 0xfda   :  { %7586 = vmatprep.subr.mxu1 %v7506_v36 }
 0xfdb   :  { %7587 = vmatpush2.msra.mxu1 %v7505_v44 }
 0xfdc   :  { %7588 = vmatprep.subr.mxu1 %v7503_v51 }
 0xfdd   :  { %7589 = vmatpush2.msra.mxu1 %v7502_v45 }
 0xfde   :  { %7590 = vmatprep.subr.mxu1 %v7500_v61 }
 0xfdf   :  { %7591 = vmatpush2.msra.mxu1 %v7499_v1 }
 0xfe0   :  { %7592 = vmatprep.subr.mxu1 %v7497_v14 }
 0xfe1   :  { %7593 = vmatpush2.msra.mxu1 %v7496_v17 }
 0xfe2   :  { %7594 = vmatprep.subr.mxu1 %v7494_v4 }
 0xfe3   :  { %7595 = vmatpush2.msra.mxu1 %v7493_v41 }
 0xfe4   :  { %7596 = vmatprep.subr.mxu1 %v7491_v11 }
 0xfe5   :  { %7597 = vmatpush2.msra.mxu1 %v7490_v12 }
0x1076   :  { %v8165_v60 = vpop.f32.mrf.mxu1 }
0x1078   :  { %v8166_v47 = vpop.f32.mrf.mxu1 }
0x1079   :  { %v8167_v49 = vadd.f32 %v8166_v47, %v8165_v60 }
0x107b   :  { %v7322_v10 = vadd.f32 %v8167_v49, %v7885_v63 }
0x107d   :  { %7434 = vmatmul.mubr.f32.vlgmr.msra.gmra.mxu0 %v7322_v10 }
0x107e   :  { %7606 = vmatpush1.msra.mxu0 %v7489_v52 }
0x107f   :  { %7607 = vmatprep.subr.mxu0 %v10010_v0 }
0x1080   :  { %7608 = vmatpush1.msra.mxu0 %v7486_v6 }
0x1081   :  { %7609 = vmatprep.subr.mxu0 %v10010_v0 }
0x1082   :  { %7610 = vmatpush1.msra.mxu0 %v7483_v22 }
0x1083   :  { %7611 = vmatprep.subr.mxu0 %v10010_v0 }
0x1084   :  { %7612 = vmatpush1.msra.mxu0 %v7480_v2 }
0x1085   :  { %7613 = vmatprep.subr.mxu0 %v10010_v0 }
0x1086   :  { %7614 = vmatpush1.msra.mxu0 %v7477_v8 }
0x1087   :  { %7615 = vmatprep.subr.mxu0 %v10010_v0 }
0x1088   :  { %7616 = vmatpush1.msra.mxu0 %v7474_v58 }
0x1089   :  { %7617 = vmatprep.subr.mxu0 %v10010_v0 }
0x108a   :  { %7618 = vmatpush1.msra.mxu0 %v7471_v53 }
0x108b   :  { %7619 = vmatprep.subr.mxu0 %v10010_v0 }
0x108c   :  { %7620 = vmatpush1.msra.mxu0 %v7468_v55 }
0x108d   :  { %7621 = vmatprep.subr.mxu0 %v10010_v0 }
0x108e   :  { %7622 = vmatpush1.msra.mxu0 %v7465_v56 }
0x108f   :  { %7623 = vmatprep.subr.mxu0 %v10010_v0 }
0x1090   :  { %7624 = vmatpush1.msra.mxu0 %v7462_v62 }
0x1091   :  { %7625 = vmatprep.subr.mxu0 %v10010_v0 }
0x1092   :  { %7626 = vmatpush1.msra.mxu0 %v7459_v54 }
0x1093   :  { %7627 = vmatprep.subr.mxu0 %v10010_v0 }
0x1094   :  { %7628 = vmatpush1.msra.mxu0 %v7456_v59 }
0x1095   :  { %7629 = vmatprep.subr.mxu0 %v10010_v0 }
0x1096   :  { %7630 = vmatpush1.msra.mxu0 %v7453_v37 }
0x1097   :  { %7631 = vmatprep.subr.mxu0 %v10010_v0 }
0x1098   :  { %7632 = vmatpush1.msra.mxu0 %v7450_v34 }
0x1099   :  { %7633 = vmatprep.subr.mxu0 %v10010_v0 }
0x109a   :  { %7634 = vmatpush1.msra.mxu0 %v7447_v42 }
0x109b   :  { %7635 = vmatprep.subr.mxu0 %v10010_v0 }
0x109c   :  { %7636 = vmatpush1.msra.mxu0 %v7444_v43 }
0x109d   :  { %7653 = vmatprep.subr.mxu0 %v10010_v0 }
0x109e   :  { %7654 = vmatpush2.msra.mxu0 %v7513_v46 }
0x109f   :  { %7655 = vmatprep.subr.mxu0 %v10010_v0 }
0x10a0   :  { %7656 = vmatpush2.msra.mxu0 %v7510_v48 }
0x10a1   :  { %7657 = vmatprep.subr.mxu0 %v10010_v0 }
0x10a2   :  { %7658 = vmatpush2.msra.mxu0 %v7507_v35 }
0x10a3   :  { %7659 = vmatprep.subr.mxu0 %v10010_v0 }
0x10a4   :  { %7660 = vmatpush2.msra.mxu0 %v7504_v18 }
0x10a5   :  { %7661 = vmatprep.subr.mxu0 %v10010_v0 }
0x10a6   :  { %7662 = vmatpush2.msra.mxu0 %v7501_v20 }
0x10a7   :  { %7663 = vmatprep.subr.mxu0 %v10010_v0 }
0x10a8   :  { %7664 = vmatpush2.msra.mxu0 %v7498_v3 }
0x10a9   :  { %7665 = vmatprep.subr.mxu0 %v10010_v0 }
0x10aa   :  { %7666 = vmatpush2.msra.mxu0 %v7495_v9 }
0x10ab   :  { %7667 = vmatprep.subr.mxu0 %v10010_v0  ;;  %v7514_v0 = vld [vmem:[%s10212_s25] sm:$0x7]  ;;  %s10011_s25 = smov [#allocation48]  }
0x10ac   :  { %7668 = vmatpush2.msra.mxu0 %v7492_v5  ;;  %v7527_v31 = vrot.slane %v7514_v0, %v10348_v24  ;;  %v7523_v29 = vrot.slane %v7514_v0, %v10326_v30  ;;  %v7519_v15 = vrot.slane %v7514_v0, %v10323_v28  ;;  %s7728_s12 = sshll.u32 %s10011_s25, 4  ;;  %s7729_s12 = int_to_ptr.vmem [resolvable:$true] %s7728_s12 }
0x10ad   :  { %s9838_s0 = scalar_lea.vmem %s7729_s12, 32  ;;  %p9843_p6 = scmp.lt.s32.totalorder %s7729_s12, %s7729_s12 }
0x10ae   :  { %p9839_p5 = scmp.ne.s32.totalorder %s7729_s12, %s9838_s0  ;;  %p9844_p7 = scmp.lt.s32.totalorder %s9838_s0, %s9838_s0 }
0x10b0   :  { %p9845_p8 = por %p9844_p7, %p9843_p6 }
0x10b2   :  { %p9846_p9 = pnand %p9845_p8, %p9839_p5 }
0x113d   :  { %v7435_v19 = vpop.f32.mrf.mxu0 }
0x113e   :  { %v7436_v21 = vadd.f32 %v7435_v19, %v7362_v7 }
0x113f   :  { %v7437_v23 = vpop.f32.mrf.mxu0 }
0x1140   :  { %v7438_v25 = vadd.f32 %v7437_v23, %v7366_v16  ;;  %v7440_v57 = vmax.f32 %v7436_v21, 0.0 }
0x1142   :  { %v7441_v26 = vmax.f32 %v7438_v25, 0.0 }
0x1144   :  { %7886 = vmatprep.mubr.msk.f32.mxu1 %vm2160_vm3, %v7441_v26  ;;  %7887 = vmatprep.mubr.msk.f32.mxu0 %vm2160_vm3, %v7441_v26 }
0x1145   :  { %7599 = vmatmul.mubr.f32.vlgmr.msra.gmra.mxu1 %v7440_v57  ;;  %7670 = vmatmul.mubr.f32.vlgmr.msra.gmra.mxu0 %v7440_v57 }
0x1205   :  { %v7600_v32 = vpop.f32.mrf.mxu1  ;;  %v7671_v33 = vpop.f32.mrf.mxu0 }
0x1206   :  { %v7672_v50 = vadd.f32 %v7671_v33, %v7527_v31  ;;  %v7601_v36 = vadd.f32 %v7600_v32, %v7519_v15 }
0x1207   :  { %v7602_v27 = vpop.f32.mrf.mxu1  ;;  %v7673_v38 = vpop.f32.mrf.mxu0 }
0x1208   :  { %v7603_v39 = vadd.f32 %v7602_v27, %v7523_v29  ;;  %v7700_v40 = vsel %vm7675_vm7, %v7672_v50, -inf  ;;  %v7676_v24 = vsel %vm7675_vm7, %v7601_v36, -inf }
0x1209   :  { %7701 = vmax.xlane.f32.xlu1 %v7700_v40 }
0x120a   :  { %v7688_v44 = vsel %vm7675_vm7, %v7603_v39, -inf }
0x120b   :  { %7689 = vmax.xlane.f32.xlu0 %v7688_v44 }
0x120f   :  { %7677 = vmax.xlane.f32.xlu0 %v7676_v24 }
0x1292   :  { %v7702_v30 = vpop.xlane.xlu1 %7701 }
0x1293   :  { %v7703_v51 = vsub.f32 %v7672_v50, %v7702_v30 }
0x1294   :  { %v7690_v45 = vpop.xlane.xlu0 %7689 }
0x1295   :  { %v7691_v60 = vsub.f32 %v7603_v39, %v7690_v45  ;;  %v7704_v63 = vmul.f32 1.442695, %v7703_v51 }
0x1297   :  { %v7692_v28 = vmul.f32 1.442695, %v7691_v60 }
0x1298   :  { %v7678_v47 = vpop.xlane.xlu0 %7677 }
0x1299   :  { %8250 = vpow2.f32 %v7692_v28  ;;  %v7679_v49 = vsub.f32 %v7601_v36, %v7678_v47 }
0x129a   :  { %8252 = vpow2.f32 %v7704_v63 }
0x129b   :  { %v7680_v10 = vmul.f32 1.442695, %v7679_v49 }
0x129d   :  { %8254 = vpow2.f32 %v7680_v10 }
0x12a6   :  { %v8251_v52 = vpop.eup %8250 }
0x12a7   :  { %v7694_v6 = vsel %vm7675_vm7, %v8251_v52, 0.0  ;;  %v8253_v22 = vpop.eup %8252 }
0x12a8   :  { %7695 = vadd.xlane.f32.xlu1 %v7694_v6  ;;  %v7706_v8 = vsel %vm7675_vm7, %v8253_v22, 0.0 }
0x12aa   :  { %v8255_v2 = vpop.eup %8254 }
0x12ab   :  { %v7682_v58 = vsel %vm7675_vm7, %v8255_v2, 0.0 }
0x12ac   :  { %7707 = vadd.xlane.f32.xlu1 %v7706_v8  ;;  %7683 = vadd.xlane.f32.xlu0 %v7682_v58 }
0x1331   :  { %v7696_v53 = vpop.xlane.xlu1 %7695 }
0x1332   :  { %8256 = vrcp.f32 %v7696_v53 }
0x1335   :  { %v7708_v55 = vpop.xlane.xlu1 %7707  ;;  %v7684_v56 = vpop.xlane.xlu0 %7683 }
0x1336   :  { %8258 = vrcp.f32 %v7708_v55 }
0x1337   :  { %8260 = vrcp.f32 %v7684_v56 }
0x133f   :  { %v8257_v62 = vpop.eup %8256 }
0x1340   :  { %v7698_v54 = vmul.f32 %v8257_v62, %v8251_v52 }
0x1342   :  { %7699 = vst [vmem:[#allocation48] sm:$0x3] %v7698_v54 }
0x1343   :  { %v8259_v59 = vpop.eup %8258 }
0x1344   :  { %9849 = shalt.err (!%p9846_p9)
}
0x1345   :  { %7731 = dma.vmem_to_hbm [thread:$0]  %s7729_s12, 32, %s10222_s3, [#allocation49]   ;;  %v8261_v37 = vpop.eup %8260  ;;  %v7710_v34 = vmul.f32 %v8259_v59, %v8253_v22 }
0x1346   :  { %v7686_v42 = vmul.f32 %v8261_v37, %v8255_v2  ;;  %s9858_s10 = scalar_lea.vmem %s7739_s20, 32  ;;  %p9863_p11 = scmp.lt.s32.totalorder %s7739_s20, %s7739_s20 }
0x1347   :  { %7711 = vst [vmem:[#allocation50] sm:$0x3] %v7710_v34  ;;  %p9859_p10 = scmp.ne.s32.totalorder %s7739_s20, %s9858_s10  ;;  %p9864_p12 = scmp.lt.s32.totalorder %s9858_s10, %s9858_s10 }
0x1348   :  { %7687 = vst [vmem:[#allocation47] sm:$0x3] %v7686_v42 }
0x1349   :  { %p9865_p13 = por %p9864_p12, %p9863_p11 }
0x134b   :  { %p9866_p0 = pnand %p9865_p13, %p9859_p10 }
0x134d   :  { %9869 = shalt.err (!%p9866_p0)
}
0x134e   :  { %7741 = dma.vmem_to_hbm [thread:$0]  %s7739_s20, 32, %s10227_s17, [#allocation49]  }
0x134f   :  { %s9878_s8 = scalar_lea.vmem %s7719_s7, 32  ;;  %p9883_p2 = scmp.lt.s32.totalorder %s7719_s7, %s7719_s7 }
0x1350   :  { %p9879_p1 = scmp.ne.s32.totalorder %s7719_s7, %s9878_s8  ;;  %p9884_p3 = scmp.lt.s32.totalorder %s9878_s8, %s9878_s8 }
0x1352   :  { %p9885_p4 = por %p9884_p3, %p9883_p2 }
0x1354   :  { %p9886_p5 = pnand %p9885_p4, %p9879_p1 }
0x1356   :  { %9889 = shalt.err (!%p9886_p5)
}
0x1357   :  { %7721 = dma.vmem_to_hbm [thread:$0]  %s7719_s7, 32, %s10217_s24, [#allocation4]  }
0x1358   :  { %9928 = dma.done.wait [#allocation4], 32  }
0x1359   :  { %9929 = vsyncadd [#allocation4], 4294967264 }
0x135a   :  { %9930 = dma.done.wait [#allocation49], 64  }
0x135b   :  { %9931 = vsyncadd [#allocation49], 4294967232 }
0x135c   :  { %7751 = vsyncpa [#allocation3], 1 }
0x135d   :  { %7752 = vsyncpa [#allocation6], 1 }
0x135e   :  { %7753 = vsyncpa [#allocation9], 1 }
0x135f   :  { %7754 = vsyncpa [#allocation12], 1 }
0x1360   :  { %7755 = vsyncpa [#allocation15], 1 }
0x1361   :  { %7756 = vsyncpa [#allocation18], 1 }
0x1362   :  { %7757 = vsyncpa [#allocation21], 1 }
0x1363   :  { %7758 = vsyncpa [#allocation24], 1 }
0x1364   :  { %7759 = vsyncpa [#allocation27], 1 }
0x1365   :  { %7760 = vsyncpa [#allocation30], 1 }
0x1366   :  { %7761 = vsyncpa [#allocation33], 1 }
0x1367   :  { %7762 = vsyncpa [#allocation36], 1 }
0x1368   :  { %7763 = vsyncpa [#allocation39], 1 }
0x1369   :  { %7764 = vsyncpa [#allocation42], 1 }
0x136a   :  { %7765 = vsyncpa [#allocation45], 1 }
0x136b   :  { %7766 = vsyncpa [#allocation4], 1 }
0x136c   :  { %7767 = vsyncpa [#allocation49], 1 }

</bundles_post_ra>
